<compile_context>
chip_gen: v6e
topology: v6e:2x2x1
jax: 0.10.0
libtpu: 0.0.40
codegen_flags: <defaults>
</compile_context>

<pallas_src>
import functools

import jax
import jax.numpy as jnp
from jax.experimental import pallas as pl
from jax.experimental.pallas import tpu as pltpu

C_PAD = 128                        # lane-dense channel padding
_VMEM_LIMIT = 32 * 1024 * 1024     # explicit limit, safe for v7x's 64 MiB VMEM


def _compiler_params():
    return pltpu.CompilerParams(
        dimension_semantics=("parallel",),   # batch axis -> both TCs on v7x
        vmem_limit_bytes=_VMEM_LIMIT,
    )


# ------------------------------ host-side prep ------------------------------

def _round_up(x, m):
    return ((x + m - 1) // m) * m


def _conv_out(size, k, s, p):
    return (size + 2 * p - k) // s + 1


def _pad_channels(x, c_pad=C_PAD):
    c = x.shape[-1]
    if c == c_pad:
        return x
    cfg = [(0, 0)] * (x.ndim - 1) + [(0, c_pad - c)]
    return jnp.pad(x, cfg)


def _pad_rows(xf, rows_needed, pad_value=0.0):
    """Pad the flattened-row (second-to-last) axis up to rows_needed, 8-aligned."""
    rows = xf.shape[-2]
    rows_pad = _round_up(max(rows, rows_needed), 8)
    if rows_pad == rows:
        return xf
    cfg = [(0, 0)] * (xf.ndim - 2) + [(0, rows_pad - rows), (0, 0)]
    return jnp.pad(xf, cfg, constant_values=pad_value)


def _flatten_s1(x_nhwc, pad, pad_value=0.0):
    """Spatial pad + row-flatten for a stride-1 conv.  Returns (xf, Wg)."""
    n, h, w, c = x_nhwc.shape
    wg = w + 2 * pad
    xp = jnp.pad(x_nhwc, ((0, 0), (pad, pad), (pad, pad), (0, 0)),
                 constant_values=pad_value)
    xf = xp.reshape(n, (h + 2 * pad) * wg, c)
    rows_needed = 2 * pad * wg + 2 * pad + h * wg     # max offset + M
    return _pad_rows(xf, rows_needed, pad_value), wg


def _space_to_depth2(x_nhwc, pad, k, h_out, pad_value=0.0):
    """Spatial pad + 2x2 parity (space-to-depth) split + row-flatten.

    Plane p = py*2 + px holds the row-flattened parity image
    x_padded[2i+py, 2j+px].  Returns (xf of shape (N, 4*l_pad, C), Ws, l_pad).
    """
    n, h, w, c = x_nhwc.shape
    hp, wp = h + 2 * pad, w + 2 * pad
    hs, ws = _round_up(hp, 2) // 2, _round_up(wp, 2) // 2
    xp = jnp.pad(
        x_nhwc,
        ((0, 0), (pad, 2 * hs - hp + pad), (pad, 2 * ws - wp + pad), (0, 0)),
        constant_values=pad_value)
    xr = xp.reshape(n, hs, 2, ws, 2, c).transpose(0, 2, 4, 1, 3, 5)
    xf = xr.reshape(n, 2, 2, hs * ws, c)
    half = (k - 1) // 2
    rows_needed = half * ws + half + h_out * ws
    xf = _pad_rows(xf, rows_needed, pad_value)
    l_pad = xf.shape[-2]
    return xf.reshape(n, 4 * l_pad, c), ws, l_pad


def _fold_bn(bn, eps=1e-5):
    gamma, beta, mean, var = bn
    scale = gamma / jnp.sqrt(var + eps)
    shift = beta - mean * scale
    return scale, shift


def _prep_weight(w_oihw, bn):
    """(Cout, Cin, kh, kw) -> bf16 (kh*kw, C_PAD, C_PAD) with BN scale folded in."""
    scale, _ = _fold_bn(bn)
    cout, cin, kh, kw = w_oihw.shape
    w = jnp.transpose(w_oihw, (2, 3, 1, 0)).reshape(kh * kw, cin, cout)
    w = w * scale[None, None, :]
    w = jnp.pad(w, ((0, 0), (0, C_PAD - cin), (0, C_PAD - cout)))
    return w.astype(jnp.bfloat16)


def _prep_shift(bn):
    _, shift = _fold_bn(bn)
    shift = jnp.pad(shift, (0, C_PAD - shift.shape[0]))
    return shift.reshape(1, C_PAD).astype(jnp.float32)


# ------------------------------- Pallas kernels ------------------------------

def _conv_s2_kernel(x_ref, w_ref, shift_ref, o_ref, *, k, ws, l_pad, m):
    """Stride-2 conv + folded-BN affine + ReLU via shift-and-matmul."""
    cout = w_ref.shape[-1]
    acc = jnp.broadcast_to(shift_ref[...], (m, cout))        # BN shift as init
    for dy in range(k):
        for dx in range(k):
            base = ((dy % 2) * 2 + (dx % 2)) * l_pad + (dy // 2) * ws + (dx // 2)
            acc = acc + jnp.dot(x_ref[0, base:base + m, :],
                                w_ref[dy * k + dx],
                                preferred_element_type=jnp.float32)
    o_ref[0] = jnp.maximum(acc, 0.0).astype(o_ref.dtype)


def _maxpool_s2_kernel(x_ref, o_ref, *, ws, l_pad, m):
    """3x3 stride-2 max pool = elementwise max of 9 shifted slabs (VPU only)."""
    out = x_ref[0, 0:m, :]
    for dy in range(3):
        for dx in range(3):
            if dy == 0 and dx == 0:
                continue
            base = ((dy % 2) * 2 + (dx % 2)) * l_pad + (dy // 2) * ws + (dx // 2)
            out = jnp.maximum(out, x_ref[0, base:base + m, :])
    o_ref[0] = out


def _conv_s1_kernel(x_ref, w_ref, shift_ref, o_ref, *, wg, m):
    """3x3 stride-1 conv + folded-BN affine + ReLU."""
    cout = w_ref.shape[-1]
    acc = jnp.broadcast_to(shift_ref[...], (m, cout))
    for dy in range(3):
        for dx in range(3):
            o = dy * wg + dx
            acc = acc + jnp.dot(x_ref[0, o:o + m, :], w_ref[dy * 3 + dx],
                                preferred_element_type=jnp.float32)
    o_ref[0] = jnp.maximum(acc, 0.0).astype(o_ref.dtype)


def _conv_s1_res_pool_kernel(x_ref, w_ref, shift_ref, res_ref, mask_ref, o_ref,
                             *, wg, m):
    """3x3 conv + BN + residual add + ReLU, fused with the global average pool."""
    cout = w_ref.shape[-1]
    acc = jnp.broadcast_to(shift_ref[...], (m, cout))
    for dy in range(3):
        for dx in range(3):
            o = dy * wg + dx
            acc = acc + jnp.dot(x_ref[0, o:o + m, :], w_ref[dy * 3 + dx],
                                preferred_element_type=jnp.float32)
    y = jnp.maximum(acc + res_ref[0].astype(jnp.float32), 0.0)
    # mask holds 1/(H*W) at valid spatial positions, 0 at the padded "garbage"
    # columns of the flattened-row formulation -> masked mean == avg pool.
    o_ref[0] = jnp.sum(y * mask_ref[...], axis=0, keepdims=True)


# ---------------------------- pallas_call wrappers ---------------------------

def conv_s2_bn_relu(xf, w, shift, *, k, ws, l_pad, m):
    n, l, c = xf.shape
    kk, _, cout = w.shape
    cost = pl.CostEstimate(
        flops=2 * n * m * c * cout * kk, transcendentals=0,
        bytes_accessed=xf.size * 2 + w.size * 2 + shift.size * 4 + n * m * cout * 2)
    return pl.pallas_call(
        functools.partial(_conv_s2_kernel, k=k, ws=ws, l_pad=l_pad, m=m),
        out_shape=jax.ShapeDtypeStruct((n, m, cout), jnp.bfloat16),
        grid=(n,),
        in_specs=[
            pl.BlockSpec((1, l, c), lambda i: (i, 0, 0)),
            pl.BlockSpec((kk, c, cout), lambda i: (0, 0, 0)),
            pl.BlockSpec((1, cout), lambda i: (0, 0)),
        ],
        out_specs=pl.BlockSpec((1, m, cout), lambda i: (i, 0, 0)),
        compiler_params=_compiler_params(),
        cost_estimate=cost,
    )(xf, w, shift)


def maxpool_s2(xf, *, ws, l_pad, m):
    n, l, c = xf.shape
    return pl.pallas_call(
        functools.partial(_maxpool_s2_kernel, ws=ws, l_pad=l_pad, m=m),
        out_shape=jax.ShapeDtypeStruct((n, m, c), xf.dtype),
        grid=(n,),
        in_specs=[pl.BlockSpec((1, l, c), lambda i: (i, 0, 0))],
        out_specs=pl.BlockSpec((1, m, c), lambda i: (i, 0, 0)),
        compiler_params=_compiler_params(),
    )(xf)


def conv_s1_bn_relu(xf, w, shift, *, wg, m):
    n, l, c = xf.shape
    kk, _, cout = w.shape
    cost = pl.CostEstimate(
        flops=2 * n * m * c * cout * kk, transcendentals=0,
        bytes_accessed=xf.size * 2 + w.size * 2 + shift.size * 4 + n * m * cout * 2)
    return pl.pallas_call(
        functools.partial(_conv_s1_kernel, wg=wg, m=m),
        out_shape=jax.ShapeDtypeStruct((n, m, cout), jnp.bfloat16),
        grid=(n,),
        in_specs=[
            pl.BlockSpec((1, l, c), lambda i: (i, 0, 0)),
            pl.BlockSpec((kk, c, cout), lambda i: (0, 0, 0)),
            pl.BlockSpec((1, cout), lambda i: (0, 0)),
        ],
        out_specs=pl.BlockSpec((1, m, cout), lambda i: (i, 0, 0)),
        compiler_params=_compiler_params(),
        cost_estimate=cost,
    )(xf, w, shift)


def conv_s1_bn_res_relu_pool(xf, w, shift, res, mask, *, wg, m):
    n, l, c = xf.shape
    kk, _, cout = w.shape
    cost = pl.CostEstimate(
        flops=2 * n * m * c * cout * kk, transcendentals=0,
        bytes_accessed=(xf.size * 2 + w.size * 2 + shift.size * 4 +
                        res.size * 2 + mask.size * 4 + n * cout * 4))
    return pl.pallas_call(
        functools.partial(_conv_s1_res_pool_kernel, wg=wg, m=m),
        out_shape=jax.ShapeDtypeStruct((n, 1, cout), jnp.float32),
        grid=(n,),
        in_specs=[
            pl.BlockSpec((1, l, c), lambda i: (i, 0, 0)),
            pl.BlockSpec((kk, c, cout), lambda i: (0, 0, 0)),
            pl.BlockSpec((1, cout), lambda i: (0, 0)),
            pl.BlockSpec((1, m, cout), lambda i: (i, 0, 0)),
            pl.BlockSpec((m, cout), lambda i: (0, 0)),
        ],
        out_specs=pl.BlockSpec((1, 1, cout), lambda i: (i, 0, 0)),
        compiler_params=_compiler_params(),
        cost_estimate=cost,
    )(xf, w, shift, res, mask)


# -------------------------------- forward pass -------------------------------

def init_params(key, cin=4, c=8):
    keys = jax.random.split(key, 6)

    def conv(k, cout, cin_, ks):
        fan_in = cin_ * ks * ks
        return jax.random.normal(k, (cout, cin_, ks, ks),
                                 jnp.float32) / jnp.sqrt(float(fan_in))

    def bn(k, ch):
        k1, k2, k3, k4 = jax.random.split(k, 4)
        gamma = 1.0 + 0.1 * jax.random.normal(k1, (ch,), jnp.float32)
        beta = 0.1 * jax.random.normal(k2, (ch,), jnp.float32)
        mean = 0.1 * jax.random.normal(k3, (ch,), jnp.float32)
        var = 1.0 + 0.1 * jnp.abs(jax.random.normal(k4, (ch,), jnp.float32))
        return (gamma, beta, mean, var)

    return {
        "conv1_w": conv(keys[0], c, cin, 7),
        "bn1": bn(keys[1], c),
        "b1_conv1_w": conv(keys[2], c, c, 3),
        "b1_bn1": bn(keys[3], c),
        "b1_conv2_w": conv(keys[4], c, c, 3),
        "b1_bn2": bn(keys[5], c),
    }


def resnet_feature_forward(x_nchw, params):
    x = jnp.transpose(x_nchw, (0, 2, 3, 1)).astype(jnp.bfloat16)   # NCHW -> NHWC
    n, hi, wi, _ = x.shape
    c_feat = params["conv1_w"].shape[0]
    x = _pad_channels(x)

    # conv1 (7x7, s2, p3) + bn1 + relu  -- fused shift-and-matmul kernel.
    ho, wo = _conv_out(hi, 7, 2, 3), _conv_out(wi, 7, 2, 3)
    xf, ws, lp = _space_to_depth2(x, pad=3, k=7, h_out=ho)
    y = conv_s2_bn_relu(xf, _prep_weight(params["conv1_w"], params["bn1"]),
                        _prep_shift(params["bn1"]),
                        k=7, ws=ws, l_pad=lp, m=ho * ws)
    x = y.reshape(n, ho, ws, C_PAD)[:, :, :wo, :]

    # maxpool (3x3, s2, p1); -inf padding as in nn.MaxPool2d.
    hp, wp = _conv_out(ho, 3, 2, 1), _conv_out(wo, 3, 2, 1)
    xf, ws, lp = _space_to_depth2(x, pad=1, k=3, h_out=hp, pad_value=-jnp.inf)
    y = maxpool_s2(xf, ws=ws, l_pad=lp, m=hp * ws)
    x = y.reshape(n, hp, ws, C_PAD)[:, :, :wp, :]

    identity = x

    # layer1 / BasicBlock conv1 (3x3, s1, p1) + bn + relu.
    xf, wg = _flatten_s1(x, pad=1)
    y = conv_s1_bn_relu(xf, _prep_weight(params["b1_conv1_w"], params["b1_bn1"]),
                        _prep_shift(params["b1_bn1"]), wg=wg, m=hp * wg)
    x = y.reshape(n, hp, wg, C_PAD)[:, :, :wp, :]

    # BasicBlock conv2 + bn + residual + relu, fused with the global avg pool.
    xf, wg = _flatten_s1(x, pad=1)
    resf = jnp.pad(identity, ((0, 0), (0, 0), (0, wg - wp), (0, 0)))
    resf = resf.reshape(n, hp * wg, C_PAD)
    mask = jnp.zeros((hp, wg), jnp.float32).at[:, :wp].set(1.0 / (hp * wp))
    mask = jnp.broadcast_to(mask.reshape(hp * wg, 1), (hp * wg, C_PAD))
    feat = conv_s1_bn_res_relu_pool(
        xf, _prep_weight(params["b1_conv2_w"], params["b1_bn2"]),
        _prep_shift(params["b1_bn2"]), resf, mask, wg=wg, m=hp * wg)

    # AdaptiveAvgPool2d((1,1)) + view(N, -1)  ->  (N, C) features.
    return feat.reshape(n, C_PAD)[:, :c_feat]


if __name__ == "__main__":
    key = jax.random.PRNGKey(0)
    kx, kp = jax.random.split(key)
    x = jax.random.normal(kx, (2, 4, 16, 16), jnp.float32)  # NCHW input
    params = init_params(kp, cin=4, c=8)

    out = jax.jit(resnet_feature_forward)(x, params)
    jax.block_until_ready(out)

    assert out.shape == (2, 8), out.shape
    assert out.dtype == jnp.float32
    assert bool(jnp.all(jnp.isfinite(out)))
    print("KERNEL_OK")
</pallas_src>

<mosaic_0001>
module attributes {stable_mosaic.version = 11 : i64} {
  func.func @_conv_s2_kernel(%arg0: i32, %arg1: memref<1x512x128xbf16, #tpu.memory_space<vmem>>, %arg2: memref<49x128x128xbf16, #tpu.memory_space<vmem>>, %arg3: memref<1x128xf32, #tpu.memory_space<vmem>>, %arg4: memref<1x88x128xbf16, #tpu.memory_space<vmem>>) attributes {dimension_semantics = [#tpu.dimension_semantics<parallel>], iteration_bounds = array<i64: 2>, scalar_prefetch = 0 : i64, scratch_operands = 0 : i64, tpu.core_type = #tpu.core_type<tc>, window_params = [{transform_indices = @transform_0, window_bounds = array<i64: 1, 512, 128>}, {pipeline_mode = #tpu.pipeline_mode<synchronous>, transform_indices = @transform_1, window_bounds = array<i64: 49, 128, 128>}, {pipeline_mode = #tpu.pipeline_mode<synchronous>, transform_indices = @transform_2, window_bounds = array<i64: 1, 128>}, {transform_indices = @transform_3, window_bounds = array<i64: 1, 88, 128>}]} {
    %c0 = arith.constant 0 : index
    %c0_0 = arith.constant 0 : index
    %0 = vector.load %arg3[%c0, %c0_0] : memref<1x128xf32, #tpu.memory_space<vmem>>, vector<1x128xf32>
    %1 = vector.shape_cast %0 : vector<1x128xf32> to vector<1x128xf32>
    %2 = vector.broadcast %1 : vector<1x128xf32> to vector<88x128xf32>
    %c0_1 = arith.constant 0 : index
    %c0_2 = arith.constant 0 : index
    %c0_3 = arith.constant 0 : index
    %3 = vector.load %arg1[%c0_1, %c0_2, %c0_3] : memref<1x512x128xbf16, #tpu.memory_space<vmem>>, vector<1x88x128xbf16>
    %4 = vector.shape_cast %3 : vector<1x88x128xbf16> to vector<88x128xbf16>
    %c0_4 = arith.constant 0 : index
    %c0_5 = arith.constant 0 : index
    %c0_6 = arith.constant 0 : index
    %5 = vector.load %arg2[%c0_4, %c0_5, %c0_6] : memref<49x128x128xbf16, #tpu.memory_space<vmem>>, vector<1x128x128xbf16>
    %6 = vector.shape_cast %5 : vector<1x128x128xbf16> to vector<128x128xbf16>
    %cst = arith.constant dense<0.000000e+00> : vector<88x128xf32>
    %7 = tpu.matmul %4, %6, %cst {dimension_numbers = #tpu.dot_dimension_numbers<[1], [0], [0], [1], [0, 0, 1, 1], [], []>} : vector<88x128xbf16>, vector<128x128xbf16>, vector<88x128xf32> -> vector<88x128xf32>
    %8 = arith.addf %2, %7 : vector<88x128xf32>
    %c0_7 = arith.constant 0 : index
    %c128 = arith.constant 128 : index
    %c0_8 = arith.constant 0 : index
    %9 = vector.load %arg1[%c0_7, %c128, %c0_8] : memref<1x512x128xbf16, #tpu.memory_space<vmem>>, vector<1x88x128xbf16>
    %10 = vector.shape_cast %9 : vector<1x88x128xbf16> to vector<88x128xbf16>
    %c1 = arith.constant 1 : index
    %c0_9 = arith.constant 0 : index
    %c0_10 = arith.constant 0 : index
    %11 = vector.load %arg2[%c1, %c0_9, %c0_10] : memref<49x128x128xbf16, #tpu.memory_space<vmem>>, vector<1x128x128xbf16>
    %12 = vector.shape_cast %11 : vector<1x128x128xbf16> to vector<128x128xbf16>
    %cst_11 = arith.constant dense<0.000000e+00> : vector<88x128xf32>
    %13 = tpu.matmul %10, %12, %cst_11 {dimension_numbers = #tpu.dot_dimension_numbers<[1], [0], [0], [1], [0, 0, 1, 1], [], []>} : vector<88x128xbf16>, vector<128x128xbf16>, vector<88x128xf32> -> vector<88x128xf32>
    %14 = arith.addf %8, %13 : vector<88x128xf32>
    %c0_12 = arith.constant 0 : index
    %c1_13 = arith.constant 1 : index
    %c0_14 = arith.constant 0 : index
    %15 = vector.load %arg1[%c0_12, %c1_13, %c0_14] : memref<1x512x128xbf16, #tpu.memory_space<vmem>>, vector<1x88x128xbf16>
    %16 = vector.shape_cast %15 : vector<1x88x128xbf16> to vector<88x128xbf16>
    %c2 = arith.constant 2 : index
    %c0_15 = arith.constant 0 : index
    %c0_16 = arith.constant 0 : index
    %17 = vector.load %arg2[%c2, %c0_15, %c0_16] : memref<49x128x128xbf16, #tpu.memory_space<vmem>>, vector<1x128x128xbf16>
    %18 = vector.shape_cast %17 : vector<1x128x128xbf16> to vector<128x128xbf16>
    %cst_17 = arith.constant dense<0.000000e+00> : vector<88x128xf32>
    %19 = tpu.matmul %16, %18, %cst_17 {dimension_numbers = #tpu.dot_dimension_numbers<[1], [0], [0], [1], [0, 0, 1, 1], [], []>} : vector<88x128xbf16>, vector<128x128xbf16>, vector<88x128xf32> -> vector<88x128xf32>
    %20 = arith.addf %14, %19 : vector<88x128xf32>
    %c0_18 = arith.constant 0 : index
    %c129 = arith.constant 129 : index
    %c0_19 = arith.constant 0 : index
    %21 = vector.load %arg1[%c0_18, %c129, %c0_19] : memref<1x512x128xbf16, #tpu.memory_space<vmem>>, vector<1x88x128xbf16>
    %22 = vector.shape_cast %21 : vector<1x88x128xbf16> to vector<88x128xbf16>
    %c3 = arith.constant 3 : index
    %c0_20 = arith.constant 0 : index
    %c0_21 = arith.constant 0 : index
    %23 = vector.load %arg2[%c3, %c0_20, %c0_21] : memref<49x128x128xbf16, #tpu.memory_space<vmem>>, vector<1x128x128xbf16>
    %24 = vector.shape_cast %23 : vector<1x128x128xbf16> to vector<128x128xbf16>
    %cst_22 = arith.constant dense<0.000000e+00> : vector<88x128xf32>
    %25 = tpu.matmul %22, %24, %cst_22 {dimension_numbers = #tpu.dot_dimension_numbers<[1], [0], [0], [1], [0, 0, 1, 1], [], []>} : vector<88x128xbf16>, vector<128x128xbf16>, vector<88x128xf32> -> vector<88x128xf32>
    %26 = arith.addf %20, %25 : vector<88x128xf32>
    %c0_23 = arith.constant 0 : index
    %c2_24 = arith.constant 2 : index
    %c0_25 = arith.constant 0 : index
    %27 = vector.load %arg1[%c0_23, %c2_24, %c0_25] : memref<1x512x128xbf16, #tpu.memory_space<vmem>>, vector<1x88x128xbf16>
    %28 = vector.shape_cast %27 : vector<1x88x128xbf16> to vector<88x128xbf16>
    %c4 = arith.constant 4 : index
    %c0_26 = arith.constant 0 : index
    %c0_27 = arith.constant 0 : index
    %29 = vector.load %arg2[%c4, %c0_26, %c0_27] : memref<49x128x128xbf16, #tpu.memory_space<vmem>>, vector<1x128x128xbf16>
    %30 = vector.shape_cast %29 : vector<1x128x128xbf16> to vector<128x128xbf16>
    %cst_28 = arith.constant dense<0.000000e+00> : vector<88x128xf32>
    %31 = tpu.matmul %28, %30, %cst_28 {dimension_numbers = #tpu.dot_dimension_numbers<[1], [0], [0], [1], [0, 0, 1, 1], [], []>} : vector<88x128xbf16>, vector<128x128xbf16>, vector<88x128xf32> -> vector<88x128xf32>
    %32 = arith.addf %26, %31 : vector<88x128xf32>
    %c0_29 = arith.constant 0 : index
    %c130 = arith.constant 130 : index
    %c0_30 = arith.constant 0 : index
    %33 = vector.load %arg1[%c0_29, %c130, %c0_30] : memref<1x512x128xbf16, #tpu.memory_space<vmem>>, vector<1x88x128xbf16>
    %34 = vector.shape_cast %33 : vector<1x88x128xbf16> to vector<88x128xbf16>
    %c5 = arith.constant 5 : index
    %c0_31 = arith.constant 0 : index
    %c0_32 = arith.constant 0 : index
    %35 = vector.load %arg2[%c5, %c0_31, %c0_32] : memref<49x128x128xbf16, #tpu.memory_space<vmem>>, vector<1x128x128xbf16>
    %36 = vector.shape_cast %35 : vector<1x128x128xbf16> to vector<128x128xbf16>
    %cst_33 = arith.constant dense<0.000000e+00> : vector<88x128xf32>
    %37 = tpu.matmul %34, %36, %cst_33 {dimension_numbers = #tpu.dot_dimension_numbers<[1], [0], [0], [1], [0, 0, 1, 1], [], []>} : vector<88x128xbf16>, vector<128x128xbf16>, vector<88x128xf32> -> vector<88x128xf32>
    %38 = arith.addf %32, %37 : vector<88x128xf32>
    %c0_34 = arith.constant 0 : index
    %c3_35 = arith.constant 3 : index
    %c0_36 = arith.constant 0 : index
    %39 = vector.load %arg1[%c0_34, %c3_35, %c0_36] : memref<1x512x128xbf16, #tpu.memory_space<vmem>>, vector<1x88x128xbf16>
    %40 = vector.shape_cast %39 : vector<1x88x128xbf16> to vector<88x128xbf16>
    %c6 = arith.constant 6 : index
    %c0_37 = arith.constant 0 : index
    %c0_38 = arith.constant 0 : index
    %41 = vector.load %arg2[%c6, %c0_37, %c0_38] : memref<49x128x128xbf16, #tpu.memory_space<vmem>>, vector<1x128x128xbf16>
    %42 = vector.shape_cast %41 : vector<1x128x128xbf16> to vector<128x128xbf16>
    %cst_39 = arith.constant dense<0.000000e+00> : vector<88x128xf32>
    %43 = tpu.matmul %40, %42, %cst_39 {dimension_numbers = #tpu.dot_dimension_numbers<[1], [0], [0], [1], [0, 0, 1, 1], [], []>} : vector<88x128xbf16>, vector<128x128xbf16>, vector<88x128xf32> -> vector<88x128xf32>
    %44 = arith.addf %38, %43 : vector<88x128xf32>
    %c0_40 = arith.constant 0 : index
    %c256 = arith.constant 256 : index
    %c0_41 = arith.constant 0 : index
    %45 = vector.load %arg1[%c0_40, %c256, %c0_41] : memref<1x512x128xbf16, #tpu.memory_space<vmem>>, vector<1x88x128xbf16>
    %46 = vector.shape_cast %45 : vector<1x88x128xbf16> to vector<88x128xbf16>
    %c7 = arith.constant 7 : index
    %c0_42 = arith.constant 0 : index
    %c0_43 = arith.constant 0 : index
    %47 = vector.load %arg2[%c7, %c0_42, %c0_43] : memref<49x128x128xbf16, #tpu.memory_space<vmem>>, vector<1x128x128xbf16>
    %48 = vector.shape_cast %47 : vector<1x128x128xbf16> to vector<128x128xbf16>
    %cst_44 = arith.constant dense<0.000000e+00> : vector<88x128xf32>
    %49 = tpu.matmul %46, %48, %cst_44 {dimension_numbers = #tpu.dot_dimension_numbers<[1], [0], [0], [1], [0, 0, 1, 1], [], []>} : vector<88x128xbf16>, vector<128x128xbf16>, vector<88x128xf32> -> vector<88x128xf32>
    %50 = arith.addf %44, %49 : vector<88x128xf32>
    %c0_45 = arith.constant 0 : index
    %c384 = arith.constant 384 : index
    %c0_46 = arith.constant 0 : index
    %51 = vector.load %arg1[%c0_45, %c384, %c0_46] : memref<1x512x128xbf16, #tpu.memory_space<vmem>>, vector<1x88x128xbf16>
    %52 = vector.shape_cast %51 : vector<1x88x128xbf16> to vector<88x128xbf16>
    %c8 = arith.constant 8 : index
    %c0_47 = arith.constant 0 : index
    %c0_48 = arith.constant 0 : index
    %53 = vector.load %arg2[%c8, %c0_47, %c0_48] : memref<49x128x128xbf16, #tpu.memory_space<vmem>>, vector<1x128x128xbf16>
    %54 = vector.shape_cast %53 : vector<1x128x128xbf16> to vector<128x128xbf16>
    %cst_49 = arith.constant dense<0.000000e+00> : vector<88x128xf32>
    %55 = tpu.matmul %52, %54, %cst_49 {dimension_numbers = #tpu.dot_dimension_numbers<[1], [0], [0], [1], [0, 0, 1, 1], [], []>} : vector<88x128xbf16>, vector<128x128xbf16>, vector<88x128xf32> -> vector<88x128xf32>
    %56 = arith.addf %50, %55 : vector<88x128xf32>
    %c0_50 = arith.constant 0 : index
    %c257 = arith.constant 257 : index
    %c0_51 = arith.constant 0 : index
    %57 = vector.load %arg1[%c0_50, %c257, %c0_51] : memref<1x512x128xbf16, #tpu.memory_space<vmem>>, vector<1x88x128xbf16>
    %58 = vector.shape_cast %57 : vector<1x88x128xbf16> to vector<88x128xbf16>
    %c9 = arith.constant 9 : index
    %c0_52 = arith.constant 0 : index
    %c0_53 = arith.constant 0 : index
    %59 = vector.load %arg2[%c9, %c0_52, %c0_53] : memref<49x128x128xbf16, #tpu.memory_space<vmem>>, vector<1x128x128xbf16>
    %60 = vector.shape_cast %59 : vector<1x128x128xbf16> to vector<128x128xbf16>
    %cst_54 = arith.constant dense<0.000000e+00> : vector<88x128xf32>
    %61 = tpu.matmul %58, %60, %cst_54 {dimension_numbers = #tpu.dot_dimension_numbers<[1], [0], [0], [1], [0, 0, 1, 1], [], []>} : vector<88x128xbf16>, vector<128x128xbf16>, vector<88x128xf32> -> vector<88x128xf32>
    %62 = arith.addf %56, %61 : vector<88x128xf32>
    %c0_55 = arith.constant 0 : index
    %c385 = arith.constant 385 : index
    %c0_56 = arith.constant 0 : index
    %63 = vector.load %arg1[%c0_55, %c385, %c0_56] : memref<1x512x128xbf16, #tpu.memory_space<vmem>>, vector<1x88x128xbf16>
    %64 = vector.shape_cast %63 : vector<1x88x128xbf16> to vector<88x128xbf16>
    %c10 = arith.constant 10 : index
    %c0_57 = arith.constant 0 : index
    %c0_58 = arith.constant 0 : index
    %65 = vector.load %arg2[%c10, %c0_57, %c0_58] : memref<49x128x128xbf16, #tpu.memory_space<vmem>>, vector<1x128x128xbf16>
    %66 = vector.shape_cast %65 : vector<1x128x128xbf16> to vector<128x128xbf16>
    %cst_59 = arith.constant dense<0.000000e+00> : vector<88x128xf32>
    %67 = tpu.matmul %64, %66, %cst_59 {dimension_numbers = #tpu.dot_dimension_numbers<[1], [0], [0], [1], [0, 0, 1, 1], [], []>} : vector<88x128xbf16>, vector<128x128xbf16>, vector<88x128xf32> -> vector<88x128xf32>
    %68 = arith.addf %62, %67 : vector<88x128xf32>
    %c0_60 = arith.constant 0 : index
    %c258 = arith.constant 258 : index
    %c0_61 = arith.constant 0 : index
    %69 = vector.load %arg1[%c0_60, %c258, %c0_61] : memref<1x512x128xbf16, #tpu.memory_space<vmem>>, vector<1x88x128xbf16>
    %70 = vector.shape_cast %69 : vector<1x88x128xbf16> to vector<88x128xbf16>
    %c11 = arith.constant 11 : index
    %c0_62 = arith.constant 0 : index
    %c0_63 = arith.constant 0 : index
    %71 = vector.load %arg2[%c11, %c0_62, %c0_63] : memref<49x128x128xbf16, #tpu.memory_space<vmem>>, vector<1x128x128xbf16>
    %72 = vector.shape_cast %71 : vector<1x128x128xbf16> to vector<128x128xbf16>
    %cst_64 = arith.constant dense<0.000000e+00> : vector<88x128xf32>
    %73 = tpu.matmul %70, %72, %cst_64 {dimension_numbers = #tpu.dot_dimension_numbers<[1], [0], [0], [1], [0, 0, 1, 1], [], []>} : vector<88x128xbf16>, vector<128x128xbf16>, vector<88x128xf32> -> vector<88x128xf32>
    %74 = arith.addf %68, %73 : vector<88x128xf32>
    %c0_65 = arith.constant 0 : index
    %c386 = arith.constant 386 : index
    %c0_66 = arith.constant 0 : index
    %75 = vector.load %arg1[%c0_65, %c386, %c0_66] : memref<1x512x128xbf16, #tpu.memory_space<vmem>>, vector<1x88x128xbf16>
    %76 = vector.shape_cast %75 : vector<1x88x128xbf16> to vector<88x128xbf16>
    %c12 = arith.constant 12 : index
    %c0_67 = arith.constant 0 : index
    %c0_68 = arith.constant 0 : index
    %77 = vector.load %arg2[%c12, %c0_67, %c0_68] : memref<49x128x128xbf16, #tpu.memory_space<vmem>>, vector<1x128x128xbf16>
    %78 = vector.shape_cast %77 : vector<1x128x128xbf16> to vector<128x128xbf16>
    %cst_69 = arith.constant dense<0.000000e+00> : vector<88x128xf32>
    %79 = tpu.matmul %76, %78, %cst_69 {dimension_numbers = #tpu.dot_dimension_numbers<[1], [0], [0], [1], [0, 0, 1, 1], [], []>} : vector<88x128xbf16>, vector<128x128xbf16>, vector<88x128xf32> -> vector<88x128xf32>
    %80 = arith.addf %74, %79 : vector<88x128xf32>
    %c0_70 = arith.constant 0 : index
    %c259 = arith.constant 259 : index
    %c0_71 = arith.constant 0 : index
    %81 = vector.load %arg1[%c0_70, %c259, %c0_71] : memref<1x512x128xbf16, #tpu.memory_space<vmem>>, vector<1x88x128xbf16>
    %82 = vector.shape_cast %81 : vector<1x88x128xbf16> to vector<88x128xbf16>
    %c13 = arith.constant 13 : index
    %c0_72 = arith.constant 0 : index
    %c0_73 = arith.constant 0 : index
    %83 = vector.load %arg2[%c13, %c0_72, %c0_73] : memref<49x128x128xbf16, #tpu.memory_space<vmem>>, vector<1x128x128xbf16>
    %84 = vector.shape_cast %83 : vector<1x128x128xbf16> to vector<128x128xbf16>
    %cst_74 = arith.constant dense<0.000000e+00> : vector<88x128xf32>
    %85 = tpu.matmul %82, %84, %cst_74 {dimension_numbers = #tpu.dot_dimension_numbers<[1], [0], [0], [1], [0, 0, 1, 1], [], []>} : vector<88x128xbf16>, vector<128x128xbf16>, vector<88x128xf32> -> vector<88x128xf32>
    %86 = arith.addf %80, %85 : vector<88x128xf32>
    %c0_75 = arith.constant 0 : index
    %c11_76 = arith.constant 11 : index
    %c0_77 = arith.constant 0 : index
    %87 = vector.load %arg1[%c0_75, %c11_76, %c0_77] : memref<1x512x128xbf16, #tpu.memory_space<vmem>>, vector<1x88x128xbf16>
    %88 = vector.shape_cast %87 : vector<1x88x128xbf16> to vector<88x128xbf16>
    %c14 = arith.constant 14 : index
    %c0_78 = arith.constant 0 : index
    %c0_79 = arith.constant 0 : index
    %89 = vector.load %arg2[%c14, %c0_78, %c0_79] : memref<49x128x128xbf16, #tpu.memory_space<vmem>>, vector<1x128x128xbf16>
    %90 = vector.shape_cast %89 : vector<1x128x128xbf16> to vector<128x128xbf16>
    %cst_80 = arith.constant dense<0.000000e+00> : vector<88x128xf32>
    %91 = tpu.matmul %88, %90, %cst_80 {dimension_numbers = #tpu.dot_dimension_numbers<[1], [0], [0], [1], [0, 0, 1, 1], [], []>} : vector<88x128xbf16>, vector<128x128xbf16>, vector<88x128xf32> -> vector<88x128xf32>
    %92 = arith.addf %86, %91 : vector<88x128xf32>
    %c0_81 = arith.constant 0 : index
    %c139 = arith.constant 139 : index
    %c0_82 = arith.constant 0 : index
    %93 = vector.load %arg1[%c0_81, %c139, %c0_82] : memref<1x512x128xbf16, #tpu.memory_space<vmem>>, vector<1x88x128xbf16>
    %94 = vector.shape_cast %93 : vector<1x88x128xbf16> to vector<88x128xbf16>
    %c15 = arith.constant 15 : index
    %c0_83 = arith.constant 0 : index
    %c0_84 = arith.constant 0 : index
    %95 = vector.load %arg2[%c15, %c0_83, %c0_84] : memref<49x128x128xbf16, #tpu.memory_space<vmem>>, vector<1x128x128xbf16>
    %96 = vector.shape_cast %95 : vector<1x128x128xbf16> to vector<128x128xbf16>
    %cst_85 = arith.constant dense<0.000000e+00> : vector<88x128xf32>
    %97 = tpu.matmul %94, %96, %cst_85 {dimension_numbers = #tpu.dot_dimension_numbers<[1], [0], [0], [1], [0, 0, 1, 1], [], []>} : vector<88x128xbf16>, vector<128x128xbf16>, vector<88x128xf32> -> vector<88x128xf32>
    %98 = arith.addf %92, %97 : vector<88x128xf32>
    %c0_86 = arith.constant 0 : index
    %c12_87 = arith.constant 12 : index
    %c0_88 = arith.constant 0 : index
    %99 = vector.load %arg1[%c0_86, %c12_87, %c0_88] : memref<1x512x128xbf16, #tpu.memory_space<vmem>>, vector<1x88x128xbf16>
    %100 = vector.shape_cast %99 : vector<1x88x128xbf16> to vector<88x128xbf16>
    %c16 = arith.constant 16 : index
    %c0_89 = arith.constant 0 : index
    %c0_90 = arith.constant 0 : index
    %101 = vector.load %arg2[%c16, %c0_89, %c0_90] : memref<49x128x128xbf16, #tpu.memory_space<vmem>>, vector<1x128x128xbf16>
    %102 = vector.shape_cast %101 : vector<1x128x128xbf16> to vector<128x128xbf16>
    %cst_91 = arith.constant dense<0.000000e+00> : vector<88x128xf32>
    %103 = tpu.matmul %100, %102, %cst_91 {dimension_numbers = #tpu.dot_dimension_numbers<[1], [0], [0], [1], [0, 0, 1, 1], [], []>} : vector<88x128xbf16>, vector<128x128xbf16>, vector<88x128xf32> -> vector<88x128xf32>
    %104 = arith.addf %98, %103 : vector<88x128xf32>
    %c0_92 = arith.constant 0 : index
    %c140 = arith.constant 140 : index
    %c0_93 = arith.constant 0 : index
    %105 = vector.load %arg1[%c0_92, %c140, %c0_93] : memref<1x512x128xbf16, #tpu.memory_space<vmem>>, vector<1x88x128xbf16>
    %106 = vector.shape_cast %105 : vector<1x88x128xbf16> to vector<88x128xbf16>
    %c17 = arith.constant 17 : index
    %c0_94 = arith.constant 0 : index
    %c0_95 = arith.constant 0 : index
    %107 = vector.load %arg2[%c17, %c0_94, %c0_95] : memref<49x128x128xbf16, #tpu.memory_space<vmem>>, vector<1x128x128xbf16>
    %108 = vector.shape_cast %107 : vector<1x128x128xbf16> to vector<128x128xbf16>
    %cst_96 = arith.constant dense<0.000000e+00> : vector<88x128xf32>
    %109 = tpu.matmul %106, %108, %cst_96 {dimension_numbers = #tpu.dot_dimension_numbers<[1], [0], [0], [1], [0, 0, 1, 1], [], []>} : vector<88x128xbf16>, vector<128x128xbf16>, vector<88x128xf32> -> vector<88x128xf32>
    %110 = arith.addf %104, %109 : vector<88x128xf32>
    %c0_97 = arith.constant 0 : index
    %c13_98 = arith.constant 13 : index
    %c0_99 = arith.constant 0 : index
    %111 = vector.load %arg1[%c0_97, %c13_98, %c0_99] : memref<1x512x128xbf16, #tpu.memory_space<vmem>>, vector<1x88x128xbf16>
    %112 = vector.shape_cast %111 : vector<1x88x128xbf16> to vector<88x128xbf16>
    %c18 = arith.constant 18 : index
    %c0_100 = arith.constant 0 : index
    %c0_101 = arith.constant 0 : index
    %113 = vector.load %arg2[%c18, %c0_100, %c0_101] : memref<49x128x128xbf16, #tpu.memory_space<vmem>>, vector<1x128x128xbf16>
    %114 = vector.shape_cast %113 : vector<1x128x128xbf16> to vector<128x128xbf16>
    %cst_102 = arith.constant dense<0.000000e+00> : vector<88x128xf32>
    %115 = tpu.matmul %112, %114, %cst_102 {dimension_numbers = #tpu.dot_dimension_numbers<[1], [0], [0], [1], [0, 0, 1, 1], [], []>} : vector<88x128xbf16>, vector<128x128xbf16>, vector<88x128xf32> -> vector<88x128xf32>
    %116 = arith.addf %110, %115 : vector<88x128xf32>
    %c0_103 = arith.constant 0 : index
    %c141 = arith.constant 141 : index
    %c0_104 = arith.constant 0 : index
    %117 = vector.load %arg1[%c0_103, %c141, %c0_104] : memref<1x512x128xbf16, #tpu.memory_space<vmem>>, vector<1x88x128xbf16>
    %118 = vector.shape_cast %117 : vector<1x88x128xbf16> to vector<88x128xbf16>
    %c19 = arith.constant 19 : index
    %c0_105 = arith.constant 0 : index
    %c0_106 = arith.constant 0 : index
    %119 = vector.load %arg2[%c19, %c0_105, %c0_106] : memref<49x128x128xbf16, #tpu.memory_space<vmem>>, vector<1x128x128xbf16>
    %120 = vector.shape_cast %119 : vector<1x128x128xbf16> to vector<128x128xbf16>
    %cst_107 = arith.constant dense<0.000000e+00> : vector<88x128xf32>
    %121 = tpu.matmul %118, %120, %cst_107 {dimension_numbers = #tpu.dot_dimension_numbers<[1], [0], [0], [1], [0, 0, 1, 1], [], []>} : vector<88x128xbf16>, vector<128x128xbf16>, vector<88x128xf32> -> vector<88x128xf32>
    %122 = arith.addf %116, %121 : vector<88x128xf32>
    %c0_108 = arith.constant 0 : index
    %c14_109 = arith.constant 14 : index
    %c0_110 = arith.constant 0 : index
    %123 = vector.load %arg1[%c0_108, %c14_109, %c0_110] : memref<1x512x128xbf16, #tpu.memory_space<vmem>>, vector<1x88x128xbf16>
    %124 = vector.shape_cast %123 : vector<1x88x128xbf16> to vector<88x128xbf16>
    %c20 = arith.constant 20 : index
    %c0_111 = arith.constant 0 : index
    %c0_112 = arith.constant 0 : index
    %125 = vector.load %arg2[%c20, %c0_111, %c0_112] : memref<49x128x128xbf16, #tpu.memory_space<vmem>>, vector<1x128x128xbf16>
    %126 = vector.shape_cast %125 : vector<1x128x128xbf16> to vector<128x128xbf16>
    %cst_113 = arith.constant dense<0.000000e+00> : vector<88x128xf32>
    %127 = tpu.matmul %124, %126, %cst_113 {dimension_numbers = #tpu.dot_dimension_numbers<[1], [0], [0], [1], [0, 0, 1, 1], [], []>} : vector<88x128xbf16>, vector<128x128xbf16>, vector<88x128xf32> -> vector<88x128xf32>
    %128 = arith.addf %122, %127 : vector<88x128xf32>
    %c0_114 = arith.constant 0 : index
    %c267 = arith.constant 267 : index
    %c0_115 = arith.constant 0 : index
    %129 = vector.load %arg1[%c0_114, %c267, %c0_115] : memref<1x512x128xbf16, #tpu.memory_space<vmem>>, vector<1x88x128xbf16>
    %130 = vector.shape_cast %129 : vector<1x88x128xbf16> to vector<88x128xbf16>
    %c21 = arith.constant 21 : index
    %c0_116 = arith.constant 0 : index
    %c0_117 = arith.constant 0 : index
    %131 = vector.load %arg2[%c21, %c0_116, %c0_117] : memref<49x128x128xbf16, #tpu.memory_space<vmem>>, vector<1x128x128xbf16>
    %132 = vector.shape_cast %131 : vector<1x128x128xbf16> to vector<128x128xbf16>
    %cst_118 = arith.constant dense<0.000000e+00> : vector<88x128xf32>
    %133 = tpu.matmul %130, %132, %cst_118 {dimension_numbers = #tpu.dot_dimension_numbers<[1], [0], [0], [1], [0, 0, 1, 1], [], []>} : vector<88x128xbf16>, vector<128x128xbf16>, vector<88x128xf32> -> vector<88x128xf32>
    %134 = arith.addf %128, %133 : vector<88x128xf32>
    %c0_119 = arith.constant 0 : index
    %c395 = arith.constant 395 : index
    %c0_120 = arith.constant 0 : index
    %135 = vector.load %arg1[%c0_119, %c395, %c0_120] : memref<1x512x128xbf16, #tpu.memory_space<vmem>>, vector<1x88x128xbf16>
    %136 = vector.shape_cast %135 : vector<1x88x128xbf16> to vector<88x128xbf16>
    %c22 = arith.constant 22 : index
    %c0_121 = arith.constant 0 : index
    %c0_122 = arith.constant 0 : index
    %137 = vector.load %arg2[%c22, %c0_121, %c0_122] : memref<49x128x128xbf16, #tpu.memory_space<vmem>>, vector<1x128x128xbf16>
    %138 = vector.shape_cast %137 : vector<1x128x128xbf16> to vector<128x128xbf16>
    %cst_123 = arith.constant dense<0.000000e+00> : vector<88x128xf32>
    %139 = tpu.matmul %136, %138, %cst_123 {dimension_numbers = #tpu.dot_dimension_numbers<[1], [0], [0], [1], [0, 0, 1, 1], [], []>} : vector<88x128xbf16>, vector<128x128xbf16>, vector<88x128xf32> -> vector<88x128xf32>
    %140 = arith.addf %134, %139 : vector<88x128xf32>
    %c0_124 = arith.constant 0 : index
    %c268 = arith.constant 268 : index
    %c0_125 = arith.constant 0 : index
    %141 = vector.load %arg1[%c0_124, %c268, %c0_125] : memref<1x512x128xbf16, #tpu.memory_space<vmem>>, vector<1x88x128xbf16>
    %142 = vector.shape_cast %141 : vector<1x88x128xbf16> to vector<88x128xbf16>
    %c23 = arith.constant 23 : index
    %c0_126 = arith.constant 0 : index
    %c0_127 = arith.constant 0 : index
    %143 = vector.load %arg2[%c23, %c0_126, %c0_127] : memref<49x128x128xbf16, #tpu.memory_space<vmem>>, vector<1x128x128xbf16>
    %144 = vector.shape_cast %143 : vector<1x128x128xbf16> to vector<128x128xbf16>
    %cst_128 = arith.constant dense<0.000000e+00> : vector<88x128xf32>
    %145 = tpu.matmul %142, %144, %cst_128 {dimension_numbers = #tpu.dot_dimension_numbers<[1], [0], [0], [1], [0, 0, 1, 1], [], []>} : vector<88x128xbf16>, vector<128x128xbf16>, vector<88x128xf32> -> vector<88x128xf32>
    %146 = arith.addf %140, %145 : vector<88x128xf32>
    %c0_129 = arith.constant 0 : index
    %c396 = arith.constant 396 : index
    %c0_130 = arith.constant 0 : index
    %147 = vector.load %arg1[%c0_129, %c396, %c0_130] : memref<1x512x128xbf16, #tpu.memory_space<vmem>>, vector<1x88x128xbf16>
    %148 = vector.shape_cast %147 : vector<1x88x128xbf16> to vector<88x128xbf16>
    %c24 = arith.constant 24 : index
    %c0_131 = arith.constant 0 : index
    %c0_132 = arith.constant 0 : index
    %149 = vector.load %arg2[%c24, %c0_131, %c0_132] : memref<49x128x128xbf16, #tpu.memory_space<vmem>>, vector<1x128x128xbf16>
    %150 = vector.shape_cast %149 : vector<1x128x128xbf16> to vector<128x128xbf16>
    %cst_133 = arith.constant dense<0.000000e+00> : vector<88x128xf32>
    %151 = tpu.matmul %148, %150, %cst_133 {dimension_numbers = #tpu.dot_dimension_numbers<[1], [0], [0], [1], [0, 0, 1, 1], [], []>} : vector<88x128xbf16>, vector<128x128xbf16>, vector<88x128xf32> -> vector<88x128xf32>
    %152 = arith.addf %146, %151 : vector<88x128xf32>
    %c0_134 = arith.constant 0 : index
    %c269 = arith.constant 269 : index
    %c0_135 = arith.constant 0 : index
    %153 = vector.load %arg1[%c0_134, %c269, %c0_135] : memref<1x512x128xbf16, #tpu.memory_space<vmem>>, vector<1x88x128xbf16>
    %154 = vector.shape_cast %153 : vector<1x88x128xbf16> to vector<88x128xbf16>
    %c25 = arith.constant 25 : index
    %c0_136 = arith.constant 0 : index
    %c0_137 = arith.constant 0 : index
    %155 = vector.load %arg2[%c25, %c0_136, %c0_137] : memref<49x128x128xbf16, #tpu.memory_space<vmem>>, vector<1x128x128xbf16>
    %156 = vector.shape_cast %155 : vector<1x128x128xbf16> to vector<128x128xbf16>
    %cst_138 = arith.constant dense<0.000000e+00> : vector<88x128xf32>
    %157 = tpu.matmul %154, %156, %cst_138 {dimension_numbers = #tpu.dot_dimension_numbers<[1], [0], [0], [1], [0, 0, 1, 1], [], []>} : vector<88x128xbf16>, vector<128x128xbf16>, vector<88x128xf32> -> vector<88x128xf32>
    %158 = arith.addf %152, %157 : vector<88x128xf32>
    %c0_139 = arith.constant 0 : index
    %c397 = arith.constant 397 : index
    %c0_140 = arith.constant 0 : index
    %159 = vector.load %arg1[%c0_139, %c397, %c0_140] : memref<1x512x128xbf16, #tpu.memory_space<vmem>>, vector<1x88x128xbf16>
    %160 = vector.shape_cast %159 : vector<1x88x128xbf16> to vector<88x128xbf16>
    %c26 = arith.constant 26 : index
    %c0_141 = arith.constant 0 : index
    %c0_142 = arith.constant 0 : index
    %161 = vector.load %arg2[%c26, %c0_141, %c0_142] : memref<49x128x128xbf16, #tpu.memory_space<vmem>>, vector<1x128x128xbf16>
    %162 = vector.shape_cast %161 : vector<1x128x128xbf16> to vector<128x128xbf16>
    %cst_143 = arith.constant dense<0.000000e+00> : vector<88x128xf32>
    %163 = tpu.matmul %160, %162, %cst_143 {dimension_numbers = #tpu.dot_dimension_numbers<[1], [0], [0], [1], [0, 0, 1, 1], [], []>} : vector<88x128xbf16>, vector<128x128xbf16>, vector<88x128xf32> -> vector<88x128xf32>
    %164 = arith.addf %158, %163 : vector<88x128xf32>
    %c0_144 = arith.constant 0 : index
    %c270 = arith.constant 270 : index
    %c0_145 = arith.constant 0 : index
    %165 = vector.load %arg1[%c0_144, %c270, %c0_145] : memref<1x512x128xbf16, #tpu.memory_space<vmem>>, vector<1x88x128xbf16>
    %166 = vector.shape_cast %165 : vector<1x88x128xbf16> to vector<88x128xbf16>
    %c27 = arith.constant 27 : index
    %c0_146 = arith.constant 0 : index
    %c0_147 = arith.constant 0 : index
    %167 = vector.load %arg2[%c27, %c0_146, %c0_147] : memref<49x128x128xbf16, #tpu.memory_space<vmem>>, vector<1x128x128xbf16>
    %168 = vector.shape_cast %167 : vector<1x128x128xbf16> to vector<128x128xbf16>
    %cst_148 = arith.constant dense<0.000000e+00> : vector<88x128xf32>
    %169 = tpu.matmul %166, %168, %cst_148 {dimension_numbers = #tpu.dot_dimension_numbers<[1], [0], [0], [1], [0, 0, 1, 1], [], []>} : vector<88x128xbf16>, vector<128x128xbf16>, vector<88x128xf32> -> vector<88x128xf32>
    %170 = arith.addf %164, %169 : vector<88x128xf32>
    %c0_149 = arith.constant 0 : index
    %c22_150 = arith.constant 22 : index
    %c0_151 = arith.constant 0 : index
    %171 = vector.load %arg1[%c0_149, %c22_150, %c0_151] : memref<1x512x128xbf16, #tpu.memory_space<vmem>>, vector<1x88x128xbf16>
    %172 = vector.shape_cast %171 : vector<1x88x128xbf16> to vector<88x128xbf16>
    %c28 = arith.constant 28 : index
    %c0_152 = arith.constant 0 : index
    %c0_153 = arith.constant 0 : index
    %173 = vector.load %arg2[%c28, %c0_152, %c0_153] : memref<49x128x128xbf16, #tpu.memory_space<vmem>>, vector<1x128x128xbf16>
    %174 = vector.shape_cast %173 : vector<1x128x128xbf16> to vector<128x128xbf16>
    %cst_154 = arith.constant dense<0.000000e+00> : vector<88x128xf32>
    %175 = tpu.matmul %172, %174, %cst_154 {dimension_numbers = #tpu.dot_dimension_numbers<[1], [0], [0], [1], [0, 0, 1, 1], [], []>} : vector<88x128xbf16>, vector<128x128xbf16>, vector<88x128xf32> -> vector<88x128xf32>
    %176 = arith.addf %170, %175 : vector<88x128xf32>
    %c0_155 = arith.constant 0 : index
    %c150 = arith.constant 150 : index
    %c0_156 = arith.constant 0 : index
    %177 = vector.load %arg1[%c0_155, %c150, %c0_156] : memref<1x512x128xbf16, #tpu.memory_space<vmem>>, vector<1x88x128xbf16>
    %178 = vector.shape_cast %177 : vector<1x88x128xbf16> to vector<88x128xbf16>
    %c29 = arith.constant 29 : index
    %c0_157 = arith.constant 0 : index
    %c0_158 = arith.constant 0 : index
    %179 = vector.load %arg2[%c29, %c0_157, %c0_158] : memref<49x128x128xbf16, #tpu.memory_space<vmem>>, vector<1x128x128xbf16>
    %180 = vector.shape_cast %179 : vector<1x128x128xbf16> to vector<128x128xbf16>
    %cst_159 = arith.constant dense<0.000000e+00> : vector<88x128xf32>
    %181 = tpu.matmul %178, %180, %cst_159 {dimension_numbers = #tpu.dot_dimension_numbers<[1], [0], [0], [1], [0, 0, 1, 1], [], []>} : vector<88x128xbf16>, vector<128x128xbf16>, vector<88x128xf32> -> vector<88x128xf32>
    %182 = arith.addf %176, %181 : vector<88x128xf32>
    %c0_160 = arith.constant 0 : index
    %c23_161 = arith.constant 23 : index
    %c0_162 = arith.constant 0 : index
    %183 = vector.load %arg1[%c0_160, %c23_161, %c0_162] : memref<1x512x128xbf16, #tpu.memory_space<vmem>>, vector<1x88x128xbf16>
    %184 = vector.shape_cast %183 : vector<1x88x128xbf16> to vector<88x128xbf16>
    %c30 = arith.constant 30 : index
    %c0_163 = arith.constant 0 : index
    %c0_164 = arith.constant 0 : index
    %185 = vector.load %arg2[%c30, %c0_163, %c0_164] : memref<49x128x128xbf16, #tpu.memory_space<vmem>>, vector<1x128x128xbf16>
    %186 = vector.shape_cast %185 : vector<1x128x128xbf16> to vector<128x128xbf16>
    %cst_165 = arith.constant dense<0.000000e+00> : vector<88x128xf32>
    %187 = tpu.matmul %184, %186, %cst_165 {dimension_numbers = #tpu.dot_dimension_numbers<[1], [0], [0], [1], [0, 0, 1, 1], [], []>} : vector<88x128xbf16>, vector<128x128xbf16>, vector<88x128xf32> -> vector<88x128xf32>
    %188 = arith.addf %182, %187 : vector<88x128xf32>
    %c0_166 = arith.constant 0 : index
    %c151 = arith.constant 151 : index
    %c0_167 = arith.constant 0 : index
    %189 = vector.load %arg1[%c0_166, %c151, %c0_167] : memref<1x512x128xbf16, #tpu.memory_space<vmem>>, vector<1x88x128xbf16>
    %190 = vector.shape_cast %189 : vector<1x88x128xbf16> to vector<88x128xbf16>
    %c31 = arith.constant 31 : index
    %c0_168 = arith.constant 0 : index
    %c0_169 = arith.constant 0 : index
    %191 = vector.load %arg2[%c31, %c0_168, %c0_169] : memref<49x128x128xbf16, #tpu.memory_space<vmem>>, vector<1x128x128xbf16>
    %192 = vector.shape_cast %191 : vector<1x128x128xbf16> to vector<128x128xbf16>
    %cst_170 = arith.constant dense<0.000000e+00> : vector<88x128xf32>
    %193 = tpu.matmul %190, %192, %cst_170 {dimension_numbers = #tpu.dot_dimension_numbers<[1], [0], [0], [1], [0, 0, 1, 1], [], []>} : vector<88x128xbf16>, vector<128x128xbf16>, vector<88x128xf32> -> vector<88x128xf32>
    %194 = arith.addf %188, %193 : vector<88x128xf32>
    %c0_171 = arith.constant 0 : index
    %c24_172 = arith.constant 24 : index
    %c0_173 = arith.constant 0 : index
    %195 = vector.load %arg1[%c0_171, %c24_172, %c0_173] : memref<1x512x128xbf16, #tpu.memory_space<vmem>>, vector<1x88x128xbf16>
    %196 = vector.shape_cast %195 : vector<1x88x128xbf16> to vector<88x128xbf16>
    %c32 = arith.constant 32 : index
    %c0_174 = arith.constant 0 : index
    %c0_175 = arith.constant 0 : index
    %197 = vector.load %arg2[%c32, %c0_174, %c0_175] : memref<49x128x128xbf16, #tpu.memory_space<vmem>>, vector<1x128x128xbf16>
    %198 = vector.shape_cast %197 : vector<1x128x128xbf16> to vector<128x128xbf16>
    %cst_176 = arith.constant dense<0.000000e+00> : vector<88x128xf32>
    %199 = tpu.matmul %196, %198, %cst_176 {dimension_numbers = #tpu.dot_dimension_numbers<[1], [0], [0], [1], [0, 0, 1, 1], [], []>} : vector<88x128xbf16>, vector<128x128xbf16>, vector<88x128xf32> -> vector<88x128xf32>
    %200 = arith.addf %194, %199 : vector<88x128xf32>
    %c0_177 = arith.constant 0 : index
    %c152 = arith.constant 152 : index
    %c0_178 = arith.constant 0 : index
    %201 = vector.load %arg1[%c0_177, %c152, %c0_178] : memref<1x512x128xbf16, #tpu.memory_space<vmem>>, vector<1x88x128xbf16>
    %202 = vector.shape_cast %201 : vector<1x88x128xbf16> to vector<88x128xbf16>
    %c33 = arith.constant 33 : index
    %c0_179 = arith.constant 0 : index
    %c0_180 = arith.constant 0 : index
    %203 = vector.load %arg2[%c33, %c0_179, %c0_180] : memref<49x128x128xbf16, #tpu.memory_space<vmem>>, vector<1x128x128xbf16>
    %204 = vector.shape_cast %203 : vector<1x128x128xbf16> to vector<128x128xbf16>
    %cst_181 = arith.constant dense<0.000000e+00> : vector<88x128xf32>
    %205 = tpu.matmul %202, %204, %cst_181 {dimension_numbers = #tpu.dot_dimension_numbers<[1], [0], [0], [1], [0, 0, 1, 1], [], []>} : vector<88x128xbf16>, vector<128x128xbf16>, vector<88x128xf32> -> vector<88x128xf32>
    %206 = arith.addf %200, %205 : vector<88x128xf32>
    %c0_182 = arith.constant 0 : index
    %c25_183 = arith.constant 25 : index
    %c0_184 = arith.constant 0 : index
    %207 = vector.load %arg1[%c0_182, %c25_183, %c0_184] : memref<1x512x128xbf16, #tpu.memory_space<vmem>>, vector<1x88x128xbf16>
    %208 = vector.shape_cast %207 : vector<1x88x128xbf16> to vector<88x128xbf16>
    %c34 = arith.constant 34 : index
    %c0_185 = arith.constant 0 : index
    %c0_186 = arith.constant 0 : index
    %209 = vector.load %arg2[%c34, %c0_185, %c0_186] : memref<49x128x128xbf16, #tpu.memory_space<vmem>>, vector<1x128x128xbf16>
    %210 = vector.shape_cast %209 : vector<1x128x128xbf16> to vector<128x128xbf16>
    %cst_187 = arith.constant dense<0.000000e+00> : vector<88x128xf32>
    %211 = tpu.matmul %208, %210, %cst_187 {dimension_numbers = #tpu.dot_dimension_numbers<[1], [0], [0], [1], [0, 0, 1, 1], [], []>} : vector<88x128xbf16>, vector<128x128xbf16>, vector<88x128xf32> -> vector<88x128xf32>
    %212 = arith.addf %206, %211 : vector<88x128xf32>
    %c0_188 = arith.constant 0 : index
    %c278 = arith.constant 278 : index
    %c0_189 = arith.constant 0 : index
    %213 = vector.load %arg1[%c0_188, %c278, %c0_189] : memref<1x512x128xbf16, #tpu.memory_space<vmem>>, vector<1x88x128xbf16>
    %214 = vector.shape_cast %213 : vector<1x88x128xbf16> to vector<88x128xbf16>
    %c35 = arith.constant 35 : index
    %c0_190 = arith.constant 0 : index
    %c0_191 = arith.constant 0 : index
    %215 = vector.load %arg2[%c35, %c0_190, %c0_191] : memref<49x128x128xbf16, #tpu.memory_space<vmem>>, vector<1x128x128xbf16>
    %216 = vector.shape_cast %215 : vector<1x128x128xbf16> to vector<128x128xbf16>
    %cst_192 = arith.constant dense<0.000000e+00> : vector<88x128xf32>
    %217 = tpu.matmul %214, %216, %cst_192 {dimension_numbers = #tpu.dot_dimension_numbers<[1], [0], [0], [1], [0, 0, 1, 1], [], []>} : vector<88x128xbf16>, vector<128x128xbf16>, vector<88x128xf32> -> vector<88x128xf32>
    %218 = arith.addf %212, %217 : vector<88x128xf32>
    %c0_193 = arith.constant 0 : index
    %c406 = arith.constant 406 : index
    %c0_194 = arith.constant 0 : index
    %219 = vector.load %arg1[%c0_193, %c406, %c0_194] : memref<1x512x128xbf16, #tpu.memory_space<vmem>>, vector<1x88x128xbf16>
    %220 = vector.shape_cast %219 : vector<1x88x128xbf16> to vector<88x128xbf16>
    %c36 = arith.constant 36 : index
    %c0_195 = arith.constant 0 : index
    %c0_196 = arith.constant 0 : index
    %221 = vector.load %arg2[%c36, %c0_195, %c0_196] : memref<49x128x128xbf16, #tpu.memory_space<vmem>>, vector<1x128x128xbf16>
    %222 = vector.shape_cast %221 : vector<1x128x128xbf16> to vector<128x128xbf16>
    %cst_197 = arith.constant dense<0.000000e+00> : vector<88x128xf32>
    %223 = tpu.matmul %220, %222, %cst_197 {dimension_numbers = #tpu.dot_dimension_numbers<[1], [0], [0], [1], [0, 0, 1, 1], [], []>} : vector<88x128xbf16>, vector<128x128xbf16>, vector<88x128xf32> -> vector<88x128xf32>
    %224 = arith.addf %218, %223 : vector<88x128xf32>
    %c0_198 = arith.constant 0 : index
    %c279 = arith.constant 279 : index
    %c0_199 = arith.constant 0 : index
    %225 = vector.load %arg1[%c0_198, %c279, %c0_199] : memref<1x512x128xbf16, #tpu.memory_space<vmem>>, vector<1x88x128xbf16>
    %226 = vector.shape_cast %225 : vector<1x88x128xbf16> to vector<88x128xbf16>
    %c37 = arith.constant 37 : index
    %c0_200 = arith.constant 0 : index
    %c0_201 = arith.constant 0 : index
    %227 = vector.load %arg2[%c37, %c0_200, %c0_201] : memref<49x128x128xbf16, #tpu.memory_space<vmem>>, vector<1x128x128xbf16>
    %228 = vector.shape_cast %227 : vector<1x128x128xbf16> to vector<128x128xbf16>
    %cst_202 = arith.constant dense<0.000000e+00> : vector<88x128xf32>
    %229 = tpu.matmul %226, %228, %cst_202 {dimension_numbers = #tpu.dot_dimension_numbers<[1], [0], [0], [1], [0, 0, 1, 1], [], []>} : vector<88x128xbf16>, vector<128x128xbf16>, vector<88x128xf32> -> vector<88x128xf32>
    %230 = arith.addf %224, %229 : vector<88x128xf32>
    %c0_203 = arith.constant 0 : index
    %c407 = arith.constant 407 : index
    %c0_204 = arith.constant 0 : index
    %231 = vector.load %arg1[%c0_203, %c407, %c0_204] : memref<1x512x128xbf16, #tpu.memory_space<vmem>>, vector<1x88x128xbf16>
    %232 = vector.shape_cast %231 : vector<1x88x128xbf16> to vector<88x128xbf16>
    %c38 = arith.constant 38 : index
    %c0_205 = arith.constant 0 : index
    %c0_206 = arith.constant 0 : index
    %233 = vector.load %arg2[%c38, %c0_205, %c0_206] : memref<49x128x128xbf16, #tpu.memory_space<vmem>>, vector<1x128x128xbf16>
    %234 = vector.shape_cast %233 : vector<1x128x128xbf16> to vector<128x128xbf16>
    %cst_207 = arith.constant dense<0.000000e+00> : vector<88x128xf32>
    %235 = tpu.matmul %232, %234, %cst_207 {dimension_numbers = #tpu.dot_dimension_numbers<[1], [0], [0], [1], [0, 0, 1, 1], [], []>} : vector<88x128xbf16>, vector<128x128xbf16>, vector<88x128xf32> -> vector<88x128xf32>
    %236 = arith.addf %230, %235 : vector<88x128xf32>
    %c0_208 = arith.constant 0 : index
    %c280 = arith.constant 280 : index
    %c0_209 = arith.constant 0 : index
    %237 = vector.load %arg1[%c0_208, %c280, %c0_209] : memref<1x512x128xbf16, #tpu.memory_space<vmem>>, vector<1x88x128xbf16>
    %238 = vector.shape_cast %237 : vector<1x88x128xbf16> to vector<88x128xbf16>
    %c39 = arith.constant 39 : index
    %c0_210 = arith.constant 0 : index
    %c0_211 = arith.constant 0 : index
    %239 = vector.load %arg2[%c39, %c0_210, %c0_211] : memref<49x128x128xbf16, #tpu.memory_space<vmem>>, vector<1x128x128xbf16>
    %240 = vector.shape_cast %239 : vector<1x128x128xbf16> to vector<128x128xbf16>
    %cst_212 = arith.constant dense<0.000000e+00> : vector<88x128xf32>
    %241 = tpu.matmul %238, %240, %cst_212 {dimension_numbers = #tpu.dot_dimension_numbers<[1], [0], [0], [1], [0, 0, 1, 1], [], []>} : vector<88x128xbf16>, vector<128x128xbf16>, vector<88x128xf32> -> vector<88x128xf32>
    %242 = arith.addf %236, %241 : vector<88x128xf32>
    %c0_213 = arith.constant 0 : index
    %c408 = arith.constant 408 : index
    %c0_214 = arith.constant 0 : index
    %243 = vector.load %arg1[%c0_213, %c408, %c0_214] : memref<1x512x128xbf16, #tpu.memory_space<vmem>>, vector<1x88x128xbf16>
    %244 = vector.shape_cast %243 : vector<1x88x128xbf16> to vector<88x128xbf16>
    %c40 = arith.constant 40 : index
    %c0_215 = arith.constant 0 : index
    %c0_216 = arith.constant 0 : index
    %245 = vector.load %arg2[%c40, %c0_215, %c0_216] : memref<49x128x128xbf16, #tpu.memory_space<vmem>>, vector<1x128x128xbf16>
    %246 = vector.shape_cast %245 : vector<1x128x128xbf16> to vector<128x128xbf16>
    %cst_217 = arith.constant dense<0.000000e+00> : vector<88x128xf32>
    %247 = tpu.matmul %244, %246, %cst_217 {dimension_numbers = #tpu.dot_dimension_numbers<[1], [0], [0], [1], [0, 0, 1, 1], [], []>} : vector<88x128xbf16>, vector<128x128xbf16>, vector<88x128xf32> -> vector<88x128xf32>
    %248 = arith.addf %242, %247 : vector<88x128xf32>
    %c0_218 = arith.constant 0 : index
    %c281 = arith.constant 281 : index
    %c0_219 = arith.constant 0 : index
    %249 = vector.load %arg1[%c0_218, %c281, %c0_219] : memref<1x512x128xbf16, #tpu.memory_space<vmem>>, vector<1x88x128xbf16>
    %250 = vector.shape_cast %249 : vector<1x88x128xbf16> to vector<88x128xbf16>
    %c41 = arith.constant 41 : index
    %c0_220 = arith.constant 0 : index
    %c0_221 = arith.constant 0 : index
    %251 = vector.load %arg2[%c41, %c0_220, %c0_221] : memref<49x128x128xbf16, #tpu.memory_space<vmem>>, vector<1x128x128xbf16>
    %252 = vector.shape_cast %251 : vector<1x128x128xbf16> to vector<128x128xbf16>
    %cst_222 = arith.constant dense<0.000000e+00> : vector<88x128xf32>
    %253 = tpu.matmul %250, %252, %cst_222 {dimension_numbers = #tpu.dot_dimension_numbers<[1], [0], [0], [1], [0, 0, 1, 1], [], []>} : vector<88x128xbf16>, vector<128x128xbf16>, vector<88x128xf32> -> vector<88x128xf32>
    %254 = arith.addf %248, %253 : vector<88x128xf32>
    %c0_223 = arith.constant 0 : index
    %c33_224 = arith.constant 33 : index
    %c0_225 = arith.constant 0 : index
    %255 = vector.load %arg1[%c0_223, %c33_224, %c0_225] : memref<1x512x128xbf16, #tpu.memory_space<vmem>>, vector<1x88x128xbf16>
    %256 = vector.shape_cast %255 : vector<1x88x128xbf16> to vector<88x128xbf16>
    %c42 = arith.constant 42 : index
    %c0_226 = arith.constant 0 : index
    %c0_227 = arith.constant 0 : index
    %257 = vector.load %arg2[%c42, %c0_226, %c0_227] : memref<49x128x128xbf16, #tpu.memory_space<vmem>>, vector<1x128x128xbf16>
    %258 = vector.shape_cast %257 : vector<1x128x128xbf16> to vector<128x128xbf16>
    %cst_228 = arith.constant dense<0.000000e+00> : vector<88x128xf32>
    %259 = tpu.matmul %256, %258, %cst_228 {dimension_numbers = #tpu.dot_dimension_numbers<[1], [0], [0], [1], [0, 0, 1, 1], [], []>} : vector<88x128xbf16>, vector<128x128xbf16>, vector<88x128xf32> -> vector<88x128xf32>
    %260 = arith.addf %254, %259 : vector<88x128xf32>
    %c0_229 = arith.constant 0 : index
    %c161 = arith.constant 161 : index
    %c0_230 = arith.constant 0 : index
    %261 = vector.load %arg1[%c0_229, %c161, %c0_230] : memref<1x512x128xbf16, #tpu.memory_space<vmem>>, vector<1x88x128xbf16>
    %262 = vector.shape_cast %261 : vector<1x88x128xbf16> to vector<88x128xbf16>
    %c43 = arith.constant 43 : index
    %c0_231 = arith.constant 0 : index
    %c0_232 = arith.constant 0 : index
    %263 = vector.load %arg2[%c43, %c0_231, %c0_232] : memref<49x128x128xbf16, #tpu.memory_space<vmem>>, vector<1x128x128xbf16>
    %264 = vector.shape_cast %263 : vector<1x128x128xbf16> to vector<128x128xbf16>
    %cst_233 = arith.constant dense<0.000000e+00> : vector<88x128xf32>
    %265 = tpu.matmul %262, %264, %cst_233 {dimension_numbers = #tpu.dot_dimension_numbers<[1], [0], [0], [1], [0, 0, 1, 1], [], []>} : vector<88x128xbf16>, vector<128x128xbf16>, vector<88x128xf32> -> vector<88x128xf32>
    %266 = arith.addf %260, %265 : vector<88x128xf32>
    %c0_234 = arith.constant 0 : index
    %c34_235 = arith.constant 34 : index
    %c0_236 = arith.constant 0 : index
    %267 = vector.load %arg1[%c0_234, %c34_235, %c0_236] : memref<1x512x128xbf16, #tpu.memory_space<vmem>>, vector<1x88x128xbf16>
    %268 = vector.shape_cast %267 : vector<1x88x128xbf16> to vector<88x128xbf16>
    %c44 = arith.constant 44 : index
    %c0_237 = arith.constant 0 : index
    %c0_238 = arith.constant 0 : index
    %269 = vector.load %arg2[%c44, %c0_237, %c0_238] : memref<49x128x128xbf16, #tpu.memory_space<vmem>>, vector<1x128x128xbf16>
    %270 = vector.shape_cast %269 : vector<1x128x128xbf16> to vector<128x128xbf16>
    %cst_239 = arith.constant dense<0.000000e+00> : vector<88x128xf32>
    %271 = tpu.matmul %268, %270, %cst_239 {dimension_numbers = #tpu.dot_dimension_numbers<[1], [0], [0], [1], [0, 0, 1, 1], [], []>} : vector<88x128xbf16>, vector<128x128xbf16>, vector<88x128xf32> -> vector<88x128xf32>
    %272 = arith.addf %266, %271 : vector<88x128xf32>
    %c0_240 = arith.constant 0 : index
    %c162 = arith.constant 162 : index
    %c0_241 = arith.constant 0 : index
    %273 = vector.load %arg1[%c0_240, %c162, %c0_241] : memref<1x512x128xbf16, #tpu.memory_space<vmem>>, vector<1x88x128xbf16>
    %274 = vector.shape_cast %273 : vector<1x88x128xbf16> to vector<88x128xbf16>
    %c45 = arith.constant 45 : index
    %c0_242 = arith.constant 0 : index
    %c0_243 = arith.constant 0 : index
    %275 = vector.load %arg2[%c45, %c0_242, %c0_243] : memref<49x128x128xbf16, #tpu.memory_space<vmem>>, vector<1x128x128xbf16>
    %276 = vector.shape_cast %275 : vector<1x128x128xbf16> to vector<128x128xbf16>
    %cst_244 = arith.constant dense<0.000000e+00> : vector<88x128xf32>
    %277 = tpu.matmul %274, %276, %cst_244 {dimension_numbers = #tpu.dot_dimension_numbers<[1], [0], [0], [1], [0, 0, 1, 1], [], []>} : vector<88x128xbf16>, vector<128x128xbf16>, vector<88x128xf32> -> vector<88x128xf32>
    %278 = arith.addf %272, %277 : vector<88x128xf32>
    %c0_245 = arith.constant 0 : index
    %c35_246 = arith.constant 35 : index
    %c0_247 = arith.constant 0 : index
    %279 = vector.load %arg1[%c0_245, %c35_246, %c0_247] : memref<1x512x128xbf16, #tpu.memory_space<vmem>>, vector<1x88x128xbf16>
    %280 = vector.shape_cast %279 : vector<1x88x128xbf16> to vector<88x128xbf16>
    %c46 = arith.constant 46 : index
    %c0_248 = arith.constant 0 : index
    %c0_249 = arith.constant 0 : index
    %281 = vector.load %arg2[%c46, %c0_248, %c0_249] : memref<49x128x128xbf16, #tpu.memory_space<vmem>>, vector<1x128x128xbf16>
    %282 = vector.shape_cast %281 : vector<1x128x128xbf16> to vector<128x128xbf16>
    %cst_250 = arith.constant dense<0.000000e+00> : vector<88x128xf32>
    %283 = tpu.matmul %280, %282, %cst_250 {dimension_numbers = #tpu.dot_dimension_numbers<[1], [0], [0], [1], [0, 0, 1, 1], [], []>} : vector<88x128xbf16>, vector<128x128xbf16>, vector<88x128xf32> -> vector<88x128xf32>
    %284 = arith.addf %278, %283 : vector<88x128xf32>
    %c0_251 = arith.constant 0 : index
    %c163 = arith.constant 163 : index
    %c0_252 = arith.constant 0 : index
    %285 = vector.load %arg1[%c0_251, %c163, %c0_252] : memref<1x512x128xbf16, #tpu.memory_space<vmem>>, vector<1x88x128xbf16>
    %286 = vector.shape_cast %285 : vector<1x88x128xbf16> to vector<88x128xbf16>
    %c47 = arith.constant 47 : index
    %c0_253 = arith.constant 0 : index
    %c0_254 = arith.constant 0 : index
    %287 = vector.load %arg2[%c47, %c0_253, %c0_254] : memref<49x128x128xbf16, #tpu.memory_space<vmem>>, vector<1x128x128xbf16>
    %288 = vector.shape_cast %287 : vector<1x128x128xbf16> to vector<128x128xbf16>
    %cst_255 = arith.constant dense<0.000000e+00> : vector<88x128xf32>
    %289 = tpu.matmul %286, %288, %cst_255 {dimension_numbers = #tpu.dot_dimension_numbers<[1], [0], [0], [1], [0, 0, 1, 1], [], []>} : vector<88x128xbf16>, vector<128x128xbf16>, vector<88x128xf32> -> vector<88x128xf32>
    %290 = arith.addf %284, %289 : vector<88x128xf32>
    %c0_256 = arith.constant 0 : index
    %c36_257 = arith.constant 36 : index
    %c0_258 = arith.constant 0 : index
    %291 = vector.load %arg1[%c0_256, %c36_257, %c0_258] : memref<1x512x128xbf16, #tpu.memory_space<vmem>>, vector<1x88x128xbf16>
    %292 = vector.shape_cast %291 : vector<1x88x128xbf16> to vector<88x128xbf16>
    %c48 = arith.constant 48 : index
    %c0_259 = arith.constant 0 : index
    %c0_260 = arith.constant 0 : index
    %293 = vector.load %arg2[%c48, %c0_259, %c0_260] : memref<49x128x128xbf16, #tpu.memory_space<vmem>>, vector<1x128x128xbf16>
    %294 = vector.shape_cast %293 : vector<1x128x128xbf16> to vector<128x128xbf16>
    %cst_261 = arith.constant dense<0.000000e+00> : vector<88x128xf32>
    %295 = tpu.matmul %292, %294, %cst_261 {dimension_numbers = #tpu.dot_dimension_numbers<[1], [0], [0], [1], [0, 0, 1, 1], [], []>} : vector<88x128xbf16>, vector<128x128xbf16>, vector<88x128xf32> -> vector<88x128xf32>
    %296 = arith.addf %290, %295 : vector<88x128xf32>
    %cst_262 = arith.constant 0.000000e+00 : f32
    %297 = vector.broadcast %cst_262 : f32 to vector<88x128xf32>
    %298 = arith.maximumf %296, %297 : vector<88x128xf32>
    %299 = arith.truncf %298 : vector<88x128xf32> to vector<88x128xbf16>
    %c0_263 = arith.constant 0 : index
    %c0_264 = arith.constant 0 : index
    %c0_265 = arith.constant 0 : index
    %300 = vector.load %arg4[%c0_263, %c0_264, %c0_265] : memref<1x88x128xbf16, #tpu.memory_space<vmem>>, vector<1x88x128xbf16>
    %301 = vector.shape_cast %300 : vector<1x88x128xbf16> to vector<88x128xbf16>
    %302 = vector.shape_cast %299 : vector<88x128xbf16> to vector<1x88x128xbf16>
    tpu.vector_store %arg4[%c0_263, %c0_264, %c0_265], %302 {strides = array<i32>} : memref<1x88x128xbf16, #tpu.memory_space<vmem>>, vector<1x88x128xbf16>,
    return
  }
  func.func @transform_0(%arg0: i32) -> (i32, i32, i32) {
    %c0_i32 = arith.constant 0 : i32
    %c0_i32_0 = arith.constant 0 : i32
    %c0_i32_1 = arith.constant 0 : i32
    return %arg0, %c0_i32, %c0_i32_0 : i32, i32, i32
  }
  func.func @transform_1(%arg0: i32) -> (i32, i32, i32) {
    %c0_i32 = arith.constant 0 : i32
    %c0_i32_0 = arith.constant 0 : i32
    %c0_i32_1 = arith.constant 0 : i32
    %c0_i32_2 = arith.constant 0 : i32
    return %c0_i32, %c0_i32_0, %c0_i32_1 : i32, i32, i32
  }
  func.func @transform_2(%arg0: i32) -> (i32, i32) {
    %c0_i32 = arith.constant 0 : i32
    %c0_i32_0 = arith.constant 0 : i32
    %c0_i32_1 = arith.constant 0 : i32
    return %c0_i32, %c0_i32_0 : i32, i32
  }
  func.func @transform_3(%arg0: i32) -> (i32, i32, i32) {
    %c0_i32 = arith.constant 0 : i32
    %c0_i32_0 = arith.constant 0 : i32
    %c0_i32_1 = arith.constant 0 : i32
    return %arg0, %c0_i32, %c0_i32_0 : i32, i32, i32
  }
}

module attributes {stable_mosaic.version = 11 : i64} {
  func.func @_maxpool_s2_kernel(%arg0: i32, %arg1: memref<1x128x128xbf16, #tpu.memory_space<vmem>>, %arg2: memref<1x20x128xbf16, #tpu.memory_space<vmem>>) attributes {dimension_semantics = [#tpu.dimension_semantics<parallel>], iteration_bounds = array<i64: 2>, scalar_prefetch = 0 : i64, scratch_operands = 0 : i64, tpu.core_type = #tpu.core_type<tc>, window_params = [{transform_indices = @transform_0, window_bounds = array<i64: 1, 128, 128>}, {transform_indices = @transform_1, window_bounds = array<i64: 1, 20, 128>}]} {
    %c0 = arith.constant 0 : index
    %c0_0 = arith.constant 0 : index
    %c0_1 = arith.constant 0 : index
    %0 = vector.load %arg1[%c0, %c0_0, %c0_1] : memref<1x128x128xbf16, #tpu.memory_space<vmem>>, vector<1x20x128xbf16>
    %1 = vector.shape_cast %0 : vector<1x20x128xbf16> to vector<20x128xbf16>
    %c0_2 = arith.constant 0 : index
    %c32 = arith.constant 32 : index
    %c0_3 = arith.constant 0 : index
    %2 = vector.load %arg1[%c0_2, %c32, %c0_3] : memref<1x128x128xbf16, #tpu.memory_space<vmem>>, vector<1x20x128xbf16>
    %3 = vector.shape_cast %2 : vector<1x20x128xbf16> to vector<20x128xbf16>
    %4 = arith.maximumf %1, %3 : vector<20x128xbf16>
    %c0_4 = arith.constant 0 : index
    %c1 = arith.constant 1 : index
    %c0_5 = arith.constant 0 : index
    %5 = vector.load %arg1[%c0_4, %c1, %c0_5] : memref<1x128x128xbf16, #tpu.memory_space<vmem>>, vector<1x20x128xbf16>
    %6 = vector.shape_cast %5 : vector<1x20x128xbf16> to vector<20x128xbf16>
    %7 = arith.maximumf %4, %6 : vector<20x128xbf16>
    %c0_6 = arith.constant 0 : index
    %c64 = arith.constant 64 : index
    %c0_7 = arith.constant 0 : index
    %8 = vector.load %arg1[%c0_6, %c64, %c0_7] : memref<1x128x128xbf16, #tpu.memory_space<vmem>>, vector<1x20x128xbf16>
    %9 = vector.shape_cast %8 : vector<1x20x128xbf16> to vector<20x128xbf16>
    %10 = arith.maximumf %7, %9 : vector<20x128xbf16>
    %c0_8 = arith.constant 0 : index
    %c96 = arith.constant 96 : index
    %c0_9 = arith.constant 0 : index
    %11 = vector.load %arg1[%c0_8, %c96, %c0_9] : memref<1x128x128xbf16, #tpu.memory_space<vmem>>, vector<1x20x128xbf16>
    %12 = vector.shape_cast %11 : vector<1x20x128xbf16> to vector<20x128xbf16>
    %13 = arith.maximumf %10, %12 : vector<20x128xbf16>
    %c0_10 = arith.constant 0 : index
    %c65 = arith.constant 65 : index
    %c0_11 = arith.constant 0 : index
    %14 = vector.load %arg1[%c0_10, %c65, %c0_11] : memref<1x128x128xbf16, #tpu.memory_space<vmem>>, vector<1x20x128xbf16>
    %15 = vector.shape_cast %14 : vector<1x20x128xbf16> to vector<20x128xbf16>
    %16 = arith.maximumf %13, %15 : vector<20x128xbf16>
    %c0_12 = arith.constant 0 : index
    %c5 = arith.constant 5 : index
    %c0_13 = arith.constant 0 : index
    %17 = vector.load %arg1[%c0_12, %c5, %c0_13] : memref<1x128x128xbf16, #tpu.memory_space<vmem>>, vector<1x20x128xbf16>
    %18 = vector.shape_cast %17 : vector<1x20x128xbf16> to vector<20x128xbf16>
    %19 = arith.maximumf %16, %18 : vector<20x128xbf16>
    %c0_14 = arith.constant 0 : index
    %c37 = arith.constant 37 : index
    %c0_15 = arith.constant 0 : index
    %20 = vector.load %arg1[%c0_14, %c37, %c0_15] : memref<1x128x128xbf16, #tpu.memory_space<vmem>>, vector<1x20x128xbf16>
    %21 = vector.shape_cast %20 : vector<1x20x128xbf16> to vector<20x128xbf16>
    %22 = arith.maximumf %19, %21 : vector<20x128xbf16>
    %c0_16 = arith.constant 0 : index
    %c6 = arith.constant 6 : index
    %c0_17 = arith.constant 0 : index
    %23 = vector.load %arg1[%c0_16, %c6, %c0_17] : memref<1x128x128xbf16, #tpu.memory_space<vmem>>, vector<1x20x128xbf16>
    %24 = vector.shape_cast %23 : vector<1x20x128xbf16> to vector<20x128xbf16>
    %25 = arith.maximumf %22, %24 : vector<20x128xbf16>
    %c0_18 = arith.constant 0 : index
    %c0_19 = arith.constant 0 : index
    %c0_20 = arith.constant 0 : index
    %26 = vector.load %arg2[%c0_18, %c0_19, %c0_20] : memref<1x20x128xbf16, #tpu.memory_space<vmem>>, vector<1x20x128xbf16>
    %27 = vector.shape_cast %26 : vector<1x20x128xbf16> to vector<20x128xbf16>
    %28 = vector.shape_cast %25 : vector<20x128xbf16> to vector<1x20x128xbf16>
    tpu.vector_store %arg2[%c0_18, %c0_19, %c0_20], %28 {strides = array<i32>} : memref<1x20x128xbf16, #tpu.memory_space<vmem>>, vector<1x20x128xbf16>,
    return
  }
  func.func @transform_0(%arg0: i32) -> (i32, i32, i32) {
    %c0_i32 = arith.constant 0 : i32
    %c0_i32_0 = arith.constant 0 : i32
    %c0_i32_1 = arith.constant 0 : i32
    return %arg0, %c0_i32, %c0_i32_0 : i32, i32, i32
  }
  func.func @transform_1(%arg0: i32) -> (i32, i32, i32) {
    %c0_i32 = arith.constant 0 : i32
    %c0_i32_0 = arith.constant 0 : i32
    %c0_i32_1 = arith.constant 0 : i32
    return %arg0, %c0_i32, %c0_i32_0 : i32, i32, i32
  }
}

module attributes {stable_mosaic.version = 11 : i64} {
  func.func @_conv_s1_kernel(%arg0: i32, %arg1: memref<1x40x128xbf16, #tpu.memory_space<vmem>>, %arg2: memref<9x128x128xbf16, #tpu.memory_space<vmem>>, %arg3: memref<1x128xf32, #tpu.memory_space<vmem>>, %arg4: memref<1x24x128xbf16, #tpu.memory_space<vmem>>) attributes {dimension_semantics = [#tpu.dimension_semantics<parallel>], iteration_bounds = array<i64: 2>, scalar_prefetch = 0 : i64, scratch_operands = 0 : i64, tpu.core_type = #tpu.core_type<tc>, window_params = [{transform_indices = @transform_0, window_bounds = array<i64: 1, 40, 128>}, {pipeline_mode = #tpu.pipeline_mode<synchronous>, transform_indices = @transform_1, window_bounds = array<i64: 9, 128, 128>}, {pipeline_mode = #tpu.pipeline_mode<synchronous>, transform_indices = @transform_2, window_bounds = array<i64: 1, 128>}, {transform_indices = @transform_3, window_bounds = array<i64: 1, 24, 128>}]} {
    %c0 = arith.constant 0 : index
    %c0_0 = arith.constant 0 : index
    %0 = vector.load %arg3[%c0, %c0_0] : memref<1x128xf32, #tpu.memory_space<vmem>>, vector<1x128xf32>
    %1 = vector.shape_cast %0 : vector<1x128xf32> to vector<1x128xf32>
    %2 = vector.broadcast %1 : vector<1x128xf32> to vector<24x128xf32>
    %c0_1 = arith.constant 0 : index
    %c0_2 = arith.constant 0 : index
    %c0_3 = arith.constant 0 : index
    %3 = vector.load %arg1[%c0_1, %c0_2, %c0_3] : memref<1x40x128xbf16, #tpu.memory_space<vmem>>, vector<1x24x128xbf16>
    %4 = vector.shape_cast %3 : vector<1x24x128xbf16> to vector<24x128xbf16>
    %c0_4 = arith.constant 0 : index
    %c0_5 = arith.constant 0 : index
    %c0_6 = arith.constant 0 : index
    %5 = vector.load %arg2[%c0_4, %c0_5, %c0_6] : memref<9x128x128xbf16, #tpu.memory_space<vmem>>, vector<1x128x128xbf16>
    %6 = vector.shape_cast %5 : vector<1x128x128xbf16> to vector<128x128xbf16>
    %cst = arith.constant dense<0.000000e+00> : vector<24x128xf32>
    %7 = tpu.matmul %4, %6, %cst {dimension_numbers = #tpu.dot_dimension_numbers<[1], [0], [0], [1], [0, 0, 1, 1], [], []>} : vector<24x128xbf16>, vector<128x128xbf16>, vector<24x128xf32> -> vector<24x128xf32>
    %8 = arith.addf %2, %7 : vector<24x128xf32>
    %c0_7 = arith.constant 0 : index
    %c1 = arith.constant 1 : index
    %c0_8 = arith.constant 0 : index
    %9 = vector.load %arg1[%c0_7, %c1, %c0_8] : memref<1x40x128xbf16, #tpu.memory_space<vmem>>, vector<1x24x128xbf16>
    %10 = vector.shape_cast %9 : vector<1x24x128xbf16> to vector<24x128xbf16>
    %c1_9 = arith.constant 1 : index
    %c0_10 = arith.constant 0 : index
    %c0_11 = arith.constant 0 : index
    %11 = vector.load %arg2[%c1_9, %c0_10, %c0_11] : memref<9x128x128xbf16, #tpu.memory_space<vmem>>, vector<1x128x128xbf16>
    %12 = vector.shape_cast %11 : vector<1x128x128xbf16> to vector<128x128xbf16>
    %cst_12 = arith.constant dense<0.000000e+00> : vector<24x128xf32>
    %13 = tpu.matmul %10, %12, %cst_12 {dimension_numbers = #tpu.dot_dimension_numbers<[1], [0], [0], [1], [0, 0, 1, 1], [], []>} : vector<24x128xbf16>, vector<128x128xbf16>, vector<24x128xf32> -> vector<24x128xf32>
    %14 = arith.addf %8, %13 : vector<24x128xf32>
    %c0_13 = arith.constant 0 : index
    %c2 = arith.constant 2 : index
    %c0_14 = arith.constant 0 : index
    %15 = vector.load %arg1[%c0_13, %c2, %c0_14] : memref<1x40x128xbf16, #tpu.memory_space<vmem>>, vector<1x24x128xbf16>
    %16 = vector.shape_cast %15 : vector<1x24x128xbf16> to vector<24x128xbf16>
    %c2_15 = arith.constant 2 : index
    %c0_16 = arith.constant 0 : index
    %c0_17 = arith.constant 0 : index
    %17 = vector.load %arg2[%c2_15, %c0_16, %c0_17] : memref<9x128x128xbf16, #tpu.memory_space<vmem>>, vector<1x128x128xbf16>
    %18 = vector.shape_cast %17 : vector<1x128x128xbf16> to vector<128x128xbf16>
    %cst_18 = arith.constant dense<0.000000e+00> : vector<24x128xf32>
    %19 = tpu.matmul %16, %18, %cst_18 {dimension_numbers = #tpu.dot_dimension_numbers<[1], [0], [0], [1], [0, 0, 1, 1], [], []>} : vector<24x128xbf16>, vector<128x128xbf16>, vector<24x128xf32> -> vector<24x128xf32>
    %20 = arith.addf %14, %19 : vector<24x128xf32>
    %c0_19 = arith.constant 0 : index
    %c6 = arith.constant 6 : index
    %c0_20 = arith.constant 0 : index
    %21 = vector.load %arg1[%c0_19, %c6, %c0_20] : memref<1x40x128xbf16, #tpu.memory_space<vmem>>, vector<1x24x128xbf16>
    %22 = vector.shape_cast %21 : vector<1x24x128xbf16> to vector<24x128xbf16>
    %c3 = arith.constant 3 : index
    %c0_21 = arith.constant 0 : index
    %c0_22 = arith.constant 0 : index
    %23 = vector.load %arg2[%c3, %c0_21, %c0_22] : memref<9x128x128xbf16, #tpu.memory_space<vmem>>, vector<1x128x128xbf16>
    %24 = vector.shape_cast %23 : vector<1x128x128xbf16> to vector<128x128xbf16>
    %cst_23 = arith.constant dense<0.000000e+00> : vector<24x128xf32>
    %25 = tpu.matmul %22, %24, %cst_23 {dimension_numbers = #tpu.dot_dimension_numbers<[1], [0], [0], [1], [0, 0, 1, 1], [], []>} : vector<24x128xbf16>, vector<128x128xbf16>, vector<24x128xf32> -> vector<24x128xf32>
    %26 = arith.addf %20, %25 : vector<24x128xf32>
    %c0_24 = arith.constant 0 : index
    %c7 = arith.constant 7 : index
    %c0_25 = arith.constant 0 : index
    %27 = vector.load %arg1[%c0_24, %c7, %c0_25] : memref<1x40x128xbf16, #tpu.memory_space<vmem>>, vector<1x24x128xbf16>
    %28 = vector.shape_cast %27 : vector<1x24x128xbf16> to vector<24x128xbf16>
    %c4 = arith.constant 4 : index
    %c0_26 = arith.constant 0 : index
    %c0_27 = arith.constant 0 : index
    %29 = vector.load %arg2[%c4, %c0_26, %c0_27] : memref<9x128x128xbf16, #tpu.memory_space<vmem>>, vector<1x128x128xbf16>
    %30 = vector.shape_cast %29 : vector<1x128x128xbf16> to vector<128x128xbf16>
    %cst_28 = arith.constant dense<0.000000e+00> : vector<24x128xf32>
    %31 = tpu.matmul %28, %30, %cst_28 {dimension_numbers = #tpu.dot_dimension_numbers<[1], [0], [0], [1], [0, 0, 1, 1], [], []>} : vector<24x128xbf16>, vector<128x128xbf16>, vector<24x128xf32> -> vector<24x128xf32>
    %32 = arith.addf %26, %31 : vector<24x128xf32>
    %c0_29 = arith.constant 0 : index
    %c8 = arith.constant 8 : index
    %c0_30 = arith.constant 0 : index
    %33 = vector.load %arg1[%c0_29, %c8, %c0_30] : memref<1x40x128xbf16, #tpu.memory_space<vmem>>, vector<1x24x128xbf16>
    %34 = vector.shape_cast %33 : vector<1x24x128xbf16> to vector<24x128xbf16>
    %c5 = arith.constant 5 : index
    %c0_31 = arith.constant 0 : index
    %c0_32 = arith.constant 0 : index
    %35 = vector.load %arg2[%c5, %c0_31, %c0_32] : memref<9x128x128xbf16, #tpu.memory_space<vmem>>, vector<1x128x128xbf16>
    %36 = vector.shape_cast %35 : vector<1x128x128xbf16> to vector<128x128xbf16>
    %cst_33 = arith.constant dense<0.000000e+00> : vector<24x128xf32>
    %37 = tpu.matmul %34, %36, %cst_33 {dimension_numbers = #tpu.dot_dimension_numbers<[1], [0], [0], [1], [0, 0, 1, 1], [], []>} : vector<24x128xbf16>, vector<128x128xbf16>, vector<24x128xf32> -> vector<24x128xf32>
    %38 = arith.addf %32, %37 : vector<24x128xf32>
    %c0_34 = arith.constant 0 : index
    %c12 = arith.constant 12 : index
    %c0_35 = arith.constant 0 : index
    %39 = vector.load %arg1[%c0_34, %c12, %c0_35] : memref<1x40x128xbf16, #tpu.memory_space<vmem>>, vector<1x24x128xbf16>
    %40 = vector.shape_cast %39 : vector<1x24x128xbf16> to vector<24x128xbf16>
    %c6_36 = arith.constant 6 : index
    %c0_37 = arith.constant 0 : index
    %c0_38 = arith.constant 0 : index
    %41 = vector.load %arg2[%c6_36, %c0_37, %c0_38] : memref<9x128x128xbf16, #tpu.memory_space<vmem>>, vector<1x128x128xbf16>
    %42 = vector.shape_cast %41 : vector<1x128x128xbf16> to vector<128x128xbf16>
    %cst_39 = arith.constant dense<0.000000e+00> : vector<24x128xf32>
    %43 = tpu.matmul %40, %42, %cst_39 {dimension_numbers = #tpu.dot_dimension_numbers<[1], [0], [0], [1], [0, 0, 1, 1], [], []>} : vector<24x128xbf16>, vector<128x128xbf16>, vector<24x128xf32> -> vector<24x128xf32>
    %44 = arith.addf %38, %43 : vector<24x128xf32>
    %c0_40 = arith.constant 0 : index
    %c13 = arith.constant 13 : index
    %c0_41 = arith.constant 0 : index
    %45 = vector.load %arg1[%c0_40, %c13, %c0_41] : memref<1x40x128xbf16, #tpu.memory_space<vmem>>, vector<1x24x128xbf16>
    %46 = vector.shape_cast %45 : vector<1x24x128xbf16> to vector<24x128xbf16>
    %c7_42 = arith.constant 7 : index
    %c0_43 = arith.constant 0 : index
    %c0_44 = arith.constant 0 : index
    %47 = vector.load %arg2[%c7_42, %c0_43, %c0_44] : memref<9x128x128xbf16, #tpu.memory_space<vmem>>, vector<1x128x128xbf16>
    %48 = vector.shape_cast %47 : vector<1x128x128xbf16> to vector<128x128xbf16>
    %cst_45 = arith.constant dense<0.000000e+00> : vector<24x128xf32>
    %49 = tpu.matmul %46, %48, %cst_45 {dimension_numbers = #tpu.dot_dimension_numbers<[1], [0], [0], [1], [0, 0, 1, 1], [], []>} : vector<24x128xbf16>, vector<128x128xbf16>, vector<24x128xf32> -> vector<24x128xf32>
    %50 = arith.addf %44, %49 : vector<24x128xf32>
    %c0_46 = arith.constant 0 : index
    %c14 = arith.constant 14 : index
    %c0_47 = arith.constant 0 : index
    %51 = vector.load %arg1[%c0_46, %c14, %c0_47] : memref<1x40x128xbf16, #tpu.memory_space<vmem>>, vector<1x24x128xbf16>
    %52 = vector.shape_cast %51 : vector<1x24x128xbf16> to vector<24x128xbf16>
    %c8_48 = arith.constant 8 : index
    %c0_49 = arith.constant 0 : index
    %c0_50 = arith.constant 0 : index
    %53 = vector.load %arg2[%c8_48, %c0_49, %c0_50] : memref<9x128x128xbf16, #tpu.memory_space<vmem>>, vector<1x128x128xbf16>
    %54 = vector.shape_cast %53 : vector<1x128x128xbf16> to vector<128x128xbf16>
    %cst_51 = arith.constant dense<0.000000e+00> : vector<24x128xf32>
    %55 = tpu.matmul %52, %54, %cst_51 {dimension_numbers = #tpu.dot_dimension_numbers<[1], [0], [0], [1], [0, 0, 1, 1], [], []>} : vector<24x128xbf16>, vector<128x128xbf16>, vector<24x128xf32> -> vector<24x128xf32>
    %56 = arith.addf %50, %55 : vector<24x128xf32>
    %cst_52 = arith.constant 0.000000e+00 : f32
    %57 = vector.broadcast %cst_52 : f32 to vector<24x128xf32>
    %58 = arith.maximumf %56, %57 : vector<24x128xf32>
    %59 = arith.truncf %58 : vector<24x128xf32> to vector<24x128xbf16>
    %c0_53 = arith.constant 0 : index
    %c0_54 = arith.constant 0 : index
    %c0_55 = arith.constant 0 : index
    %60 = vector.load %arg4[%c0_53, %c0_54, %c0_55] : memref<1x24x128xbf16, #tpu.memory_space<vmem>>, vector<1x24x128xbf16>
    %61 = vector.shape_cast %60 : vector<1x24x128xbf16> to vector<24x128xbf16>
    %62 = vector.shape_cast %59 : vector<24x128xbf16> to vector<1x24x128xbf16>
    tpu.vector_store %arg4[%c0_53, %c0_54, %c0_55], %62 {strides = array<i32>} : memref<1x24x128xbf16, #tpu.memory_space<vmem>>, vector<1x24x128xbf16>,
    return
  }
  func.func @transform_0(%arg0: i32) -> (i32, i32, i32) {
    %c0_i32 = arith.constant 0 : i32
    %c0_i32_0 = arith.constant 0 : i32
    %c0_i32_1 = arith.constant 0 : i32
    return %arg0, %c0_i32, %c0_i32_0 : i32, i32, i32
  }
  func.func @transform_1(%arg0: i32) -> (i32, i32, i32) {
    %c0_i32 = arith.constant 0 : i32
    %c0_i32_0 = arith.constant 0 : i32
    %c0_i32_1 = arith.constant 0 : i32
    %c0_i32_2 = arith.constant 0 : i32
    return %c0_i32, %c0_i32_0, %c0_i32_1 : i32, i32, i32
  }
  func.func @transform_2(%arg0: i32) -> (i32, i32) {
    %c0_i32 = arith.constant 0 : i32
    %c0_i32_0 = arith.constant 0 : i32
    %c0_i32_1 = arith.constant 0 : i32
    return %c0_i32, %c0_i32_0 : i32, i32
  }
  func.func @transform_3(%arg0: i32) -> (i32, i32, i32) {
    %c0_i32 = arith.constant 0 : i32
    %c0_i32_0 = arith.constant 0 : i32
    %c0_i32_1 = arith.constant 0 : i32
    return %arg0, %c0_i32, %c0_i32_0 : i32, i32, i32
  }
}

module attributes {stable_mosaic.version = 11 : i64} {
  func.func @_conv_s1_res_pool_kernel(%arg0: i32, %arg1: memref<1x40x128xbf16, #tpu.memory_space<vmem>>, %arg2: memref<9x128x128xbf16, #tpu.memory_space<vmem>>, %arg3: memref<1x128xf32, #tpu.memory_space<vmem>>, %arg4: memref<1x24x128xbf16, #tpu.memory_space<vmem>>, %arg5: memref<24x128xf32, #tpu.memory_space<vmem>>, %arg6: memref<1x1x128xf32, #tpu.memory_space<vmem>>) attributes {dimension_semantics = [#tpu.dimension_semantics<parallel>], iteration_bounds = array<i64: 2>, scalar_prefetch = 0 : i64, scratch_operands = 0 : i64, tpu.core_type = #tpu.core_type<tc>, window_params = [{transform_indices = @transform_0, window_bounds = array<i64: 1, 40, 128>}, {pipeline_mode = #tpu.pipeline_mode<synchronous>, transform_indices = @transform_1, window_bounds = array<i64: 9, 128, 128>}, {pipeline_mode = #tpu.pipeline_mode<synchronous>, transform_indices = @transform_2, window_bounds = array<i64: 1, 128>}, {transform_indices = @transform_3, window_bounds = array<i64: 1, 24, 128>}, {pipeline_mode = #tpu.pipeline_mode<synchronous>, transform_indices = @transform_4, window_bounds = array<i64: 24, 128>}, {transform_indices = @transform_5, window_bounds = array<i64: 1, 1, 128>}]} {
    %c0 = arith.constant 0 : index
    %c0_0 = arith.constant 0 : index
    %0 = vector.load %arg3[%c0, %c0_0] : memref<1x128xf32, #tpu.memory_space<vmem>>, vector<1x128xf32>
    %1 = vector.shape_cast %0 : vector<1x128xf32> to vector<1x128xf32>
    %2 = vector.broadcast %1 : vector<1x128xf32> to vector<24x128xf32>
    %c0_1 = arith.constant 0 : index
    %c0_2 = arith.constant 0 : index
    %c0_3 = arith.constant 0 : index
    %3 = vector.load %arg1[%c0_1, %c0_2, %c0_3] : memref<1x40x128xbf16, #tpu.memory_space<vmem>>, vector<1x24x128xbf16>
    %4 = vector.shape_cast %3 : vector<1x24x128xbf16> to vector<24x128xbf16>
    %c0_4 = arith.constant 0 : index
    %c0_5 = arith.constant 0 : index
    %c0_6 = arith.constant 0 : index
    %5 = vector.load %arg2[%c0_4, %c0_5, %c0_6] : memref<9x128x128xbf16, #tpu.memory_space<vmem>>, vector<1x128x128xbf16>
    %6 = vector.shape_cast %5 : vector<1x128x128xbf16> to vector<128x128xbf16>
    %cst = arith.constant dense<0.000000e+00> : vector<24x128xf32>
    %7 = tpu.matmul %4, %6, %cst {dimension_numbers = #tpu.dot_dimension_numbers<[1], [0], [0], [1], [0, 0, 1, 1], [], []>} : vector<24x128xbf16>, vector<128x128xbf16>, vector<24x128xf32> -> vector<24x128xf32>
    %8 = arith.addf %2, %7 : vector<24x128xf32>
    %c0_7 = arith.constant 0 : index
    %c1 = arith.constant 1 : index
    %c0_8 = arith.constant 0 : index
    %9 = vector.load %arg1[%c0_7, %c1, %c0_8] : memref<1x40x128xbf16, #tpu.memory_space<vmem>>, vector<1x24x128xbf16>
    %10 = vector.shape_cast %9 : vector<1x24x128xbf16> to vector<24x128xbf16>
    %c1_9 = arith.constant 1 : index
    %c0_10 = arith.constant 0 : index
    %c0_11 = arith.constant 0 : index
    %11 = vector.load %arg2[%c1_9, %c0_10, %c0_11] : memref<9x128x128xbf16, #tpu.memory_space<vmem>>, vector<1x128x128xbf16>
    %12 = vector.shape_cast %11 : vector<1x128x128xbf16> to vector<128x128xbf16>
    %cst_12 = arith.constant dense<0.000000e+00> : vector<24x128xf32>
    %13 = tpu.matmul %10, %12, %cst_12 {dimension_numbers = #tpu.dot_dimension_numbers<[1], [0], [0], [1], [0, 0, 1, 1], [], []>} : vector<24x128xbf16>, vector<128x128xbf16>, vector<24x128xf32> -> vector<24x128xf32>
    %14 = arith.addf %8, %13 : vector<24x128xf32>
    %c0_13 = arith.constant 0 : index
    %c2 = arith.constant 2 : index
    %c0_14 = arith.constant 0 : index
    %15 = vector.load %arg1[%c0_13, %c2, %c0_14] : memref<1x40x128xbf16, #tpu.memory_space<vmem>>, vector<1x24x128xbf16>
    %16 = vector.shape_cast %15 : vector<1x24x128xbf16> to vector<24x128xbf16>
    %c2_15 = arith.constant 2 : index
    %c0_16 = arith.constant 0 : index
    %c0_17 = arith.constant 0 : index
    %17 = vector.load %arg2[%c2_15, %c0_16, %c0_17] : memref<9x128x128xbf16, #tpu.memory_space<vmem>>, vector<1x128x128xbf16>
    %18 = vector.shape_cast %17 : vector<1x128x128xbf16> to vector<128x128xbf16>
    %cst_18 = arith.constant dense<0.000000e+00> : vector<24x128xf32>
    %19 = tpu.matmul %16, %18, %cst_18 {dimension_numbers = #tpu.dot_dimension_numbers<[1], [0], [0], [1], [0, 0, 1, 1], [], []>} : vector<24x128xbf16>, vector<128x128xbf16>, vector<24x128xf32> -> vector<24x128xf32>
    %20 = arith.addf %14, %19 : vector<24x128xf32>
    %c0_19 = arith.constant 0 : index
    %c6 = arith.constant 6 : index
    %c0_20 = arith.constant 0 : index
    %21 = vector.load %arg1[%c0_19, %c6, %c0_20] : memref<1x40x128xbf16, #tpu.memory_space<vmem>>, vector<1x24x128xbf16>
    %22 = vector.shape_cast %21 : vector<1x24x128xbf16> to vector<24x128xbf16>
    %c3 = arith.constant 3 : index
    %c0_21 = arith.constant 0 : index
    %c0_22 = arith.constant 0 : index
    %23 = vector.load %arg2[%c3, %c0_21, %c0_22] : memref<9x128x128xbf16, #tpu.memory_space<vmem>>, vector<1x128x128xbf16>
    %24 = vector.shape_cast %23 : vector<1x128x128xbf16> to vector<128x128xbf16>
    %cst_23 = arith.constant dense<0.000000e+00> : vector<24x128xf32>
    %25 = tpu.matmul %22, %24, %cst_23 {dimension_numbers = #tpu.dot_dimension_numbers<[1], [0], [0], [1], [0, 0, 1, 1], [], []>} : vector<24x128xbf16>, vector<128x128xbf16>, vector<24x128xf32> -> vector<24x128xf32>
    %26 = arith.addf %20, %25 : vector<24x128xf32>
    %c0_24 = arith.constant 0 : index
    %c7 = arith.constant 7 : index
    %c0_25 = arith.constant 0 : index
    %27 = vector.load %arg1[%c0_24, %c7, %c0_25] : memref<1x40x128xbf16, #tpu.memory_space<vmem>>, vector<1x24x128xbf16>
    %28 = vector.shape_cast %27 : vector<1x24x128xbf16> to vector<24x128xbf16>
    %c4 = arith.constant 4 : index
    %c0_26 = arith.constant 0 : index
    %c0_27 = arith.constant 0 : index
    %29 = vector.load %arg2[%c4, %c0_26, %c0_27] : memref<9x128x128xbf16, #tpu.memory_space<vmem>>, vector<1x128x128xbf16>
    %30 = vector.shape_cast %29 : vector<1x128x128xbf16> to vector<128x128xbf16>
    %cst_28 = arith.constant dense<0.000000e+00> : vector<24x128xf32>
    %31 = tpu.matmul %28, %30, %cst_28 {dimension_numbers = #tpu.dot_dimension_numbers<[1], [0], [0], [1], [0, 0, 1, 1], [], []>} : vector<24x128xbf16>, vector<128x128xbf16>, vector<24x128xf32> -> vector<24x128xf32>
    %32 = arith.addf %26, %31 : vector<24x128xf32>
    %c0_29 = arith.constant 0 : index
    %c8 = arith.constant 8 : index
    %c0_30 = arith.constant 0 : index
    %33 = vector.load %arg1[%c0_29, %c8, %c0_30] : memref<1x40x128xbf16, #tpu.memory_space<vmem>>, vector<1x24x128xbf16>
    %34 = vector.shape_cast %33 : vector<1x24x128xbf16> to vector<24x128xbf16>
    %c5 = arith.constant 5 : index
    %c0_31 = arith.constant 0 : index
    %c0_32 = arith.constant 0 : index
    %35 = vector.load %arg2[%c5, %c0_31, %c0_32] : memref<9x128x128xbf16, #tpu.memory_space<vmem>>, vector<1x128x128xbf16>
    %36 = vector.shape_cast %35 : vector<1x128x128xbf16> to vector<128x128xbf16>
    %cst_33 = arith.constant dense<0.000000e+00> : vector<24x128xf32>
    %37 = tpu.matmul %34, %36, %cst_33 {dimension_numbers = #tpu.dot_dimension_numbers<[1], [0], [0], [1], [0, 0, 1, 1], [], []>} : vector<24x128xbf16>, vector<128x128xbf16>, vector<24x128xf32> -> vector<24x128xf32>
    %38 = arith.addf %32, %37 : vector<24x128xf32>
    %c0_34 = arith.constant 0 : index
    %c12 = arith.constant 12 : index
    %c0_35 = arith.constant 0 : index
    %39 = vector.load %arg1[%c0_34, %c12, %c0_35] : memref<1x40x128xbf16, #tpu.memory_space<vmem>>, vector<1x24x128xbf16>
    %40 = vector.shape_cast %39 : vector<1x24x128xbf16> to vector<24x128xbf16>
    %c6_36 = arith.constant 6 : index
    %c0_37 = arith.constant 0 : index
    %c0_38 = arith.constant 0 : index
    %41 = vector.load %arg2[%c6_36, %c0_37, %c0_38] : memref<9x128x128xbf16, #tpu.memory_space<vmem>>, vector<1x128x128xbf16>
    %42 = vector.shape_cast %41 : vector<1x128x128xbf16> to vector<128x128xbf16>
    %cst_39 = arith.constant dense<0.000000e+00> : vector<24x128xf32>
    %43 = tpu.matmul %40, %42, %cst_39 {dimension_numbers = #tpu.dot_dimension_numbers<[1], [0], [0], [1], [0, 0, 1, 1], [], []>} : vector<24x128xbf16>, vector<128x128xbf16>, vector<24x128xf32> -> vector<24x128xf32>
    %44 = arith.addf %38, %43 : vector<24x128xf32>
    %c0_40 = arith.constant 0 : index
    %c13 = arith.constant 13 : index
    %c0_41 = arith.constant 0 : index
    %45 = vector.load %arg1[%c0_40, %c13, %c0_41] : memref<1x40x128xbf16, #tpu.memory_space<vmem>>, vector<1x24x128xbf16>
    %46 = vector.shape_cast %45 : vector<1x24x128xbf16> to vector<24x128xbf16>
    %c7_42 = arith.constant 7 : index
    %c0_43 = arith.constant 0 : index
    %c0_44 = arith.constant 0 : index
    %47 = vector.load %arg2[%c7_42, %c0_43, %c0_44] : memref<9x128x128xbf16, #tpu.memory_space<vmem>>, vector<1x128x128xbf16>
    %48 = vector.shape_cast %47 : vector<1x128x128xbf16> to vector<128x128xbf16>
    %cst_45 = arith.constant dense<0.000000e+00> : vector<24x128xf32>
    %49 = tpu.matmul %46, %48, %cst_45 {dimension_numbers = #tpu.dot_dimension_numbers<[1], [0], [0], [1], [0, 0, 1, 1], [], []>} : vector<24x128xbf16>, vector<128x128xbf16>, vector<24x128xf32> -> vector<24x128xf32>
    %50 = arith.addf %44, %49 : vector<24x128xf32>
    %c0_46 = arith.constant 0 : index
    %c14 = arith.constant 14 : index
    %c0_47 = arith.constant 0 : index
    %51 = vector.load %arg1[%c0_46, %c14, %c0_47] : memref<1x40x128xbf16, #tpu.memory_space<vmem>>, vector<1x24x128xbf16>
    %52 = vector.shape_cast %51 : vector<1x24x128xbf16> to vector<24x128xbf16>
    %c8_48 = arith.constant 8 : index
    %c0_49 = arith.constant 0 : index
    %c0_50 = arith.constant 0 : index
    %53 = vector.load %arg2[%c8_48, %c0_49, %c0_50] : memref<9x128x128xbf16, #tpu.memory_space<vmem>>, vector<1x128x128xbf16>
    %54 = vector.shape_cast %53 : vector<1x128x128xbf16> to vector<128x128xbf16>
    %cst_51 = arith.constant dense<0.000000e+00> : vector<24x128xf32>
    %55 = tpu.matmul %52, %54, %cst_51 {dimension_numbers = #tpu.dot_dimension_numbers<[1], [0], [0], [1], [0, 0, 1, 1], [], []>} : vector<24x128xbf16>, vector<128x128xbf16>, vector<24x128xf32> -> vector<24x128xf32>
    %56 = arith.addf %50, %55 : vector<24x128xf32>
    %c0_52 = arith.constant 0 : index
    %c0_53 = arith.constant 0 : index
    %c0_54 = arith.constant 0 : index
    %57 = vector.load %arg4[%c0_52, %c0_53, %c0_54] : memref<1x24x128xbf16, #tpu.memory_space<vmem>>, vector<1x24x128xbf16>
    %58 = vector.shape_cast %57 : vector<1x24x128xbf16> to vector<24x128xbf16>
    %59 = arith.extf %58 : vector<24x128xbf16> to vector<24x128xf32>
    %60 = arith.addf %56, %59 : vector<24x128xf32>
    %cst_55 = arith.constant 0.000000e+00 : f32
    %61 = vector.broadcast %cst_55 : f32 to vector<24x128xf32>
    %62 = arith.maximumf %60, %61 : vector<24x128xf32>
    %c0_56 = arith.constant 0 : index
    %c0_57 = arith.constant 0 : index
    %63 = vector.load %arg5[%c0_56, %c0_57] : memref<24x128xf32, #tpu.memory_space<vmem>>, vector<24x128xf32>
    %64 = arith.mulf %62, %63 : vector<24x128xf32>
    %cst_58 = arith.constant dense<0.000000e+00> : vector<128xf32>
    %65 = vector.multi_reduction <add>, %64, %cst_58 [0] : vector<24x128xf32> to vector<128xf32>
    %66 = vector.shape_cast %65 : vector<128xf32> to vector<1x128xf32>
    %c0_59 = arith.constant 0 : index
    %c0_60 = arith.constant 0 : index
    %c0_61 = arith.constant 0 : index
    %67 = vector.load %arg6[%c0_59, %c0_60, %c0_61] : memref<1x1x128xf32, #tpu.memory_space<vmem>>, vector<1x1x128xf32>
    %68 = vector.shape_cast %67 : vector<1x1x128xf32> to vector<1x128xf32>
    %69 = vector.shape_cast %66 : vector<1x128xf32> to vector<1x1x128xf32>
    tpu.vector_store %arg6[%c0_59, %c0_60, %c0_61], %69 {strides = array<i32>} : memref<1x1x128xf32, #tpu.memory_space<vmem>>, vector<1x1x128xf32>,
    return
  }
  func.func @transform_0(%arg0: i32) -> (i32, i32, i32) {
    %c0_i32 = arith.constant 0 : i32
    %c0_i32_0 = arith.constant 0 : i32
    %c0_i32_1 = arith.constant 0 : i32
    return %arg0, %c0_i32, %c0_i32_0 : i32, i32, i32
  }
  func.func @transform_1(%arg0: i32) -> (i32, i32, i32) {
    %c0_i32 = arith.constant 0 : i32
    %c0_i32_0 = arith.constant 0 : i32
    %c0_i32_1 = arith.constant 0 : i32
    %c0_i32_2 = arith.constant 0 : i32
    return %c0_i32, %c0_i32_0, %c0_i32_1 : i32, i32, i32
  }
  func.func @transform_2(%arg0: i32) -> (i32, i32) {
    %c0_i32 = arith.constant 0 : i32
    %c0_i32_0 = arith.constant 0 : i32
    %c0_i32_1 = arith.constant 0 : i32
    return %c0_i32, %c0_i32_0 : i32, i32
  }
  func.func @transform_3(%arg0: i32) -> (i32, i32, i32) {
    %c0_i32 = arith.constant 0 : i32
    %c0_i32_0 = arith.constant 0 : i32
    %c0_i32_1 = arith.constant 0 : i32
    return %arg0, %c0_i32, %c0_i32_0 : i32, i32, i32
  }
  func.func @transform_4(%arg0: i32) -> (i32, i32) {
    %c0_i32 = arith.constant 0 : i32
    %c0_i32_0 = arith.constant 0 : i32
    %c0_i32_1 = arith.constant 0 : i32
    return %c0_i32, %c0_i32_0 : i32, i32
  }
  func.func @transform_5(%arg0: i32) -> (i32, i32, i32) {
    %c0_i32 = arith.constant 0 : i32
    %c0_i32_0 = arith.constant 0 : i32
    %c0_i32_1 = arith.constant 0 : i32
    return %arg0, %c0_i32, %c0_i32_0 : i32, i32, i32
  }
}

</mosaic_0001>

<bundles_post_ra>
// kernel: resnet_feature_forward.5
= control target key start
LH: loop header
LB: loop body
LE: loop exit
PB: predicated region body
PF: predicated region fallthrough
CT: control target
= control target key end

     0   :  { %s424_s6 = smov 0   ;;  %s541_s0 = inlined_call_operand.vmem [shape: bf16[2,128,128], index: 0, kind: input, shape index: {}]   ;;  %s542_s1 = inlined_call_operand.vmem [shape: bf16[2,20,128], index: 1, kind: output, shape index: {}]  }
   0x1 LB: > { %s379_s7 = sadd.s32 4294967295, %s412_s6   ;;  %p383_p0 = scmp.ge.s32.totalorder %s412_s6, 1  ;;  %s412_s6 = sphi %s424_s6, %s11_s6  }
   0x2   : > { %p87_p1 = scmp.lt.s32.totalorder %s412_s6, 3 }
   0x4   : > { %p88_p2 = pnand %p383_p0, %p87_p1 }
   0x5   : > { %p107_p3 = scmp.lt.s32.totalorder (!%p88_p2), %s379_s7, 1 }
   0x6   : > { %91 = sbr.rel (%p88_p2) target bundleno = 51 (0x33), region = 24 }
   0xb   : > { %s550_s7 = smov (!%p107_p3, %s379_s7), 1  ;;  %vm127_vm0 = vsmask.f32 3328  ;;  %vm128_vm1 = vsmask.f32 7440  ;;  %vm302_vm5 = vcmask 1040384  }
   0xc   : > { %s390_s8 = sshll.u32 %s550_s7, 6  ;;  %vm466_vm2 = vmor %vm127_vm0, %vm128_vm1  ;;  %vm216_vm3 = vsmask.f32 1280  ;;  %vm217_vm4 = vsmask.f32 5392  ;;  %vm303_vm6 = vcmask 1044484  }
   0xd   : > { %s438_s11 = scalar_lea.vmem %s541_s0, %s390_s8  ;;  %vm498_vm7 = vmor %vm216_vm3, %vm217_vm4  ;;  %s397_s12 = smul.u32 12, %s550_s7 }
   0xe   : > { %v117_v0 = vld [vmem:[%s438_s11] sm:$0xf]  ;;  %v442_v1 = vld [vmem:[%s438_s11 + $0x4] sm:$0xf]  ;;  %v119_v2 = vld [vmem:[%s438_s11 + $0x8] sm:$0x3] }
   0xf   : > { %v120_v3 = vld [vmem:[%s438_s11 + $0x10] sm:$0xf]  ;;  %v447_v4 = vld [vmem:[%s438_s11 + $0x14] sm:$0xf]  ;;  %v122_v5 = vld [vmem:[%s438_s11 + $0x18] sm:$0x3]  ;;  %s116_s15 = scalar_lea.vmem %s542_s1, %s397_s12 }
  0x10   : > { %v126_v6 = vld [vmem:[%s438_s11 + $0x8] sm:$0x7]  ;;  %v131_v7 = vshrl.u32 %v117_v0, 16  ;;  %v134_v8 = vshll.u32 %v117_v0, 16  ;;  %v140_v9 = vshll.u32 %v442_v1, 16  ;;  %v144_v10 = vshrl.u32 %v442_v1, 16  ;;  %vm515_vm8 = vmor %vm302_vm5, %vm303_vm6 }
  0x11   : > { %v150_v11 = vshll.u32 %v126_v6, 16  ;;  %v454_v12 = vld [vmem:[%s438_s11 + $0x20] sm:$0xf]  ;;  %v123_v13 = vmax.bf16 %v120_v3, %v117_v0  ;;  %v154_v15 = vshrl.u32 %v126_v6, 16  ;;  %v166_v16 = vld [vmem:[%s438_s11 + $0x24] sm:$0xf]  ;;  %v124_v21 = vmax.bf16 %v447_v4, %v442_v1 }
  0x12   : > { %v133_v14 = vrot.slane %v131_v7, 4  ;;  %v136_v17 = vrot.slane %v134_v8, 5  ;;  %v142_v18 = vrot.slane %v140_v9, 5  ;;  %v146_v19 = vrot.slane %v144_v10, 4  ;;  %v177_v24 = vld [vmem:[%s438_s11 + $0x28] sm:$0x7] }
  0x13   : > { %v152_v20 = vrot.slane %v150_v11, 5  ;;  %v125_v22 = vmax.bf16 %v122_v5, %v119_v2  ;;  %v156_v23 = vrot.slane %v154_v15, 4  ;;  %v179_v25 = vshrl.u32 %v454_v12, 16  ;;  %v213_v35 = vld [vmem:[%s438_s11] sm:$0xc] }
  0x14   : > { %v137_v26 = vor.u32 %v136_v17, %v133_v14  ;;  %v147_v27 = vor.u32 %v146_v19, %v142_v18  ;;  %v182_v28 = vshll.u32 %v454_v12, 16  ;;  %v188_v29 = vshll.u32 %v166_v16, 16  ;;  %v167_v46 = vld [vmem:[%s438_s11 + $0x28] sm:$0x3]  ;;  %v171_v52 = vld [vmem:[%s438_s11 + $0x30] sm:$0xf] }
  0x15   : > { %v157_v31 = vor.u32 %v156_v23, %v152_v20  ;;  %v181_v32 = vrot.slane %v179_v25, 4  ;;  %v192_v33 = vshrl.u32 %v166_v16, 16  ;;  %v198_v34 = vshll.u32 %v177_v24, 16  ;;  %v172_v53 = vld [vmem:[%s438_s11 + $0x34] sm:$0xf] }
  0x16   : > { %v138_v36 = vrot.slane %v137_v26, 4  ;;  %v148_v37 = vrot.slane %v147_v27, 4  ;;  %v184_v38 = vrot.slane %v182_v28, 5  ;;  %v190_v39 = vrot.slane %v188_v29, 5  ;;  %v173_v55 = vld [vmem:[%s438_s11 + $0x38] sm:$0x3] }
  0x17   : > { %v158_v40 = vrot.slane %v157_v31, 4  ;;  %v194_v41 = vrot.slane %v192_v33, 4  ;;  %v200_v42 = vrot.slane %v198_v34, 5  ;;  %v202_v43 = vshrl.u32 %v177_v24, 16  ;;  %v481_v0 = vld [vmem:[%s438_s11 + $0x8] sm:$0xf] }
  0x18   : > { %v143_v44 = vsel %vm466_vm2, %v138_v36, %v142_v18  ;;  %v153_v45 = vsel %vm466_vm2, %v148_v37, %v152_v20  ;;  %v185_v47 = vor.u32 %v184_v38, %v181_v32  ;;  %v220_v48 = vshrl.u32 %v213_v35, 16  ;;  %v486_v5 = vld [vmem:[%s438_s11 + $0xc] sm:$0x1]  ;;  %v254_v18 = vld [vmem:[%s438_s11 + $0x10] sm:$0xc] }
  0x19   : > { %v162_v49 = vmax.bf16 %v143_v44, %v123_v13  ;;  %v163_v50 = vmax.bf16 %v153_v45, %v124_v21  ;;  %v164_v51 = vmax.bf16 %v158_v40, %v125_v22  ;;  %v195_v54 = vor.u32 %v194_v41, %v190_v39  ;;  %v255_v27 = vld [vmem:[%s438_s11 + $0x18] sm:$0xf]  ;;  %v256_v32 = vld [vmem:[%s438_s11 + $0x1c] sm:$0x1] }
  0x1a   : > { %v186_v56 = vrot.slane %v185_v47, 4  ;;  %v204_v57 = vrot.slane %v202_v43, 4  ;;  %v222_v58 = vrot.slane %v220_v48, 6  ;;  %v223_v59 = vshll.u32 %v213_v35, 16  ;;  %v297_v43 = vld [vmem:[%s438_s11] sm:$0x8] }
  0x1b   : > { %v168_v60 = vmax.bf16 %v454_v12, %v162_v49  ;;  %v169_v61 = vmax.bf16 %v166_v16, %v163_v50  ;;  %v170_v62 = vmax.bf16 %v167_v46, %v164_v51  ;;  %v196_v63 = vrot.slane %v195_v54, 4 }
  0x1c   : > { %v191_v2 = vsel %vm466_vm2, %v186_v56, %v190_v39  ;;  %v205_v3 = vor.u32 %v204_v57, %v200_v42  ;;  %v225_v6 = vrot.slane %v223_v59, 7  ;;  %v228_v7 = vrot.slane %v144_v10, 6 }
  0x1d   : > { %v174_v8 = vmax.bf16 %v171_v52, %v168_v60  ;;  %v175_v11 = vmax.bf16 %v172_v53, %v169_v61  ;;  %v176_v13 = vmax.bf16 %v173_v55, %v170_v62  ;;  %v201_v12 = vsel %vm466_vm2, %v196_v63, %v200_v42 }
  0x1e   : > { %v206_v14 = vrot.slane %v205_v3, 4  ;;  %v226_v15 = vor.u32 %v225_v6, %v222_v58  ;;  %v229_v16 = vrot.slane %v140_v9, 7  ;;  %v234_v17 = vshrl.u32 %v481_v0, 16 }
  0x1f   : > { %v210_v19 = vmax.bf16 %v191_v2, %v174_v8  ;;  %v237_v10 = vshll.u32 %v481_v0, 16  ;;  %v244_v20 = vshll.u32 %v486_v5, 16  ;;  %v211_v21 = vmax.bf16 %v201_v12, %v175_v11 }
  0x20   : > { %v227_v23 = vrot.slane %v226_v15, 4  ;;  %v230_v24 = vor.u32 %v229_v16, %v228_v7  ;;  %v236_v9 = vrot.slane %v234_v17, 6  ;;  %v212_v25 = vmax.bf16 %v206_v14, %v176_v13 }
  0x21   : > { %v239_v26 = vrot.slane %v237_v10, 7  ;;  %v258_v28 = vshrl.u32 %v254_v18, 16  ;;  %v261_v29 = vshll.u32 %v254_v18, 16  ;;  %v246_v31 = vrot.slane %v244_v20, 7 }
  0x22   : > { %v232_v30 = vrot.slane %v230_v24, 4  ;;  %v267_v33 = vshrl.u32 %v447_v4, 16  ;;  %v270_v34 = vshll.u32 %v447_v4, 16  ;;  %v231_v35 = vsel %vm498_vm7, %v227_v23, %v230_v24 }
  0x23   : > { %v240_v36 = vor.u32 %v239_v26, %v236_v9  ;;  %v260_v37 = vrot.slane %v258_v28, 6  ;;  %v263_v38 = vrot.slane %v261_v29, 7  ;;  %v277_v41 = vshrl.u32 %v255_v27, 16 }
  0x24   : > { %v269_v39 = vrot.slane %v267_v33, 6  ;;  %v272_v40 = vrot.slane %v270_v34, 7  ;;  %v280_v42 = vshll.u32 %v255_v27, 16  ;;  %v287_v47 = vshll.u32 %v256_v32, 16 }
  0x25   : > { %v241_v44 = vsel %vm498_vm7, %v232_v30, %v240_v36  ;;  %v242_v45 = vrot.slane %v240_v36, 4  ;;  %v264_v46 = vor.u32 %v263_v38, %v260_v37  ;;  %v251_v48 = vmax.bf16 %v231_v35, %v210_v19 }
  0x26   : > { %v273_v49 = vor.u32 %v272_v40, %v269_v39  ;;  %v279_v4 = vrot.slane %v277_v41, 6  ;;  %v282_v50 = vrot.slane %v280_v42, 7  ;;  %v252_v52 = vmax.bf16 %v241_v44, %v211_v21 }
  0x27   : > { %v247_v51 = vsel %vm498_vm7, %v242_v45, %v246_v31  ;;  %v265_v53 = vrot.slane %v264_v46, 4  ;;  %v387_v55 = vrot.slane %v297_v43, 11  ;;  %v289_v58 = vrot.slane %v287_v47, 7 }
  0x28   : > { %v275_v56 = vrot.slane %v273_v49, 4  ;;  %v283_v57 = vor.u32 %v282_v50, %v279_v4  ;;  %v307_v59 = vrot.slane %v442_v1, 7  ;;  %v253_v60 = vmax.bf16 %v247_v51, %v212_v25 }
  0x29   : > { %v274_v61 = vsel %vm498_vm7, %v265_v53, %v273_v49  ;;  %v310_v62 = vrot.slane %v481_v0, 7  ;;  %v313_v63 = vrot.slane %v486_v5, 7 }
  0x2a   : > { %v284_v2 = vsel %vm498_vm7, %v275_v56, %v283_v57  ;;  %v285_v3 = vrot.slane %v283_v57, 4  ;;  %v294_v6 = vmax.bf16 %v274_v61, %v251_v48  ;;  %v308_v7 = vsel %vm515_vm8, %v387_v55, %v307_v59 }
  0x2b   : > { %v295_v8 = vmax.bf16 %v284_v2, %v252_v52  ;;  %v309_v11 = vrot.slane %v307_v59, 4  ;;  %v312_v1 = vrot.slane %v310_v62, 4 }
  0x2c   : > { %v290_v13 = vsel %vm498_vm7, %v285_v3, %v289_v58  ;;  %v318_v12 = vmax.bf16 %v308_v7, %v294_v6 }
  0x2d   : > { %v296_v14 = vmax.bf16 %v290_v13, %v253_v60  ;;  %v311_v0 = vsel %vm515_vm8, %v309_v11, %v310_v62  ;;  %v314_v5 = vsel %vm515_vm8, %v312_v1, %v313_v63 }
  0x2e   : > { %v319_v15 = vmax.bf16 %v311_v0, %v295_v8 }
  0x2f   : > { %v320_v16 = vmax.bf16 %v314_v5, %v296_v14 }
  0x30   : > { %v396_v17 = vcombine.low %v318_v12, %v319_v15 }
  0x31   : > { %323 = vst [vmem:[%s116_s15 + $0x8] sm:$0x3] %v320_v16 }
  0x32   : > { %395 = vst [vmem:[%s116_s15] sm:$0xff] %v396_v17  }
  0x33 PF: > { %s11_s6 = sadd.s32 1, %s412_s6  }
  0x34   : > { %p8_p4 = scmp.ge.s32.totalorder %s11_s6, 4  }
  0x36   :  { %10 = sbr.rel (!%p8_p4) target bundleno = 1 (0x1), region = 54 }

// kernel: resnet_feature_forward.6
= control target key start
LH: loop header
LB: loop body
LE: loop exit
PB: predicated region body
PF: predicated region fallthrough
CT: control target
= control target key end

     0   :  { %s2075_s12 = smov 0   ;;  %s2378_s0 = inlined_call_operand.vmem [shape: bf16[2,40,128], index: 0, kind: input, shape index: {}]   ;;  %s2379_s1 = inlined_call_operand.vmem [shape: bf16[9,128,128], index: 1, kind: input, shape index: {}]   ;;  %s2380_s2 = inlined_call_operand.vmem [shape: f32[1,128], index: 2, kind: input, shape index: {}]   ;;  %s2381_s3 = inlined_call_operand.vmem [shape: bf16[2,24,128], index: 3, kind: output, shape index: {}]  }
   0x1 LB: > { %s1446_s13 = sadd.s32 4294967295, %s2053_s12   ;;  %p1450_p0 = scmp.ge.s32.totalorder %s2053_s12, 1  ;;  %s2053_s12 = sphi %s2075_s12, %s13_s12  }
   0x2   : > { %p137_p1 = scmp.lt.s32.totalorder %s2053_s12, 3 }
   0x4   : > { %p138_p2 = pnand %p1450_p0, %p137_p1 }
   0x5   : > { %p161_p3 = scmp.lt.s32.totalorder (!%p138_p2), %s1446_s13, 1 }
   0x6   : > { %141 = sbr.rel (%p138_p2) target bundleno = 378 (0x17a), region = 32 }
   0xb   : > { %v1961_v0 = vld [vmem:[%s2379_s1 + $0x38] sm:$0xff]   ;;  %v1963_v2 = vld [vmem:[%s2379_s1 + $0x30] sm:$0xff]   ;;  %v1965_v4 = vld [vmem:[%s2379_s1 + $0x28] sm:$0xff]   ;;  %s2383_s13 = smov (!%p161_p3, %s1446_s13), 1  ;;  %vm338_vm0 = vsmask.f32 7424 }
   0xc   : > { %v1962_v1 = vld [vmem:[%s2379_s1 + $0x78] sm:$0xff]   ;;  %1771 = vmatprep.subr.bf16.mxu0 %v1961_v0  ;;  %v1964_v3 = vld [vmem:[%s2379_s1 + $0x70] sm:$0xff]   ;;  %v1966_v5 = vld [vmem:[%s2379_s1 + $0x68] sm:$0xff]   ;;  %s1951_s30 = smul.u32 20, %s2383_s13  ;;  %vm476_vm1 = vcmask 1046528   ;;  %vm606_vm2 = vcmask 1044480  }
   0xd   : > { %1772 = vmatpush3.bf16.msra.mxu0 %v1961_v0  ;;  %1791 = vmatprep.subr.bf16.mxu1 %v1962_v1  ;;  %v1967_v6 = vld [vmem:[%s2379_s1 + $0x20] sm:$0xff]   ;;  %v1969_v8 = vld [vmem:[%s2379_s1 + $0x18] sm:$0xff]   ;;  %v1971_v10 = vld [vmem:[%s2379_s1 + $0x10] sm:$0xff]   ;;  %vm732_vm3 = vsmask.f32 4352  ;;  %vm1002_vm4 = vcmask 1045504  }
   0xe   : > { %1792 = vmatpush3.bf16.msra.mxu1 %v1962_v1  ;;  %1773 = vmatprep.subr.bf16.mxu0 %v1963_v2  ;;  %v1968_v7 = vld [vmem:[%s2379_s1 + $0x60] sm:$0xff]   ;;  %v1970_v9 = vld [vmem:[%s2379_s1 + $0x58] sm:$0xff]   ;;  %s2122_s14 = scalar_lea.vmem %s2378_s0, %s1951_s30  ;;  %v1972_v12 = vld [vmem:[%s2379_s1 + $0x50] sm:$0xff]   ;;  %vm1128_vm5 = vsmask.f32 5376 }
   0xf   : > { %1793 = vmatprep.subr.bf16.mxu1 %v1964_v3  ;;  %v1977_v11 = vld [vmem:[%s2122_s14] sm:$0xff]   ;;  %v2133_v15 = vld [vmem:[%s2122_s14 + $0x8] sm:$0xf]  ;;  %v310_v16 = vld [vmem:[%s2122_s14 + $0xc] sm:$0x1] }
  0x10   : > { %1787 = vmatprep.mubr.bf16.mxu0 %v1977_v11  ;;  %v307_v13 = vld [vmem:[%s2122_s14] sm:$0xf]  ;;  %v2130_v14 = vld [vmem:[%s2122_s14 + $0x4] sm:$0xf]  ;;  %v1973_v17 = vld [vmem:[%s2379_s1 + $0x8] sm:$0xff]   ;;  %v2141_v19 = vcombine.low %v2133_v15, %v310_v16 }
  0x11   : > { %1774 = vmatpush3.bf16.msra.mxu0 %v1963_v2  ;;  %v1480_v18 = vcombine.low %v307_v13, %v2130_v14  ;;  %v1974_v20 = vld [vmem:[%s2379_s1 + $0x48] sm:$0xff]   ;;  %v1975_v21 = vld [vmem:[%s2379_s1] sm:$0xff]   ;;  %v1979_v30 = vld [vmem:[%s2379_s1 + $0xb8] sm:$0xff]   ;;  %v1582_v16 = vcombine.low %v2130_v14, %v2133_v15 }
  0x12   : > { %1794 = vmatpush3.bf16.msra.mxu1 %v1964_v3  ;;  %1775 = vmatprep.subr.bf16.mxu0 %v1965_v4  ;;  %v347_v24 = vshll.u32 %v2141_v19, 16  ;;  %v1976_v25 = vld [vmem:[%s2379_s1 + $0x40] sm:$0xff]   ;;  %v351_v29 = vshrl.u32 %v2141_v19, 16  ;;  %v1982_v32 = vld [vmem:[%s2379_s1 + $0xf8] sm:$0xff]   ;;  %v1978_v33 = vld [vmem:[%s2122_s14 + $0x8] ss:$0 sps:$4 sm:$0xff]  }
  0x13   : > { %1795 = vmatprep.subr.bf16.mxu1 %v1966_v5  ;;  %v340_v22 = vshrl.u32 %v1480_v18, 16  ;;  %v342_v23 = vshll.u32 %v1480_v18, 16  ;;  %v1983_v35 = vld [vmem:[%s2379_s1 + $0xb0] sm:$0xff]   ;;  %v1985_v37 = vld [vmem:[%s2379_s1 + $0xa8] sm:$0xff]   ;;  %v455_v38 = vld [vmem:[%s2122_s14] sm:$0xe] }
  0x14   : > { %v349_v27 = vrot.slane %v347_v24, 1  ;;  %v1984_v36 = vld [vmem:[%s2379_s1 + $0xf0] sm:$0xff]   ;;  %v1986_v39 = vld [vmem:[%s2379_s1 + $0xe8] sm:$0xff]   ;;  %v1506_v40 = vcombine.low %v455_v38, %v2130_v14  ;;  %v478_v41 = vrot.slane %v2141_v19, 1  ;;  %v581_v42 = vld [vmem:[%s2122_s14] sm:$0x8] }
  0x15   : > { %1776 = vmatpush3.bf16.msra.mxu0 %v1965_v4  ;;  %v344_v26 = vrot.slane %v342_v23, 1  ;;  %v582_v43 = vld [vmem:[%s2122_s14 + $0xc] sm:$0x7]  ;;  %v1531_v45 = vcombine.low %v581_v42, %v2130_v14  ;;  %v1987_v47 = vld [vmem:[%s2379_s1 + $0xa0] sm:$0xff]   ;;  %v1989_v53 = vld [vmem:[%s2379_s1 + $0x98] sm:$0xff]  }
  0x16   : > { %1796 = vmatpush3.bf16.msra.mxu1 %v1966_v5  ;;  %1777 = vmatprep.subr.bf16.mxu0 %v1967_v6  ;;  %v353_v34 = vor.u32 %v351_v29, %v349_v27  ;;  %v477_v44 = vrot.slane %v1506_v40, 1  ;;  %v1532_v46 = vcombine.low %v2133_v15, %v582_v43  ;;  %v1988_v48 = vld [vmem:[%s2379_s1 + $0xe0] sm:$0xff]   ;;  %v1990_v54 = vld [vmem:[%s2379_s1 + $0xd8] sm:$0xff]   ;;  %v1991_v55 = vld [vmem:[%s2379_s1 + $0x90] sm:$0xff]  }
  0x17   : > { %1797 = vmatprep.subr.bf16.mxu1 %v1968_v7  ;;  %v345_v28 = vor.u32 %v344_v26, %v340_v22  ;;  %v607_v50 = vrot.slane %v1531_v45, 3  ;;  %v1992_v56 = vld [vmem:[%s2379_s1 + $0xd0] sm:$0xff]   ;;  %v1993_v57 = vld [vmem:[%s2379_s1 + $0x88] sm:$0xff]   ;;  %v734_v61 = vshrl.u32 %v1531_v45, 16  ;;  %v737_v62 = vshll.u32 %v1531_v45, 16  ;;  %v1995_v63 = vld [vmem:[%s2379_s1 + $0x80] sm:$0xff]  }
  0x18   : > { %v479_v49 = vsel %vm476_vm1, %v477_v44, %v478_v41  ;;  %v608_v51 = vrot.slane %v1532_v46, 3  ;;  %v1994_v58 = vld [vmem:[%s2379_s1 + $0xc8] sm:$0xff]   ;;  %v1996_v0 = vld [vmem:[%s2379_s1 + $0xc0] sm:$0xff]   ;;  %v2002_v11 = vld [vmem:[%s2379_s1 + $0x130] sm:$0xff]  }
  0x19   : > { %1778 = vmatpush3.bf16.msra.mxu0 %v1967_v6  ;;  %v350_v31 = vsel %vm338_vm0, %v345_v28, %v349_v27  ;;  %v2209_v59 = vld [vmem:[%s2122_s14 + $0xc] sm:$0xf]  ;;  %v736_v3 = vrot.slane %v734_v61, 3  ;;  %v739_v4 = vrot.slane %v737_v62, 4  ;;  %v2006_v14 = vld [vmem:[%s2379_s1 + $0x120] sm:$0xff]   ;;  %v2008_v19 = vld [vmem:[%s2379_s1 + $0x118] sm:$0xff]  }
  0x1a   : > { %1798 = vmatpush3.bf16.msra.mxu1 %v1968_v7  ;;  %1779 = vmatprep.subr.bf16.mxu0 %v1969_v8  ;;  %v609_v52 = vsel %vm606_vm2, %v607_v50, %v608_v51  ;;  %v1557_v60 = vcombine.low %v2133_v15, %v2209_v59  ;;  %v1998_v7 = vld [vmem:[%s2379_s1 + $0x138] sm:$0xff]   ;;  %v2005_v18 = vld [vmem:[%s2379_s1 + $0x168] sm:$0xff]   ;;  %v2007_v15 = vld [vmem:[%s2379_s1 + $0x160] sm:$0xff]  }
  0x1b   : > { %1799 = vmatprep.subr.bf16.mxu1 %v1970_v9  ;;  %1807 = vmatprep.mubr.bf16.mxu1 %v350_v31  ;;  %v2009_v22 = vld [vmem:[%s2379_s1 + $0x158] sm:$0xff]   ;;  %v2010_v23 = vld [vmem:[%s2379_s1 + $0x110] sm:$0xff]   ;;  %v971_v24 = vld [vmem:[%s2122_s14 + $0x4] sm:$0xc] }
  0x1c   : > { %v742_v1 = vshrl.u32 %v1557_v60, 16  ;;  %v745_v2 = vshll.u32 %v1557_v60, 16  ;;  %v972_v26 = vld [vmem:[%s2122_s14 + $0x8] sm:$0xf]  ;;  %v1247_v27 = vld [vmem:[%s2122_s14 + $0x4] sm:$0x8] }
  0x1d   : > { %1780 = vmatpush3.bf16.msra.mxu0 %v1969_v8  ;;  %v2001_v8 = vld [vmem:[%s2379_s1 + $0x178] sm:$0xff]   ;;  %v2011_v28 = vld [vmem:[%s2379_s1 + $0x150] sm:$0xff]   ;;  %v1659_v29 = vcombine.low %v1247_v27, %v972_v26  ;;  %v1608_v31 = vcombine.low %v971_v24, %v972_v26  ;;  %v2015_v42 = vld [vmem:[%s2379_s1 + $0x140] sm:$0xff]  }
  0x1e   : > { %1800 = vmatpush3.bf16.msra.mxu1 %v1970_v9  ;;  %1781 = vmatprep.subr.bf16.mxu0 %v1971_v10  ;;  %v744_v5 = vrot.slane %v742_v1, 3  ;;  %v747_v6 = vrot.slane %v745_v2, 4  ;;  %v740_v9 = vor.u32 %v739_v4, %v736_v3  ;;  %v2024_v60 = vld [vmem:[%s2379_s1 + $0x1e8] sm:$0xff]   ;;  %v2025_v61 = vld [vmem:[%s2379_s1 + $0x1a0] sm:$0xff]   ;;  %v2029_v1 = vld [vmem:[%s2379_s1 + $0x190] sm:$0xff]  }
  0x1f   : > { %1801 = vmatprep.subr.bf16.mxu1 %v1972_v12  ;;  %v1133_v38 = vshll.u32 %v1608_v31, 16  ;;  %v1003_v50 = vrot.slane %v1608_v31, 2  ;;  %v2026_v62 = vld [vmem:[%s2379_s1 + $0x1e0] sm:$0xff]   ;;  %v2030_v2 = vld [vmem:[%s2379_s1 + $0x1d0] sm:$0xff]   ;;  %v2031_v3 = vld [vmem:[%s2379_s1 + $0x188] sm:$0xff]  }
  0x20   : > { %v2032_v4 = vld [vmem:[%s2379_s1 + $0x1c8] sm:$0xff]  }
  0x21   : > { %1782 = vmatpush3.bf16.msra.mxu0 %v1971_v10  ;;  %v2225_v10 = vor.u32 %v747_v6, %v744_v5  ;;  %v1135_v45 = vrot.slane %v1133_v38, 3  ;;  %v2033_v5 = vld [vmem:[%s2379_s1 + $0x180] sm:$0xff]  }
  0x22   : > { %1802 = vmatpush3.bf16.msra.mxu1 %v1972_v12  ;;  %1783 = vmatprep.subr.bf16.mxu0 %v1973_v17  ;;  %v2003_v12 = vld [vmem:[%s2379_s1 + $0x170] sm:$0xff]   ;;  %v2034_v6 = vld [vmem:[%s2379_s1 + $0x1c0] sm:$0xff]  }
  0x23   : > { %1803 = vmatprep.subr.bf16.mxu1 %v1974_v20  ;;  %v749_v13 = vsel %vm732_vm3, %v740_v9, %v2225_v10  ;;  %v2040_v9 = vld [vmem:[%s2379_s1 + $0x228] sm:$0xff]  }
  0x25   : > { %1784 = vmatpush3.bf16.msra.mxu0 %v1973_v17  ;;  %v2004_v17 = vld [vmem:[%s2379_s1 + $0x128] sm:$0xff]  }
  0x26   : > { %1804 = vmatpush3.bf16.msra.mxu1 %v1974_v20  ;;  %1785 = vmatprep.subr.bf16.mxu0 %v1975_v21  ;;  %v973_v20 = vld [vmem:[%s2122_s14 + $0xc] sm:$0xf] }
  0x27   : > { %1805 = vmatprep.subr.bf16.mxu1 %v1976_v25 }
  0x29   : > { %1786 = vmatpush3.bf16.msra.mxu0 %v1975_v21  ;;  %v1107_v21 = vld [vmem:[%s2122_s14 + $0x10] sm:$0x7] }
  0x2a   : > { %1806 = vmatpush3.bf16.msra.mxu1 %v1976_v25  ;;  %1811 = vmatprep.subr.bf16.mxu0 %v1979_v30  ;;  %v2262_v25 = vcombine.low %v973_v20, %v1107_v21 }
  0x2b   : > { %1831 = vmatprep.subr.bf16.mxu1 %v1982_v32 }
  0x2c   : > { %1788 = vmatmul.mubr.bf16.vlgmr.msra.gmra.mxu0 %v1978_v33  ;;  %v2012_v33 = vld [vmem:[%s2379_s1 + $0x108] sm:$0xff]   ;;  %v1141_v40 = vshll.u32 %v2262_v25, 16 }
  0x2d   : > { %1812 = vmatpush3.bf16.msra.mxu0 %v1979_v30  ;;  %1808 = vmatmul.mubr.bf16.vlgmr.msra.gmra.mxu1 %v353_v34  ;;  %v1269_v30 = vrot.slane %v2262_v25, 3  ;;  %v2013_v34 = vld [vmem:[%s2379_s1 + $0x148] sm:$0xff]  }
  0x2e   : > { %1832 = vmatpush3.bf16.msra.mxu1 %v1982_v32  ;;  %1813 = vmatprep.subr.bf16.mxu0 %v1983_v35  ;;  %v1268_v32 = vrot.slane %v1659_v29, 3 }
  0x2f   : > { %1833 = vmatprep.subr.bf16.mxu1 %v1984_v36  ;;  %1827 = vmatprep.mubr.bf16.mxu0 %v479_v49  ;;  %v2020_v49 = vld [vmem:[%s2379_s1 + $0x1f8] sm:$0xff]  }
  0x30   : > { %1847 = vmatprep.mubr.bf16.mxu1 %v609_v52  ;;  %v1583_v52 = vcombine.low %v2209_v59, %v2209_v59  ;;  %v2023_v59 = vld [vmem:[%s2379_s1 + $0x1a8] sm:$0xff]  }
  0x31   : > { %1814 = vmatpush3.bf16.msra.mxu0 %v1983_v35  ;;  %v2279_v35 = vsel %vm606_vm2, %v1268_v32, %v1269_v30 }
  0x32   : > { %1834 = vmatpush3.bf16.msra.mxu1 %v1984_v36  ;;  %1815 = vmatprep.subr.bf16.mxu0 %v1985_v37  ;;  %v974_v36 = vld [vmem:[%s2122_s14 + $0x10] sm:$0x3]  ;;  %s1952_s14 = smul.u32 12, %s2383_s13 }
  0x33   : > { %1835 = vmatprep.subr.bf16.mxu1 %v1986_v39  ;;  %v1609_v43 = vcombine.low %v973_v20, %v974_v36 }
  0x34   : > { %s170_s19 = scalar_lea.vmem %s2381_s3, %s1952_s14 }
  0x35   : > { %1816 = vmatpush3.bf16.msra.mxu0 %v1985_v37  ;;  %v1130_v37 = vshrl.u32 %v1608_v31, 16 }
  0x36   : > { %1836 = vmatpush3.bf16.msra.mxu1 %v1986_v39  ;;  %1817 = vmatprep.subr.bf16.mxu0 %v1987_v47  ;;  %v1138_v39 = vshrl.u32 %v2262_v25, 16 }
  0x37   : > { %1837 = vmatprep.subr.bf16.mxu1 %v1988_v48  ;;  %v1132_v44 = vrot.slane %v1130_v37, 2 }
  0x38   : > { %v1140_v46 = vrot.slane %v1138_v39, 2 }
  0x39   : > { %1818 = vmatpush3.bf16.msra.mxu0 %v1987_v47  ;;  %v1143_v47 = vrot.slane %v1141_v40, 3 }
  0x3a   : > { %1838 = vmatpush3.bf16.msra.mxu1 %v1988_v48  ;;  %1819 = vmatprep.subr.bf16.mxu0 %v1989_v53  ;;  %v2017_v48 = vld [vmem:[%s2379_s1 + $0x1b8] sm:$0xff]  }
  0x3b   : > { %1839 = vmatprep.subr.bf16.mxu1 %v1990_v54 }
  0x3d   : > { %1820 = vmatpush3.bf16.msra.mxu0 %v1989_v53  ;;  %v1136_v53 = vor.u32 %v1135_v45, %v1132_v44 }
  0x3e   : > { %1840 = vmatpush3.bf16.msra.mxu1 %v1990_v54  ;;  %1821 = vmatprep.subr.bf16.mxu0 %v1991_v55  ;;  %v1144_v54 = vor.u32 %v1143_v47, %v1140_v46 }
  0x3f   : > { %1841 = vmatprep.subr.bf16.mxu1 %v1992_v56 }
  0x41   : > { %1822 = vmatpush3.bf16.msra.mxu0 %v1991_v55  ;;  %v2021_v55 = vld [vmem:[%s2379_s1 + $0x1b0] sm:$0xff]  }
  0x42   : > { %1842 = vmatpush3.bf16.msra.mxu1 %v1992_v56  ;;  %1823 = vmatprep.subr.bf16.mxu0 %v1993_v57  ;;  %v2022_v56 = vld [vmem:[%s2379_s1 + $0x1f0] sm:$0xff]  }
  0x43   : > { %1843 = vmatprep.subr.bf16.mxu1 %v1994_v58 }
  0x45   : > { %1824 = vmatpush3.bf16.msra.mxu0 %v1993_v57 }
  0x46   : > { %1844 = vmatpush3.bf16.msra.mxu1 %v1994_v58  ;;  %1825 = vmatprep.subr.bf16.mxu0 %v1995_v63  ;;  %v1145_v58 = vsel %vm1128_vm5, %v1136_v53, %v1144_v54 }
  0x47   : > { %1845 = vmatprep.subr.bf16.mxu1 %v1996_v0 }
  0x49   : > { %1826 = vmatpush3.bf16.msra.mxu0 %v1995_v63  ;;  %v2027_v63 = vld [vmem:[%s2379_s1 + $0x198] sm:$0xff]  }
  0x4a   : > { %1846 = vmatpush3.bf16.msra.mxu1 %v1996_v0  ;;  %1851 = vmatprep.subr.bf16.mxu0 %v1998_v7  ;;  %v2028_v0 = vld [vmem:[%s2379_s1 + $0x1d8] sm:$0xff]  }
  0x4b   : > { %1871 = vmatprep.subr.bf16.mxu1 %v2001_v8 }
  0x4c   : > { %1828 = vmatmul.mubr.bf16.vlgmr.msra.gmra.mxu0 %v478_v41  ;;  %v2014_v41 = vld [vmem:[%s2379_s1 + $0x100] sm:$0xff]  }
  0x4d   : > { %1852 = vmatpush3.bf16.msra.mxu0 %v1998_v7  ;;  %1848 = vmatmul.mubr.bf16.vlgmr.msra.gmra.mxu1 %v608_v51  ;;  %v1004_v51 = vrot.slane %v1609_v43, 2  ;;  %v2038_v7 = vld [vmem:[%s2379_s1 + $0x238] sm:$0xff]  }
  0x4e   : > { %1872 = vmatpush3.bf16.msra.mxu1 %v2001_v8  ;;  %1853 = vmatprep.subr.bf16.mxu0 %v2002_v11  ;;  %v2039_v8 = vld [vmem:[%s2379_s1 + $0x230] sm:$0xff]  }
  0x4f   : > { %1873 = vmatprep.subr.bf16.mxu1 %v2003_v12  ;;  %1867 = vmatprep.mubr.bf16.mxu0 %v749_v13  ;;  %v1005_v57 = vsel %vm1002_vm4, %v1003_v50, %v1004_v51  ;;  %v2044_v13 = vld [vmem:[%s2379_s1 + $0x208] sm:$0xff]  }
  0x50   : > { %1887 = vmatprep.mubr.bf16.mxu1 %v1582_v16  ;;  %v2045_v16 = vld [vmem:[%s2379_s1 + $0x200] sm:$0xff]  }
  0x51   : > { %1854 = vmatpush3.bf16.msra.mxu0 %v2002_v11  ;;  %v2042_v11 = vld [vmem:[%s2379_s1 + $0x218] sm:$0xff]  }
  0x52   : > { %1874 = vmatpush3.bf16.msra.mxu1 %v2003_v12  ;;  %1855 = vmatprep.subr.bf16.mxu0 %v2004_v17  ;;  %v2043_v12 = vld [vmem:[%s2379_s1 + $0x210] sm:$0xff]  }
  0x53   : > { %1875 = vmatprep.subr.bf16.mxu1 %v2005_v18 }
  0x55   : > { %1856 = vmatpush3.bf16.msra.mxu0 %v2004_v17  ;;  %v1453_v17 = vld [vmem:[%s2380_s2] ss:$0 sm:$0xff] }
  0x56   : > { %1876 = vmatpush3.bf16.msra.mxu1 %v2005_v18  ;;  %1857 = vmatprep.subr.bf16.mxu0 %v2006_v14 }
  0x57   : > { %1877 = vmatprep.subr.bf16.mxu1 %v2007_v15 }
  0x59   : > { %1858 = vmatpush3.bf16.msra.mxu0 %v2006_v14 }
  0x5a   : > { %1878 = vmatpush3.bf16.msra.mxu1 %v2007_v15  ;;  %1859 = vmatprep.subr.bf16.mxu0 %v2008_v19 }
  0x5b   : > { %1879 = vmatprep.subr.bf16.mxu1 %v2009_v22 }
  0x5d   : > { %1860 = vmatpush3.bf16.msra.mxu0 %v2008_v19 }
  0x5e   : > { %1880 = vmatpush3.bf16.msra.mxu1 %v2009_v22  ;;  %1861 = vmatprep.subr.bf16.mxu0 %v2010_v23 }
  0x5f   : > { %1881 = vmatprep.subr.bf16.mxu1 %v2011_v28 }
  0x61   : > { %1862 = vmatpush3.bf16.msra.mxu0 %v2010_v23 }
  0x62   : > { %1882 = vmatpush3.bf16.msra.mxu1 %v2011_v28  ;;  %1863 = vmatprep.subr.bf16.mxu0 %v2012_v33 }
  0x63   : > { %1883 = vmatprep.subr.bf16.mxu1 %v2013_v34 }
  0x65   : > { %1864 = vmatpush3.bf16.msra.mxu0 %v2012_v33 }
  0x66   : > { %1884 = vmatpush3.bf16.msra.mxu1 %v2013_v34  ;;  %1865 = vmatprep.subr.bf16.mxu0 %v2014_v41 }
  0x67   : > { %1885 = vmatprep.subr.bf16.mxu1 %v2015_v42 }
  0x69   : > { %1866 = vmatpush3.bf16.msra.mxu0 %v2014_v41 }
  0x6a   : > { %1886 = vmatpush3.bf16.msra.mxu1 %v2015_v42  ;;  %1891 = vmatprep.subr.bf16.mxu0 %v2017_v48 }
  0x6b   : > { %1911 = vmatprep.subr.bf16.mxu1 %v2020_v49 }
  0x6c   : > { %1868 = vmatmul.mubr.bf16.vlgmr.msra.gmra.mxu0 %v2225_v10  ;;  %v2041_v10 = vld [vmem:[%s2379_s1 + $0x220] sm:$0xff]  }
  0x6d   : > { %1892 = vmatpush3.bf16.msra.mxu0 %v2017_v48  ;;  %1888 = vmatmul.mubr.bf16.vlgmr.msra.gmra.mxu1 %v1583_v52 }
  0x6e   : > { %1912 = vmatpush3.bf16.msra.mxu1 %v2020_v49  ;;  %1893 = vmatprep.subr.bf16.mxu0 %v2021_v55 }
  0x6f   : > { %1913 = vmatprep.subr.bf16.mxu1 %v2022_v56  ;;  %1907 = vmatprep.mubr.bf16.mxu0 %v1005_v57 }
  0x70   : > { %1927 = vmatprep.mubr.bf16.mxu1 %v1145_v58 }
  0x71   : > { %1894 = vmatpush3.bf16.msra.mxu0 %v2021_v55 }
  0x72   : > { %1914 = vmatpush3.bf16.msra.mxu1 %v2022_v56  ;;  %1895 = vmatprep.subr.bf16.mxu0 %v2023_v59 }
  0x73   : > { %1915 = vmatprep.subr.bf16.mxu1 %v2024_v60 }
  0x75   : > { %1896 = vmatpush3.bf16.msra.mxu0 %v2023_v59 }
  0x76   : > { %1916 = vmatpush3.bf16.msra.mxu1 %v2024_v60  ;;  %1897 = vmatprep.subr.bf16.mxu0 %v2025_v61 }
  0x77   : > { %1917 = vmatprep.subr.bf16.mxu1 %v2026_v62 }
  0x79   : > { %1898 = vmatpush3.bf16.msra.mxu0 %v2025_v61 }
  0x7a   : > { %1918 = vmatpush3.bf16.msra.mxu1 %v2026_v62  ;;  %1899 = vmatprep.subr.bf16.mxu0 %v2027_v63 }
  0x7b   : > { %1919 = vmatprep.subr.bf16.mxu1 %v2028_v0 }
  0x7d   : > { %1900 = vmatpush3.bf16.msra.mxu0 %v2027_v63 }
  0x7e   : > { %1920 = vmatpush3.bf16.msra.mxu1 %v2028_v0  ;;  %1901 = vmatprep.subr.bf16.mxu0 %v2029_v1 }
  0x7f   : > { %1921 = vmatprep.subr.bf16.mxu1 %v2030_v2 }
  0x81   : > { %1902 = vmatpush3.bf16.msra.mxu0 %v2029_v1 }
  0x82   : > { %1922 = vmatpush3.bf16.msra.mxu1 %v2030_v2  ;;  %1903 = vmatprep.subr.bf16.mxu0 %v2031_v3 }
  0x83   : > { %1923 = vmatprep.subr.bf16.mxu1 %v2032_v4 }
  0x85   : > { %1904 = vmatpush3.bf16.msra.mxu0 %v2031_v3 }
  0x86   : > { %1924 = vmatpush3.bf16.msra.mxu1 %v2032_v4  ;;  %1905 = vmatprep.subr.bf16.mxu0 %v2033_v5 }
  0x87   : > { %1925 = vmatprep.subr.bf16.mxu1 %v2034_v6 }
  0x89   : > { %1906 = vmatpush3.bf16.msra.mxu0 %v2033_v5 }
  0x8a   : > { %1926 = vmatpush3.bf16.msra.mxu1 %v2034_v6  ;;  %1931 = vmatprep.subr.bf16.mxu0 %v2038_v7 }
  0x8c   : > { %1908 = vmatmul.mubr.bf16.vlgmr.msra.gmra.mxu0 %v1004_v51 }
  0x8d   : > { %1932 = vmatpush3.bf16.msra.mxu0 %v2038_v7  ;;  %1928 = vmatmul.mubr.bf16.vlgmr.msra.gmra.mxu1 %v1144_v54 }
  0x8e   : > { %1933 = vmatprep.subr.bf16.mxu0 %v2039_v8  ;;  %1947 = vmatprep.mubr.bf16.mxu0 %v2279_v35 }
  0x91   : > { %1934 = vmatpush3.bf16.msra.mxu0 %v2039_v8 }
  0x92   : > { %1935 = vmatprep.subr.bf16.mxu0 %v2040_v9 }
  0x95   : > { %1936 = vmatpush3.bf16.msra.mxu0 %v2040_v9 }
  0x96   : > { %1937 = vmatprep.subr.bf16.mxu0 %v2041_v10 }
  0x99   : > { %1938 = vmatpush3.bf16.msra.mxu0 %v2041_v10 }
  0x9a   : > { %1939 = vmatprep.subr.bf16.mxu0 %v2042_v11 }
  0x9d   : > { %1940 = vmatpush3.bf16.msra.mxu0 %v2042_v11 }
  0x9e   : > { %1941 = vmatprep.subr.bf16.mxu0 %v2043_v12 }
  0xa1   : > { %1942 = vmatpush3.bf16.msra.mxu0 %v2043_v12 }
  0xa2   : > { %1943 = vmatprep.subr.bf16.mxu0 %v2044_v13 }
  0xa5   : > { %1944 = vmatpush3.bf16.msra.mxu0 %v2044_v13 }
  0xa6   : > { %1945 = vmatprep.subr.bf16.mxu0 %v2045_v16 }
  0xa9   : > { %1946 = vmatpush3.bf16.msra.mxu0 %v2045_v16 }
  0xac   : > { %1948 = vmatmul.mubr.bf16.vlgmr.msra.gmra.mxu0 %v1269_v30 }
  0xec   : > { %v1789_v18 = vpop.f32.mrf.mxu0 }
  0xed   : > { %v306_v14 = vadd.f32 %v1789_v18, %v1453_v17  ;;  %v1809_v15 = vpop.f32.mrf.mxu1 }
  0xee   : > { %v290_v19 = vpop.f32.mrf.mxu0 }
  0xef   : > { %v304_v20 = vadd.f32 %v1453_v17, %v290_v19  ;;  %v454_v21 = vadd.f32 %v1809_v15, %v306_v14  ;;  %v438_v22 = vpop.f32.mrf.mxu1 }
  0xf0   : > { %v1790_v23 = vpop.f32.mrf.mxu0 }
  0xf1   : > { %v452_v24 = vadd.f32 %v438_v22, %v304_v20  ;;  %v1810_v26 = vpop.f32.mrf.mxu1 }
  0xf2   : > { %v293_v27 = vpop.f32.mrf.mxu0 }
  0xf3   : > { %v305_v28 = vadd.f32 %v1453_v17, %v293_v27  ;;  %v441_v29 = vpop.f32.mrf.mxu1 }
  0xf5   : > { %v453_v31 = vadd.f32 %v441_v29, %v305_v28 }
 0x10c   : > { %v1829_v25 = vpop.f32.mrf.mxu0 }
 0x10d   : > { %v580_v30 = vadd.f32 %v1829_v25, %v454_v21  ;;  %v1849_v32 = vpop.f32.mrf.mxu1 }
 0x10e   : > { %v564_v33 = vpop.f32.mrf.mxu0 }
 0x10f   : > { %v578_v34 = vadd.f32 %v564_v33, %v452_v24  ;;  %v710_v35 = vadd.f32 %v1849_v32, %v580_v30  ;;  %v694_v36 = vpop.f32.mrf.mxu1 }
 0x110   : > { %v1830_v37 = vpop.f32.mrf.mxu0 }
 0x111   : > { %v708_v38 = vadd.f32 %v694_v36, %v578_v34  ;;  %v1850_v39 = vpop.f32.mrf.mxu1 }
 0x112   : > { %v567_v40 = vpop.f32.mrf.mxu0 }
 0x113   : > { %v697_v41 = vpop.f32.mrf.mxu1  ;;  %v579_v56 = vadd.f32 %v567_v40, %v453_v31 }
 0x115   : > { %v709_v58 = vadd.f32 %v697_v41, %v579_v56 }
 0x12c   : > { %v1869_v42 = vpop.f32.mrf.mxu0 }
 0x12d   : > { %v1889_v43 = vpop.f32.mrf.mxu1  ;;  %v850_v57 = vadd.f32 %v1869_v42, %v710_v35 }
 0x12e   : > { %v834_v44 = vpop.f32.mrf.mxu0 }
 0x12f   : > { %v954_v45 = vpop.f32.mrf.mxu1  ;;  %v848_v59 = vadd.f32 %v834_v44, %v708_v38  ;;  %v970_v60 = vadd.f32 %v1889_v43, %v850_v57 }
 0x130   : > { %v1870_v46 = vpop.f32.mrf.mxu0 }
 0x131   : > { %v1890_v47 = vpop.f32.mrf.mxu1  ;;  %v968_v63 = vadd.f32 %v954_v45, %v848_v59 }
 0x132   : > { %v837_v48 = vpop.f32.mrf.mxu0 }
 0x133   : > { %v957_v49 = vpop.f32.mrf.mxu1  ;;  %v849_v61 = vadd.f32 %v837_v48, %v709_v58 }
 0x135   : > { %v969_v1 = vadd.f32 %v957_v49, %v849_v61 }
 0x14c   : > { %v1909_v50 = vpop.f32.mrf.mxu0 }
 0x14d   : > { %v1929_v51 = vpop.f32.mrf.mxu1  ;;  %v1106_v62 = vadd.f32 %v1909_v50, %v970_v60 }
 0x14e   : > { %v1090_v52 = vpop.f32.mrf.mxu0 }
 0x14f   : > { %v1230_v53 = vpop.f32.mrf.mxu1  ;;  %v1104_v2 = vadd.f32 %v1090_v52, %v968_v63  ;;  %v1246_v3 = vadd.f32 %v1929_v51, %v1106_v62 }
 0x150   : > { %v1910_v54 = vpop.f32.mrf.mxu0 }
 0x151   : > { %v1930_v55 = vpop.f32.mrf.mxu1  ;;  %v1244_v9 = vadd.f32 %v1230_v53, %v1104_v2 }
 0x152   : > { %v1093_v0 = vpop.f32.mrf.mxu0 }
 0x153   : > { %v1105_v5 = vadd.f32 %v1093_v0, %v969_v1  ;;  %v1233_v7 = vpop.f32.mrf.mxu1 }
 0x155   : > { %v1245_v12 = vadd.f32 %v1233_v7, %v1105_v5 }
 0x16c   : > { %v1949_v4 = vpop.f32.mrf.mxu0 }
 0x16d   : > { %v1371_v6 = vadd.f32 %v1949_v4, %v1246_v3 }
 0x16e   : > { %v1355_v8 = vpop.f32.mrf.mxu0 }
 0x16f   : > { %v1374_v10 = vmax.f32 %v1371_v6, 0.0  ;;  %v1369_v16 = vadd.f32 %v1355_v8, %v1244_v9 }
 0x170   : > { %v1950_v11 = vpop.f32.mrf.mxu0 }
 0x171   : > { %v1675_v13 = vpack.c.bf16 %v1374_v10, %v1374_v10  ;;  %v1372_v14 = vmax.f32 %v1369_v16, 0.0 }
 0x172   : > { %v1358_v17 = vpop.f32.mrf.mxu0 }
 0x173   : > { %1390 = vst [vmem:[%s170_s19 + $0x8] sm:$0xf] %v1675_v13  ;;  %v1370_v18 = vadd.f32 %v1358_v17, %v1245_v12 }
 0x175   : > { %v1373_v15 = vmax.f32 %v1370_v18, 0.0 }
 0x177   : > { %v1679_v19 = vpack.c.bf16 %v1373_v15, %v1372_v14 }
 0x179   : > { %1680 = vst [vmem:[%s170_s19] sm:$0xff] %v1679_v19  }
 0x17a PF: > { %s13_s12 = sadd.s32 1, %s2053_s12  }
 0x17b   : > { %p10_p4 = scmp.ge.s32.totalorder %s13_s12, 4  }
 0x17d   :  { %12 = sbr.rel (!%p10_p4) target bundleno = 1 (0x1), region = 70 }

// kernel: resnet_feature_forward.7
= control target key start
LH: loop header
LB: loop body
LE: loop exit
PB: predicated region body
PF: predicated region fallthrough
CT: control target
= control target key end

     0   :  { %10 = vsyncpa [#allocation3], 0  ;;  %s2653_s0 = inlined_call_operand.vmem [shape: bf16[2,40,128], index: 0, kind: input, shape index: {}]   ;;  %s2654_s1 = inlined_call_operand.vmem [shape: bf16[9,128,128], index: 1, kind: input, shape index: {}]   ;;  %s2655_s2 = inlined_call_operand.vmem [shape: f32[1,128], index: 2, kind: input, shape index: {}]   ;;  %s2656_s3 = inlined_call_operand.vmem [shape: bf16[2,24,128], index: 3, kind: input, shape index: {}]   ;;  %s2657_s4 = inlined_call_operand.vmem [shape: f32[24,128], index: 4, kind: input, shape index: {}]   ;;  %s2658_s5 = inlined_call_operand.hbm [shape: f32[2,1,128], index: 5, kind: output, shape index: {}]  }
   0x1   :  { %12 = vsyncpa [#allocation3 + $0x1], 0  ;;  %s2268_s18 = smov 0   ;;  %s2270_s19 = smov 0  }
   0x2   :  { %s2272_s20 = smov 0   ;;  %s2274_s21 = smov 0  }
   0x3 LB: > { %s2289_s22 = sadd.s32 4294967295, %s2235_s21   ;;  %s1550_s23 = sadd.s32 4294967294, %s2235_s21   ;;  %s2235_s21 = sphi %s2274_s21, %s2664_s21   ;;  %s2231_s20 = sphi %s2272_s20, %s2663_s20   ;;  %s2227_s19 = sphi %s2270_s19, %s2662_s19   ;;  %s2223_s18 = sphi %s2268_s18, %s2661_s18  }
   0x4   : > { %s2293_s24 = sadd.s32 1, %s2235_s21   ;;  %s140_s25 = sadd.s32 1, %s2231_s20 }
   0x5   : > { %s137_s26 = ssub.s32 %s2235_s21, %s2293_s24  ;;  %p150_p0 = scmp.ne.s32.totalorder %s2231_s20, %s2227_s19 }
   0x6   : > { %p138_p1 = scmp.eq.s32.totalorder %s137_s26, 0  ;;  %p151_p2 = scmp.eq.s32.totalorder %s2289_s22, 1 }
   0x7   : > { %p156_p3 = scmp.ne.s32.totalorder %s2227_s19, %s2223_s18  ;;  %p157_p4 = scmp.eq.s32.totalorder %s1550_s23, 1 }
   0x8   : > { %s2304_s27 = scalar_select %p138_p1, %s2231_s20, %s140_s25  }
   0x9   : > { %p2306_p5 = por %p151_p2, %p150_p0  ;;  %p2310_p6 = por %p157_p4, %p156_p3 }
   0xa   : > { %p1553_p7 = scmp.ge.s32.totalorder %s2235_s21, 1  ;;  %p200_p8 = scmp.lt.s32.totalorder %s2235_s21, 3 }
   0xc   : > { %p201_p9 = pnand %p1553_p7, %p200_p8 }
   0xd   : > { %p232_p10 = scmp.lt.s32.totalorder (!%p201_p9), %s2289_s22, 1  ;;  %s230_s26 = sand.u32 (!%p201_p9), 1, %s2227_s19  }
   0xe   : > { %204 = sbr.rel (%p201_p9) target bundleno = 416 (0x1a0), region = 40  ;;  %s231_s30 = scalar_lea.vmem (!%p201_p9), [#allocation2], %s230_s26 }
   0xf   : > { %s1471_s10 = scalar_lea.sflag (!%p201_p9), [#allocation3], %s230_s26 }
  0x13   : > { %v2089_v0 = vld [vmem:[%s2654_s1 + $0x38] sm:$0xff]   ;;  %v2091_v2 = vld [vmem:[%s2654_s1 + $0x30] sm:$0xff]   ;;  %v2093_v4 = vld [vmem:[%s2654_s1 + $0x28] sm:$0xff]   ;;  %s2336_s17 = scalar_select %p232_p10, %s2289_s22, 1  ;;  %vm409_vm0 = vsmask.f32 7424 }
  0x14   : > { %v2090_v1 = vld [vmem:[%s2654_s1 + $0x78] sm:$0xff]   ;;  %1868 = vmatprep.subr.bf16.mxu0 %v2089_v0  ;;  %v2092_v3 = vld [vmem:[%s2654_s1 + $0x70] sm:$0xff]   ;;  %v2094_v5 = vld [vmem:[%s2654_s1 + $0x68] sm:$0xff]   ;;  %vm547_vm1 = vcmask 1046528   ;;  %vm677_vm2 = vcmask 1044480   ;;  %vm1073_vm4 = vcmask 1045504  }
  0x15   : > { %1869 = vmatpush3.bf16.msra.mxu0 %v2089_v0  ;;  %1888 = vmatprep.subr.bf16.mxu1 %v2090_v1  ;;  %v2095_v6 = vld [vmem:[%s2654_s1 + $0x20] sm:$0xff]   ;;  %s2048_s6 = smul.u32 20, %s2336_s17  ;;  %v2097_v8 = vld [vmem:[%s2654_s1 + $0x18] sm:$0xff]   ;;  %v2099_v10 = vld [vmem:[%s2654_s1 + $0x10] sm:$0xff]   ;;  %vm803_vm3 = vsmask.f32 4352 }
  0x16   : > { %1889 = vmatpush3.bf16.msra.mxu1 %v2090_v1  ;;  %1870 = vmatprep.subr.bf16.mxu0 %v2091_v2  ;;  %v2096_v7 = vld [vmem:[%s2654_s1 + $0x60] sm:$0xff]   ;;  %v2098_v9 = vld [vmem:[%s2654_s1 + $0x58] sm:$0xff]   ;;  %v2100_v12 = vld [vmem:[%s2654_s1 + $0x50] sm:$0xff]   ;;  %vm1199_vm5 = vsmask.f32 5376  ;;  %s2049_s9 = smul.u32 12, %s2336_s17 }
  0x17   : > { %1890 = vmatprep.subr.bf16.mxu1 %v2092_v3  ;;  %s2357_s15 = scalar_lea.vmem %s2653_s0, %s2048_s6  ;;  %v2101_v17 = vld [vmem:[%s2654_s1 + $0x8] sm:$0xff]   ;;  %v2103_v21 = vld [vmem:[%s2654_s1] sm:$0xff]   ;;  %v2107_v30 = vld [vmem:[%s2654_s1 + $0xb8] sm:$0xff]   ;;  %s1483_s6 = sshll.u32 %s231_s30, 4  ;;  %s1484_s6 = int_to_ptr.vmem [resolvable:$true] %s1483_s6 }
  0x18   : > { %v2105_v11 = vld [vmem:[%s2357_s15] sm:$0xff]   ;;  %v2368_v15 = vld [vmem:[%s2357_s15 + $0x8] sm:$0xf]  ;;  %v381_v16 = vld [vmem:[%s2357_s15 + $0xc] sm:$0x1]  ;;  %s241_s12 = scalar_lea.vmem %s2656_s3, %s2049_s9  ;;  %s2175_s11 = scalar_lea.vmem %s1484_s6, 16 }
  0x19   : > { %1871 = vmatpush3.bf16.msra.mxu0 %v2091_v2  ;;  %1884 = vmatprep.mubr.bf16.mxu0 %v2105_v11  ;;  %v378_v13 = vld [vmem:[%s2357_s15] sm:$0xf]  ;;  %v2365_v14 = vld [vmem:[%s2357_s15 + $0x4] sm:$0xf]  ;;  %v2376_v19 = vcombine.low %v2368_v15, %v381_v16  ;;  %v2102_v20 = vld [vmem:[%s2654_s1 + $0x48] sm:$0xff]   ;;  %p2176_p11 = scmp.ne.s32.totalorder %s1484_s6, %s2175_s11 }
  0x1a   : > { %1891 = vmatpush3.bf16.msra.mxu1 %v2092_v3  ;;  %1872 = vmatprep.subr.bf16.mxu0 %v2093_v4  ;;  %v1583_v18 = vcombine.low %v378_v13, %v2365_v14  ;;  %v2104_v25 = vld [vmem:[%s2654_s1 + $0x40] sm:$0xff]   ;;  %v2110_v32 = vld [vmem:[%s2654_s1 + $0xf8] sm:$0xff]   ;;  %v2106_v33 = vld [vmem:[%s2357_s15 + $0x8] ss:$0 sps:$4 sm:$0xff]   ;;  %v1685_v16 = vcombine.low %v2365_v14, %v2368_v15 }
  0x1b   : > { %1892 = vmatprep.subr.bf16.mxu1 %v2094_v5  ;;  %v418_v24 = vshll.u32 %v2376_v19, 16  ;;  %v422_v29 = vshrl.u32 %v2376_v19, 16  ;;  %v2111_v35 = vld [vmem:[%s2654_s1 + $0xb0] sm:$0xff]   ;;  %v2113_v37 = vld [vmem:[%s2654_s1 + $0xa8] sm:$0xff]   ;;  %v526_v38 = vld [vmem:[%s2357_s15] sm:$0xe]  ;;  %p2177_p12 = pnand %p2176_p11, %p2306_p5 }
  0x1c   : > { %v411_v22 = vshrl.u32 %v1583_v18, 16  ;;  %v413_v23 = vshll.u32 %v1583_v18, 16  ;;  %v2112_v36 = vld [vmem:[%s2654_s1 + $0xf0] sm:$0xff]   ;;  %v2114_v39 = vld [vmem:[%s2654_s1 + $0xe8] sm:$0xff]   ;;  %v1609_v40 = vcombine.low %v526_v38, %v2365_v14  ;;  %v549_v41 = vrot.slane %v2376_v19, 1  ;;  %v2115_v47 = vld [vmem:[%s2654_s1 + $0xa0] sm:$0xff]  }
  0x1d   : > { %1873 = vmatpush3.bf16.msra.mxu0 %v2093_v4  ;;  %v420_v27 = vrot.slane %v418_v24, 1  ;;  %v652_v42 = vld [vmem:[%s2357_s15] sm:$0x8]  ;;  %v653_v43 = vld [vmem:[%s2357_s15 + $0xc] sm:$0x7]  ;;  %v2117_v53 = vld [vmem:[%s2654_s1 + $0x98] sm:$0xff]   ;;  %p2178_p13 = pneg %p2177_p12 }
  0x1e   : > { %1893 = vmatpush3.bf16.msra.mxu1 %v2094_v5  ;;  %1874 = vmatprep.subr.bf16.mxu0 %v2095_v6  ;;  %v415_v26 = vrot.slane %v413_v23, 1  ;;  %v548_v44 = vrot.slane %v1609_v40, 1  ;;  %v1634_v45 = vcombine.low %v652_v42, %v2365_v14  ;;  %v1635_v46 = vcombine.low %v2368_v15, %v653_v43  ;;  %v2116_v48 = vld [vmem:[%s2654_s1 + $0xe0] sm:$0xff]   ;;  %v2118_v54 = vld [vmem:[%s2654_s1 + $0xd8] sm:$0xff]   ;;  %v2119_v55 = vld [vmem:[%s2654_s1 + $0x90] sm:$0xff]  }
  0x1f   : > { %1894 = vmatprep.subr.bf16.mxu1 %v2096_v7  ;;  %v424_v34 = vor.u32 %v422_v29, %v420_v27  ;;  %v2120_v56 = vld [vmem:[%s2654_s1 + $0xd0] sm:$0xff]   ;;  %v2121_v57 = vld [vmem:[%s2654_s1 + $0x88] sm:$0xff]   ;;  %v2123_v63 = vld [vmem:[%s2654_s1 + $0x80] sm:$0xff]  }
  0x20   : > { %v416_v28 = vor.u32 %v415_v26, %v411_v22  ;;  %v550_v49 = vsel %vm547_vm1, %v548_v44, %v549_v41  ;;  %v678_v50 = vrot.slane %v1634_v45, 3  ;;  %v679_v51 = vrot.slane %v1635_v46, 3  ;;  %v2122_v58 = vld [vmem:[%s2654_s1 + $0xc8] sm:$0xff]   ;;  %v2124_v0 = vld [vmem:[%s2654_s1 + $0xc0] sm:$0xff]   ;;  %v2130_v11 = vld [vmem:[%s2654_s1 + $0x130] sm:$0xff]  }
  0x21   : > { %1875 = vmatpush3.bf16.msra.mxu0 %v2095_v6  ;;  %v2444_v59 = vld [vmem:[%s2357_s15 + $0xc] sm:$0xf]  ;;  %v805_v61 = vshrl.u32 %v1634_v45, 16  ;;  %v808_v62 = vshll.u32 %v1634_v45, 16  ;;  %v2134_v14 = vld [vmem:[%s2654_s1 + $0x120] sm:$0xff]   ;;  %v2136_v19 = vld [vmem:[%s2654_s1 + $0x118] sm:$0xff]  }
  0x22   : > { %1895 = vmatpush3.bf16.msra.mxu1 %v2096_v7  ;;  %1876 = vmatprep.subr.bf16.mxu0 %v2097_v8  ;;  %v421_v31 = vsel %vm409_vm0, %v416_v28, %v420_v27  ;;  %v680_v52 = vsel %vm677_vm2, %v678_v50, %v679_v51  ;;  %v1660_v60 = vcombine.low %v2368_v15, %v2444_v59  ;;  %v2126_v7 = vld [vmem:[%s2654_s1 + $0x138] sm:$0xff]   ;;  %v2133_v18 = vld [vmem:[%s2654_s1 + $0x168] sm:$0xff]   ;;  %v2135_v15 = vld [vmem:[%s2654_s1 + $0x160] sm:$0xff]  }
  0x23   : > { %1896 = vmatprep.subr.bf16.mxu1 %v2098_v9  ;;  %1904 = vmatprep.mubr.bf16.mxu1 %v421_v31  ;;  %v807_v3 = vrot.slane %v805_v61, 3  ;;  %v810_v4 = vrot.slane %v808_v62, 4  ;;  %v2137_v22 = vld [vmem:[%s2654_s1 + $0x158] sm:$0xff]   ;;  %v2138_v23 = vld [vmem:[%s2654_s1 + $0x110] sm:$0xff]   ;;  %v1042_v24 = vld [vmem:[%s2357_s15 + $0x4] sm:$0xc] }
  0x24   : > { %v813_v1 = vshrl.u32 %v1660_v60, 16  ;;  %v816_v2 = vshll.u32 %v1660_v60, 16  ;;  %v1043_v26 = vld [vmem:[%s2357_s15 + $0x8] sm:$0xf]  ;;  %v1318_v27 = vld [vmem:[%s2357_s15 + $0x4] sm:$0x8] }
  0x25   : > { %1877 = vmatpush3.bf16.msra.mxu0 %v2097_v8  ;;  %v2129_v8 = vld [vmem:[%s2654_s1 + $0x178] sm:$0xff]   ;;  %v2139_v28 = vld [vmem:[%s2654_s1 + $0x150] sm:$0xff]   ;;  %v1762_v29 = vcombine.low %v1318_v27, %v1043_v26  ;;  %v1711_v31 = vcombine.low %v1042_v24, %v1043_v26  ;;  %v2143_v42 = vld [vmem:[%s2654_s1 + $0x140] sm:$0xff]  }
  0x26   : > { %1897 = vmatpush3.bf16.msra.mxu1 %v2098_v9  ;;  %1878 = vmatprep.subr.bf16.mxu0 %v2099_v10  ;;  %v815_v5 = vrot.slane %v813_v1, 3  ;;  %v818_v6 = vrot.slane %v816_v2, 4  ;;  %v811_v9 = vor.u32 %v810_v4, %v807_v3  ;;  %v2152_v60 = vld [vmem:[%s2654_s1 + $0x1e8] sm:$0xff]   ;;  %v2153_v61 = vld [vmem:[%s2654_s1 + $0x1a0] sm:$0xff]   ;;  %v2157_v1 = vld [vmem:[%s2654_s1 + $0x190] sm:$0xff]  }
  0x27   : > { %1898 = vmatprep.subr.bf16.mxu1 %v2100_v12  ;;  %v1204_v38 = vshll.u32 %v1711_v31, 16  ;;  %v1074_v50 = vrot.slane %v1711_v31, 2  ;;  %v2154_v62 = vld [vmem:[%s2654_s1 + $0x1e0] sm:$0xff]   ;;  %v2158_v2 = vld [vmem:[%s2654_s1 + $0x1d0] sm:$0xff]   ;;  %v2159_v3 = vld [vmem:[%s2654_s1 + $0x188] sm:$0xff]  }
  0x28   : > { %v2160_v4 = vld [vmem:[%s2654_s1 + $0x1c8] sm:$0xff]  }
  0x29   : > { %1879 = vmatpush3.bf16.msra.mxu0 %v2099_v10  ;;  %v2460_v10 = vor.u32 %v818_v6, %v815_v5  ;;  %v1206_v45 = vrot.slane %v1204_v38, 3  ;;  %v2161_v5 = vld [vmem:[%s2654_s1 + $0x180] sm:$0xff]  }
  0x2a   : > { %1899 = vmatpush3.bf16.msra.mxu1 %v2100_v12  ;;  %1880 = vmatprep.subr.bf16.mxu0 %v2101_v17  ;;  %v2131_v12 = vld [vmem:[%s2654_s1 + $0x170] sm:$0xff]   ;;  %v2162_v6 = vld [vmem:[%s2654_s1 + $0x1c0] sm:$0xff]  }
  0x2b   : > { %1900 = vmatprep.subr.bf16.mxu1 %v2102_v20  ;;  %v820_v13 = vsel %vm803_vm3, %v811_v9, %v2460_v10  ;;  %v2168_v9 = vld [vmem:[%s2654_s1 + $0x228] sm:$0xff]  }
  0x2d   : > { %1881 = vmatpush3.bf16.msra.mxu0 %v2101_v17  ;;  %v2132_v17 = vld [vmem:[%s2654_s1 + $0x128] sm:$0xff]  }
  0x2e   : > { %1901 = vmatpush3.bf16.msra.mxu1 %v2102_v20  ;;  %1882 = vmatprep.subr.bf16.mxu0 %v2103_v21  ;;  %v1044_v20 = vld [vmem:[%s2357_s15 + $0xc] sm:$0xf] }
  0x2f   : > { %1902 = vmatprep.subr.bf16.mxu1 %v2104_v25 }
  0x31   : > { %1883 = vmatpush3.bf16.msra.mxu0 %v2103_v21  ;;  %v1178_v21 = vld [vmem:[%s2357_s15 + $0x10] sm:$0x7] }
  0x32   : > { %1903 = vmatpush3.bf16.msra.mxu1 %v2104_v25  ;;  %1908 = vmatprep.subr.bf16.mxu0 %v2107_v30  ;;  %v2497_v25 = vcombine.low %v1044_v20, %v1178_v21 }
  0x33   : > { %1928 = vmatprep.subr.bf16.mxu1 %v2110_v32 }
  0x34   : > { %1885 = vmatmul.mubr.bf16.vlgmr.msra.gmra.mxu0 %v2106_v33  ;;  %v2140_v33 = vld [vmem:[%s2654_s1 + $0x108] sm:$0xff]   ;;  %v1212_v40 = vshll.u32 %v2497_v25, 16 }
  0x35   : > { %1909 = vmatpush3.bf16.msra.mxu0 %v2107_v30  ;;  %1905 = vmatmul.mubr.bf16.vlgmr.msra.gmra.mxu1 %v424_v34  ;;  %v1340_v30 = vrot.slane %v2497_v25, 3  ;;  %v2141_v34 = vld [vmem:[%s2654_s1 + $0x148] sm:$0xff]  }
  0x36   : > { %1929 = vmatpush3.bf16.msra.mxu1 %v2110_v32  ;;  %1910 = vmatprep.subr.bf16.mxu0 %v2111_v35  ;;  %v1339_v32 = vrot.slane %v1762_v29, 3 }
  0x37   : > { %1930 = vmatprep.subr.bf16.mxu1 %v2112_v36  ;;  %1924 = vmatprep.mubr.bf16.mxu0 %v550_v49  ;;  %v2148_v49 = vld [vmem:[%s2654_s1 + $0x1f8] sm:$0xff]  }
  0x38   : > { %1944 = vmatprep.mubr.bf16.mxu1 %v680_v52  ;;  %v1686_v52 = vcombine.low %v2444_v59, %v2444_v59  ;;  %v2151_v59 = vld [vmem:[%s2654_s1 + $0x1a8] sm:$0xff]  }
  0x39   : > { %1911 = vmatpush3.bf16.msra.mxu0 %v2111_v35  ;;  %v2514_v35 = vsel %vm677_vm2, %v1339_v32, %v1340_v30 }
  0x3a   : > { %1931 = vmatpush3.bf16.msra.mxu1 %v2112_v36  ;;  %1912 = vmatprep.subr.bf16.mxu0 %v2113_v37  ;;  %v1045_v36 = vld [vmem:[%s2357_s15 + $0x10] sm:$0x3]  ;;  %s1771_s15 = sshll.u32 %s2289_s22, 4 }
  0x3b   : > { %1932 = vmatprep.subr.bf16.mxu1 %v2114_v39  ;;  %v1712_v43 = vcombine.low %v1044_v20, %v1045_v36  ;;  %s1481_s9 = scalar_lea.hbm %s2658_s5, %s1771_s15 }
  0x3d   : > { %1913 = vmatpush3.bf16.msra.mxu0 %v2113_v37  ;;  %v1201_v37 = vshrl.u32 %v1711_v31, 16 }
  0x3e   : > { %1933 = vmatpush3.bf16.msra.mxu1 %v2114_v39  ;;  %1914 = vmatprep.subr.bf16.mxu0 %v2115_v47  ;;  %v1209_v39 = vshrl.u32 %v2497_v25, 16 }
  0x3f   : > { %1934 = vmatprep.subr.bf16.mxu1 %v2116_v48  ;;  %v1203_v44 = vrot.slane %v1201_v37, 2 }
  0x40   : > { %v1211_v46 = vrot.slane %v1209_v39, 2 }
  0x41   : > { %1915 = vmatpush3.bf16.msra.mxu0 %v2115_v47  ;;  %v1214_v47 = vrot.slane %v1212_v40, 3 }
  0x42   : > { %1935 = vmatpush3.bf16.msra.mxu1 %v2116_v48  ;;  %1916 = vmatprep.subr.bf16.mxu0 %v2117_v53  ;;  %v2145_v48 = vld [vmem:[%s2654_s1 + $0x1b8] sm:$0xff]  }
  0x43   : > { %1936 = vmatprep.subr.bf16.mxu1 %v2118_v54 }
  0x45   : > { %1917 = vmatpush3.bf16.msra.mxu0 %v2117_v53  ;;  %v1207_v53 = vor.u32 %v1206_v45, %v1203_v44 }
  0x46   : > { %1937 = vmatpush3.bf16.msra.mxu1 %v2118_v54  ;;  %1918 = vmatprep.subr.bf16.mxu0 %v2119_v55  ;;  %v1215_v54 = vor.u32 %v1214_v47, %v1211_v46 }
  0x47   : > { %1938 = vmatprep.subr.bf16.mxu1 %v2120_v56 }
  0x49   : > { %1919 = vmatpush3.bf16.msra.mxu0 %v2119_v55  ;;  %v2149_v55 = vld [vmem:[%s2654_s1 + $0x1b0] sm:$0xff]  }
  0x4a   : > { %1939 = vmatpush3.bf16.msra.mxu1 %v2120_v56  ;;  %1920 = vmatprep.subr.bf16.mxu0 %v2121_v57  ;;  %v2150_v56 = vld [vmem:[%s2654_s1 + $0x1f0] sm:$0xff]  }
  0x4b   : > { %1940 = vmatprep.subr.bf16.mxu1 %v2122_v58 }
  0x4d   : > { %1921 = vmatpush3.bf16.msra.mxu0 %v2121_v57 }
  0x4e   : > { %1941 = vmatpush3.bf16.msra.mxu1 %v2122_v58  ;;  %1922 = vmatprep.subr.bf16.mxu0 %v2123_v63  ;;  %v1216_v58 = vsel %vm1199_vm5, %v1207_v53, %v1215_v54 }
  0x4f   : > { %1942 = vmatprep.subr.bf16.mxu1 %v2124_v0 }
  0x51   : > { %1923 = vmatpush3.bf16.msra.mxu0 %v2123_v63  ;;  %v2155_v63 = vld [vmem:[%s2654_s1 + $0x198] sm:$0xff]  }
  0x52   : > { %1943 = vmatpush3.bf16.msra.mxu1 %v2124_v0  ;;  %1948 = vmatprep.subr.bf16.mxu0 %v2126_v7  ;;  %v2156_v0 = vld [vmem:[%s2654_s1 + $0x1d8] sm:$0xff]  }
  0x53   : > { %1968 = vmatprep.subr.bf16.mxu1 %v2129_v8 }
  0x54   : > { %1925 = vmatmul.mubr.bf16.vlgmr.msra.gmra.mxu0 %v549_v41  ;;  %v2142_v41 = vld [vmem:[%s2654_s1 + $0x100] sm:$0xff]  }
  0x55   : > { %1949 = vmatpush3.bf16.msra.mxu0 %v2126_v7  ;;  %1945 = vmatmul.mubr.bf16.vlgmr.msra.gmra.mxu1 %v679_v51  ;;  %v1075_v51 = vrot.slane %v1712_v43, 2  ;;  %v2166_v7 = vld [vmem:[%s2654_s1 + $0x238] sm:$0xff]  }
  0x56   : > { %1969 = vmatpush3.bf16.msra.mxu1 %v2129_v8  ;;  %1950 = vmatprep.subr.bf16.mxu0 %v2130_v11  ;;  %v2167_v8 = vld [vmem:[%s2654_s1 + $0x230] sm:$0xff]  }
  0x57   : > { %1970 = vmatprep.subr.bf16.mxu1 %v2131_v12  ;;  %1964 = vmatprep.mubr.bf16.mxu0 %v820_v13  ;;  %v1076_v57 = vsel %vm1073_vm4, %v1074_v50, %v1075_v51  ;;  %v2172_v13 = vld [vmem:[%s2654_s1 + $0x208] sm:$0xff]  }
  0x58   : > { %1984 = vmatprep.mubr.bf16.mxu1 %v1685_v16  ;;  %v2173_v16 = vld [vmem:[%s2654_s1 + $0x200] sm:$0xff]  }
  0x59   : > { %1951 = vmatpush3.bf16.msra.mxu0 %v2130_v11  ;;  %v2170_v11 = vld [vmem:[%s2654_s1 + $0x218] sm:$0xff]  }
  0x5a   : > { %1971 = vmatpush3.bf16.msra.mxu1 %v2131_v12  ;;  %1952 = vmatprep.subr.bf16.mxu0 %v2132_v17  ;;  %v2171_v12 = vld [vmem:[%s2654_s1 + $0x210] sm:$0xff]  }
  0x5b   : > { %1972 = vmatprep.subr.bf16.mxu1 %v2133_v18 }
  0x5d   : > { %1953 = vmatpush3.bf16.msra.mxu0 %v2132_v17  ;;  %v1556_v17 = vld [vmem:[%s2655_s2] ss:$0 sm:$0xff] }
  0x5e   : > { %1973 = vmatpush3.bf16.msra.mxu1 %v2133_v18  ;;  %1954 = vmatprep.subr.bf16.mxu0 %v2134_v14 }
  0x5f   : > { %1974 = vmatprep.subr.bf16.mxu1 %v2135_v15 }
  0x61   : > { %1955 = vmatpush3.bf16.msra.mxu0 %v2134_v14 }
  0x62   : > { %1975 = vmatpush3.bf16.msra.mxu1 %v2135_v15  ;;  %1956 = vmatprep.subr.bf16.mxu0 %v2136_v19 }
  0x63   : > { %1976 = vmatprep.subr.bf16.mxu1 %v2137_v22 }
  0x65   : > { %1957 = vmatpush3.bf16.msra.mxu0 %v2136_v19 }
  0x66   : > { %1977 = vmatpush3.bf16.msra.mxu1 %v2137_v22  ;;  %1958 = vmatprep.subr.bf16.mxu0 %v2138_v23 }
  0x67   : > { %1978 = vmatprep.subr.bf16.mxu1 %v2139_v28 }
  0x69   : > { %1959 = vmatpush3.bf16.msra.mxu0 %v2138_v23 }
  0x6a   : > { %1979 = vmatpush3.bf16.msra.mxu1 %v2139_v28  ;;  %1960 = vmatprep.subr.bf16.mxu0 %v2140_v33 }
  0x6b   : > { %1980 = vmatprep.subr.bf16.mxu1 %v2141_v34 }
  0x6d   : > { %1961 = vmatpush3.bf16.msra.mxu0 %v2140_v33 }
  0x6e   : > { %1981 = vmatpush3.bf16.msra.mxu1 %v2141_v34  ;;  %1962 = vmatprep.subr.bf16.mxu0 %v2142_v41 }
  0x6f   : > { %1982 = vmatprep.subr.bf16.mxu1 %v2143_v42 }
  0x71   : > { %1963 = vmatpush3.bf16.msra.mxu0 %v2142_v41 }
  0x72   : > { %1983 = vmatpush3.bf16.msra.mxu1 %v2143_v42  ;;  %1988 = vmatprep.subr.bf16.mxu0 %v2145_v48 }
  0x73   : > { %2008 = vmatprep.subr.bf16.mxu1 %v2148_v49 }
  0x74   : > { %1965 = vmatmul.mubr.bf16.vlgmr.msra.gmra.mxu0 %v2460_v10  ;;  %v2169_v10 = vld [vmem:[%s2654_s1 + $0x220] sm:$0xff]  }
  0x75   : > { %1989 = vmatpush3.bf16.msra.mxu0 %v2145_v48  ;;  %1985 = vmatmul.mubr.bf16.vlgmr.msra.gmra.mxu1 %v1686_v52 }
  0x76   : > { %2009 = vmatpush3.bf16.msra.mxu1 %v2148_v49  ;;  %1990 = vmatprep.subr.bf16.mxu0 %v2149_v55 }
  0x77   : > { %2010 = vmatprep.subr.bf16.mxu1 %v2150_v56  ;;  %2004 = vmatprep.mubr.bf16.mxu0 %v1076_v57 }
  0x78   : > { %2024 = vmatprep.mubr.bf16.mxu1 %v1216_v58 }
  0x79   : > { %1991 = vmatpush3.bf16.msra.mxu0 %v2149_v55 }
  0x7a   : > { %2011 = vmatpush3.bf16.msra.mxu1 %v2150_v56  ;;  %1992 = vmatprep.subr.bf16.mxu0 %v2151_v59 }
  0x7b   : > { %2012 = vmatprep.subr.bf16.mxu1 %v2152_v60 }
  0x7d   : > { %1993 = vmatpush3.bf16.msra.mxu0 %v2151_v59 }
  0x7e   : > { %2013 = vmatpush3.bf16.msra.mxu1 %v2152_v60  ;;  %1994 = vmatprep.subr.bf16.mxu0 %v2153_v61 }
  0x7f   : > { %2014 = vmatprep.subr.bf16.mxu1 %v2154_v62 }
  0x81   : > { %1995 = vmatpush3.bf16.msra.mxu0 %v2153_v61 }
  0x82   : > { %2015 = vmatpush3.bf16.msra.mxu1 %v2154_v62  ;;  %1996 = vmatprep.subr.bf16.mxu0 %v2155_v63 }
  0x83   : > { %2016 = vmatprep.subr.bf16.mxu1 %v2156_v0 }
  0x85   : > { %1997 = vmatpush3.bf16.msra.mxu0 %v2155_v63 }
  0x86   : > { %2017 = vmatpush3.bf16.msra.mxu1 %v2156_v0  ;;  %1998 = vmatprep.subr.bf16.mxu0 %v2157_v1 }
  0x87   : > { %2018 = vmatprep.subr.bf16.mxu1 %v2158_v2 }
  0x89   : > { %1999 = vmatpush3.bf16.msra.mxu0 %v2157_v1 }
  0x8a   : > { %2019 = vmatpush3.bf16.msra.mxu1 %v2158_v2  ;;  %2000 = vmatprep.subr.bf16.mxu0 %v2159_v3  ;;  %v1775_v2 = vld [vmem:[%s241_s12] sm:$0xff]  }
  0x8b   : > { %2020 = vmatprep.subr.bf16.mxu1 %v2160_v4 }
  0x8d   : > { %2001 = vmatpush3.bf16.msra.mxu0 %v2159_v3 }
  0x8e   : > { %2021 = vmatpush3.bf16.msra.mxu1 %v2160_v4  ;;  %2002 = vmatprep.subr.bf16.mxu0 %v2161_v5 }
  0x8f   : > { %2022 = vmatprep.subr.bf16.mxu1 %v2162_v6 }
  0x91   : > { %2003 = vmatpush3.bf16.msra.mxu0 %v2161_v5  ;;  %v1445_v5 = vld [vmem:[%s241_s12 + $0x8] sm:$0xf]  ;;  %s2237_s12 = smov [#allocation2]  }
  0x92   : > { %2023 = vmatpush3.bf16.msra.mxu1 %v2162_v6  ;;  %2028 = vmatprep.subr.bf16.mxu0 %v2166_v7  ;;  %s2179_s17 = sshll.u32 %s2237_s12, 4  ;;  %s2180_s17 = int_to_ptr.vmem [resolvable:$false] %s2179_s17 }
  0x93   : > { %s2181_s22 = scalar_lea.vmem %s2180_s17, 32  ;;  %p2182_p0 = scmp.lt.s32.totalorder %s1484_s6, %s2180_s17 }
  0x94   : > { %2005 = vmatmul.mubr.bf16.vlgmr.msra.gmra.mxu0 %v1075_v51  ;;  %p2183_p1 = scmp.lt.s32.totalorder %s2181_s22, %s2175_s11 }
  0x95   : > { %2029 = vmatpush3.bf16.msra.mxu0 %v2166_v7  ;;  %2025 = vmatmul.mubr.bf16.vlgmr.msra.gmra.mxu1 %v1215_v54 }
  0x96   : > { %2030 = vmatprep.subr.bf16.mxu0 %v2167_v8  ;;  %2044 = vmatprep.mubr.bf16.mxu0 %v2514_v35  ;;  %p2184_p2 = por %p2183_p1, %p2182_p0 }
  0x98   : > { %p2185_p3 = pnand %p2184_p2, %p2178_p13 }
  0x99   : > { %2031 = vmatpush3.bf16.msra.mxu0 %v2167_v8 }
  0x9a   : > { %2032 = vmatprep.subr.bf16.mxu0 %v2168_v9 }
  0x9d   : > { %2033 = vmatpush3.bf16.msra.mxu0 %v2168_v9  ;;  %v1776_v9 = vunpack.c.l.bf16 %v1775_v2 }
  0x9e   : > { %2034 = vmatprep.subr.bf16.mxu0 %v2169_v10 }
  0xa1   : > { %2035 = vmatpush3.bf16.msra.mxu0 %v2169_v10 }
  0xa2   : > { %2036 = vmatprep.subr.bf16.mxu0 %v2170_v11 }
  0xa5   : > { %2037 = vmatpush3.bf16.msra.mxu0 %v2170_v11 }
  0xa6   : > { %2038 = vmatprep.subr.bf16.mxu0 %v2171_v12 }
  0xa9   : > { %2039 = vmatpush3.bf16.msra.mxu0 %v2171_v12 }
  0xaa   : > { %2040 = vmatprep.subr.bf16.mxu0 %v2172_v13 }
  0xad   : > { %2041 = vmatpush3.bf16.msra.mxu0 %v2172_v13  ;;  %v1448_v13 = vunpack.c.l.bf16 %v1445_v5 }
  0xae   : > { %2042 = vmatprep.subr.bf16.mxu0 %v2173_v16 }
  0xb1   : > { %2043 = vmatpush3.bf16.msra.mxu0 %v2173_v16 }
  0xb4   : > { %2045 = vmatmul.mubr.bf16.vlgmr.msra.gmra.mxu0 %v1340_v30 }
  0xf4   : > { %v1886_v18 = vpop.f32.mrf.mxu0 }
  0xf5   : > { %v377_v14 = vadd.f32 %v1886_v18, %v1556_v17  ;;  %v1906_v15 = vpop.f32.mrf.mxu1 }
  0xf6   : > { %v361_v19 = vpop.f32.mrf.mxu0 }
  0xf7   : > { %v375_v20 = vadd.f32 %v1556_v17, %v361_v19  ;;  %v525_v21 = vadd.f32 %v1906_v15, %v377_v14  ;;  %v509_v22 = vpop.f32.mrf.mxu1  ;;  %v1777_v15 = vunpack.c.h.bf16 %v1775_v2 }
  0xf8   : > { %v1887_v23 = vpop.f32.mrf.mxu0 }
  0xf9   : > { %v523_v24 = vadd.f32 %v509_v22, %v375_v20  ;;  %v1907_v26 = vpop.f32.mrf.mxu1 }
  0xfa   : > { %v364_v27 = vpop.f32.mrf.mxu0  ;;  %v1456_v26 = vld [vmem:[%s2657_s4 + $0x8] sm:$0xff] }
  0xfb   : > { %v376_v28 = vadd.f32 %v1556_v17, %v364_v27  ;;  %v512_v29 = vpop.f32.mrf.mxu1 }
  0xfd   : > { %v524_v31 = vadd.f32 %v512_v29, %v376_v28  ;;  %v1457_v29 = vld [vmem:[%s2657_s4 + $0x10] sm:$0xff] }
 0x114   : > { %v1926_v25 = vpop.f32.mrf.mxu0 }
 0x115   : > { %v651_v30 = vadd.f32 %v1926_v25, %v525_v21  ;;  %v1946_v32 = vpop.f32.mrf.mxu1 }
 0x116   : > { %v635_v33 = vpop.f32.mrf.mxu0 }
 0x117   : > { %v649_v34 = vadd.f32 %v635_v33, %v523_v24  ;;  %v781_v35 = vadd.f32 %v1946_v32, %v651_v30  ;;  %v765_v36 = vpop.f32.mrf.mxu1  ;;  %v1455_v24 = vld [vmem:[%s2657_s4] sm:$0xff] }
 0x118   : > { %v1927_v37 = vpop.f32.mrf.mxu0 }
 0x119   : > { %v779_v38 = vadd.f32 %v765_v36, %v649_v34  ;;  %v1947_v39 = vpop.f32.mrf.mxu1 }
 0x11a   : > { %v638_v40 = vpop.f32.mrf.mxu0 }
 0x11b   : > { %v768_v41 = vpop.f32.mrf.mxu1  ;;  %v650_v58 = vadd.f32 %v638_v40, %v524_v31 }
 0x11d   : > { %v780_v60 = vadd.f32 %v768_v41, %v650_v58 }
 0x134   : > { %v1966_v42 = vpop.f32.mrf.mxu0 }
 0x135   : > { %v921_v43 = vadd.f32 %v1966_v42, %v781_v35  ;;  %v1986_v44 = vpop.f32.mrf.mxu1 }
 0x136   : > { %v905_v45 = vpop.f32.mrf.mxu0 }
 0x137   : > { %v1041_v46 = vadd.f32 %v1986_v44, %v921_v43  ;;  %v1025_v47 = vpop.f32.mrf.mxu1  ;;  %v919_v59 = vadd.f32 %v905_v45, %v779_v38 }
 0x138   : > { %v1967_v48 = vpop.f32.mrf.mxu0 }
 0x139   : > { %v1987_v49 = vpop.f32.mrf.mxu1  ;;  %v1039_v61 = vadd.f32 %v1025_v47, %v919_v59 }
 0x13a   : > { %v908_v50 = vpop.f32.mrf.mxu0 }
 0x13b   : > { %v1028_v51 = vpop.f32.mrf.mxu1  ;;  %v920_v62 = vadd.f32 %v908_v50, %v780_v60 }
 0x13d   : > { %v1040_v3 = vadd.f32 %v1028_v51, %v920_v62 }
 0x154   : > { %v2006_v52 = vpop.f32.mrf.mxu0 }
 0x155   : > { %v2026_v53 = vpop.f32.mrf.mxu1  ;;  %v1177_v63 = vadd.f32 %v2006_v52, %v1041_v46 }
 0x156   : > { %v1161_v54 = vpop.f32.mrf.mxu0 }
 0x157   : > { %v1301_v55 = vpop.f32.mrf.mxu1  ;;  %v1175_v0 = vadd.f32 %v1161_v54, %v1039_v61  ;;  %v1317_v6 = vadd.f32 %v2026_v53, %v1177_v63 }
 0x158   : > { %v2007_v56 = vpop.f32.mrf.mxu0 }
 0x159   : > { %v2027_v57 = vpop.f32.mrf.mxu1  ;;  %v1315_v7 = vadd.f32 %v1301_v55, %v1175_v0 }
 0x15a   : > { %v1164_v1 = vpop.f32.mrf.mxu0 }
 0x15b   : > { %v1176_v8 = vadd.f32 %v1164_v1, %v1040_v3  ;;  %v1304_v10 = vpop.f32.mrf.mxu1 }
 0x15d   : > { %v1316_v18 = vadd.f32 %v1304_v10, %v1176_v8 }
 0x174   : > { %v2046_v4 = vpop.f32.mrf.mxu0 }
 0x175   : > { %v1442_v12 = vadd.f32 %v2046_v4, %v1317_v6 }
 0x176   : > { %v1426_v11 = vpop.f32.mrf.mxu0 }
 0x177   : > { %v1440_v16 = vadd.f32 %v1426_v11, %v1315_v7  ;;  %v1451_v20 = vadd.f32 %v1448_v13, %v1442_v12 }
 0x178   : > { %v2047_v17 = vpop.f32.mrf.mxu0 }
 0x179   : > { %v1449_v14 = vadd.f32 %v1776_v9, %v1440_v16  ;;  %v1454_v27 = vmax.f32 %v1451_v20, 0.0 }
 0x17a   : > { %v1429_v19 = vpop.f32.mrf.mxu0 }
 0x17b   : > { %v1441_v21 = vadd.f32 %v1429_v19, %v1316_v18  ;;  %v1452_v22 = vmax.f32 %v1449_v14, 0.0  ;;  %v1460_v30 = vmul.f32 %v1457_v29, %v1454_v27 }
 0x17d   : > { %v1450_v23 = vadd.f32 %v1777_v15, %v1441_v21  ;;  %v1458_v31 = vmul.f32 %v1455_v24, %v1452_v22 }
 0x17f   : > { %v1453_v28 = vmax.f32 %v1450_v23, 0.0 }
 0x181   : > { %v1459_v25 = vmul.f32 %v1456_v26, %v1453_v28 }
 0x183   : > { %v1461_v32 = vadd.f32 %v1459_v25, %v1458_v31 }
 0x185   : > { %v1462_v33 = vadd.f32 %v1461_v32, %v1460_v30 }
 0x187   : > { %v1463_v34 = vrot.slane %v1462_v33, 4 }
 0x189   : > { %v1464_v35 = vadd.f32 %v1463_v34, %v1462_v33 }
 0x18b   : > { %v1465_v36 = vrot.slane %v1464_v35, 2 }
 0x18d   : > { %v1466_v37 = vadd.f32 %v1465_v36, %v1464_v35 }
 0x18f   : > { %v1467_v38 = vrot.slane %v1466_v37, 1 }
 0x191   : > { %v1468_v39 = vadd.f32 %v1467_v38, %v1466_v37 }
 0x193   : > { %1469 = vst [vmem:[%s231_s30] sm:$0x1] %v1468_v39 }
 0x194   : > { %2188 = shalt.err (!%p2185_p3)
}
 0x195   : > { %s2189_s13 = scalar_lea.hbm %s1481_s9, 16  ;;  %s2193_s23 = scalar_lea.hbm %s2658_s5, 32 }
 0x196   : > { %p2190_p4 = scmp.ne.s32.totalorder %s1481_s9, %s2189_s13  ;;  %p2194_p9 = scmp.lt.s32.totalorder %s1481_s9, %s2658_s5 }
 0x197   : > { %p2195_p10 = scmp.lt.s32.totalorder %s2193_s23, %s2189_s13 }
 0x198   : > { %p2191_p7 = pnand %p2190_p4, %p2306_p5 }
 0x199   : > { %p2196_p11 = por %p2195_p10, %p2194_p9 }
 0x19a   : > { %p2192_p8 = pneg %p2191_p7 }
 0x19c   : > { %p2197_p12 = pnand %p2196_p11, %p2192_p8 }
 0x19e   : > { %2200 = shalt.err (!%p2197_p12)
}
 0x19f   : > { %2050 = dma.vmem_to_hbm [thread:$0]  (%p2306_p5), %s1484_s6, 16, %s1481_s9, %s1471_s10  }
 0x1a0 PF: > { %p2056_p13 = scmp.ge.s32.totalorder %s2235_s21, 2  ;;  %s1495_s15 = sand.u32 1, %s2223_s18  }
 0x1a1   : > { %s1496_s30 = scalar_lea.sflag [#allocation3], %s1495_s15 }
 0x1a2   : > { %p2053_p0 = pnand %p2056_p13, %p2310_p6 }
 0x1a4   : > { %p2054_p1 = pneg %p2053_p0 }
 0x1a6   : > { %2218 = dma.done.wait (%p2054_p1), %s1496_s30, 16  }
 0x1a7   : > { %2220 = vsyncadd (%p2054_p1), %s1496_s30, 4294967280  ;;  %p15_p2 = scmp.ge.s32.totalorder %s2293_s24, 4   ;;  %s2661_s18 = smov %s2227_s19 }
 0x1a8   : > { %s2662_s19 = smov %s2231_s20  ;;  %s2663_s20 = smov %s2304_s27 }
 0x1a9   : > { %s2664_s21 = smov %s2293_s24  ;;  %17 = sbr.rel (!%p15_p2) target bundleno = 3 (0x3), region = 86 }
 0x1ae   :  { %1500 = vsyncpa [#allocation3], 1 }
 0x1af   :  { %1502 = vsyncpa [#allocation3 + $0x1], 1 }

// kernel: resnet_feature_forward.4
= control target key start
LH: loop header
LB: loop body
LE: loop exit
PB: predicated region body
PF: predicated region fallthrough
CT: control target
= control target key end

     0   :  { %s14533_s12 = smov 0   ;;  %s18257_s0 = inlined_call_operand.vmem [shape: bf16[2,512,128], index: 0, kind: input, shape index: {}]   ;;  %s18258_s1 = inlined_call_operand.vmem [shape: bf16[49,128,128], index: 1, kind: input, shape index: {}]   ;;  %s18259_s2 = inlined_call_operand.vmem [shape: f32[1,128], index: 2, kind: input, shape index: {}]   ;;  %s18260_s3 = inlined_call_operand.vmem [shape: bf16[2,88,128], index: 3, kind: output, shape index: {}]  }
   0x1 LB: > { %s10448_s13 = sadd.s32 4294967295, %s14511_s12   ;;  %p10452_p0 = scmp.ge.s32.totalorder %s14511_s12, 1  ;;  %s14511_s12 = sphi %s14533_s12, %s13_s12  }
   0x2   : > { %p137_p1 = scmp.lt.s32.totalorder %s14511_s12, 3 }
   0x4   : > { %p138_p2 = pnand %p10452_p0, %p137_p1 }
   0x6   : > { %141 = sbr.rel (%p138_p2) target bundleno = 1027 (0x403), region = 32 }
   0xb   : > { %v13923_v0 = vld [vmem:[%s18258_s1 + $0x38] sm:$0xff]   ;;  %v13925_v2 = vld [vmem:[%s18258_s1 + $0x30] sm:$0xff]   ;;  %p161_p3 = scmp.lt.s32.totalorder %s10448_s13, 1  ;;  %v13927_v4 = vld [vmem:[%s18258_s1 + $0x28] sm:$0xff]   ;;  %vm639_vm0 = vsmask.f32 7424 }
   0xc   : > { %v13924_v1 = vld [vmem:[%s18258_s1 + $0x78] sm:$0xff]   ;;  %12526 = vmatprep.subr.bf16.mxu0 %v13923_v0  ;;  %v13926_v3 = vld [vmem:[%s18258_s1 + $0x70] sm:$0xff]   ;;  %v13928_v5 = vld [vmem:[%s18258_s1 + $0x68] sm:$0xff]   ;;  %vm1104_vm1 = vcmask 1046528   ;;  %vm1459_vm2 = vsmask.f32 6400 }
   0xd   : > { %12554 = vmatprep.subr.bf16.mxu1 %v13924_v1  ;;  %12527 = vmatpush3.bf16.msra.mxu0 %v13923_v0  ;;  %s18517_s13 = smov (!%p161_p3, %s10448_s13), 1  ;;  %v13929_v6 = vld [vmem:[%s18258_s1 + $0x20] sm:$0xff]   ;;  %v13931_v8 = vld [vmem:[%s18258_s1 + $0x18] sm:$0xff]   ;;  %v13933_v10 = vld [vmem:[%s18258_s1 + $0x10] sm:$0xff]   ;;  %vm3985_vm3 = vsmask.f32 5376 }
   0xe   : > { %12555 = vmatpush3.bf16.msra.mxu1 %v13924_v1  ;;  %12528 = vmatprep.subr.bf16.mxu0 %v13925_v2  ;;  %v13930_v7 = vld [vmem:[%s18258_s1 + $0x60] sm:$0xff]   ;;  %s11799_s30 = sshll.u32 %s18517_s13, 8  ;;  %v13932_v9 = vld [vmem:[%s18258_s1 + $0x58] sm:$0xff]   ;;  %v13934_v11 = vld [vmem:[%s18258_s1 + $0x50] sm:$0xff]   ;;  %vm4384_vm4 = vcmask 1044480   ;;  %vm3630_vm5 = vcmask 1045504  }
   0xf   : > { %12556 = vmatprep.subr.bf16.mxu1 %v13926_v3  ;;  %s14577_s10 = scalar_lea.vmem %s18257_s0, %s11799_s30  ;;  %v13935_v14 = vld [vmem:[%s18258_s1 + $0x8] sm:$0xff]   ;;  %v13937_v16 = vld [vmem:[%s18258_s1] sm:$0xff]   ;;  %v13943_v19 = vld [vmem:[%s18258_s1 + $0xb8] sm:$0xff]   ;;  %vm6435_vm6 = vsmask.f32 4352  ;;  %s13914_s9 = smul.u32 44, %s18517_s13 }
  0x10   : > { %v13939_v12 = vld [vmem:[%s14577_s10] sm:$0xff]   ;;  %v13936_v15 = vld [vmem:[%s18258_s1 + $0x48] sm:$0xff]   ;;  %v13944_v20 = vld [vmem:[%s18258_s1 + $0xf8] sm:$0xff]  }
  0x11   : > { %12529 = vmatpush3.bf16.msra.mxu0 %v13925_v2  ;;  %v13940_v13 = vld [vmem:[%s14577_s10 + $0x40] sm:$0xff]   ;;  %12542 = vmatprep.mubr.bf16.mxu0 %v13939_v12  ;;  %v13941_v18 = vld [vmem:[%s14577_s10 + $0x8] sm:$0xff]   ;;  %v13945_v22 = vld [vmem:[%s18258_s1 + $0xb0] sm:$0xff]   ;;  %s18245_s14 = scalar_lea.vmem %s18260_s3, %s13914_s9 }
  0x12   : > { %12557 = vmatpush3.bf16.msra.mxu1 %v13926_v3  ;;  %12530 = vmatprep.subr.bf16.mxu0 %v13927_v4  ;;  %v13938_v17 = vld [vmem:[%s18258_s1 + $0x40] sm:$0xff]   ;;  %v13942_v21 = vld [vmem:[%s14577_s10 + $0x48] sm:$0xff]   ;;  %v13946_v23 = vld [vmem:[%s18258_s1 + $0xf0] sm:$0xff]  }
  0x13   : > { %12558 = vmatprep.subr.bf16.mxu1 %v13928_v5  ;;  %12570 = vmatprep.mubr.bf16.mxu1 %v13940_v13  ;;  %v13947_v24 = vld [vmem:[%s14577_s10 + $0x10] sm:$0xff]   ;;  %v13948_v26 = vld [vmem:[%s18258_s1 + $0xa8] sm:$0xff]   ;;  %v13950_v28 = vld [vmem:[%s14577_s10 + $0x18] sm:$0xff]  }
  0x14   : > { %v13951_v25 = vld [vmem:[%s14577_s10 + $0x50] sm:$0xff]   ;;  %v13949_v27 = vld [vmem:[%s18258_s1 + $0xe8] sm:$0xff]   ;;  %v13952_v29 = vld [vmem:[%s14577_s10 + $0x58] sm:$0xff]  }
  0x15   : > { %12531 = vmatpush3.bf16.msra.mxu0 %v13927_v4  ;;  %v13953_v30 = vld [vmem:[%s18258_s1 + $0xa0] sm:$0xff]   ;;  %v13956_v33 = vld [vmem:[%s18258_s1 + $0x98] sm:$0xff]   ;;  %v13958_v38 = vld [vmem:[%s14577_s10 + $0x28] ss:$0 sps:$4 sm:$0xff]  }
  0x16   : > { %12559 = vmatpush3.bf16.msra.mxu1 %v13928_v5  ;;  %12532 = vmatprep.subr.bf16.mxu0 %v13929_v6  ;;  %v13954_v31 = vld [vmem:[%s18258_s1 + $0xe0] sm:$0xff]   ;;  %v13957_v35 = vld [vmem:[%s18258_s1 + $0xd8] sm:$0xff]   ;;  %v14644_v40 = vld [vmem:[%s14577_s10 + $0x8] sm:$0xff]  }
  0x17   : > { %12560 = vmatprep.subr.bf16.mxu1 %v13930_v7  ;;  %v13955_v32 = vld [vmem:[%s14577_s10 + $0x20] sm:$0xff]   ;;  %v13960_v41 = vld [vmem:[%s14577_s10 + $0x68] ss:$0 sps:$4 sm:$0xff]   ;;  %v13961_v44 = vld [vmem:[%s18258_s1 + $0x90] sm:$0xff]   ;;  %v648_v47 = vshll.u32 %v14644_v40, 16  ;;  %v652_v2 = vshrl.u32 %v14644_v40, 16 }
  0x18   : > { %v13959_v34 = vld [vmem:[%s14577_s10 + $0x60] sm:$0xff]   ;;  %v14657_v49 = vld [vmem:[%s14577_s10 + $0x48] sm:$0xff]   ;;  %v13962_v52 = vld [vmem:[%s18258_s1 + $0xd0] sm:$0xff]  }
  0x19   : > { %12533 = vmatpush3.bf16.msra.mxu0 %v13929_v6  ;;  %v580_v36 = vld [vmem:[%s14577_s10] sm:$0xf]  ;;  %v14639_v37 = vld [vmem:[%s14577_s10 + $0x4] sm:$0xf]  ;;  %v650_v51 = vrot.slane %v648_v47, 1  ;;  %v899_v55 = vshll.u32 %v14657_v49, 16 }
  0x1a   : > { %12561 = vmatpush3.bf16.msra.mxu1 %v13930_v7  ;;  %12534 = vmatprep.subr.bf16.mxu0 %v13931_v8  ;;  %v10517_v39 = vcombine.low %v580_v36, %v14639_v37  ;;  %v832_v42 = vld [vmem:[%s14577_s10 + $0x40] sm:$0xf]  ;;  %v14649_v43 = vld [vmem:[%s14577_s10 + $0x44] sm:$0xf]  ;;  %v13963_v57 = vld [vmem:[%s18258_s1 + $0x88] sm:$0xff]   ;;  %v903_v7 = vshrl.u32 %v14657_v49, 16 }
  0x1b   : > { %12562 = vmatprep.subr.bf16.mxu1 %v13932_v9  ;;  %v10547_v48 = vcombine.low %v832_v42, %v14649_v43  ;;  %v901_v59 = vrot.slane %v899_v55, 1  ;;  %v14669_v60 = vld [vmem:[%s14577_s10 + $0x10] sm:$0xff]   ;;  %v13964_v63 = vld [vmem:[%s18258_s1 + $0xc8] sm:$0xff]   ;;  %v13965_v1 = vld [vmem:[%s18258_s1 + $0x80] sm:$0xff]   ;;  %v654_v13 = vor.u32 %v652_v2, %v650_v51 }
  0x1c   : > { %v641_v45 = vshrl.u32 %v10517_v39, 16  ;;  %v643_v46 = vshll.u32 %v10517_v39, 16  ;;  %v14673_v62 = vld [vmem:[%s14577_s10 + $0x50] sm:$0xff]   ;;  %v13966_v3 = vld [vmem:[%s18258_s1 + $0xc0] sm:$0xff]   ;;  %v656_v5 = vshll.u32 %v14669_v60, 16  ;;  %v14688_v6 = vld [vmem:[%s14577_s10 + $0x18] sm:$0xff]  }
  0x1d   : > { %12535 = vmatpush3.bf16.msra.mxu0 %v13931_v8  ;;  %v892_v53 = vshrl.u32 %v10547_v48, 16  ;;  %v894_v54 = vshll.u32 %v10547_v48, 16  ;;  %v907_v8 = vshll.u32 %v14673_v62, 16  ;;  %v664_v12 = vshll.u32 %v14688_v6, 16 }
  0x1e   : > { %12563 = vmatpush3.bf16.msra.mxu1 %v13932_v9  ;;  %12536 = vmatprep.subr.bf16.mxu0 %v13933_v10  ;;  %v645_v50 = vrot.slane %v643_v46, 1  ;;  %v14693_v9 = vld [vmem:[%s14577_s10 + $0x20] sm:$0xff]   ;;  %v14747_v46 = vld [vmem:[%s14577_s10 + $0x68] sm:$0x1f]  }
  0x1f   : > { %12564 = vmatprep.subr.bf16.mxu1 %v13934_v11  ;;  %v896_v58 = vrot.slane %v894_v54, 1  ;;  %v676_v39 = vshrl.u32 %v14693_v9, 16  ;;  %v931_v54 = vshll.u32 %v14747_v46, 16 }
  0x20   : > { %v646_v56 = vor.u32 %v645_v50, %v641_v45  ;;  %v13979_v50 = vld [vmem:[%s18258_s1 + $0x128] sm:$0xff]  }
  0x21   : > { %12537 = vmatpush3.bf16.msra.mxu0 %v13933_v10  ;;  %v897_v0 = vor.u32 %v896_v58, %v892_v53  ;;  %v13973_v10 = vld [vmem:[%s18258_s1 + $0x138] sm:$0xff]   ;;  %v13980_v53 = vld [vmem:[%s18258_s1 + $0x168] sm:$0xff]  }
  0x22   : > { %12565 = vmatpush3.bf16.msra.mxu1 %v13934_v11  ;;  %12538 = vmatprep.subr.bf16.mxu0 %v13935_v14  ;;  %v651_v61 = vsel %vm639_vm0, %v646_v56, %v650_v51  ;;  %v660_v11 = vshrl.u32 %v14669_v60, 16 }
  0x23   : > { %12566 = vmatprep.subr.bf16.mxu1 %v13936_v15  ;;  %v902_v4 = vsel %vm639_vm0, %v897_v0, %v901_v59  ;;  %v13984_v0 = vld [vmem:[%s18258_s1 + $0x160] sm:$0xff]  }
  0x25   : > { %12539 = vmatpush3.bf16.msra.mxu0 %v13935_v14  ;;  %v658_v14 = vrot.slane %v656_v5, 1 }
  0x26   : > { %12567 = vmatpush3.bf16.msra.mxu1 %v13936_v15  ;;  %12540 = vmatprep.subr.bf16.mxu0 %v13937_v16  ;;  %v13974_v15 = vld [vmem:[%s18258_s1 + $0x178] sm:$0xff]  }
  0x27   : > { %12568 = vmatprep.subr.bf16.mxu1 %v13938_v17 }
  0x29   : > { %12541 = vmatpush3.bf16.msra.mxu0 %v13937_v16  ;;  %v911_v16 = vshrl.u32 %v14673_v62, 16 }
  0x2a   : > { %12569 = vmatpush3.bf16.msra.mxu1 %v13938_v17  ;;  %12582 = vmatprep.subr.bf16.mxu0 %v13943_v19  ;;  %v905_v17 = vor.u32 %v903_v7, %v901_v59  ;;  %v933_v59 = vrot.slane %v931_v54, 1  ;;  %v1261_v7 = vld [vmem:[%s14577_s10 + $0x40] sm:$0xe]  ;;  %v14002_v54 = vld [vmem:[%s18258_s1 + $0x1e8] sm:$0xff]  }
  0x2b   : > { %12610 = vmatprep.subr.bf16.mxu1 %v13944_v20 }
  0x2c   : > { %12543 = vmatmul.mubr.bf16.vlgmr.msra.gmra.mxu0 %v13941_v18  ;;  %v909_v18 = vrot.slane %v907_v8, 1 }
  0x2d   : > { %12571 = vmatmul.mubr.bf16.vlgmr.msra.gmra.mxu1 %v13942_v21  ;;  %12583 = vmatpush3.bf16.msra.mxu0 %v13943_v19  ;;  %v14709_v19 = vld [vmem:[%s14577_s10 + $0x58] sm:$0xff]   ;;  %v14713_v21 = vld [vmem:[%s14577_s10 + $0x60] sm:$0xff]  }
  0x2e   : > { %12611 = vmatpush3.bf16.msra.mxu1 %v13944_v20  ;;  %12584 = vmatprep.subr.bf16.mxu0 %v13945_v22  ;;  %v672_v20 = vshll.u32 %v14693_v9, 16  ;;  %v927_v48 = vshrl.u32 %v14713_v21, 16 }
  0x2f   : > { %12612 = vmatprep.subr.bf16.mxu1 %v13946_v23  ;;  %12546 = vmatprep.mubr.bf16.mxu0 %v13947_v24  ;;  %v666_v24 = vrot.slane %v664_v12, 1 }
  0x30   : > { %12574 = vmatprep.mubr.bf16.mxu1 %v13951_v25  ;;  %v915_v25 = vshll.u32 %v14709_v19, 16  ;;  %v674_v36 = vrot.slane %v672_v20, 1 }
  0x31   : > { %12585 = vmatpush3.bf16.msra.mxu0 %v13945_v22  ;;  %v13975_v22 = vld [vmem:[%s18258_s1 + $0x130] sm:$0xff]  }
  0x32   : > { %12613 = vmatpush3.bf16.msra.mxu1 %v13946_v23  ;;  %12586 = vmatprep.subr.bf16.mxu0 %v13948_v26  ;;  %v662_v23 = vor.u32 %v660_v11, %v658_v14  ;;  %v678_v55 = vor.u32 %v676_v39, %v674_v36 }
  0x33   : > { %12614 = vmatprep.subr.bf16.mxu1 %v13949_v27 }
  0x34   : > { %12547 = vmatmul.mubr.bf16.gmra.mxu0 %v13950_v28  ;;  %v668_v28 = vshrl.u32 %v14688_v6, 16 }
  0x35   : > { %12587 = vmatpush3.bf16.msra.mxu0 %v13948_v26  ;;  %12575 = vmatmul.mubr.bf16.gmra.mxu1 %v13952_v29  ;;  %v659_v26 = vsel %vm639_vm0, %v654_v13, %v658_v14  ;;  %v913_v29 = vor.u32 %v911_v16, %v909_v18  ;;  %v10602_v14 = vcombine.low %v1261_v7, %v14649_v43  ;;  %v13987_v16 = vld [vmem:[%s18258_s1 + $0x158] sm:$0xff]  }
  0x36   : > { %12615 = vmatpush3.bf16.msra.mxu1 %v13949_v27  ;;  %12588 = vmatprep.subr.bf16.mxu0 %v13953_v30  ;;  %v13976_v27 = vld [vmem:[%s18258_s1 + $0x170] sm:$0xff]   ;;  %v670_v42 = vor.u32 %v668_v28, %v666_v24  ;;  %v14005_v7 = vld [vmem:[%s18258_s1 + $0x198] sm:$0xff]  }
  0x37   : > { %12616 = vmatprep.subr.bf16.mxu1 %v13954_v31  ;;  %12550 = vmatprep.mubr.bf16.mxu0 %v13955_v32  ;;  %v910_v32 = vsel %vm639_vm0, %v905_v17, %v909_v18 }
  0x38   : > { %12578 = vmatprep.mubr.bf16.mxu1 %v13959_v34  ;;  %v923_v34 = vshll.u32 %v14713_v21, 16 }
  0x39   : > { %12589 = vmatpush3.bf16.msra.mxu0 %v13953_v30  ;;  %v919_v30 = vshrl.u32 %v14709_v19, 16 }
  0x3a   : > { %12617 = vmatpush3.bf16.msra.mxu1 %v13954_v31  ;;  %12590 = vmatprep.subr.bf16.mxu0 %v13956_v33  ;;  %v14730_v31 = vld [vmem:[%s14577_s10 + $0x28] sm:$0xf] }
  0x3b   : > { %12618 = vmatprep.subr.bf16.mxu1 %v13957_v35 }
  0x3c   : > { %12551 = vmatmul.mubr.bf16.gmra.mxu0 %v13958_v38 }
  0x3d   : > { %12591 = vmatpush3.bf16.msra.mxu0 %v13956_v33  ;;  %12579 = vmatmul.mubr.bf16.gmra.mxu1 %v13960_v41  ;;  %v917_v33 = vrot.slane %v915_v25, 1  ;;  %v667_v41 = vsel %vm639_vm0, %v662_v23, %v666_v24  ;;  %v1283_v23 = vrot.slane %v14657_v49, 1  ;;  %v13989_v24 = vld [vmem:[%s18258_s1 + $0x110] sm:$0xff]   ;;  %v13991_v49 = vld [vmem:[%s18258_s1 + $0x108] sm:$0xff]  }
  0x3e   : > { %12619 = vmatpush3.bf16.msra.mxu1 %v13957_v35  ;;  %12592 = vmatprep.subr.bf16.mxu0 %v13961_v44  ;;  %v591_v35 = vld [vmem:[%s14577_s10 + $0x2c] sm:$0x1]  ;;  %v13990_v25 = vld [vmem:[%s18258_s1 + $0x150] sm:$0xff]  }
  0x3f   : > { %12620 = vmatprep.subr.bf16.mxu1 %v13962_v52  ;;  %12598 = vmatprep.mubr.bf16.mxu0 %v651_v61  ;;  %v14738_v38 = vcombine.low %v14730_v31, %v591_v35  ;;  %v921_v51 = vor.u32 %v919_v30, %v917_v33  ;;  %v13993_v30 = vld [vmem:[%s18258_s1 + $0x100] sm:$0xff]   ;;  %v13997_v35 = vld [vmem:[%s18258_s1 + $0x1b8] sm:$0xff]  }
  0x40   : > { %12626 = vmatprep.mubr.bf16.mxu1 %v902_v4  ;;  %v1083_v4 = vld [vmem:[%s14577_s10] sm:$0xe] }
  0x41   : > { %12593 = vmatpush3.bf16.msra.mxu0 %v13961_v44  ;;  %v918_v44 = vsel %vm639_vm0, %v913_v29, %v917_v33  ;;  %v680_v45 = vshll.u32 %v14738_v38, 16  ;;  %v14774_v13 = vcombine.low %v1083_v4, %v14639_v37  ;;  %v1106_v37 = vrot.slane %v14644_v40, 1  ;;  %v13992_v29 = vld [vmem:[%s18258_s1 + $0x148] sm:$0xff]  }
  0x42   : > { %12621 = vmatpush3.bf16.msra.mxu1 %v13962_v52  ;;  %12594 = vmatprep.subr.bf16.mxu0 %v13963_v57  ;;  %v925_v52 = vrot.slane %v923_v34, 1  ;;  %v1108_v33 = vrot.slane %v14669_v60, 1  ;;  %v1285_v34 = vrot.slane %v14673_v62, 1  ;;  %v13999_v62 = vld [vmem:[%s18258_s1 + $0x1b0] sm:$0xff]  }
  0x43   : > { %12622 = vmatprep.subr.bf16.mxu1 %v13964_v63  ;;  %v682_v56 = vrot.slane %v680_v45, 1  ;;  %v1105_v17 = vrot.slane %v14774_v13, 1 }
  0x44   : > { %v929_v58 = vor.u32 %v927_v48, %v925_v52  ;;  %v926_v61 = vsel %vm639_vm0, %v921_v51, %v925_v52  ;;  %v1286_v45 = vsel %vm1104_vm1, %v1283_v23, %v1285_v34  ;;  %v14000_v48 = vld [vmem:[%s18258_s1 + $0x1f0] sm:$0xff]   ;;  %v14001_v52 = vld [vmem:[%s18258_s1 + $0x1a8] sm:$0xff]  }
  0x45   : > { %12595 = vmatpush3.bf16.msra.mxu0 %v13963_v57  ;;  %v675_v57 = vsel %vm639_vm0, %v670_v42, %v674_v36  ;;  %v13998_v36 = vld [vmem:[%s18258_s1 + $0x1f8] sm:$0xff]   ;;  %v1109_v42 = vsel %vm1104_vm1, %v1106_v37, %v1108_v33 }
  0x46   : > { %12623 = vmatpush3.bf16.msra.mxu1 %v13964_v63  ;;  %12596 = vmatprep.subr.bf16.mxu0 %v13965_v1  ;;  %v13983_v63 = vld [vmem:[%s18258_s1 + $0x120] sm:$0xff]   ;;  %v934_v8 = vsel %vm639_vm0, %v929_v58, %v933_v59 }
  0x47   : > { %12624 = vmatprep.subr.bf16.mxu1 %v13966_v3 }
  0x49   : > { %12597 = vmatpush3.bf16.msra.mxu0 %v13965_v1  ;;  %v684_v1 = vshrl.u32 %v14738_v38, 16 }
  0x4a   : > { %12625 = vmatpush3.bf16.msra.mxu1 %v13966_v3  ;;  %12638 = vmatprep.subr.bf16.mxu0 %v13973_v10  ;;  %v683_v3 = vsel %vm639_vm0, %v678_v55, %v682_v56  ;;  %v1114_v55 = vrot.slane %v14738_v38, 1  ;;  %v14004_v38 = vld [vmem:[%s18258_s1 + $0x1e0] sm:$0xff]  }
  0x4b   : > { %12666 = vmatprep.subr.bf16.mxu1 %v13974_v15  ;;  %v686_v18 = vor.u32 %v684_v1, %v682_v56  ;;  %v1461_v56 = vshrl.u32 %v14774_v13, 16 }
  0x4c   : > { %12599 = vmatmul.mubr.bf16.vlgmr.msra.gmra.mxu0 %v659_v26  ;;  %v1107_v26 = vsel %vm1104_vm1, %v1105_v17, %v1106_v37  ;;  %v1472_v17 = vrot.slane %v660_v11, 1  ;;  %v14011_v37 = vld [vmem:[%s18258_s1 + $0x180] sm:$0xff]   ;;  %v1476_v11 = vrot.slane %v668_v28, 1  ;;  %v14014_v28 = vld [vmem:[%s14577_s10 + $0x88] sm:$0xff]  }
  0x4d   : > { %12627 = vmatmul.mubr.bf16.vlgmr.msra.gmra.mxu1 %v910_v32  ;;  %12639 = vmatpush3.bf16.msra.mxu0 %v13973_v10  ;;  %v935_v10 = vshrl.u32 %v14747_v46, 16  ;;  %v13994_v32 = vld [vmem:[%s18258_s1 + $0x140] sm:$0xff]  }
  0x4e   : > { %12667 = vmatpush3.bf16.msra.mxu1 %v13974_v15  ;;  %12640 = vmatprep.subr.bf16.mxu0 %v13975_v22  ;;  %v13986_v15 = vld [vmem:[%s18258_s1 + $0x118] sm:$0xff]  }
  0x4f   : > { %12668 = vmatprep.subr.bf16.mxu1 %v13976_v27  ;;  %12602 = vmatprep.mubr.bf16.mxu0 %v667_v41  ;;  %v937_v43 = vor.u32 %v935_v10, %v933_v59  ;;  %v1110_v41 = vrot.slane %v14688_v6, 1  ;;  %v1291_v59 = vrot.slane %v14747_v46, 1  ;;  %v1468_v46 = vrot.slane %v652_v2, 1  ;;  %v14006_v2 = vld [vmem:[%s18258_s1 + $0x1d8] sm:$0xff]   ;;  %v14008_v10 = vld [vmem:[%s18258_s1 + $0x1d0] sm:$0xff]  }
  0x50   : > { %12630 = vmatprep.mubr.bf16.mxu1 %v918_v44  ;;  %v1287_v44 = vrot.slane %v14709_v19, 1  ;;  %v1112_v19 = vrot.slane %v14693_v9, 1  ;;  %v14016_v6 = vld [vmem:[%s18258_s1 + $0x278] sm:$0xff]   ;;  %v14018_v9 = vld [vmem:[%s18258_s1 + $0x270] sm:$0xff]  }
  0x51   : > { %12641 = vmatpush3.bf16.msra.mxu0 %v13975_v22  ;;  %v1282_v22 = vrot.slane %v10602_v14, 1  ;;  %v14013_v14 = vld [vmem:[%s14577_s10 + $0x80] sm:$0xff]  }
  0x52   : > { %12669 = vmatpush3.bf16.msra.mxu1 %v13976_v27  ;;  %12642 = vmatprep.subr.bf16.mxu0 %v13979_v50  ;;  %v1288_v51 = vsel %vm1104_vm1, %v1285_v34, %v1287_v44  ;;  %v1113_v58 = vsel %vm1104_vm1, %v1110_v41, %v1112_v19 }
  0x53   : > { %12670 = vmatprep.subr.bf16.mxu1 %v13980_v53  ;;  %v1284_v27 = vsel %vm1104_vm1, %v1282_v22, %v1283_v23  ;;  %v14012_v22 = vld [vmem:[%s18258_s1 + $0x1c0] sm:$0xff]   ;;  %v1477_v23 = vrot.slane %v664_v12, 2  ;;  %v1481_v12 = vrot.slane %v672_v20, 2  ;;  %v14021_v20 = vld [vmem:[%s14577_s10 + $0x90] sm:$0xff]  }
  0x54   : > { %12603 = vmatmul.mubr.bf16.gmra.mxu0 %v675_v57  ;;  %v1464_v57 = vshll.u32 %v14774_v13, 16 }
  0x55   : > { %12643 = vmatpush3.bf16.msra.mxu0 %v13979_v50  ;;  %12631 = vmatmul.mubr.bf16.gmra.mxu1 %v926_v61  ;;  %v1111_v50 = vsel %vm1104_vm1, %v1108_v33, %v1110_v41  ;;  %v14003_v61 = vld [vmem:[%s18258_s1 + $0x1a0] sm:$0xff]   ;;  %v14019_v41 = vld [vmem:[%s18258_s1 + $0x228] sm:$0xff]  }
  0x56   : > { %12671 = vmatpush3.bf16.msra.mxu1 %v13980_v53  ;;  %12644 = vmatprep.subr.bf16.mxu0 %v13983_v63  ;;  %v1289_v53 = vrot.slane %v14713_v21, 1  ;;  %v1466_v1 = vrot.slane %v1464_v57, 2  ;;  %v14026_v57 = vld [vmem:[%s18258_s1 + $0x218] sm:$0xff]  }
  0x57   : > { %12672 = vmatprep.subr.bf16.mxu1 %v13984_v0  ;;  %12606 = vmatprep.mubr.bf16.mxu0 %v683_v3  ;;  %v1469_v3 = vrot.slane %v648_v47, 2 }
  0x58   : > { %12634 = vmatprep.mubr.bf16.mxu1 %v934_v8  ;;  %v1290_v21 = vsel %vm1104_vm1, %v1287_v44, %v1289_v53  ;;  %v1292_v4 = vsel %vm1104_vm1, %v1289_v53, %v1291_v59  ;;  %v14007_v8 = vld [vmem:[%s18258_s1 + $0x190] sm:$0xff]   ;;  %v14022_v44 = vld [vmem:[%s14577_s10 + $0x98] sm:$0xff]   ;;  %v14028_v53 = vld [vmem:[%s14577_s10 + $0xa0] sm:$0xff]  }
  0x59   : > { %12645 = vmatpush3.bf16.msra.mxu0 %v13983_v63  ;;  %v1115_v63 = vsel %vm1104_vm1, %v1112_v19, %v1114_v55  ;;  %v1470_v47 = vor.u32 %v1469_v3, %v1468_v46  ;;  %v14023_v19 = vld [vmem:[%s18258_s1 + $0x220] sm:$0xff]   ;;  %v14032_v46 = vld [vmem:[%s18258_s1 + $0x208] sm:$0xff]  }
  0x5a   : > { %12673 = vmatpush3.bf16.msra.mxu1 %v13984_v0  ;;  %12646 = vmatprep.subr.bf16.mxu0 %v13986_v15  ;;  %v1463_v0 = vrot.slane %v1461_v56, 1 }
  0x5b   : > { %12674 = vmatprep.subr.bf16.mxu1 %v13987_v16 }
  0x5c   : > { %12607 = vmatmul.mubr.bf16.gmra.mxu0 %v686_v18  ;;  %v1467_v40 = vor.u32 %v1466_v1, %v1463_v0  ;;  %v1473_v18 = vrot.slane %v656_v5, 2  ;;  %v14015_v5 = vld [vmem:[%s18258_s1 + $0x238] sm:$0xff]   ;;  %v14036_v0 = vld [vmem:[%s14577_s10 + $0xc0] sm:$0xff]   ;;  %v14950_v1 = vld [vmem:[%s14577_s10 + $0x90] sm:$0xff]  }
  0x5d   : > { %12647 = vmatpush3.bf16.msra.mxu0 %v13986_v15  ;;  %12635 = vmatmul.mubr.bf16.gmra.mxu1 %v937_v43  ;;  %v14009_v15 = vld [vmem:[%s18258_s1 + $0x188] sm:$0xff]  }
  0x5e   : > { %12675 = vmatpush3.bf16.msra.mxu1 %v13987_v16  ;;  %12648 = vmatprep.subr.bf16.mxu0 %v13989_v24  ;;  %v1471_v13 = vsel %vm1459_vm2, %v1467_v40, %v1470_v47  ;;  %v14010_v16 = vld [vmem:[%s18258_s1 + $0x1c8] sm:$0xff]   ;;  %v1474_v60 = vor.u32 %v1473_v18, %v1472_v17  ;;  %v14034_v40 = vld [vmem:[%s18258_s1 + $0x200] sm:$0xff]  }
  0x5f   : > { %12676 = vmatprep.subr.bf16.mxu1 %v13990_v25  ;;  %12654 = vmatprep.mubr.bf16.mxu0 %v1107_v26  ;;  %v1438_v43 = vld [vmem:[%s14577_s10 + $0x2c] sm:$0x3]  ;;  %v1478_v26 = vor.u32 %v1477_v23, %v1476_v11  ;;  %v14981_v17 = vld [vmem:[%s14577_s10 + $0xa8] sm:$0xf]  ;;  %v14043_v23 = vld [vmem:[%s18258_s1 + $0x2b0] sm:$0xff]  }
  0x60   : > { %12682 = vmatprep.mubr.bf16.mxu1 %v1284_v27  ;;  %v14039_v18 = vld [vmem:[%s14577_s10 + $0xc8] sm:$0xff]  }
  0x61   : > { %12649 = vmatpush3.bf16.msra.mxu0 %v13989_v24  ;;  %v10627_v24 = vcombine.low %v14730_v31, %v1438_v43  ;;  %v14017_v31 = vld [vmem:[%s18258_s1 + $0x230] sm:$0xff]   ;;  %v2051_v43 = vld [vmem:[%s14577_s10 + $0xac] sm:$0x1] }
  0x62   : > { %12677 = vmatpush3.bf16.msra.mxu1 %v13990_v25  ;;  %12650 = vmatprep.subr.bf16.mxu0 %v13991_v49  ;;  %v1480_v25 = vrot.slane %v676_v39, 1  ;;  %v1475_v39 = vsel %vm1459_vm2, %v1470_v47, %v1474_v60  ;;  %v14035_v47 = vld [vmem:[%s18258_s1 + $0x240] sm:$0xff]  }
  0x63   : > { %12678 = vmatprep.subr.bf16.mxu1 %v13992_v29  ;;  %v1485_v27 = vshrl.u32 %v10627_v24, 16 }
  0x65   : > { %12651 = vmatpush3.bf16.msra.mxu0 %v13991_v49  ;;  %v1488_v49 = vshll.u32 %v10627_v24, 16  ;;  %v1487_v33 = vrot.slane %v1485_v27, 1  ;;  %v2291_v24 = vld [vmem:[%s14577_s10 + $0xc0] sm:$0xf] }
  0x66   : > { %12679 = vmatpush3.bf16.msra.mxu1 %v13992_v29  ;;  %12652 = vmatprep.subr.bf16.mxu0 %v13993_v30  ;;  %v2040_v29 = vld [vmem:[%s14577_s10 + $0x80] sm:$0xf] }
  0x67   : > { %12680 = vmatprep.subr.bf16.mxu1 %v13994_v32  ;;  %v1490_v34 = vrot.slane %v1488_v49, 2 }
  0x69   : > { %12653 = vmatpush3.bf16.msra.mxu0 %v13993_v30  ;;  %v14905_v30 = vld [vmem:[%s14577_s10 + $0x84] sm:$0xf] }
  0x6a   : > { %12681 = vmatpush3.bf16.msra.mxu1 %v13994_v32  ;;  %12694 = vmatprep.subr.bf16.mxu0 %v13997_v35  ;;  %v1479_v32 = vsel %vm1459_vm2, %v1474_v60, %v1478_v26  ;;  %v14997_v60 = vld [vmem:[%s14577_s10 + $0xc4] sm:$0xf] }
  0x6b   : > { %12722 = vmatprep.subr.bf16.mxu1 %v13998_v36  ;;  %v10742_v27 = vcombine.low %v2291_v24, %v14997_v60 }
  0x6c   : > { %12655 = vmatmul.mubr.bf16.vlgmr.msra.gmra.mxu0 %v1109_v42  ;;  %v14020_v42 = vld [vmem:[%s18258_s1 + $0x268] sm:$0xff]  }
  0x6d   : > { %12683 = vmatmul.mubr.bf16.vlgmr.msra.gmra.mxu1 %v1286_v45  ;;  %12695 = vmatpush3.bf16.msra.mxu0 %v13997_v35  ;;  %v1482_v35 = vor.u32 %v1481_v12, %v1480_v25  ;;  %v1491_v45 = vor.u32 %v1490_v34, %v1487_v33  ;;  %v14048_v34 = vld [vmem:[%s18258_s1 + $0x2e8] sm:$0xff]  }
  0x6e   : > { %12723 = vmatpush3.bf16.msra.mxu1 %v13998_v36  ;;  %12696 = vmatprep.subr.bf16.mxu0 %v13999_v62  ;;  %v10712_v36 = vcombine.low %v2040_v29, %v14905_v30 }
  0x6f   : > { %12724 = vmatprep.subr.bf16.mxu1 %v14000_v48  ;;  %12658 = vmatprep.mubr.bf16.mxu0 %v1111_v50 }
  0x70   : > { %12686 = vmatprep.mubr.bf16.mxu1 %v1288_v51  ;;  %v2102_v50 = vshll.u32 %v10712_v36, 16  ;;  %v14024_v51 = vld [vmem:[%s18258_s1 + $0x260] sm:$0xff]  }
  0x71   : > { %12697 = vmatpush3.bf16.msra.mxu0 %v13999_v62  ;;  %v1483_v62 = vsel %vm1459_vm2, %v1478_v26, %v1482_v35  ;;  %v14045_v26 = vld [vmem:[%s14577_s10 + $0xd0] sm:$0xff]  }
  0x72   : > { %12725 = vmatpush3.bf16.msra.mxu1 %v14000_v48  ;;  %12698 = vmatprep.subr.bf16.mxu0 %v14001_v52  ;;  %v14922_v48 = vld [vmem:[%s14577_s10 + $0x88] sm:$0xff]  }
  0x73   : > { %12726 = vmatprep.subr.bf16.mxu1 %v14002_v54  ;;  %v2107_v56 = vshll.u32 %v14922_v48, 16 }
  0x74   : > { %12659 = vmatmul.mubr.bf16.gmra.mxu0 %v1113_v58  ;;  %v14027_v58 = vld [vmem:[%s18258_s1 + $0x258] sm:$0xff]  }
  0x75   : > { %12699 = vmatpush3.bf16.msra.mxu0 %v14001_v52  ;;  %12687 = vmatmul.mubr.bf16.gmra.mxu1 %v1290_v21  ;;  %v1492_v52 = vsel %vm1459_vm2, %v1482_v35, %v1491_v45  ;;  %v14030_v21 = vld [vmem:[%s18258_s1 + $0x210] sm:$0xff]   ;;  %v14051_v35 = vld [vmem:[%s18258_s1 + $0x2a0] sm:$0xff]  }
  0x76   : > { %12727 = vmatpush3.bf16.msra.mxu1 %v14002_v54  ;;  %12700 = vmatprep.subr.bf16.mxu0 %v14003_v61  ;;  %v2100_v54 = vshrl.u32 %v10712_v36, 16  ;;  %v15030_v36 = vld [vmem:[%s14577_s10 + $0xc8] sm:$0xff]  }
  0x77   : > { %12728 = vmatprep.subr.bf16.mxu1 %v14004_v38  ;;  %12662 = vmatprep.mubr.bf16.mxu0 %v1115_v63  ;;  %v14031_v63 = vld [vmem:[%s18258_s1 + $0x250] sm:$0xff]  }
  0x78   : > { %12690 = vmatprep.mubr.bf16.mxu1 %v1292_v4  ;;  %v14033_v4 = vld [vmem:[%s18258_s1 + $0x248] sm:$0xff]  }
  0x79   : > { %12701 = vmatpush3.bf16.msra.mxu0 %v14003_v61 }
  0x7a   : > { %12729 = vmatpush3.bf16.msra.mxu1 %v14004_v38  ;;  %12702 = vmatprep.subr.bf16.mxu0 %v14005_v7  ;;  %v2109_v38 = vrot.slane %v2107_v56, 1 }
  0x7b   : > { %12730 = vmatprep.subr.bf16.mxu1 %v14006_v2 }
  0x7c   : > { %12663 = vmatmul.mubr.bf16.gmra.mxu0 %v1114_v55  ;;  %v2104_v55 = vrot.slane %v2102_v50, 1  ;;  %v2542_v50 = vld [vmem:[%s14577_s10 + $0x80] sm:$0xe] }
  0x7d   : > { %12703 = vmatpush3.bf16.msra.mxu0 %v14005_v7  ;;  %12691 = vmatmul.mubr.bf16.gmra.mxu1 %v1291_v59  ;;  %v14029_v59 = vld [vmem:[%s14577_s10 + $0xa8] ss:$0 sps:$4 sm:$0xff]   ;;  %v2115_v7 = vshll.u32 %v14950_v1, 16 }
  0x7e   : > { %12731 = vmatpush3.bf16.msra.mxu1 %v14006_v2  ;;  %12704 = vmatprep.subr.bf16.mxu0 %v14007_v8  ;;  %v2105_v61 = vor.u32 %v2104_v55, %v2100_v54  ;;  %v14961_v2 = vld [vmem:[%s14577_s10 + $0x98] sm:$0xff]  }
  0x7f   : > { %12732 = vmatprep.subr.bf16.mxu1 %v14008_v10  ;;  %12710 = vmatprep.mubr.bf16.mxu0 %v1471_v13  ;;  %v2123_v13 = vshll.u32 %v14961_v2, 16  ;;  %v2127_v12 = vshrl.u32 %v14961_v2, 16  ;;  %v14055_v54 = vld [vmem:[%s18258_s1 + $0x298] sm:$0xff]  }
  0x80   : > { %12738 = vmatprep.mubr.bf16.mxu1 %v14013_v14  ;;  %v2110_v3 = vsel %vm639_vm0, %v2105_v61, %v2109_v38  ;;  %v14041_v14 = vld [vmem:[%s18258_s1 + $0x2b8] sm:$0xff]  }
  0x81   : > { %12705 = vmatpush3.bf16.msra.mxu0 %v14007_v8  ;;  %v2111_v8 = vshrl.u32 %v14922_v48, 16  ;;  %v2125_v11 = vrot.slane %v2123_v13, 1 }
  0x82   : > { %12733 = vmatpush3.bf16.msra.mxu1 %v14008_v10  ;;  %12706 = vmatprep.subr.bf16.mxu0 %v14009_v15  ;;  %v2117_v10 = vrot.slane %v2115_v7, 1 }
  0x83   : > { %12734 = vmatprep.subr.bf16.mxu1 %v14010_v16 }
  0x85   : > { %12707 = vmatpush3.bf16.msra.mxu0 %v14009_v15  ;;  %v2119_v15 = vshrl.u32 %v14950_v1, 16 }
  0x86   : > { %12735 = vmatpush3.bf16.msra.mxu1 %v14010_v16  ;;  %12708 = vmatprep.subr.bf16.mxu0 %v14011_v37  ;;  %v14978_v16 = vld [vmem:[%s14577_s10 + $0xa0] sm:$0xff]  }
  0x87   : > { %12736 = vmatprep.subr.bf16.mxu1 %v14012_v22  ;;  %v2121_v25 = vor.u32 %v2119_v15, %v2117_v10 }
  0x89   : > { %12709 = vmatpush3.bf16.msra.mxu0 %v14011_v37  ;;  %v2113_v37 = vor.u32 %v2111_v8, %v2109_v38  ;;  %v2126_v49 = vsel %vm639_vm0, %v2121_v25, %v2125_v11 }
  0x8a   : > { %12737 = vmatpush3.bf16.msra.mxu1 %v14012_v22  ;;  %12750 = vmatprep.subr.bf16.mxu0 %v14015_v5  ;;  %v14042_v22 = vld [vmem:[%s18258_s1 + $0x2f8] sm:$0xff]  }
  0x8b   : > { %12778 = vmatprep.subr.bf16.mxu1 %v14016_v6 }
  0x8c   : > { %12711 = vmatmul.mubr.bf16.vlgmr.msra.gmra.mxu0 %v1475_v39  ;;  %v2135_v39 = vshrl.u32 %v14978_v16, 16 }
  0x8d   : > { %12739 = vmatmul.mubr.bf16.vlgmr.msra.gmra.mxu1 %v14014_v28  ;;  %12751 = vmatpush3.bf16.msra.mxu0 %v14015_v5  ;;  %v14044_v5 = vld [vmem:[%s18258_s1 + $0x2f0] sm:$0xff]   ;;  %v15005_v28 = vcombine.low %v14981_v17, %v2051_v43 }
  0x8e   : > { %12779 = vmatpush3.bf16.msra.mxu1 %v14016_v6  ;;  %12752 = vmatprep.subr.bf16.mxu0 %v14017_v31  ;;  %v2118_v6 = vsel %vm639_vm0, %v2113_v37, %v2117_v10  ;;  %v14060_v10 = vld [vmem:[%s18258_s1 + $0x288] sm:$0xff]   ;;  %v15073_v37 = vld [vmem:[%s14577_s10 + $0xd8] sm:$0xff]  }
  0x8f   : > { %12780 = vmatprep.subr.bf16.mxu1 %v14018_v9  ;;  %12714 = vmatprep.mubr.bf16.mxu0 %v1479_v32  ;;  %v2139_v29 = vshll.u32 %v15005_v28, 16  ;;  %v2129_v32 = vor.u32 %v2127_v12, %v2125_v11  ;;  %v14063_v11 = vld [vmem:[%s18258_s1 + $0x2c0] sm:$0xff]   ;;  %v2374_v24 = vshll.u32 %v15073_v37, 16 }
  0x90   : > { %12742 = vmatprep.mubr.bf16.mxu1 %v14021_v20  ;;  %v14047_v20 = vld [vmem:[%s18258_s1 + $0x2a8] sm:$0xff]  }
  0x91   : > { %12753 = vmatpush3.bf16.msra.mxu0 %v14017_v31  ;;  %v2131_v31 = vshll.u32 %v14978_v16, 16 }
  0x92   : > { %12781 = vmatpush3.bf16.msra.mxu1 %v14018_v9  ;;  %12754 = vmatprep.subr.bf16.mxu0 %v14019_v41  ;;  %v14046_v9 = vld [vmem:[%s14577_s10 + $0xd8] sm:$0xff]  }
  0x93   : > { %12782 = vmatprep.subr.bf16.mxu1 %v14020_v42  ;;  %v2133_v33 = vrot.slane %v2131_v31, 1 }
  0x94   : > { %12715 = vmatmul.mubr.bf16.gmra.mxu0 %v1483_v62 }
  0x95   : > { %12755 = vmatpush3.bf16.msra.mxu0 %v14019_v41  ;;  %12743 = vmatmul.mubr.bf16.gmra.mxu1 %v14022_v44  ;;  %v2353_v41 = vshll.u32 %v10742_v27, 16  ;;  %v2137_v44 = vor.u32 %v2135_v39, %v2133_v33  ;;  %v2134_v62 = vsel %vm639_vm0, %v2129_v32, %v2133_v33  ;;  %v15097_v32 = vld [vmem:[%s14577_s10 + $0xe8] sm:$0x1f]  }
  0x96   : > { %12783 = vmatpush3.bf16.msra.mxu1 %v14020_v42  ;;  %12756 = vmatprep.subr.bf16.mxu0 %v14023_v19  ;;  %v14052_v42 = vld [vmem:[%s18258_s1 + $0x2e0] sm:$0xff]  }
  0x97   : > { %12784 = vmatprep.subr.bf16.mxu1 %v14024_v51  ;;  %12718 = vmatprep.mubr.bf16.mxu0 %v1492_v52  ;;  %v2355_v52 = vrot.slane %v2353_v41, 1 }
  0x98   : > { %12746 = vmatprep.mubr.bf16.mxu1 %v14028_v53  ;;  %v2358_v53 = vshll.u32 %v15030_v36, 16 }
  0x99   : > { %12757 = vmatpush3.bf16.msra.mxu0 %v14023_v19  ;;  %v14053_v19 = vld [vmem:[%s14577_s10 + $0xe0] sm:$0xff]  }
  0x9a   : > { %12785 = vmatpush3.bf16.msra.mxu1 %v14024_v51  ;;  %12758 = vmatprep.subr.bf16.mxu0 %v14026_v57  ;;  %v2351_v51 = vshrl.u32 %v10742_v27, 16  ;;  %v2360_v38 = vrot.slane %v2358_v53, 1  ;;  %v14068_v27 = vld [vmem:[%s18258_s1 + $0x338] sm:$0xff]  }
  0x9b   : > { %12786 = vmatprep.subr.bf16.mxu1 %v14027_v58 }
  0x9c   : > { %12719 = vmatmul.mubr.bf16.gmra.mxu0 %v1491_v45  ;;  %v2141_v45 = vrot.slane %v2139_v29, 1  ;;  %v2356_v61 = vor.u32 %v2355_v52, %v2351_v51 }
  0x9d   : > { %12759 = vmatpush3.bf16.msra.mxu0 %v14026_v57  ;;  %12747 = vmatmul.mubr.bf16.gmra.mxu1 %v14029_v59  ;;  %v2143_v57 = vshrl.u32 %v15005_v28, 16  ;;  %v14054_v59 = vld [vmem:[%s14577_s10 + $0xe8] ss:$0 sps:$4 sm:$0xff]  }
  0x9e   : > { %12787 = vmatpush3.bf16.msra.mxu1 %v14027_v58  ;;  %12760 = vmatprep.subr.bf16.mxu0 %v14030_v21  ;;  %v2142_v55 = vsel %vm639_vm0, %v2137_v44, %v2141_v45  ;;  %v15047_v58 = vcombine.low %v2542_v50, %v14905_v30  ;;  %v2564_v30 = vrot.slane %v14922_v48, 1  ;;  %v14071_v44 = vld [vmem:[%s18258_s1 + $0x370] sm:$0xff]   ;;  %v2390_v50 = vshll.u32 %v15097_v32, 16 }
  0x9f   : > { %12788 = vmatprep.subr.bf16.mxu1 %v14031_v63  ;;  %12766 = vmatprep.mubr.bf16.mxu0 %v14036_v0 }
  0xa0   : > { %12794 = vmatprep.mubr.bf16.mxu1 %v2110_v3  ;;  %v2563_v0 = vrot.slane %v15047_v58, 1  ;;  %v14059_v3 = vld [vmem:[%s18258_s1 + $0x2d0] sm:$0xff]  }
  0xa1   : > { %12761 = vmatpush3.bf16.msra.mxu0 %v14030_v21  ;;  %v14056_v21 = vld [vmem:[%s18258_s1 + $0x2d8] sm:$0xff]  }
  0xa2   : > { %12789 = vmatpush3.bf16.msra.mxu1 %v14031_v63  ;;  %12762 = vmatprep.subr.bf16.mxu0 %v14032_v46  ;;  %v2145_v63 = vor.u32 %v2143_v57, %v2141_v45  ;;  %v2925_v57 = vrot.slane %v2111_v8, 1  ;;  %v2918_v8 = vshrl.u32 %v15047_v58, 16 }
  0xa3   : > { %12790 = vmatprep.subr.bf16.mxu1 %v14033_v4 }
  0xa5   : > { %12763 = vmatpush3.bf16.msra.mxu0 %v14032_v46  ;;  %v14058_v46 = vld [vmem:[%s18258_s1 + $0x290] sm:$0xff]  }
  0xa6   : > { %12791 = vmatpush3.bf16.msra.mxu1 %v14033_v4  ;;  %12764 = vmatprep.subr.bf16.mxu0 %v14034_v40  ;;  %v2361_v4 = vsel %vm639_vm0, %v2356_v61, %v2360_v38  ;;  %v14076_v61 = vld [vmem:[%s18258_s1 + $0x320] sm:$0xff]  }
  0xa7   : > { %12792 = vmatprep.subr.bf16.mxu1 %v14035_v47 }
  0xa9   : > { %12765 = vmatpush3.bf16.msra.mxu0 %v14034_v40  ;;  %v15063_v40 = vld [vmem:[%s14577_s10 + $0xd0] sm:$0xff]  }
  0xaa   : > { %12793 = vmatpush3.bf16.msra.mxu1 %v14035_v47  ;;  %12806 = vmatprep.subr.bf16.mxu0 %v14041_v14  ;;  %v2565_v47 = vsel %vm1104_vm1, %v2563_v0, %v2564_v30  ;;  %v2366_v43 = vshll.u32 %v15063_v40, 16  ;;  %v2921_v0 = vshll.u32 %v15047_v58, 16  ;;  %v2394_v58 = vshrl.u32 %v15097_v32, 16 }
  0xab   : > { %12834 = vmatprep.subr.bf16.mxu1 %v14042_v22 }
  0xac   : > { %12767 = vmatmul.mubr.bf16.vlgmr.msra.gmra.mxu0 %v14039_v18  ;;  %v2362_v18 = vshrl.u32 %v15030_v36, 16  ;;  %v2368_v25 = vrot.slane %v2366_v43, 1  ;;  %v2923_v43 = vrot.slane %v2921_v0, 2 }
  0xad   : > { %12795 = vmatmul.mubr.bf16.vlgmr.msra.gmra.mxu1 %v2118_v6  ;;  %12807 = vmatpush3.bf16.msra.mxu0 %v14041_v14  ;;  %v14061_v14 = vld [vmem:[%s18258_s1 + $0x2c8] sm:$0xff]   ;;  %v15086_v6 = vld [vmem:[%s14577_s10 + $0xe0] sm:$0xff]  }
  0xae   : > { %12835 = vmatpush3.bf16.msra.mxu1 %v14042_v22  ;;  %12808 = vmatprep.subr.bf16.mxu0 %v14043_v23  ;;  %v14062_v22 = vld [vmem:[%s18258_s1 + $0x280] sm:$0xff]  }
  0xaf   : > { %12836 = vmatprep.subr.bf16.mxu1 %v14044_v5  ;;  %12770 = vmatprep.mubr.bf16.mxu0 %v14045_v26  ;;  %v2566_v26 = vrot.slane %v14950_v1, 1  ;;  %v14079_v1 = vld [vmem:[%s18258_s1 + $0x318] sm:$0xff]  }
  0xb0   : > { %12798 = vmatprep.mubr.bf16.mxu1 %v2126_v49  ;;  %v14069_v49 = vld [vmem:[%s18258_s1 + $0x378] sm:$0xff]  }
  0xb1   : > { %12809 = vmatpush3.bf16.msra.mxu0 %v14043_v23  ;;  %v2370_v23 = vshrl.u32 %v15063_v40, 16  ;;  %v2567_v41 = vsel %vm1104_vm1, %v2564_v30, %v2566_v26  ;;  %v14077_v30 = vld [vmem:[%s18258_s1 + $0x360] sm:$0xff]  }
  0xb2   : > { %12837 = vmatpush3.bf16.msra.mxu1 %v14044_v5  ;;  %12810 = vmatprep.subr.bf16.mxu0 %v14047_v20  ;;  %v2364_v5 = vor.u32 %v2362_v18, %v2360_v38  ;;  %v2920_v18 = vrot.slane %v2918_v8, 1  ;;  %v14088_v8 = vld [vmem:[%s18258_s1 + $0x3b8] sm:$0xff]  }
  0xb3   : > { %12838 = vmatprep.subr.bf16.mxu1 %v14048_v34  ;;  %v2372_v29 = vor.u32 %v2370_v23, %v2368_v25 }
  0xb4   : > { %12771 = vmatmul.mubr.bf16.gmra.mxu0 %v14046_v9  ;;  %v2376_v9 = vrot.slane %v2374_v24, 1  ;;  %v2369_v33 = vsel %vm639_vm0, %v2364_v5, %v2368_v25  ;;  %v14081_v24 = vld [vmem:[%s18258_s1 + $0x310] sm:$0xff]   ;;  %v2924_v25 = vor.u32 %v2923_v43, %v2920_v18 }
  0xb5   : > { %12811 = vmatpush3.bf16.msra.mxu0 %v14047_v20  ;;  %12799 = vmatmul.mubr.bf16.gmra.mxu1 %v2134_v62  ;;  %v2568_v20 = vrot.slane %v14961_v2, 1  ;;  %v2386_v62 = vshrl.u32 %v15086_v6, 16  ;;  %v2741_v2 = vrot.slane %v15030_v36, 1 }
  0xb6   : > { %12839 = vmatpush3.bf16.msra.mxu1 %v14048_v34  ;;  %12812 = vmatprep.subr.bf16.mxu0 %v14051_v35  ;;  %v2378_v34 = vshrl.u32 %v15073_v37, 16  ;;  %v2377_v45 = vsel %vm639_vm0, %v2372_v29, %v2376_v9  ;;  %v15182_v29 = vrot.slane %v2135_v39, 1 }
  0xb7   : > { %12840 = vmatprep.subr.bf16.mxu1 %v14052_v42  ;;  %12774 = vmatprep.mubr.bf16.mxu0 %v14053_v19  ;;  %v15114_v19 = vrot.slane %v2119_v15, 1  ;;  %v2569_v53 = vsel %vm1104_vm1, %v2566_v26, %v2568_v20  ;;  %v2926_v15 = vrot.slane %v2107_v56, 2  ;;  %v2719_v56 = vld [vmem:[%s14577_s10 + $0xc0] sm:$0xe] }
  0xb8   : > { %12802 = vmatprep.mubr.bf16.mxu1 %v2142_v55  ;;  %v2380_v51 = vor.u32 %v2378_v34, %v2376_v9  ;;  %v2570_v55 = vrot.slane %v14978_v16, 1  ;;  %v15186_v34 = vld [vmem:[%s14577_s10 + $0xc] sm:$0xff]  }
  0xb9   : > { %12813 = vmatpush3.bf16.msra.mxu0 %v14051_v35  ;;  %v2382_v35 = vshll.u32 %v15086_v6, 16  ;;  %v15176_v26 = vor.u32 %v2926_v15, %v2925_v57  ;;  %v3166_v15 = vshll.u32 %v15186_v34, 16 }
  0xba   : > { %12841 = vmatpush3.bf16.msra.mxu1 %v14052_v42  ;;  %12814 = vmatprep.subr.bf16.mxu0 %v14055_v54  ;;  %v14070_v42 = vld [vmem:[%s18258_s1 + $0x330] sm:$0xff]  }
  0xbb   : > { %12842 = vmatprep.subr.bf16.mxu1 %v14056_v21  ;;  %v2384_v52 = vrot.slane %v2382_v35, 1  ;;  %v3352_v35 = vld [vmem:[%s14577_s10 + $0x44] sm:$0xe]  ;;  %v2928_v39 = vsel %vm1459_vm2, %v2924_v25, %v15176_v26  ;;  %v15231_v0 = vrot.slane %v3166_v15, 2 }
  0xbc   : > { %12775 = vmatmul.mubr.bf16.gmra.mxu0 %v14054_v59  ;;  %v14075_v59 = vld [vmem:[%s18258_s1 + $0x368] sm:$0xff]  }
  0xbd   : > { %12815 = vmatpush3.bf16.msra.mxu0 %v14055_v54  ;;  %12803 = vmatmul.mubr.bf16.gmra.mxu1 %v2145_v63  ;;  %v14074_v54 = vld [vmem:[%s18258_s1 + $0x328] sm:$0xff]   ;;  %v2388_v38 = vor.u32 %v2386_v62, %v2384_v52  ;;  %v2392_v63 = vrot.slane %v2390_v50, 1  ;;  %v2385_v48 = vsel %vm639_vm0, %v2380_v51, %v2384_v52 }
  0xbe   : > { %12843 = vmatpush3.bf16.msra.mxu1 %v14056_v21  ;;  %12816 = vmatprep.subr.bf16.mxu0 %v14058_v46  ;;  %v2572_v21 = vrot.slane %v15005_v28, 1  ;;  %v2571_v28 = vsel %vm1104_vm1, %v2568_v20, %v2570_v55  ;;  %v15203_v62 = vld [vmem:[%s14577_s10 + $0x4c] sm:$0xff]  }
  0xbf   : > { %12844 = vmatprep.subr.bf16.mxu1 %v14059_v3  ;;  %12822 = vmatprep.mubr.bf16.mxu0 %v2361_v4  ;;  %v2393_v4 = vsel %vm639_vm0, %v2388_v38, %v2392_v63  ;;  %v2396_v23 = vor.u32 %v2394_v58, %v2392_v63  ;;  %v14084_v52 = vld [vmem:[%s18258_s1 + $0x348] sm:$0xff]   ;;  %v3423_v58 = vshll.u32 %v15203_v62, 16 }
  0xc0   : > { %12850 = vmatprep.mubr.bf16.mxu1 %v2565_v47  ;;  %v10797_v47 = vcombine.low %v2719_v56, %v14997_v60  ;;  %v15161_v60 = vrot.slane %v2123_v13, 2  ;;  %v2743_v13 = vrot.slane %v15063_v40, 1 }
  0xc1   : > { %12817 = vmatpush3.bf16.msra.mxu0 %v14058_v46  ;;  %v15142_v46 = vrot.slane %v2115_v7, 2  ;;  %v14080_v7 = vld [vmem:[%s18258_s1 + $0x358] sm:$0xff]   ;;  %v15278_v25 = vrot.slane %v3423_v58, 2 }
  0xc2   : > { %12845 = vmatpush3.bf16.msra.mxu1 %v14059_v3  ;;  %12818 = vmatprep.subr.bf16.mxu0 %v14060_v10  ;;  %v2896_v3 = vld [vmem:[%s14577_s10 + $0xac] sm:$0x3]  ;;  %v2740_v5 = vrot.slane %v10797_v47, 1 }
  0xc3   : > { %12846 = vmatprep.subr.bf16.mxu1 %v14061_v14 }
  0xc5   : > { %12819 = vmatpush3.bf16.msra.mxu0 %v14060_v10  ;;  %v15150_v10 = vrot.slane %v2127_v12, 1  ;;  %v10822_v12 = vcombine.low %v14981_v17, %v2896_v3  ;;  %v14082_v17 = vld [vmem:[%s18258_s1 + $0x350] sm:$0xff]   ;;  %v14089_v3 = vld [vmem:[%s18258_s1 + $0x3f8] sm:$0xff]  }
  0xc6   : > { %12847 = vmatpush3.bf16.msra.mxu1 %v14061_v14  ;;  %12820 = vmatprep.subr.bf16.mxu0 %v14062_v22  ;;  %v2573_v14 = vsel %vm1104_vm1, %v2570_v55, %v2572_v21  ;;  %v3163_v55 = vshrl.u32 %v15186_v34, 16 }
  0xc7   : > { %12848 = vmatprep.subr.bf16.mxu1 %v14063_v11  ;;  %v2942_v9 = vshrl.u32 %v10822_v12, 16  ;;  %v2945_v20 = vshll.u32 %v10822_v12, 16  ;;  %v2935_v18 = vor.u32 %v15161_v60, %v15150_v10  ;;  %v3995_v10 = vrot.slane %v3166_v15, 3 }
  0xc8   : > { %v3994_v12 = vrot.slane %v3163_v55, 2 }
  0xc9   : > { %12821 = vmatpush3.bf16.msra.mxu0 %v14062_v22  ;;  %v3095_v22 = vld [vmem:[%s14577_s10 + $0x4] sm:$0xe]  ;;  %v2947_v57 = vrot.slane %v2945_v20, 2 }
  0xca   : > { %12849 = vmatpush3.bf16.msra.mxu1 %v14063_v11  ;;  %12862 = vmatprep.subr.bf16.mxu0 %v14068_v27  ;;  %v15166_v11 = vld [vmem:[%s14577_s10 + $0x8] sm:$0xf] }
  0xcb   : > { %12890 = vmatprep.subr.bf16.mxu1 %v14069_v49 }
  0xcc   : > { %12823 = vmatmul.mubr.bf16.vlgmr.msra.gmra.mxu0 %v2369_v33  ;;  %v10847_v33 = vcombine.low %v3095_v22, %v15166_v11  ;;  %v2744_v22 = vsel %vm1104_vm1, %v2741_v2, %v2743_v13 }
  0xcd   : > { %12851 = vmatmul.mubr.bf16.vlgmr.msra.gmra.mxu1 %v2567_v41  ;;  %12863 = vmatpush3.bf16.msra.mxu0 %v14068_v27  ;;  %v2745_v27 = vrot.slane %v15073_v37, 1  ;;  %v14083_v41 = vld [vmem:[%s18258_s1 + $0x308] sm:$0xff]  }
  0xce   : > { %12891 = vmatpush3.bf16.msra.mxu1 %v14069_v49  ;;  %12864 = vmatprep.subr.bf16.mxu0 %v14070_v42  ;;  %v2747_v49 = vrot.slane %v15086_v6, 1  ;;  %v3155_v50 = vshrl.u32 %v10847_v33, 16  ;;  %v3158_v51 = vshll.u32 %v10847_v33, 16  ;;  %v15297_v33 = vld [vmem:[%s18258_s1 + $0x3a8] sm:$0xff]  }
  0xcf   : > { %12892 = vmatprep.subr.bf16.mxu1 %v14071_v44  ;;  %12826 = vmatprep.mubr.bf16.mxu0 %v2377_v45  ;;  %v2938_v45 = vrot.slane %v2131_v31, 2  ;;  %v14085_v31 = vld [vmem:[%s18258_s1 + $0x300] sm:$0xff]  }
  0xd0   : > { %12854 = vmatprep.mubr.bf16.mxu1 %v2569_v53  ;;  %v2749_v53 = vrot.slane %v15097_v32, 1  ;;  %v15222_v38 = vrot.slane %v3155_v50, 1  ;;  %v15224_v63 = vrot.slane %v3158_v51, 2  ;;  %v2748_v40 = vsel %vm1104_vm1, %v2745_v27, %v2747_v49 }
  0xd1   : > { %12865 = vmatpush3.bf16.msra.mxu0 %v14070_v42  ;;  %v2742_v42 = vsel %vm1104_vm1, %v2740_v5, %v2741_v2  ;;  %v15273_v5 = vld [vmem:[%s14577_s10 + $0x1c] sm:$0xff]   ;;  %v2939_v60 = vor.u32 %v2938_v45, %v15182_v29  ;;  %v2746_v29 = vsel %vm1104_vm1, %v2743_v13, %v2745_v27  ;;  %v14093_v13 = vld [vmem:[%s18258_s1 + $0x3e8] sm:$0xff]  }
  0xd2   : > { %12893 = vmatpush3.bf16.msra.mxu1 %v14071_v44  ;;  %12866 = vmatprep.subr.bf16.mxu0 %v14074_v54  ;;  %v15196_v44 = vld [vmem:[%s14577_s10 + $0x48] sm:$0xf]  ;;  %v3181_v50 = vshrl.u32 %v15273_v5, 16  ;;  %v18267_v51 = vshll.u32 %v15273_v5, 16  ;;  %v15319_v37 = vsel %vm1104_vm1, %v2747_v49, %v2749_v53  ;;  %v4194_v49 = vrot.slane %v3423_v58, 3 }
  0xd3   : > { %12894 = vmatprep.subr.bf16.mxu1 %v14075_v59  ;;  %v10877_v16 = vcombine.low %v3352_v35, %v15196_v44 }
  0xd4   : > { %12827 = vmatmul.mubr.bf16.gmra.mxu0 %v2385_v48  ;;  %v15226_v48 = vrot.slane %v3163_v55, 1  ;;  %v15326_v55 = vld [vmem:[%s14577_s10 + $0x5c] sm:$0xff]  }
  0xd5   : > { %12867 = vmatpush3.bf16.msra.mxu0 %v14074_v54  ;;  %12855 = vmatmul.mubr.bf16.gmra.mxu1 %v2571_v28  ;;  %v2944_v54 = vrot.slane %v2942_v9, 1  ;;  %v3412_v56 = vshrl.u32 %v10877_v16, 16  ;;  %v3415_v28 = vshll.u32 %v10877_v16, 16  ;;  %v15287_v9 = vor.u32 %v3995_v10, %v3994_v12 }
  0xd6   : > { %12895 = vmatpush3.bf16.msra.mxu1 %v14075_v59  ;;  %12868 = vmatprep.subr.bf16.mxu0 %v14076_v61  ;;  %v14086_v59 = vld [vmem:[%s18258_s1 + $0x340] sm:$0xff]  }
  0xd7   : > { %12896 = vmatprep.subr.bf16.mxu1 %v14077_v30  ;;  %12830 = vmatprep.mubr.bf16.mxu0 %v2393_v4  ;;  %v15260_v43 = vrot.slane %v3415_v28, 2 }
  0xd8   : > { %12858 = vmatprep.mubr.bf16.mxu1 %v2573_v14  ;;  %v14090_v14 = vld [vmem:[%s18258_s1 + $0x3b0] sm:$0xff]  }
  0xd9   : > { %12869 = vmatpush3.bf16.msra.mxu0 %v14076_v61  ;;  %v15220_v61 = vld [vmem:[%s14577_s10 + $0x14] sm:$0xff]  }
  0xda   : > { %12897 = vmatpush3.bf16.msra.mxu1 %v14077_v30  ;;  %12870 = vmatprep.subr.bf16.mxu0 %v14079_v1  ;;  %v2931_v30 = vor.u32 %v15142_v46, %v15114_v19  ;;  %v3172_v47 = vshrl.u32 %v15220_v61, 16  ;;  %v15248_v19 = vld [vmem:[%s14577_s10 + $0x54] sm:$0xff]   ;;  %v15253_v46 = vld [vmem:[%s18259_s2] ss:$0 sm:$0xff] }
  0xdb   : > { %12898 = vmatprep.subr.bf16.mxu1 %v14080_v7 }
  0xdc   : > { %12831 = vmatmul.mubr.bf16.gmra.mxu0 %v2396_v23  ;;  %v2932_v23 = vsel %vm1459_vm2, %v15176_v26, %v2931_v30  ;;  %v15280_v36 = vrot.slane %v3172_v47, 1  ;;  %v15285_v26 = vld [vmem:[%s14577_s10 + $0x24] sm:$0xff]   ;;  %v2936_v35 = vsel %vm1459_vm2, %v2931_v30, %v2935_v18  ;;  %v3998_v28 = vrot.slane %v3172_v47, 2 }
  0xdd   : > { %12871 = vmatpush3.bf16.msra.mxu0 %v14079_v1  ;;  %12859 = vmatmul.mubr.bf16.gmra.mxu1 %v2572_v21  ;;  %v3420_v21 = vshrl.u32 %v15203_v62, 16  ;;  %v3175_v1 = vshll.u32 %v15220_v61, 16  ;;  %v18264_v6 = vshrl.u32 %v15285_v26, 16  ;;  %v3161_v47 = vor.u32 %v15224_v63, %v15222_v38 }
  0xde   : > { %12899 = vmatpush3.bf16.msra.mxu1 %v14080_v7  ;;  %12872 = vmatprep.subr.bf16.mxu0 %v14081_v24  ;;  %v15245_v7 = vrot.slane %v3412_v56, 1  ;;  %v15337_v56 = vld [vmem:[%s18258_s1 + $0x3a0] sm:$0xff]   ;;  %v4002_v38 = vrot.slane %v3181_v50, 2 }
  0xdf   : > { %12900 = vmatprep.subr.bf16.mxu1 %v14082_v17  ;;  %12878 = vmatprep.mubr.bf16.mxu0 %v2742_v42  ;;  %v15240_v4 = vrot.slane %v3420_v21, 1  ;;  %v15282_v2 = vrot.slane %v3175_v1, 2  ;;  %v3432_v42 = vshll.u32 %v15248_v19, 16  ;;  %v4193_v16 = vrot.slane %v3420_v21, 2  ;;  %v15341_v21 = vld [vmem:[%s14577_s10 + $0x64] sm:$0xff]  }
  0xe0   : > { %12906 = vmatprep.mubr.bf16.mxu1 %v2928_v39  ;;  %v3999_v30 = vrot.slane %v3175_v1, 3  ;;  %v18266_v1 = vshrl.u32 %v15326_v55, 16 }
  0xe1   : > { %12873 = vmatpush3.bf16.msra.mxu0 %v14081_v24  ;;  %v14091_v24 = vld [vmem:[%s18258_s1 + $0x3f0] sm:$0xff]  }
  0xe2   : > { %12901 = vmatpush3.bf16.msra.mxu1 %v14082_v17  ;;  %12874 = vmatprep.subr.bf16.mxu0 %v14083_v41  ;;  %v15276_v17 = vor.u32 %v2947_v57, %v2944_v54  ;;  %v2940_v54 = vsel %vm1459_vm2, %v2935_v18, %v2939_v60 }
  0xe3   : > { %12902 = vmatprep.subr.bf16.mxu1 %v14084_v52 }
  0xe4   : > { %v15323_v27 = vsel %vm1459_vm2, %v2939_v60, %v15276_v17  ;;  %v4000_v60 = vor.u32 %v3999_v30, %v3998_v28  ;;  %v18261_v28 = vshll.u32 %v15341_v21, 16 }
  0xe5   : > { %12875 = vmatpush3.bf16.msra.mxu0 %v14083_v41  ;;  %v3429_v41 = vshrl.u32 %v15248_v19, 16 }
  0xe6   : > { %12903 = vmatpush3.bf16.msra.mxu1 %v14084_v52  ;;  %12876 = vmatprep.subr.bf16.mxu0 %v14085_v31 }
  0xe7   : > { %12904 = vmatprep.subr.bf16.mxu1 %v14086_v59 }
  0xe9   : > { %12877 = vmatpush3.bf16.msra.mxu0 %v14085_v31 }
  0xea   : > { %12905 = vmatpush3.bf16.msra.mxu1 %v14086_v59  ;;  %12918 = vmatprep.subr.bf16.mxu0 %v14088_v8 }
  0xeb   : > { %12946 = vmatprep.subr.bf16.mxu1 %v14089_v3 }
  0xec   : > { %v12544_v20 = vpop.f32.mrf.mxu0  ;;  %12879 = vmatmul.mubr.bf16.vlgmr.msra.gmra.mxu0 %v2744_v22  ;;  %v14095_v22 = vld [vmem:[%s18258_s1 + $0x3e0] sm:$0xff]  }
  0xed   : > { %v370_v39 = vadd.f32 %v12544_v20, %v15253_v46  ;;  %v12572_v45 = vpop.f32.mrf.mxu1  ;;  %12907 = vmatmul.mubr.bf16.vlgmr.msra.gmra.mxu1 %v2932_v23  ;;  %12919 = vmatpush3.bf16.msra.mxu0 %v14088_v8  ;;  %v18263_v8 = vshll.u32 %v15285_v26, 16  ;;  %v15351_v23 = vor.u32 %v4194_v49, %v4193_v16 }
  0xee   : > { %12947 = vmatpush3.bf16.msra.mxu1 %v14089_v3  ;;  %v322_v52 = vpop.f32.mrf.mxu0  ;;  %12920 = vmatprep.subr.bf16.mxu0 %v14090_v14  ;;  %v4197_v3 = vrot.slane %v3429_v41, 2 }
  0xef   : > { %v15330_v31 = vadd.f32 %v12572_v45, %v370_v39  ;;  %v368_v57 = vadd.f32 %v15253_v46, %v322_v52  ;;  %v523_v15 = vpop.f32.mrf.mxu1  ;;  %12948 = vmatprep.subr.bf16.mxu1 %v14091_v24  ;;  %12882 = vmatprep.mubr.bf16.mxu0 %v2746_v29  ;;  %v15375_v39 = vld [vmem:[%s18258_s1 + $0x398] sm:$0xff]   ;;  %v18262_v45 = vshrl.u32 %v15341_v21, 16  ;;  %v15380_v52 = vsel %vm3985_vm3, %v15287_v9, %v4000_v60 }
  0xf0   : > { %v12545_v59 = vpop.f32.mrf.mxu0  ;;  %12910 = vmatprep.mubr.bf16.mxu1 %v2936_v35  ;;  %v18265_v35 = vshll.u32 %v15326_v55, 16  ;;  %v4007_v49 = vrot.slane %v18263_v8, 3 }
  0xf1   : > { %v15345_v18 = vadd.f32 %v523_v15, %v368_v57  ;;  %v371_v58 = vadd.f32 %v12545_v59, %v15253_v46  ;;  %v12573_v12 = vpop.f32.mrf.mxu1  ;;  %12921 = vmatpush3.bf16.msra.mxu0 %v14090_v14  ;;  %v4198_v14 = vrot.slane %v3432_v42, 3  ;;  %v3418_v57 = vor.u32 %v15260_v43, %v15245_v7 }
  0xf2   : > { %12949 = vmatpush3.bf16.msra.mxu1 %v14091_v24  ;;  %v15353_v10 = vpop.f32.mrf.mxu0  ;;  %12922 = vmatprep.subr.bf16.mxu0 %v15297_v33  ;;  %v15367_v24 = vor.u32 %v15231_v0, %v15226_v48  ;;  %v4003_v0 = vrot.slane %v18267_v51, 3  ;;  %v4006_v15 = vrot.slane %v18264_v6, 2  ;;  %v4201_v7 = vrot.slane %v18266_v1, 2 }
  0xf3   : > { %18304 = vst [vmem:[#allocation2_spill] sm:$0xff] %v15353_v10  ;;  %v15361_v20 = vadd.f32 %v12573_v12, %v371_v58  ;;  %v15363_v29 = vpop.f32.mrf.mxu1  ;;  %12950 = vmatprep.subr.bf16.mxu1 %v14093_v13  ;;  %v4199_v48 = vor.u32 %v4198_v14, %v4197_v3  ;;  %v14097_v3 = vld [vmem:[%s18258_s1 + $0x3d8] sm:$0xff]   ;;  %v4202_v12 = vrot.slane %v18265_v35, 3 }
  0xf4   : > { %18305 = vst [vmem:[#allocation3_spill] sm:$0xff] %v15363_v29  ;;  %12883 = vmatmul.mubr.bf16.gmra.mxu0 %v2748_v40  ;;  %v12548_v63 = vpop.f32.mrf.mxu0  ;;  %v15407_v58 = vor.u32 %v4007_v49, %v4006_v15 }
  0xf5   : > { %v374_v16 = vadd.f32 %v12548_v63, %v15253_v46  ;;  %12923 = vmatpush3.bf16.msra.mxu0 %v15297_v33  ;;  %12911 = vmatmul.mubr.bf16.gmra.mxu1 %v2940_v54  ;;  %v12576_v40 = vpop.f32.mrf.mxu1  ;;  %v15396_v33 = vsel %vm3985_vm3, %v15351_v23, %v4199_v48  ;;  %v4004_v54 = vor.u32 %v4003_v0, %v4002_v38  ;;  %v15415_v38 = vld [vmem:[%s18258_s1 + $0x390] sm:$0xff]   ;;  %v15422_v63 = vld [vmem:[%s14577_s10 + $0x2c] sm:$0xf] }
  0xf6   : > { %12951 = vmatpush3.bf16.msra.mxu1 %v14093_v13  ;;  %v338_v59 = vpop.f32.mrf.mxu0  ;;  %12924 = vmatprep.subr.bf16.mxu0 %v15337_v56  ;;  %v4203_v49 = vor.u32 %v4202_v12, %v4201_v7  ;;  %v4164_v7 = vld [vmem:[%s14577_s10 + $0x70] sm:$0x7]  ;;  %v18268_v12 = vrot.slane %v15186_v34, 3 }
  0xf7   : > { %v372_v43 = vadd.f32 %v15253_v46, %v338_v59  ;;  %v15401_v30 = vadd.f32 %v12576_v40, %v374_v16  ;;  %12952 = vmatprep.subr.bf16.mxu1 %v14095_v22  ;;  %v539_v13 = vpop.f32.mrf.mxu1  ;;  %12886 = vmatprep.mubr.bf16.mxu0 %v15319_v37  ;;  %v15419_v37 = vor.u32 %v15278_v25, %v15240_v4  ;;  %v4205_v16 = vrot.slane %v18262_v45, 2  ;;  %v14100_v25 = vld [vmem:[%s18258_s1 + $0x3d0] sm:$0xff]  }
  0xf8   : > { %v12549_v14 = vpop.f32.mrf.mxu0  ;;  %12914 = vmatprep.mubr.bf16.mxu1 %v15323_v27  ;;  %v15425_v0 = vsel %vm3985_vm3, %v4000_v60, %v4004_v54  ;;  %v4206_v27 = vrot.slane %v18261_v28, 3  ;;  %v15440_v60 = vsel %vm3985_vm3, %v4004_v54, %v15407_v58  ;;  %v3964_v59 = vld [vmem:[%s14577_s10 + $0x30] sm:$0x7] }
  0xf9   : > { %v375_v40 = vadd.f32 %v12549_v14, %v15253_v46  ;;  %v15432_v15 = vadd.f32 %v539_v13, %v372_v43  ;;  %12925 = vmatpush3.bf16.msra.mxu0 %v15337_v56  ;;  %v12577_v4 = vpop.f32.mrf.mxu1  ;;  %v3170_v56 = vsel %vm1459_vm2, %v3161_v47, %v15367_v24  ;;  %v15449_v43 = vld [vmem:[%s14577_s10 + $0x6c] sm:$0xf]  ;;  %v15452_v14 = vcombine.low %v15422_v63, %v3964_v59 }
  0xfa   : > { %12953 = vmatpush3.bf16.msra.mxu1 %v14095_v22  ;;  %v15443_v28 = vpop.f32.mrf.mxu0  ;;  %12926 = vmatprep.subr.bf16.mxu0 %v15375_v39  ;;  %v4207_v13 = vor.u32 %v4206_v27, %v4205_v16  ;;  %v15459_v22 = vsel %vm3985_vm3, %v4199_v48, %v4203_v49  ;;  %v3427_v32 = vsel %vm1459_vm2, %v3418_v57, %v15419_v37 }
  0xfb   : > { %18306 = vst [vmem:[#allocation4_spill] sm:$0xff] %v15443_v28  ;;  %v15454_v45 = vadd.f32 %v12577_v4, %v375_v40  ;;  %12954 = vmatprep.subr.bf16.mxu1 %v14097_v3  ;;  %v15456_v54 = vpop.f32.mrf.mxu1  ;;  %v4011_v27 = vshrl.u32 %v15452_v14, 16  ;;  %v4014_v40 = vshll.u32 %v15452_v14, 16  ;;  %v10982_v4 = vcombine.low %v15449_v43, %v4164_v7 }
  0xfc   : > { %18307 = vst [vmem:[#allocation5_spill] sm:$0xff] %v15456_v54  ;;  %12887 = vmatmul.mubr.bf16.gmra.mxu0 %v2749_v53  ;;  %v12552_v47 = vpop.f32.mrf.mxu0  ;;  %v15466_v16 = vsel %vm3985_vm3, %v4203_v49, %v4207_v13  ;;  %v3431_v53 = vrot.slane %v3429_v41, 1  ;;  %v4388_v49 = vrot.slane %v15220_v61, 3 }
  0xfd   : > { %v378_v48 = vadd.f32 %v12552_v47, %v15253_v46  ;;  %12927 = vmatpush3.bf16.msra.mxu0 %v15375_v39  ;;  %12915 = vmatmul.mubr.bf16.gmra.mxu1 %v15276_v17  ;;  %v12580_v59 = vpop.f32.mrf.mxu1  ;;  %v14101_v39 = vld [vmem:[%s18258_s1 + $0x388] sm:$0xff]   ;;  %v4013_v7 = vrot.slane %v4011_v27, 2  ;;  %v4016_v57 = vrot.slane %v4014_v40, 3  ;;  %v4210_v47 = vshrl.u32 %v10982_v4, 16  ;;  %v14103_v27 = vld [vmem:[%s18258_s1 + $0x380] sm:$0xff]  }
  0xfe   : > { %12955 = vmatpush3.bf16.msra.mxu1 %v14097_v3  ;;  %v354_v8 = vpop.f32.mrf.mxu0  ;;  %12928 = vmatprep.subr.bf16.mxu0 %v15415_v38  ;;  %v14102_v17 = vld [vmem:[%s18258_s1 + $0x3c8] sm:$0xff]   ;;  %v4213_v6 = vshll.u32 %v10982_v4, 16  ;;  %v15492_v1 = vsel %vm4384_vm4, %v18268_v12, %v4388_v49  ;;  %v3106_v40 = vld [vmem:[%s14577_s10 + $0x30] sm:$0x3] }
  0xff   : > { %v376_v41 = vadd.f32 %v15253_v46, %v354_v8  ;;  %v15487_v35 = vadd.f32 %v12580_v59, %v378_v48  ;;  %12956 = vmatprep.subr.bf16.mxu1 %v14100_v25  ;;  %v555_v3 = vpop.f32.mrf.mxu1  ;;  %12934 = vmatprep.mubr.bf16.mxu0 %v3170_v56  ;;  %v15498_v4 = vor.u32 %v4016_v57, %v4013_v7  ;;  %v4212_v46 = vrot.slane %v4210_v47, 2  ;;  %v3363_v59 = vld [vmem:[%s14577_s10 + $0x70] sm:$0x3] }
 0x100   : > { %v12553_v51 = vpop.f32.mrf.mxu0  ;;  %12962 = vmatprep.mubr.bf16.mxu1 %v3427_v32  ;;  %v4215_v8 = vrot.slane %v4213_v6, 3  ;;  %v4390_v6 = vrot.slane %v15273_v5, 3  ;;  %v15522_v47 = vcombine.low %v15422_v63, %v3106_v40  ;;  %v15539_v40 = vcombine.low %v15449_v43, %v3363_v59 }
 0x101   : > { %v15500_v48 = vadd.f32 %v555_v3, %v376_v41  ;;  %12929 = vmatpush3.bf16.msra.mxu0 %v15415_v38  ;;  %v12581_v56 = vpop.f32.mrf.mxu1  ;;  %v3434_v51 = vrot.slane %v3432_v42, 2  ;;  %v15509_v32 = vsel %vm3985_vm3, %v15407_v58, %v15498_v4  ;;  %v14104_v38 = vld [vmem:[%s18258_s1 + $0x3c0] sm:$0xff]   ;;  %v18308_v42 = vshll.u32 %v15273_v5, 16 }
 0x102   : > { %12957 = vmatpush3.bf16.msra.mxu1 %v14100_v25  ;;  %12930 = vmatprep.subr.bf16.mxu0 %v14101_v39  ;;  %v15511_v7 = vor.u32 %v4215_v8, %v4212_v46  ;;  %v3183_v25 = vrot.slane %v3181_v50, 1  ;;  %v15529_v41 = vsel %vm4384_vm4, %v4388_v49, %v4390_v6  ;;  %v4392_v3 = vrot.slane %v15285_v26, 3  ;;  %v14111_v49 = vld [vmem:[%s18258_s1 + $0x438] sm:$0xff]   ;;  %v15565_v54 = vpop.f32.mrf.mxu0 }
 0x103   : > { %12958 = vmatprep.subr.bf16.mxu1 %v14102_v17  ;;  %v3186_v57 = vrot.slane %v18308_v42, 2  ;;  %18309 = vst [vmem:[#allocation6_spill] sm:$0xff] %v15529_v41  ;;  %v3178_v46 = vor.u32 %v15282_v2, %v15280_v36  ;;  %v18310_v50 = vshrl.u32 %v15326_v55, 16  ;;  %v18311_v56 = vshll.u32 %v15326_v55, 16  ;;  %v14112_v36 = vld [vmem:[%s18258_s1 + $0x478] sm:$0xff]   ;;  %18316 = vst [vmem:[#allocation8_spill] sm:$0xff] %v15565_v54  ;;  %v15572_v10 = vpop.f32.mrf.mxu1 }
 0x104   : > { %v15526_v58 = vsel %vm3985_vm3, %v4207_v13, %v15511_v7  ;;  %v3435_v13 = vor.u32 %v3434_v51, %v3431_v53  ;;  %v18312_v2 = vshrl.u32 %v15285_v26, 16  ;;  %v18313_v42 = vshll.u32 %v15285_v26, 16  ;;  %v14113_v53 = vld [vmem:[%s18258_s1 + $0x430] sm:$0xff]   ;;  %18318 = vst [vmem:[#allocation9_spill] sm:$0xff] %v15572_v10 }
 0x105   : > { %12931 = vmatpush3.bf16.msra.mxu0 %v14101_v39  ;;  %v3440_v8 = vrot.slane %v18310_v50, 1  ;;  %v3443_v63 = vrot.slane %v18311_v56, 2  ;;  %v15552_v43 = vsel %vm4384_vm4, %v4390_v6, %v4392_v3  ;;  %v18315_v51 = vshrl.u32 %v15341_v21, 16 }
 0x106   : > { %12959 = vmatpush3.bf16.msra.mxu1 %v14102_v17  ;;  %12932 = vmatprep.subr.bf16.mxu0 %v14103_v27  ;;  %v3192_v39 = vrot.slane %v18312_v2, 1  ;;  %v3195_v50 = vrot.slane %v18313_v42, 2  ;;  %18314 = vst [vmem:[#allocation7_spill] sm:$0xff] %v15552_v43  ;;  %v3187_v17 = vor.u32 %v3186_v57, %v3183_v25  ;;  %v3199_v56 = vshrl.u32 %v15522_v47, 16 }
 0x107   : > { %12960 = vmatprep.subr.bf16.mxu1 %v14104_v38  ;;  %v3449_v59 = vrot.slane %v18315_v51, 1  ;;  %v3202_v12 = vshll.u32 %v15522_v47, 16  ;;  %v3179_v2 = vsel %vm1459_vm2, %v15367_v24, %v3178_v46  ;;  %v3444_v42 = vor.u32 %v3443_v63, %v3440_v8  ;;  %v14114_v24 = vld [vmem:[%s18258_s1 + $0x470] sm:$0xff]  }
 0x108   : > { %v3456_v6 = vshrl.u32 %v15539_v40, 16  ;;  %v3459_v29 = vshll.u32 %v15539_v40, 16  ;;  %v3436_v25 = vsel %vm1459_vm2, %v15419_v37, %v3435_v13  ;;  %v18317_v57 = vshll.u32 %v15341_v21, 16 }
 0x109   : > { %12933 = vmatpush3.bf16.msra.mxu0 %v14103_v27  ;;  %v18269_v27 = vrot.slane %v15452_v14, 3  ;;  %v3196_v8 = vor.u32 %v3195_v50, %v3192_v39  ;;  %v3201_v54 = vrot.slane %v3199_v56, 1  ;;  %v3204_v37 = vrot.slane %v3202_v12, 2  ;;  %v14117_v12 = vld [vmem:[%s18258_s1 + $0x428] sm:$0xff]  }
 0x10a   : > { %12961 = vmatpush3.bf16.msra.mxu1 %v14104_v38  ;;  %12974 = vmatprep.subr.bf16.mxu0 %v14111_v49  ;;  %v3452_v51 = vrot.slane %v18317_v57, 2  ;;  %v3188_v38 = vsel %vm1459_vm2, %v3178_v46, %v3187_v17  ;;  %v3445_v43 = vsel %vm1459_vm2, %v3435_v13, %v3444_v42  ;;  %v3458_v41 = vrot.slane %v3456_v6, 1  ;;  %v3787_v6 = vld [vmem:[%s14577_s10 + $0x44] sm:$0xc] }
 0x10b   : > { %13002 = vmatprep.subr.bf16.mxu1 %v14112_v36  ;;  %v15581_v57 = vsel %vm4384_vm4, %v4392_v3, %v18269_v27  ;;  %v3461_v39 = vrot.slane %v3459_v29, 2  ;;  %v14118_v29 = vld [vmem:[%s18258_s1 + $0x468] sm:$0xff]  }
 0x10c   : > { %v12600_v63 = vpop.f32.mrf.mxu0  ;;  %12935 = vmatmul.mubr.bf16.vlgmr.msra.gmra.mxu0 %v3179_v2  ;;  %v3453_v46 = vor.u32 %v3452_v51, %v3449_v59 }
 0x10d   : > { %v823_v28 = vadd.f32 %v12600_v63, %v15330_v31  ;;  %v12628_v10 = vpop.f32.mrf.mxu1  ;;  %12963 = vmatmul.mubr.bf16.vlgmr.msra.gmra.mxu1 %v3436_v25  ;;  %12975 = vmatpush3.bf16.msra.mxu0 %v14111_v49  ;;  %v3205_v49 = vor.u32 %v3204_v37, %v3201_v54  ;;  %v14121_v54 = vld [vmem:[%s18258_s1 + $0x420] sm:$0xff]  }
 0x10e   : > { %13003 = vmatpush3.bf16.msra.mxu1 %v14112_v36  ;;  %v775_v50 = vpop.f32.mrf.mxu0  ;;  %12976 = vmatprep.subr.bf16.mxu0 %v14113_v53  ;;  %v3609_v36 = vld [vmem:[%s14577_s10 + $0x4] sm:$0xc]  ;;  %v3454_v51 = vsel %vm1459_vm2, %v3444_v42, %v3453_v46  ;;  %v15618_v42 = vcombine.low %v3787_v6, %v15196_v44 }
 0x10f   : > { %v15588_v3 = vadd.f32 %v12628_v10, %v823_v28  ;;  %v821_v31 = vadd.f32 %v775_v50, %v15345_v18  ;;  %v1026_v56 = vpop.f32.mrf.mxu1  ;;  %13004 = vmatprep.subr.bf16.mxu1 %v14114_v24  ;;  %12938 = vmatprep.mubr.bf16.mxu0 %v3188_v38  ;;  %v3197_v28 = vsel %vm1459_vm2, %v3187_v17, %v3196_v8 }
 0x110   : > { %v12601_v13 = vpop.f32.mrf.mxu0  ;;  %12966 = vmatprep.mubr.bf16.mxu1 %v3445_v43  ;;  %v3462_v18 = vor.u32 %v3461_v39, %v3458_v41  ;;  %v15615_v17 = vcombine.low %v3609_v36, %v15166_v11 }
 0x111   : > { %v15595_v2 = vadd.f32 %v1026_v56, %v821_v31  ;;  %v824_v59 = vadd.f32 %v12601_v13, %v15361_v20  ;;  %v12629_v10 = vpop.f32.mrf.mxu1  ;;  %12977 = vmatpush3.bf16.msra.mxu0 %v14113_v53  ;;  %v14122_v20 = vld [vmem:[%s18258_s1 + $0x460] sm:$0xff]   ;;  %v3206_v53 = vsel %vm1459_vm2, %v3196_v8, %v3205_v49  ;;  %v14124_v8 = vld [vmem:[%s18258_s1 + $0x418] sm:$0xff]   ;;  %v3632_v31 = vrot.slane %v15186_v34, 2 }
 0x112   : > { %13005 = vmatpush3.bf16.msra.mxu1 %v14114_v24  ;;  %v15600_v25 = vpop.f32.mrf.mxu0  ;;  %12978 = vmatprep.subr.bf16.mxu0 %v14117_v12  ;;  %v3463_v37 = vsel %vm1459_vm2, %v3453_v46, %v3462_v18  ;;  %v3631_v46 = vrot.slane %v15615_v17, 2  ;;  %v3808_v56 = vrot.slane %v15618_v42, 2 }
 0x113   : > { %18319 = vst [vmem:[#allocation10_spill] sm:$0xff] %v15600_v25  ;;  %v15606_v43 = vadd.f32 %v12629_v10, %v824_v59  ;;  %v15608_v63 = vpop.f32.mrf.mxu1  ;;  %13006 = vmatprep.subr.bf16.mxu1 %v14118_v29  ;;  %v14127_v10 = vld [vmem:[%s18258_s1 + $0x410] sm:$0xff]  }
 0x114   : > { %18320 = vst [vmem:[#allocation11_spill] sm:$0xff] %v15608_v63  ;;  %v12604_v41 = vpop.f32.mrf.mxu0  ;;  %12939 = vmatmul.mubr.bf16.gmra.mxu0 %v3197_v28 }
 0x115   : > { %v827_v24 = vadd.f32 %v12604_v41, %v15401_v30  ;;  %12979 = vmatpush3.bf16.msra.mxu0 %v14117_v12  ;;  %v12632_v38 = vpop.f32.mrf.mxu1  ;;  %12967 = vmatmul.mubr.bf16.gmra.mxu1 %v3454_v51  ;;  %v14125_v30 = vld [vmem:[%s18258_s1 + $0x458] sm:$0xff]   ;;  %v3633_v51 = vsel %vm3630_vm5, %v3631_v46, %v3632_v31 }
 0x116   : > { %13007 = vmatpush3.bf16.msra.mxu1 %v14118_v29  ;;  %v791_v39 = vpop.f32.mrf.mxu0  ;;  %12980 = vmatprep.subr.bf16.mxu0 %v14121_v54  ;;  %v14136_v46 = vld [vmem:[%s18258_s1 + $0x4f8] sm:$0xff]  }
 0x117   : > { %v825_v11 = vadd.f32 %v791_v39, %v15432_v15  ;;  %v15626_v50 = vadd.f32 %v12632_v38, %v827_v24  ;;  %v1042_v44 = vpop.f32.mrf.mxu1  ;;  %13008 = vmatprep.subr.bf16.mxu1 %v14122_v20  ;;  %12942 = vmatprep.mubr.bf16.mxu0 %v3206_v53  ;;  %v3809_v15 = vrot.slane %v15203_v62, 2  ;;  %v14128_v62 = vld [vmem:[%s18258_s1 + $0x450] sm:$0xff]   ;;  %v14129_v24 = vld [vmem:[%s18258_s1 + $0x408] sm:$0xff]  }
 0x118   : > { %v12605_v12 = vpop.f32.mrf.mxu0  ;;  %12970 = vmatprep.mubr.bf16.mxu1 %v3463_v37 }
 0x119   : > { %v828_v29 = vadd.f32 %v12605_v12, %v15454_v45  ;;  %v15636_v13 = vadd.f32 %v1042_v44, %v825_v11  ;;  %12981 = vmatpush3.bf16.msra.mxu0 %v14121_v54  ;;  %v12633_v36 = vpop.f32.mrf.mxu1  ;;  %v3810_v41 = vsel %vm3630_vm5, %v3808_v56, %v3809_v15  ;;  %v14132_v11 = vld [vmem:[%s18258_s1 + $0x440] sm:$0xff]   ;;  %v3634_v44 = vrot.slane %v15220_v61, 2  ;;  %v14135_v12 = vld [vmem:[%s18258_s1 + $0x4b8] sm:$0xff]  }
 0x11a   : > { %13009 = vmatpush3.bf16.msra.mxu1 %v14122_v20  ;;  %v15638_v59 = vpop.f32.mrf.mxu0  ;;  %12982 = vmatprep.subr.bf16.mxu0 %v14124_v8  ;;  %v3636_v56 = vrot.slane %v15273_v5, 2  ;;  %v14138_v5 = vld [vmem:[%s18258_s1 + $0x4f0] sm:$0xff]  }
 0x11b   : > { %v15643_v28 = vadd.f32 %v12633_v36, %v828_v29  ;;  %v15645_v6 = vpop.f32.mrf.mxu1  ;;  %13010 = vmatprep.subr.bf16.mxu1 %v14125_v30  ;;  %v3813_v29 = vrot.slane %v15326_v55, 2  ;;  %v3635_v61 = vsel %vm3630_vm5, %v3632_v31, %v3634_v44  ;;  %v3987_v36 = vshrl.u32 %v15615_v17, 16 }
 0x11c   : > { %18321 = vst [vmem:[#allocation12_spill] sm:$0xff] %v15645_v6  ;;  %v12608_v45 = vpop.f32.mrf.mxu0  ;;  %12943 = vmatmul.mubr.bf16.gmra.mxu0 %v3205_v49  ;;  %v3638_v55 = vrot.slane %v15285_v26, 2  ;;  %v3815_v31 = vrot.slane %v15341_v21, 2  ;;  %v14144_v21 = vld [vmem:[%s18258_s1 + $0x4d8] sm:$0xff]  }
 0x11d   : > { %v831_v54 = vadd.f32 %v12608_v45, %v15487_v35  ;;  %12983 = vmatpush3.bf16.msra.mxu0 %v14124_v8  ;;  %v12636_v20 = vpop.f32.mrf.mxu1  ;;  %12971 = vmatmul.mubr.bf16.gmra.mxu1 %v3462_v18  ;;  %v14130_v35 = vld [vmem:[%s18258_s1 + $0x448] sm:$0xff]  }
 0x11e   : > { %13011 = vmatpush3.bf16.msra.mxu1 %v14125_v30  ;;  %v807_v53 = vpop.f32.mrf.mxu0  ;;  %12984 = vmatprep.subr.bf16.mxu0 %v14127_v10  ;;  %v3811_v30 = vrot.slane %v15248_v19, 2 }
 0x11f   : > { %v829_v38 = vadd.f32 %v807_v53, %v15500_v48  ;;  %v15657_v37 = vadd.f32 %v12636_v20, %v831_v54  ;;  %v1058_v49 = vpop.f32.mrf.mxu1  ;;  %13012 = vmatprep.subr.bf16.mxu1 %v14128_v62  ;;  %12990 = vmatprep.mubr.bf16.mxu0 %v3633_v51  ;;  %v14131_v48 = vld [vmem:[%s18258_s1 + $0x400] sm:$0xff]   ;;  %v3640_v51 = vrot.slane %v15522_v47, 2  ;;  %v3637_v20 = vsel %vm3630_vm5, %v3634_v44, %v3636_v56  ;;  %v14148_v47 = vld [vmem:[%s18258_s1 + $0x4c8] sm:$0xff]  }
 0x120   : > { %v12609_v18 = vpop.f32.mrf.mxu0  ;;  %13018 = vmatprep.mubr.bf16.mxu1 %v3810_v41  ;;  %v14139_v41 = vld [vmem:[%s18258_s1 + $0x4a8] sm:$0xff]   ;;  %v3814_v26 = vsel %vm3630_vm5, %v3811_v30, %v3813_v29  ;;  %v3817_v53 = vrot.slane %v15539_v40, 2  ;;  %v5409_v40 = vld [vmem:[%s14577_s10 + $0xb0] sm:$0x7] }
 0x121   : > { %v15662_v39 = vadd.f32 %v1058_v49, %v829_v38  ;;  %12985 = vmatpush3.bf16.msra.mxu0 %v14127_v10  ;;  %v12637_v8 = vpop.f32.mrf.mxu1  ;;  %v3812_v10 = vsel %vm3630_vm5, %v3809_v15, %v3811_v30  ;;  %v15697_v15 = vld [vmem:[%s14577_s10 + $0x8c] sm:$0xff]   ;;  %v15706_v49 = vrot.slane %v3987_v36, 2  ;;  %v4186_v18 = vshrl.u32 %v15618_v42, 16  ;;  %v14141_v36 = vld [vmem:[%s18258_s1 + $0x4a0] sm:$0xff]  }
 0x122   : > { %13013 = vmatpush3.bf16.msra.mxu1 %v14128_v62  ;;  %12986 = vmatprep.subr.bf16.mxu0 %v14129_v24  ;;  %v15682_v19 = vpop.f32.mrf.mxu0  ;;  %v14137_v62 = vld [vmem:[%s18258_s1 + $0x4b0] sm:$0xff]  }
 0x123   : > { %13014 = vmatprep.subr.bf16.mxu1 %v14130_v35  ;;  %18322 = vst [vmem:[#allocation13_spill] sm:$0xff] %v15682_v19  ;;  %v15693_v45 = vpop.f32.mrf.mxu1  ;;  %v15711_v8 = vld [vmem:[%s14577_s10 + $0x94] sm:$0xff]  }
 0x124   : > { %18323 = vst [vmem:[#allocation14_spill] sm:$0xff] %v15693_v45 }
 0x125   : > { %12987 = vmatpush3.bf16.msra.mxu0 %v14129_v24 }
 0x126   : > { %13015 = vmatpush3.bf16.msra.mxu1 %v14130_v35  ;;  %12988 = vmatprep.subr.bf16.mxu0 %v14131_v48  ;;  %v3990_v35 = vshll.u32 %v15615_v17, 16  ;;  %v4189_v17 = vshll.u32 %v15618_v42, 16  ;;  %v3816_v42 = vsel %vm3630_vm5, %v3813_v29, %v3815_v31 }
 0x127   : > { %13016 = vmatprep.subr.bf16.mxu1 %v14132_v11 }
 0x129   : > { %12989 = vmatpush3.bf16.msra.mxu0 %v14131_v48 }
 0x12a   : > { %13017 = vmatpush3.bf16.msra.mxu1 %v14132_v11  ;;  %13030 = vmatprep.subr.bf16.mxu0 %v14135_v12 }
 0x12b   : > { %13058 = vmatprep.subr.bf16.mxu1 %v14136_v46 }
 0x12c   : > { %v12656_v54 = vpop.f32.mrf.mxu0  ;;  %12991 = vmatmul.mubr.bf16.vlgmr.msra.gmra.mxu0 %v3635_v61 }
 0x12d   : > { %v1252_v24 = vadd.f32 %v12656_v54, %v15588_v3  ;;  %v12684_v38 = vpop.f32.mrf.mxu1  ;;  %13019 = vmatmul.mubr.bf16.vlgmr.msra.gmra.mxu1 %v3812_v10  ;;  %13031 = vmatpush3.bf16.msra.mxu0 %v14135_v12  ;;  %v14140_v3 = vld [vmem:[%s18258_s1 + $0x4e8] sm:$0xff]   ;;  %v18270_v12 = vshrl.u32 %v15697_v15, 16 }
 0x12e   : > { %13059 = vmatpush3.bf16.msra.mxu1 %v14136_v46  ;;  %v1204_v48 = vpop.f32.mrf.mxu0  ;;  %13032 = vmatprep.subr.bf16.mxu0 %v14137_v62  ;;  %v3639_v46 = vsel %vm3630_vm5, %v3636_v56, %v3638_v55  ;;  %v14142_v56 = vld [vmem:[%s18258_s1 + $0x4e0] sm:$0xff]  }
 0x12f   : > { %v15713_v11 = vadd.f32 %v12684_v38, %v1252_v24  ;;  %v1250_v44 = vadd.f32 %v1204_v48, %v15595_v2  ;;  %v1381_v30 = vpop.f32.mrf.mxu1  ;;  %13060 = vmatprep.subr.bf16.mxu1 %v14138_v5  ;;  %12994 = vmatprep.mubr.bf16.mxu0 %v3637_v20  ;;  %v15734_v20 = vrot.slane %v3990_v35, 3  ;;  %v15738_v24 = vrot.slane %v4186_v18, 2  ;;  %v15750_v35 = vld [vmem:[%s14577_s10 + $0x9c] sm:$0xff]  }
 0x130   : > { %v12657_v61 = vpop.f32.mrf.mxu0  ;;  %13022 = vmatprep.mubr.bf16.mxu1 %v3814_v26  ;;  %v5438_v29 = vrot.slane %v18270_v12, 2  ;;  %v3641_v18 = vsel %vm3630_vm5, %v3638_v55, %v3640_v51  ;;  %v3818_v55 = vsel %vm3630_vm5, %v3815_v31, %v3817_v53 }
 0x131   : > { %v15725_v2 = vadd.f32 %v1381_v30, %v1250_v44  ;;  %v1253_v10 = vadd.f32 %v12657_v61, %v15606_v43  ;;  %v12685_v54 = vpop.f32.mrf.mxu1  ;;  %13033 = vmatpush3.bf16.msra.mxu0 %v14137_v62  ;;  %v18273_v43 = vshll.u32 %v15697_v15, 16  ;;  %v18271_v62 = vshrl.u32 %v15711_v8, 16  ;;  %v15756_v61 = vld [vmem:[%s14577_s10 + $0xa4] sm:$0xff]  }
 0x132   : > { %13061 = vmatpush3.bf16.msra.mxu1 %v14138_v5  ;;  %v15736_v26 = vpop.f32.mrf.mxu0  ;;  %13034 = vmatprep.subr.bf16.mxu0 %v14139_v41  ;;  %v18272_v5 = vshll.u32 %v15711_v8, 16  ;;  %v4191_v30 = vrot.slane %v4189_v17, 3  ;;  %v3993_v31 = vor.u32 %v15734_v20, %v15706_v49 }
 0x133   : > { %18324 = vst [vmem:[#allocation15_spill] sm:$0xff] %v15736_v26  ;;  %v15744_v38 = vadd.f32 %v12685_v54, %v1253_v10  ;;  %v15746_v48 = vpop.f32.mrf.mxu1  ;;  %13062 = vmatprep.subr.bf16.mxu1 %v14140_v3  ;;  %v5439_v10 = vrot.slane %v18273_v43, 3  ;;  %v5442_v54 = vrot.slane %v18271_v62, 2  ;;  %v18275_v43 = vshll.u32 %v15756_v61, 16 }
 0x134   : > { %18325 = vst [vmem:[#allocation16_spill] sm:$0xff] %v15746_v48  ;;  %v12660_v44 = vpop.f32.mrf.mxu0  ;;  %12995 = vmatmul.mubr.bf16.gmra.mxu0 %v3639_v46  ;;  %v14143_v46 = vld [vmem:[%s18258_s1 + $0x498] sm:$0xff]   ;;  %v5443_v17 = vrot.slane %v18272_v5, 3 }
 0x135   : > { %v1256_v27 = vadd.f32 %v12660_v44, %v15626_v50  ;;  %13035 = vmatpush3.bf16.msra.mxu0 %v14139_v41  ;;  %v12688_v12 = vpop.f32.mrf.mxu1  ;;  %13023 = vmatmul.mubr.bf16.gmra.mxu1 %v3816_v42  ;;  %v15773_v50 = vor.u32 %v5439_v10, %v5438_v29  ;;  %v4192_v29 = vor.u32 %v4191_v30, %v15738_v24  ;;  %v14145_v24 = vld [vmem:[%s18258_s1 + $0x490] sm:$0xff]  }
 0x136   : > { %13063 = vmatpush3.bf16.msra.mxu1 %v14140_v3  ;;  %v1220_v62 = vpop.f32.mrf.mxu0  ;;  %13036 = vmatprep.subr.bf16.mxu0 %v14141_v36  ;;  %v18277_v3 = vshrl.u32 %v15750_v35, 16 }
 0x137   : > { %v1254_v41 = vadd.f32 %v1220_v62, %v15636_v13  ;;  %v15776_v42 = vadd.f32 %v12688_v12, %v1256_v27  ;;  %v1397_v44 = vpop.f32.mrf.mxu1  ;;  %13064 = vmatprep.subr.bf16.mxu1 %v14142_v56  ;;  %12998 = vmatprep.mubr.bf16.mxu0 %v3641_v18  ;;  %v18276_v13 = vshll.u32 %v15750_v35, 16  ;;  %v18274_v27 = vshrl.u32 %v15756_v61, 16 }
 0x138   : > { %v12661_v5 = vpop.f32.mrf.mxu0  ;;  %13026 = vmatprep.mubr.bf16.mxu1 %v3818_v55  ;;  %v5444_v12 = vor.u32 %v5443_v17, %v5442_v54  ;;  %v5446_v49 = vrot.slane %v18277_v3, 2  ;;  %v14146_v54 = vld [vmem:[%s18258_s1 + $0x4d0] sm:$0xff]   ;;  %v5451_v55 = vrot.slane %v18275_v43, 3  ;;  %v15831_v43 = vld [vmem:[%s14577_s10 + $0xac] sm:$0xf] }
 0x139   : > { %v1257_v62 = vadd.f32 %v12661_v5, %v15643_v28  ;;  %v15788_v18 = vadd.f32 %v1397_v44, %v1254_v41  ;;  %13037 = vmatpush3.bf16.msra.mxu0 %v14141_v36  ;;  %v12689_v10 = vpop.f32.mrf.mxu1  ;;  %v5447_v36 = vrot.slane %v18276_v13, 3  ;;  %v5450_v5 = vrot.slane %v18274_v27, 2  ;;  %v14147_v41 = vld [vmem:[%s18258_s1 + $0x488] sm:$0xff]  }
 0x13a   : > { %13065 = vmatpush3.bf16.msra.mxu1 %v14142_v56  ;;  %v15793_v20 = vpop.f32.mrf.mxu0  ;;  %13038 = vmatprep.subr.bf16.mxu0 %v14143_v46  ;;  %v15800_v28 = vsel %vm3985_vm3, %v15773_v50, %v5444_v12  ;;  %v3997_v44 = vsel %vm3985_vm3, %v3993_v31, %v15287_v9 }
 0x13b   : > { %18326 = vst [vmem:[#allocation17_spill] sm:$0xff] %v15793_v20  ;;  %v15806_v30 = vadd.f32 %v12689_v10, %v1257_v62  ;;  %v15808_v56 = vpop.f32.mrf.mxu1  ;;  %13066 = vmatprep.subr.bf16.mxu1 %v14144_v21  ;;  %v5448_v62 = vor.u32 %v5447_v36, %v5446_v49  ;;  %v5452_v13 = vor.u32 %v5451_v55, %v5450_v5  ;;  %v15841_v49 = vld [vmem:[%s14577_s10 + $0xcc] sm:$0xff]   ;;  %v14150_v5 = vld [vmem:[%s18258_s1 + $0x4c0] sm:$0xff]  }
 0x13c   : > { %18327 = vst [vmem:[#allocation18_spill] sm:$0xff] %v15808_v56  ;;  %v12664_v17 = vpop.f32.mrf.mxu0  ;;  %12999 = vmatmul.mubr.bf16.gmra.mxu0 %v3640_v51  ;;  %v4196_v51 = vsel %vm3985_vm3, %v4192_v29, %v15351_v23  ;;  %v14149_v29 = vld [vmem:[%s18258_s1 + $0x480] sm:$0xff]  }
 0x13d   : > { %v1260_v10 = vadd.f32 %v12664_v17, %v15657_v37  ;;  %13039 = vmatpush3.bf16.msra.mxu0 %v14143_v46  ;;  %v12692_v27 = vpop.f32.mrf.mxu1  ;;  %13027 = vmatmul.mubr.bf16.gmra.mxu1 %v3817_v53  ;;  %v15834_v37 = vsel %vm3985_vm3, %v5444_v12, %v5448_v62  ;;  %v15844_v23 = vsel %vm3985_vm3, %v5448_v62, %v5452_v13  ;;  %v15850_v12 = vld [vmem:[%s14577_s10 + $0xd4] sm:$0xff]   ;;  %v15864_v62 = vld [vmem:[%s14577_s10 + $0x88] sm:$0xf] }
 0x13e   : > { %13067 = vmatpush3.bf16.msra.mxu1 %v14144_v21  ;;  %v1236_v9 = vpop.f32.mrf.mxu0  ;;  %13040 = vmatprep.subr.bf16.mxu0 %v14145_v24 }
 0x13f   : > { %v1258_v53 = vadd.f32 %v1236_v9, %v15662_v39  ;;  %v15838_v46 = vadd.f32 %v12692_v27, %v1260_v10  ;;  %v1413_v31 = vpop.f32.mrf.mxu1  ;;  %13068 = vmatprep.subr.bf16.mxu1 %v14146_v54  ;;  %13046 = vmatprep.mubr.bf16.mxu0 %v3997_v44  ;;  %v15853_v39 = vcombine.low %v15831_v43, %v5409_v40  ;;  %v4541_v44 = vld [vmem:[%s14577_s10 + $0x84] sm:$0xe]  ;;  %v18279_v9 = vshll.u32 %v15841_v49, 16  ;;  %v14152_v40 = vld [vmem:[%s18258_s1 + $0x578] sm:$0xff]  }
 0x140   : > { %v12665_v21 = vpop.f32.mrf.mxu0  ;;  %13074 = vmatprep.mubr.bf16.mxu1 %v4196_v51 }
 0x141   : > { %v15855_v27 = vadd.f32 %v1413_v31, %v1258_v53  ;;  %13041 = vmatpush3.bf16.msra.mxu0 %v14145_v24  ;;  %v12693_v36 = vpop.f32.mrf.mxu1  ;;  %v5455_v55 = vshrl.u32 %v15853_v39, 16  ;;  %v5458_v17 = vshll.u32 %v15853_v39, 16  ;;  %v18278_v24 = vshrl.u32 %v15841_v49, 16 }
 0x142   : > { %13069 = vmatpush3.bf16.msra.mxu1 %v14146_v54  ;;  %13042 = vmatprep.subr.bf16.mxu0 %v14147_v41  ;;  %v14151_v54 = vld [vmem:[%s18258_s1 + $0x538] sm:$0xff]   ;;  %v15875_v53 = vcombine.low %v4541_v44, %v15864_v62  ;;  %v18280_v31 = vshrl.u32 %v15850_v12, 16  ;;  %v15885_v36 = vld [vmem:[%s14577_s10 + $0xe4] sm:$0xff]   ;;  %v14153_v44 = vld [vmem:[%s18258_s1 + $0x530] sm:$0xff]   ;;  %v15907_v48 = vpop.f32.mrf.mxu0 }
 0x143   : > { %13070 = vmatprep.subr.bf16.mxu1 %v14148_v47  ;;  %v5457_v10 = vrot.slane %v5455_v55, 2  ;;  %v5460_v51 = vrot.slane %v5458_v17, 3  ;;  %v5637_v55 = vrot.slane %v18278_v24, 2  ;;  %v5638_v17 = vrot.slane %v18279_v9, 3  ;;  %v14154_v24 = vld [vmem:[%s18258_s1 + $0x570] sm:$0xff]   ;;  %18328 = vst [vmem:[#allocation19_spill] sm:$0xff] %v15907_v48 }
 0x144   : > { %v4604_v56 = vshll.u32 %v15875_v53, 16 }
 0x145   : > { %13043 = vmatpush3.bf16.msra.mxu0 %v14147_v41  ;;  %v18281_v41 = vshll.u32 %v15850_v12, 16  ;;  %v15879_v21 = vor.u32 %v5460_v51, %v5457_v10  ;;  %v5641_v10 = vrot.slane %v18280_v31, 2  ;;  %v15905_v9 = vor.u32 %v5638_v17, %v5637_v55  ;;  %v15911_v31 = vpop.f32.mrf.mxu1  ;;  %v14156_v55 = vld [vmem:[%s18258_s1 + $0x568] sm:$0xff]  }
 0x146   : > { %13071 = vmatpush3.bf16.msra.mxu1 %v14148_v47  ;;  %13044 = vmatprep.subr.bf16.mxu0 %v14149_v29  ;;  %v15882_v47 = vld [vmem:[%s14577_s10 + $0xdc] sm:$0xff]   ;;  %18329 = vst [vmem:[#allocation20_spill] sm:$0xff] %v15911_v31 }
 0x147   : > { %13072 = vmatprep.subr.bf16.mxu1 %v14150_v5  ;;  %v15896_v3 = vsel %vm3985_vm3, %v5452_v13, %v15879_v21  ;;  %v5642_v51 = vrot.slane %v18281_v41, 3  ;;  %v4601_v13 = vshrl.u32 %v15875_v53, 16 }
 0x149   : > { %13045 = vmatpush3.bf16.msra.mxu0 %v14149_v29  ;;  %v5643_v26 = vor.u32 %v5642_v51, %v5641_v10 }
 0x14a   : > { %13073 = vmatpush3.bf16.msra.mxu1 %v14150_v5  ;;  %13086 = vmatprep.subr.bf16.mxu0 %v14151_v54  ;;  %v14155_v5 = vld [vmem:[%s18258_s1 + $0x528] sm:$0xff]  }
 0x14b   : > { %13114 = vmatprep.subr.bf16.mxu1 %v14152_v40  ;;  %v15923_v53 = vsel %vm3985_vm3, %v15905_v9, %v5643_v26 }
 0x14c   : > { %v12712_v17 = vpop.f32.mrf.mxu0  ;;  %13047 = vmatmul.mubr.bf16.vlgmr.msra.gmra.mxu0 %v15380_v52 }
 0x14d   : > { %v1629_v10 = vadd.f32 %v12712_v17, %v15713_v11  ;;  %v12740_v51 = vpop.f32.mrf.mxu1  ;;  %13075 = vmatmul.mubr.bf16.vlgmr.msra.gmra.mxu1 %v15396_v33  ;;  %13087 = vmatpush3.bf16.msra.mxu0 %v14151_v54  ;;  %v4363_v11 = vld [vmem:[%s14577_s10 + $0x4] sm:$0x8]  ;;  %v18330_v17 = vshrl.u32 %v15882_v47, 16  ;;  %v18331_v54 = vshll.u32 %v15882_v47, 16 }
 0x14e   : > { %13115 = vmatpush3.bf16.msra.mxu1 %v14152_v40  ;;  %v1581_v52 = vpop.f32.mrf.mxu0  ;;  %13088 = vmatprep.subr.bf16.mxu0 %v14153_v44  ;;  %v18332_v40 = vshrl.u32 %v15885_v36, 16 }
 0x14f   : > { %v15930_v45 = vadd.f32 %v12740_v51, %v1629_v10  ;;  %v1627_v41 = vadd.f32 %v1581_v52, %v15725_v2  ;;  %v1782_v29 = vpop.f32.mrf.mxu1  ;;  %13116 = vmatprep.subr.bf16.mxu1 %v14154_v24  ;;  %13050 = vmatprep.mubr.bf16.mxu0 %v15425_v0  ;;  %v5645_v33 = vrot.slane %v18330_v17, 2  ;;  %v5646_v31 = vrot.slane %v18331_v54, 3  ;;  %v14157_v2 = vld [vmem:[%s18258_s1 + $0x520] sm:$0xff]  }
 0x150   : > { %v12713_v48 = vpop.f32.mrf.mxu0  ;;  %13078 = vmatprep.mubr.bf16.mxu1 %v15459_v22  ;;  %v5649_v10 = vrot.slane %v18332_v40, 2  ;;  %v18333_v0 = vshll.u32 %v15885_v36, 16  ;;  %v14158_v22 = vld [vmem:[%s18258_s1 + $0x560] sm:$0xff]   ;;  %v14484_v40 = vld [vmem:[%s14577_s10 + $0x8] sm:$0xf] }
 0x151   : > { %v15947_v52 = vadd.f32 %v1782_v29, %v1627_v41  ;;  %v1630_v17 = vadd.f32 %v12713_v48, %v15744_v38  ;;  %v12741_v20 = vpop.f32.mrf.mxu1  ;;  %13089 = vmatpush3.bf16.msra.mxu0 %v14153_v44  ;;  %v5647_v54 = vor.u32 %v5646_v31, %v5645_v33  ;;  %v11007_v6 = vcombine.low %v4363_v11, %v14484_v40  ;;  %v15962_v44 = vld [vmem:[%s14577_s10 + $0xec] sm:$0xf]  ;;  %v14160_v31 = vld [vmem:[%s18258_s1 + $0x518] sm:$0xff]  }
 0x152   : > { %v5650_v51 = vrot.slane %v18333_v0, 3  ;;  %13117 = vmatpush3.bf16.msra.mxu1 %v14154_v24  ;;  %v15953_v63 = vpop.f32.mrf.mxu0  ;;  %13090 = vmatprep.subr.bf16.mxu0 %v14155_v5  ;;  %v5608_v0 = vld [vmem:[%s14577_s10 + $0xf0] sm:$0x7]  ;;  %v4603_v38 = vrot.slane %v4601_v13, 1  ;;  %v4606_v48 = vrot.slane %v4604_v56, 2  ;;  %v18337_v33 = vshll.u32 %v15697_v15, 16 }
 0x153   : > { %18334 = vst [vmem:[#allocation21_spill] sm:$0xff] %v15953_v63  ;;  %v15957_v41 = vadd.f32 %v12741_v20, %v1630_v17  ;;  %v15959_v29 = vpop.f32.mrf.mxu1  ;;  %13118 = vmatprep.subr.bf16.mxu1 %v14156_v55  ;;  %v15965_v25 = vsel %vm3985_vm3, %v5643_v26, %v5647_v54  ;;  %v18336_v20 = vshrl.u32 %v15697_v15, 16  ;;  %v11167_v13 = vcombine.low %v15962_v44, %v5608_v0 }
 0x154   : > { %v5651_v19 = vor.u32 %v5650_v51, %v5649_v10  ;;  %18335 = vst [vmem:[#allocation22_spill] sm:$0xff] %v15959_v29  ;;  %v12716_v24 = vpop.f32.mrf.mxu0  ;;  %13051 = vmatmul.mubr.bf16.gmra.mxu0 %v15440_v60  ;;  %v4614_v10 = vrot.slane %v18337_v33, 2 }
 0x155   : > { %v4611_v11 = vrot.slane %v18336_v20, 1  ;;  %v1633_v26 = vadd.f32 %v12716_v24, %v15776_v42  ;;  %13091 = vmatpush3.bf16.msra.mxu0 %v14155_v5  ;;  %v12744_v51 = vpop.f32.mrf.mxu1  ;;  %13079 = vmatmul.mubr.bf16.gmra.mxu1 %v15466_v16  ;;  %v5654_v17 = vshrl.u32 %v11167_v13, 16  ;;  %v5657_v40 = vshll.u32 %v11167_v13, 16  ;;  %v14161_v42 = vld [vmem:[%s18258_s1 + $0x558] sm:$0xff]   ;;  %v14163_v16 = vld [vmem:[%s18258_s1 + $0x510] sm:$0xff]  }
 0x156   : > { %v15976_v56 = vsel %vm3985_vm3, %v5647_v54, %v5651_v19  ;;  %13119 = vmatpush3.bf16.msra.mxu1 %v14156_v55  ;;  %v1597_v60 = vpop.f32.mrf.mxu0  ;;  %13092 = vmatprep.subr.bf16.mxu0 %v14157_v2  ;;  %v4385_v5 = vrot.slane %v11007_v6, 3  ;;  %v4607_v13 = vor.u32 %v4606_v48, %v4603_v38  ;;  %v18340_v38 = vrot.slane %v15186_v34, 3 }
 0x157   : > { %v1631_v20 = vadd.f32 %v1597_v60, %v15788_v18  ;;  %v15982_v15 = vadd.f32 %v12744_v51, %v1633_v26  ;;  %v1798_v33 = vpop.f32.mrf.mxu1  ;;  %13120 = vmatprep.subr.bf16.mxu1 %v14158_v22  ;;  %13054 = vmatprep.mubr.bf16.mxu0 %v15509_v32  ;;  %v5656_v55 = vrot.slane %v5654_v17, 2  ;;  %v5659_v18 = vrot.slane %v5657_v40, 3 }
 0x158   : > { %v12717_v54 = vpop.f32.mrf.mxu0  ;;  %13082 = vmatprep.mubr.bf16.mxu1 %v15526_v58  ;;  %v15995_v26 = vor.u32 %v4614_v10, %v4611_v11  ;;  %v4387_v48 = vsel %vm4384_vm4, %v4385_v5, %v18340_v38 }
 0x159   : > { %v1634_v0 = vadd.f32 %v12717_v54, %v15806_v30  ;;  %v15993_v24 = vadd.f32 %v1798_v33, %v1631_v20  ;;  %13093 = vmatpush3.bf16.msra.mxu0 %v14157_v2  ;;  %v12745_v32 = vpop.f32.mrf.mxu1  ;;  %v15999_v58 = vor.u32 %v5659_v18, %v5656_v55  ;;  %v14164_v30 = vld [vmem:[%s18258_s1 + $0x550] sm:$0xff]   ;;  %v18342_v33 = vshll.u32 %v15711_v8, 16 }
 0x15a   : > { %13121 = vmatpush3.bf16.msra.mxu1 %v14158_v22  ;;  %v15997_v6 = vpop.f32.mrf.mxu0  ;;  %13094 = vmatprep.subr.bf16.mxu0 %v14160_v31  ;;  %v14165_v22 = vld [vmem:[%s18258_s1 + $0x508] sm:$0xff]   ;;  %v4616_v34 = vsel %vm1459_vm2, %v4607_v13, %v15995_v26  ;;  %v4552_v54 = vld [vmem:[%s14577_s10 + $0xb0] sm:$0x3]  ;;  %v18344_v13 = vshll.u32 %v15750_v35, 16 }
 0x15b   : > { %18338 = vst [vmem:[#allocation23_spill] sm:$0xff] %v15997_v6  ;;  %v16001_v51 = vadd.f32 %v12745_v32, %v1634_v0  ;;  %v16003_v60 = vpop.f32.mrf.mxu1  ;;  %13122 = vmatprep.subr.bf16.mxu1 %v14161_v42  ;;  %v16017_v11 = vsel %vm3985_vm3, %v5651_v19, %v15999_v58  ;;  %v4623_v5 = vrot.slane %v18342_v33, 2  ;;  %v18343_v0 = vshrl.u32 %v15750_v35, 16  ;;  %v14174_v35 = vld [vmem:[%s18258_s1 + $0x5f8] sm:$0xff]  }
 0x15c   : > { %18339 = vst [vmem:[#allocation24_spill] sm:$0xff] %v16003_v60  ;;  %v12720_v2 = vpop.f32.mrf.mxu0  ;;  %13055 = vmatmul.mubr.bf16.gmra.mxu0 %v15498_v4  ;;  %v14166_v4 = vld [vmem:[%s18258_s1 + $0x548] sm:$0xff]   ;;  %v16047_v38 = vcombine.low %v15831_v43, %v4552_v54  ;;  %v18347_v33 = vshll.u32 %v15756_v61, 16 }
 0x15d   : > { %v1637_v10 = vadd.f32 %v12720_v2, %v15838_v46  ;;  %13095 = vmatpush3.bf16.msra.mxu0 %v14160_v31  ;;  %v12748_v17 = vpop.f32.mrf.mxu1  ;;  %13083 = vmatmul.mubr.bf16.gmra.mxu1 %v15511_v7  ;;  %v18341_v31 = vshrl.u32 %v15711_v8, 16  ;;  %v14168_v8 = vld [vmem:[%s18258_s1 + $0x540] sm:$0xff]   ;;  %v4629_v32 = vrot.slane %v18343_v0, 1  ;;  %v4632_v2 = vrot.slane %v18344_v13, 2 }
 0x15e   : > { %13123 = vmatpush3.bf16.msra.mxu1 %v14161_v42  ;;  %v1613_v40 = vpop.f32.mrf.mxu0  ;;  %13096 = vmatprep.subr.bf16.mxu0 %v14163_v16  ;;  %v14167_v42 = vld [vmem:[%s18258_s1 + $0x500] sm:$0xff]   ;;  %v4645_v43 = vshrl.u32 %v16047_v38, 16 }
 0x15f   : > { %v1635_v19 = vadd.f32 %v1613_v40, %v15855_v27  ;;  %v16027_v20 = vadd.f32 %v12748_v17, %v1637_v10  ;;  %v1814_v46 = vpop.f32.mrf.mxu1  ;;  %13124 = vmatprep.subr.bf16.mxu1 %v14164_v30  ;;  %13102 = vmatprep.mubr.bf16.mxu0 %v4387_v48  ;;  %v4620_v7 = vrot.slane %v18341_v31, 1  ;;  %v14175_v48 = vld [vmem:[%s18258_s1 + $0x5b0] sm:$0xff]   ;;  %v4798_v10 = vld [vmem:[%s14577_s10 + $0xc4] sm:$0xe]  ;;  %v4633_v17 = vor.u32 %v4632_v2, %v4629_v32  ;;  %v16068_v40 = vld [vmem:[%s14577_s10 + $0x18] sm:$0xf] }
 0x160   : > { %v12721_v55 = vpop.f32.mrf.mxu0  ;;  %13130 = vmatprep.mubr.bf16.mxu1 %v4616_v34  ;;  %v16065_v34 = vld [vmem:[%s14577_s10 + $0x14] sm:$0xf]  ;;  %v18346_v31 = vshrl.u32 %v15756_v61, 16 }
 0x161   : > { %v16037_v18 = vadd.f32 %v1814_v46, %v1635_v19  ;;  %13097 = vmatpush3.bf16.msra.mxu0 %v14163_v16  ;;  %v12749_v27 = vpop.f32.mrf.mxu1  ;;  %v4624_v16 = vor.u32 %v4623_v5, %v4620_v7  ;;  %v4641_v5 = vrot.slane %v18347_v33, 2  ;;  %v16081_v55 = vld [vmem:[%s14577_s10 + $0x54] sm:$0xf] }
 0x162   : > { %13125 = vmatpush3.bf16.msra.mxu1 %v14164_v30  ;;  %13098 = vmatprep.subr.bf16.mxu0 %v14165_v22  ;;  %v14173_v30 = vld [vmem:[%s18258_s1 + $0x5b8] sm:$0xff]   ;;  %v16070_v19 = vpop.f32.mrf.mxu0  ;;  %v4638_v7 = vrot.slane %v18346_v31, 1  ;;  %v4647_v31 = vrot.slane %v4645_v43, 1 }
 0x163   : > { %13126 = vmatprep.subr.bf16.mxu1 %v14166_v4  ;;  %18345 = vst [vmem:[#allocation25_spill] sm:$0xff] %v16070_v19  ;;  %v4625_v46 = vsel %vm1459_vm2, %v15995_v26, %v4624_v16  ;;  %v16086_v27 = vpop.f32.mrf.mxu1  ;;  %v14176_v26 = vld [vmem:[%s18258_s1 + $0x5f0] sm:$0xff]   ;;  %v4634_v2 = vsel %vm1459_vm2, %v4624_v16, %v4633_v17  ;;  %v14178_v16 = vld [vmem:[%s18258_s1 + $0x5e8] sm:$0xff]  }
 0x164   : > { %18348 = vst [vmem:[#allocation26_spill] sm:$0xff] %v16086_v27  ;;  %v4642_v27 = vor.u32 %v4641_v5, %v4638_v7 }
 0x165   : > { %13099 = vmatpush3.bf16.msra.mxu0 %v14165_v22  ;;  %v4648_v22 = vshll.u32 %v16047_v38, 16 }
 0x166   : > { %13127 = vmatpush3.bf16.msra.mxu1 %v14166_v4  ;;  %13100 = vmatprep.subr.bf16.mxu0 %v14167_v42  ;;  %v16062_v4 = vld [vmem:[%s14577_s10 + $0xc8] sm:$0xf] }
 0x167   : > { %13128 = vmatprep.subr.bf16.mxu1 %v14168_v8  ;;  %v11062_v61 = vcombine.low %v4798_v10, %v16062_v4  ;;  %v4650_v33 = vrot.slane %v4648_v22, 2 }
 0x169   : > { %13101 = vmatpush3.bf16.msra.mxu0 %v14167_v42  ;;  %v16084_v42 = vld [vmem:[%s14577_s10 + $0x58] sm:$0xf]  ;;  %v4861_v43 = vshll.u32 %v11062_v61, 16 }
 0x16a   : > { %13129 = vmatpush3.bf16.msra.mxu1 %v14168_v8  ;;  %13142 = vmatprep.subr.bf16.mxu0 %v14173_v30  ;;  %v14177_v8 = vld [vmem:[%s18258_s1 + $0x5a8] sm:$0xff]  }
 0x16b   : > { %13170 = vmatprep.subr.bf16.mxu1 %v14174_v35 }
 0x16c   : > { %v12768_v0 = vpop.f32.mrf.mxu0  ;;  %13103 = vmatmul.mubr.bf16.vlgmr.msra.gmra.mxu0 %v15492_v1 }
 0x16d   : > { %v2031_v32 = vadd.f32 %v12768_v0, %v15930_v45  ;;  %v12796_v13 = vpop.f32.mrf.mxu1  ;;  %13131 = vmatmul.mubr.bf16.vlgmr.msra.gmra.mxu1 %v4625_v46  ;;  %13143 = vmatpush3.bf16.msra.mxu0 %v14173_v30  ;;  %v18349_v46 = vld [vmem:[#allocation6_spill] sm:$0xff] }
 0x16e   : > { %13171 = vmatpush3.bf16.msra.mxu1 %v14174_v35  ;;  %v1983_v54 = vpop.f32.mrf.mxu0  ;;  %13144 = vmatprep.subr.bf16.mxu0 %v14175_v48  ;;  %v4858_v35 = vshrl.u32 %v11062_v61, 16 }
 0x16f   : > { %v16100_v1 = vadd.f32 %v12796_v13, %v2031_v32  ;;  %v2029_v10 = vadd.f32 %v1983_v54, %v15947_v52  ;;  %v2234_v45 = vpop.f32.mrf.mxu1  ;;  %13172 = vmatprep.subr.bf16.mxu1 %v14176_v26  ;;  %13106 = vmatprep.mubr.bf16.mxu0 %v18349_v46  ;;  %v14181_v52 = vld [vmem:[%s18258_s1 + $0x5a0] sm:$0xff]   ;;  %v4651_v54 = vor.u32 %v4650_v33, %v4647_v31  ;;  %v4863_v46 = vrot.slane %v4861_v43, 2 }
 0x170   : > { %v12769_v30 = vpop.f32.mrf.mxu0  ;;  %13134 = vmatprep.mubr.bf16.mxu1 %v4634_v2  ;;  %v4643_v32 = vsel %vm1459_vm2, %v4633_v17, %v4642_v27  ;;  %v5055_v13 = vld [vmem:[%s14577_s10 + $0x84] sm:$0xc]  ;;  %v4860_v17 = vrot.slane %v4858_v35, 1 }
 0x171   : > { %v16107_v22 = vadd.f32 %v2234_v45, %v2029_v10  ;;  %v2032_v7 = vadd.f32 %v12769_v30, %v15957_v41  ;;  %v12797_v5 = vpop.f32.mrf.mxu1  ;;  %13145 = vmatpush3.bf16.msra.mxu0 %v14175_v48  ;;  %v14182_v41 = vld [vmem:[%s18258_s1 + $0x5e0] sm:$0xff]   ;;  %v18352_v48 = vshrl.u32 %v15841_v49, 16  ;;  %v18354_v45 = vld [vmem:[#allocation7_spill] sm:$0xff] }
 0x172   : > { %13173 = vmatpush3.bf16.msra.mxu1 %v14176_v26  ;;  %v16113_v0 = vpop.f32.mrf.mxu0  ;;  %13146 = vmatprep.subr.bf16.mxu0 %v14177_v8  ;;  %v18353_v26 = vshll.u32 %v15841_v49, 16  ;;  %v14183_v49 = vld [vmem:[%s18258_s1 + $0x598] sm:$0xff]  }
 0x173   : > { %18350 = vst [vmem:[#allocation6_spill] sm:$0xff] %v16113_v0  ;;  %v16117_v2 = vadd.f32 %v12797_v5, %v2032_v7  ;;  %v16119_v61 = vpop.f32.mrf.mxu1  ;;  %13174 = vmatprep.subr.bf16.mxu1 %v14178_v16  ;;  %v4868_v10 = vrot.slane %v18352_v48, 1  ;;  %v4652_v5 = vsel %vm1459_vm2, %v4642_v27, %v4651_v54 }
 0x174   : > { %18351 = vst [vmem:[#allocation27_spill] sm:$0xff] %v16119_v61  ;;  %v4871_v31 = vrot.slane %v18353_v26, 2  ;;  %v12772_v33 = vpop.f32.mrf.mxu0  ;;  %13107 = vmatmul.mubr.bf16.gmra.mxu0 %v18354_v45  ;;  %v16132_v61 = vcombine.low %v5055_v13, %v15864_v62  ;;  %v14184_v62 = vld [vmem:[%s18258_s1 + $0x5d8] sm:$0xff]  }
 0x175   : > { %v2035_v30 = vadd.f32 %v12772_v33, %v15982_v15  ;;  %13147 = vmatpush3.bf16.msra.mxu0 %v14177_v8  ;;  %v12800_v7 = vpop.f32.mrf.mxu1  ;;  %13135 = vmatmul.mubr.bf16.gmra.mxu1 %v4643_v32  ;;  %v4864_v8 = vor.u32 %v4863_v46, %v4860_v17  ;;  %v16147_v32 = vld [vmem:[%s14577_s10 + $0x8c] sm:$0xff]   ;;  %v18357_v46 = vrot.slane %v15452_v14, 3 }
 0x176   : > { %13175 = vmatpush3.bf16.msra.mxu1 %v14178_v16  ;;  %v1999_v48 = vpop.f32.mrf.mxu0  ;;  %13148 = vmatprep.subr.bf16.mxu0 %v14181_v52  ;;  %v16144_v16 = vor.u32 %v4871_v31, %v4868_v10  ;;  %v5077_v13 = vrot.slane %v16147_v32, 2  ;;  %v5076_v45 = vrot.slane %v16132_v61, 2 }
 0x177   : > { %v2033_v35 = vadd.f32 %v1999_v48, %v15993_v24  ;;  %v16138_v43 = vadd.f32 %v12800_v7, %v2035_v30  ;;  %v2250_v15 = vpop.f32.mrf.mxu1  ;;  %13176 = vmatprep.subr.bf16.mxu1 %v14182_v41  ;;  %13110 = vmatprep.mubr.bf16.mxu0 %v15581_v57  ;;  %v14186_v57 = vld [vmem:[%s18258_s1 + $0x590] sm:$0xff]   ;;  %v14189_v48 = vld [vmem:[%s18258_s1 + $0x5c8] sm:$0xff]  }
 0x178   : > { %v12773_v27 = vpop.f32.mrf.mxu0  ;;  %13138 = vmatprep.mubr.bf16.mxu1 %v4652_v5  ;;  %v4873_v30 = vsel %vm1459_vm2, %v4864_v8, %v16144_v16  ;;  %v5078_v14 = vsel %vm3630_vm5, %v5076_v45, %v5077_v13  ;;  %v18359_v8 = vshll.u32 %v15850_v12, 16 }
 0x179   : > { %v2036_v24 = vadd.f32 %v12773_v27, %v16001_v51  ;;  %v16151_v26 = vadd.f32 %v2250_v15, %v2033_v35  ;;  %13149 = vmatpush3.bf16.msra.mxu0 %v14181_v52  ;;  %v12801_v33 = vpop.f32.mrf.mxu1  ;;  %v14187_v51 = vld [vmem:[%s18258_s1 + $0x5d0] sm:$0xff]  }
 0x17a   : > { %13177 = vmatpush3.bf16.msra.mxu1 %v14182_v41  ;;  %v16157_v17 = vpop.f32.mrf.mxu0  ;;  %13150 = vmatprep.subr.bf16.mxu0 %v14183_v49  ;;  %v14188_v41 = vld [vmem:[%s18258_s1 + $0x588] sm:$0xff]  }
 0x17b   : > { %18355 = vst [vmem:[#allocation7_spill] sm:$0xff] %v16157_v17  ;;  %v16159_v10 = vadd.f32 %v12801_v33, %v2036_v24  ;;  %v16161_v31 = vpop.f32.mrf.mxu1  ;;  %13178 = vmatprep.subr.bf16.mxu1 %v14184_v62  ;;  %v4880_v24 = vrot.slane %v18359_v8, 2  ;;  %v4809_v33 = vld [vmem:[%s14577_s10 + $0xf0] sm:$0x3]  ;;  %v18363_v8 = vshll.u32 %v15885_v36, 16 }
 0x17c   : > { %18356 = vst [vmem:[#allocation28_spill] sm:$0xff] %v16161_v31  ;;  %v12776_v52 = vpop.f32.mrf.mxu0  ;;  %13111 = vmatmul.mubr.bf16.gmra.mxu0 %v18357_v46  ;;  %v18360_v46 = vshrl.u32 %v15882_v47, 16  ;;  %v14202_v31 = vld [vmem:[%s18258_s1 + $0x628] sm:$0xff]  }
 0x17d   : > { %v2039_v7 = vadd.f32 %v12776_v52, %v16027_v20  ;;  %13151 = vmatpush3.bf16.msra.mxu0 %v14183_v49  ;;  %v12804_v5 = vpop.f32.mrf.mxu1  ;;  %13139 = vmatmul.mubr.bf16.gmra.mxu1 %v4651_v54  ;;  %v18358_v54 = vshrl.u32 %v15850_v12, 16  ;;  %v14191_v12 = vld [vmem:[%s18258_s1 + $0x5c0] sm:$0xff]  }
 0x17e   : > { %13179 = vmatpush3.bf16.msra.mxu1 %v14184_v62  ;;  %v2015_v35 = vpop.f32.mrf.mxu0  ;;  %13152 = vmatprep.subr.bf16.mxu0 %v14186_v57  ;;  %v14190_v62 = vld [vmem:[%s18258_s1 + $0x580] sm:$0xff]  }
 0x17f   : > { %v2037_v15 = vadd.f32 %v2015_v35, %v16037_v18  ;;  %v16181_v27 = vadd.f32 %v12804_v5, %v2039_v7  ;;  %v2266_v20 = vpop.f32.mrf.mxu1  ;;  %13180 = vmatprep.subr.bf16.mxu1 %v14187_v51  ;;  %13158 = vmatprep.mubr.bf16.mxu0 %v4873_v30  ;;  %v4877_v49 = vrot.slane %v18358_v54, 1  ;;  %v4886_v30 = vrot.slane %v18360_v46, 1 }
 0x180   : > { %v12777_v52 = vpop.f32.mrf.mxu0  ;;  %13186 = vmatprep.mubr.bf16.mxu1 %v5078_v14  ;;  %v18361_v7 = vshll.u32 %v15882_v47, 16  ;;  %v16201_v35 = vcombine.low %v15962_v44, %v4809_v33  ;;  %v14197_v47 = vld [vmem:[%s18258_s1 + $0x678] sm:$0xff]   ;;  %v18362_v54 = vshrl.u32 %v15885_v36, 16  ;;  %v14199_v36 = vld [vmem:[%s18258_s1 + $0x670] sm:$0xff]  }
 0x181   : > { %v16191_v18 = vadd.f32 %v2266_v20, %v2037_v15  ;;  %13153 = vmatpush3.bf16.msra.mxu0 %v14186_v57  ;;  %v12805_v45 = vpop.f32.mrf.mxu1  ;;  %v4881_v57 = vor.u32 %v4880_v24, %v4877_v49  ;;  %v14196_v15 = vld [vmem:[%s18258_s1 + $0x638] sm:$0xff]   ;;  %v4898_v24 = vrot.slane %v18363_v8, 2 }
 0x182   : > { %13181 = vmatpush3.bf16.msra.mxu1 %v14187_v51  ;;  %13154 = vmatprep.subr.bf16.mxu0 %v14188_v41  ;;  %v4889_v5 = vrot.slane %v18361_v7, 2  ;;  %v16204_v51 = vld [vmem:[%s14577_s10 + $0x94] sm:$0xff]   ;;  %v4905_v20 = vshll.u32 %v16201_v35, 16  ;;  %v4895_v49 = vrot.slane %v18362_v54, 1  ;;  %v16222_v33 = vld [vmem:[%s14577_s10 + $0x9c] sm:$0xff]   ;;  %v16225_v45 = vpop.f32.mrf.mxu0 }
 0x183   : > { %13182 = vmatprep.subr.bf16.mxu1 %v14189_v48  ;;  %v5079_v14 = vrot.slane %v16204_v51, 2  ;;  %v5081_v52 = vrot.slane %v16222_v33, 2  ;;  %18364 = vst [vmem:[#allocation29_spill] sm:$0xff] %v16225_v45  ;;  %v16233_v46 = vpop.f32.mrf.mxu1 }
 0x184   : > { %v4890_v44 = vor.u32 %v4889_v5, %v4886_v30  ;;  %18365 = vst [vmem:[#allocation30_spill] sm:$0xff] %v16233_v46  ;;  %v4907_v5 = vrot.slane %v4905_v20, 2  ;;  %v4899_v8 = vor.u32 %v4898_v24, %v4895_v49  ;;  %v5085_v49 = vrot.slane %v16047_v38, 2 }
 0x185   : > { %13155 = vmatpush3.bf16.msra.mxu0 %v14188_v41  ;;  %v4902_v41 = vshrl.u32 %v16201_v35, 16  ;;  %v5082_v46 = vsel %vm3630_vm5, %v5079_v14, %v5081_v52  ;;  %v5431_v24 = vshrl.u32 %v16132_v61, 16 }
 0x186   : > { %13183 = vmatpush3.bf16.msra.mxu1 %v14189_v48  ;;  %13156 = vmatprep.subr.bf16.mxu0 %v14190_v62  ;;  %v4882_v48 = vsel %vm1459_vm2, %v16144_v16, %v4881_v57  ;;  %v14198_v16 = vld [vmem:[%s18258_s1 + $0x630] sm:$0xff]  }
 0x187   : > { %13184 = vmatprep.subr.bf16.mxu1 %v14191_v12  ;;  %v4904_v7 = vrot.slane %v4902_v41, 1 }
 0x189   : > { %13157 = vmatpush3.bf16.msra.mxu0 %v14190_v62  ;;  %v5080_v62 = vsel %vm3630_vm5, %v5077_v13, %v5079_v14  ;;  %v14203_v14 = vld [vmem:[%s18258_s1 + $0x668] sm:$0xff]   ;;  %v4908_v20 = vor.u32 %v4907_v5, %v4904_v7  ;;  %v14204_v7 = vld [vmem:[%s18258_s1 + $0x620] sm:$0xff]  }
 0x18a   : > { %13185 = vmatpush3.bf16.msra.mxu1 %v14191_v12  ;;  %13198 = vmatprep.subr.bf16.mxu0 %v14196_v15  ;;  %v4891_v12 = vsel %vm1459_vm2, %v4881_v57, %v4890_v44 }
 0x18b   : > { %13226 = vmatprep.subr.bf16.mxu1 %v14197_v47 }
 0x18c   : > { %v12824_v30 = vpop.f32.mrf.mxu0  ;;  %13159 = vmatmul.mubr.bf16.vlgmr.msra.gmra.mxu0 %v4882_v48  ;;  %v16245_v48 = vld [vmem:[%s14577_s10 + $0xa4] sm:$0xff]  }
 0x18d   : > { %v2533_v13 = vadd.f32 %v12824_v30, %v16100_v1  ;;  %v12852_v54 = vpop.f32.mrf.mxu1  ;;  %13187 = vmatmul.mubr.bf16.vlgmr.msra.gmra.mxu1 %v5080_v62  ;;  %13199 = vmatpush3.bf16.msra.mxu0 %v14196_v15  ;;  %v5083_v57 = vrot.slane %v16245_v48, 2  ;;  %v5434_v62 = vshll.u32 %v16132_v61, 16 }
 0x18e   : > { %13227 = vmatpush3.bf16.msra.mxu1 %v14197_v47  ;;  %v2485_v45 = vpop.f32.mrf.mxu0  ;;  %13200 = vmatprep.subr.bf16.mxu0 %v14198_v16 }
 0x18f   : > { %v16248_v41 = vadd.f32 %v12852_v54, %v2533_v13  ;;  %v2531_v1 = vadd.f32 %v2485_v45, %v16107_v22  ;;  %v2662_v15 = vpop.f32.mrf.mxu1  ;;  %13228 = vmatprep.subr.bf16.mxu1 %v14199_v36  ;;  %13162 = vmatprep.mubr.bf16.mxu0 %v4891_v12  ;;  %v4900_v12 = vsel %vm1459_vm2, %v4890_v44, %v4899_v8  ;;  %v5232_v13 = vld [vmem:[%s14577_s10 + $0xc4] sm:$0xc] }
 0x190   : > { %v12825_v47 = vpop.f32.mrf.mxu0  ;;  %13190 = vmatprep.mubr.bf16.mxu1 %v5082_v46  ;;  %v5084_v46 = vsel %vm3630_vm5, %v5081_v52, %v5083_v57 }
 0x191   : > { %v16257_v30 = vadd.f32 %v2662_v15, %v2531_v1  ;;  %v2534_v22 = vadd.f32 %v12825_v47, %v16117_v2  ;;  %v12853_v45 = vpop.f32.mrf.mxu1  ;;  %13201 = vmatpush3.bf16.msra.mxu0 %v14198_v16  ;;  %v14205_v2 = vld [vmem:[%s18258_s1 + $0x660] sm:$0xff]   ;;  %v4909_v16 = vsel %vm1459_vm2, %v4899_v8, %v4908_v20  ;;  %v5086_v15 = vsel %vm3630_vm5, %v5083_v57, %v5085_v49  ;;  %v14208_v57 = vld [vmem:[%s18258_s1 + $0x658] sm:$0xff]  }
 0x192   : > { %13229 = vmatpush3.bf16.msra.mxu1 %v14199_v36  ;;  %v16262_v54 = vpop.f32.mrf.mxu0  ;;  %13202 = vmatprep.subr.bf16.mxu0 %v14202_v31  ;;  %v16277_v36 = vcombine.low %v5232_v13, %v16062_v4  ;;  %v5433_v47 = vrot.slane %v5431_v24, 2  ;;  %v14207_v4 = vld [vmem:[%s18258_s1 + $0x618] sm:$0xff]  }
 0x193   : > { %18366 = vst [vmem:[#allocation31_spill] sm:$0xff] %v16262_v54  ;;  %v16268_v61 = vadd.f32 %v12853_v45, %v2534_v22  ;;  %v16270_v5 = vpop.f32.mrf.mxu1  ;;  %13230 = vmatprep.subr.bf16.mxu1 %v14203_v14  ;;  %v5436_v22 = vrot.slane %v5434_v62, 3  ;;  %v14489_v62 = vld [vmem:[%s14577_s10 + $0xcc] sm:$0xff]  }
 0x194   : > { %18367 = vst [vmem:[#allocation32_spill] sm:$0xff] %v16270_v5  ;;  %v12828_v44 = vpop.f32.mrf.mxu0  ;;  %13163 = vmatmul.mubr.bf16.gmra.mxu0 %v4900_v12  ;;  %v5254_v12 = vrot.slane %v14489_v62, 2 }
 0x195   : > { %v2537_v52 = vadd.f32 %v12828_v44, %v16138_v43  ;;  %13203 = vmatpush3.bf16.msra.mxu0 %v14202_v31  ;;  %v12856_v1 = vpop.f32.mrf.mxu1  ;;  %13191 = vmatmul.mubr.bf16.gmra.mxu1 %v5084_v46  ;;  %v5437_v44 = vor.u32 %v5436_v22, %v5433_v47 }
 0x196   : > { %13231 = vmatpush3.bf16.msra.mxu1 %v14203_v14  ;;  %v2501_v45 = vpop.f32.mrf.mxu0  ;;  %13204 = vmatprep.subr.bf16.mxu0 %v14204_v7  ;;  %v5253_v14 = vrot.slane %v16277_v36, 2 }
 0x197   : > { %v2535_v8 = vadd.f32 %v2501_v45, %v16151_v26  ;;  %v16287_v43 = vadd.f32 %v12856_v1, %v2537_v52  ;;  %v2678_v31 = vpop.f32.mrf.mxu1  ;;  %13232 = vmatprep.subr.bf16.mxu1 %v14205_v2  ;;  %13166 = vmatprep.mubr.bf16.mxu0 %v4909_v16  ;;  %v14209_v16 = vld [vmem:[%s18258_s1 + $0x610] sm:$0xff]  }
 0x198   : > { %v12829_v24 = vpop.f32.mrf.mxu0  ;;  %13194 = vmatprep.mubr.bf16.mxu1 %v5086_v15  ;;  %v5255_v47 = vsel %vm3630_vm5, %v5253_v14, %v5254_v12 }
 0x199   : > { %v2538_v13 = vadd.f32 %v12829_v24, %v16159_v10  ;;  %v16295_v46 = vadd.f32 %v2678_v31, %v2535_v8  ;;  %13205 = vmatpush3.bf16.msra.mxu0 %v14204_v7  ;;  %v12857_v26 = vpop.f32.mrf.mxu1  ;;  %v14210_v10 = vld [vmem:[%s18258_s1 + $0x650] sm:$0xff]   ;;  %v5441_v8 = vsel %vm3985_vm3, %v5437_v44, %v15773_v50  ;;  %v14213_v50 = vld [vmem:[%s18258_s1 + $0x600] sm:$0xff]  }
 0x19a   : > { %13233 = vmatpush3.bf16.msra.mxu1 %v14205_v2  ;;  %v16297_v52 = vpop.f32.mrf.mxu0  ;;  %13206 = vmatprep.subr.bf16.mxu0 %v14207_v4  ;;  %v14211_v2 = vld [vmem:[%s18258_s1 + $0x608] sm:$0xff]   ;;  %v14491_v44 = vld [vmem:[%s14577_s10 + $0xdc] sm:$0xff]  }
 0x19b   : > { %18368 = vst [vmem:[#allocation33_spill] sm:$0xff] %v16297_v52  ;;  %v16302_v1 = vadd.f32 %v12857_v26, %v2538_v13  ;;  %v16304_v15 = vpop.f32.mrf.mxu1  ;;  %13234 = vmatprep.subr.bf16.mxu1 %v14208_v57  ;;  %v14216_v13 = vld [vmem:[%s18258_s1 + $0x6b8] sm:$0xff]  }
 0x19c   : > { %18369 = vst [vmem:[#allocation34_spill] sm:$0xff] %v16304_v15  ;;  %v12832_v7 = vpop.f32.mrf.mxu0  ;;  %13167 = vmatmul.mubr.bf16.gmra.mxu0 %v4908_v20  ;;  %v14217_v26 = vld [vmem:[%s18258_s1 + $0x6f8] sm:$0xff]  }
 0x19d   : > { %v2541_v22 = vadd.f32 %v12832_v7, %v16181_v27  ;;  %13207 = vmatpush3.bf16.msra.mxu0 %v14207_v4  ;;  %v12860_v45 = vpop.f32.mrf.mxu1  ;;  %13195 = vmatmul.mubr.bf16.gmra.mxu1 %v5085_v49  ;;  %v14212_v27 = vld [vmem:[%s18258_s1 + $0x648] sm:$0xff]   ;;  %v14214_v4 = vld [vmem:[%s18258_s1 + $0x640] sm:$0xff]   ;;  %v16344_v7 = vld [vmem:[%s14577_s10 + $0x50] sm:$0xf] }
 0x19e   : > { %13235 = vmatpush3.bf16.msra.mxu1 %v14208_v57  ;;  %v2517_v31 = vpop.f32.mrf.mxu0  ;;  %13208 = vmatprep.subr.bf16.mxu0 %v14209_v16  ;;  %v14490_v57 = vld [vmem:[%s14577_s10 + $0xd4] sm:$0xff]  }
 0x19f   : > { %v2539_v20 = vadd.f32 %v2517_v31, %v16191_v18  ;;  %v16319_v24 = vadd.f32 %v12860_v45, %v2541_v22  ;;  %v2694_v62 = vpop.f32.mrf.mxu1  ;;  %13236 = vmatprep.subr.bf16.mxu1 %v14210_v10  ;;  %13214 = vmatprep.mubr.bf16.mxu0 %v5255_v47  ;;  %v5256_v14 = vrot.slane %v14490_v57, 2  ;;  %v14219_v31 = vld [vmem:[%s18258_s1 + $0x6f0] sm:$0xff]   ;;  %v14221_v57 = vld [vmem:[%s18258_s1 + $0x6e8] sm:$0xff]  }
 0x1a0   : > { %v12833_v38 = vpop.f32.mrf.mxu0  ;;  %13242 = vmatprep.mubr.bf16.mxu1 %v5441_v8 }
 0x1a1   : > { %v16327_v49 = vadd.f32 %v2694_v62, %v2539_v20  ;;  %13209 = vmatpush3.bf16.msra.mxu0 %v14209_v16  ;;  %v12861_v18 = vpop.f32.mrf.mxu1  ;;  %v5258_v16 = vrot.slane %v14491_v44, 2  ;;  %v5257_v47 = vsel %vm3630_vm5, %v5254_v12, %v5256_v14  ;;  %v14492_v20 = vld [vmem:[%s14577_s10 + $0xe4] sm:$0xff]  }
 0x1a2   : > { %13237 = vmatpush3.bf16.msra.mxu1 %v14210_v10  ;;  %13210 = vmatprep.subr.bf16.mxu0 %v14211_v2  ;;  %v16341_v10 = vld [vmem:[%s14577_s10 + $0x4c] sm:$0xf]  ;;  %v16350_v22 = vpop.f32.mrf.mxu0  ;;  %v5260_v62 = vrot.slane %v14492_v20, 2 }
 0x1a3   : > { %13238 = vmatprep.subr.bf16.mxu1 %v14212_v27  ;;  %18370 = vst [vmem:[#allocation35_spill] sm:$0xff] %v16350_v22  ;;  %v16354_v8 = vpop.f32.mrf.mxu1  ;;  %v5259_v12 = vsel %vm3630_vm5, %v5256_v14, %v5258_v16  ;;  %v16666_v22 = vld [vmem:[%s14577_s10 + $0xd4] sm:$0xf] }
 0x1a4   : > { %18371 = vst [vmem:[#allocation36_spill] sm:$0xff] %v16354_v8  ;;  %18385 = vst [vmem:[#allocation49_spill] sm:$0xff] %v16666_v22 }
 0x1a5   : > { %13211 = vmatpush3.bf16.msra.mxu0 %v14211_v2  ;;  %v14218_v2 = vld [vmem:[%s18258_s1 + $0x6b0] sm:$0xff]  }
 0x1a6   : > { %13239 = vmatpush3.bf16.msra.mxu1 %v14212_v27  ;;  %13212 = vmatprep.subr.bf16.mxu0 %v14213_v50  ;;  %v5262_v27 = vrot.slane %v16201_v35, 2 }
 0x1a7   : > { %13240 = vmatprep.subr.bf16.mxu1 %v14214_v4 }
 0x1a9   : > { %13213 = vmatpush3.bf16.msra.mxu0 %v14213_v50  ;;  %v14220_v50 = vld [vmem:[%s18258_s1 + $0x6a8] sm:$0xff]  }
 0x1aa   : > { %13241 = vmatpush3.bf16.msra.mxu1 %v14214_v4  ;;  %13254 = vmatprep.subr.bf16.mxu0 %v14216_v13 }
 0x1ab   : > { %13282 = vmatprep.subr.bf16.mxu1 %v14217_v26 }
 0x1ac   : > { %v12880_v38 = vpop.f32.mrf.mxu0  ;;  %13215 = vmatmul.mubr.bf16.vlgmr.msra.gmra.mxu0 %v5257_v47 }
 0x1ad   : > { %v2887_v18 = vadd.f32 %v12880_v38, %v16248_v41  ;;  %v12908_v4 = vpop.f32.mrf.mxu1  ;;  %13243 = vmatmul.mubr.bf16.vlgmr.msra.gmra.mxu1 %v15800_v28  ;;  %13255 = vmatpush3.bf16.msra.mxu0 %v14216_v13  ;;  %v5630_v41 = vshrl.u32 %v16277_v36, 16  ;;  %v5633_v38 = vshll.u32 %v16277_v36, 16  ;;  %v5807_v28 = vld [vmem:[%s14577_s10 + $0x84] sm:$0x8] }
 0x1ae   : > { %13283 = vmatpush3.bf16.msra.mxu1 %v14217_v26  ;;  %v2839_v44 = vpop.f32.mrf.mxu0  ;;  %13256 = vmatprep.subr.bf16.mxu0 %v14218_v2  ;;  %v14222_v26 = vld [vmem:[%s18258_s1 + $0x6a0] sm:$0xff]  }
 0x1af   : > { %v16370_v47 = vadd.f32 %v12908_v4, %v2887_v18  ;;  %v2885_v14 = vadd.f32 %v2839_v44, %v16257_v30  ;;  %v3038_v20 = vpop.f32.mrf.mxu1  ;;  %13284 = vmatprep.subr.bf16.mxu1 %v14219_v31  ;;  %13218 = vmatprep.mubr.bf16.mxu0 %v5259_v12  ;;  %v5261_v12 = vsel %vm3630_vm5, %v5258_v16, %v5260_v62  ;;  %v5635_v45 = vrot.slane %v5633_v38, 3 }
 0x1b0   : > { %v12881_v13 = vpop.f32.mrf.mxu0  ;;  %13246 = vmatprep.mubr.bf16.mxu1 %v15834_v37  ;;  %v5263_v16 = vsel %vm3630_vm5, %v5260_v62, %v5262_v27  ;;  %v14225_v62 = vld [vmem:[%s18258_s1 + $0x6d8] sm:$0xff]  }
 0x1b1   : > { %v16380_v18 = vadd.f32 %v3038_v20, %v2885_v14  ;;  %v2888_v30 = vadd.f32 %v12881_v13, %v16268_v61  ;;  %v12909_v4 = vpop.f32.mrf.mxu1  ;;  %13257 = vmatpush3.bf16.msra.mxu0 %v14218_v2  ;;  %v14223_v14 = vld [vmem:[%s18258_s1 + $0x6e0] sm:$0xff]   ;;  %v5632_v20 = vrot.slane %v5630_v41, 2  ;;  %v14493_v61 = vld [vmem:[%s14577_s10 + $0x88] sm:$0xf] }
 0x1b2   : > { %13285 = vmatpush3.bf16.msra.mxu1 %v14219_v31  ;;  %v16384_v44 = vpop.f32.mrf.mxu0  ;;  %13258 = vmatprep.subr.bf16.mxu0 %v14220_v50  ;;  %v11192_v13 = vcombine.low %v5807_v28, %v14493_v61  ;;  %v14224_v31 = vld [vmem:[%s18258_s1 + $0x698] sm:$0xff]  }
 0x1b3   : > { %18372 = vst [vmem:[#allocation37_spill] sm:$0xff] %v16384_v44  ;;  %v16386_v36 = vadd.f32 %v12909_v4, %v2888_v30  ;;  %v16388_v37 = vpop.f32.mrf.mxu1  ;;  %13286 = vmatprep.subr.bf16.mxu1 %v14221_v57  ;;  %v16655_v44 = vld [vmem:[%s14577_s10 + $0x70] sm:$0xf] }
 0x1b4   : > { %18373 = vst [vmem:[#allocation38_spill] sm:$0xff] %v16388_v37  ;;  %v12884_v2 = vpop.f32.mrf.mxu0  ;;  %13219 = vmatmul.mubr.bf16.gmra.mxu0 %v5261_v12  ;;  %v5828_v61 = vrot.slane %v11192_v13, 3 }
 0x1b5   : > { %v2891_v30 = vadd.f32 %v12884_v2, %v16287_v43  ;;  %13259 = vmatpush3.bf16.msra.mxu0 %v14220_v50  ;;  %v12912_v4 = vpop.f32.mrf.mxu1  ;;  %13247 = vmatmul.mubr.bf16.gmra.mxu1 %v15844_v23  ;;  %v5829_v43 = vrot.slane %v16147_v32, 3  ;;  %v14227_v23 = vld [vmem:[%s18258_s1 + $0x690] sm:$0xff]  }
 0x1b6   : > { %13287 = vmatpush3.bf16.msra.mxu1 %v14221_v57  ;;  %v2855_v41 = vpop.f32.mrf.mxu0  ;;  %13260 = vmatprep.subr.bf16.mxu0 %v14222_v26 }
 0x1b7   : > { %v2889_v38 = vadd.f32 %v2855_v41, %v16295_v46  ;;  %v16403_v28 = vadd.f32 %v12912_v4, %v2891_v30  ;;  %v3054_v12 = vpop.f32.mrf.mxu1  ;;  %13288 = vmatprep.subr.bf16.mxu1 %v14223_v14  ;;  %13222 = vmatprep.mubr.bf16.mxu0 %v5263_v16  ;;  %v5636_v46 = vor.u32 %v5635_v45, %v5632_v20 }
 0x1b8   : > { %v12885_v50 = vpop.f32.mrf.mxu0  ;;  %13250 = vmatprep.mubr.bf16.mxu1 %v15896_v3  ;;  %v14228_v3 = vld [vmem:[%s18258_s1 + $0x6d0] sm:$0xff]   ;;  %v5830_v4 = vsel %vm4384_vm4, %v5828_v61, %v5829_v43  ;;  %v14234_v61 = vld [vmem:[%s18258_s1 + $0x738] sm:$0xff]  }
 0x1b9   : > { %v2892_v57 = vadd.f32 %v12885_v50, %v16302_v1  ;;  %v16414_v2 = vadd.f32 %v3054_v12, %v2889_v38  ;;  %13261 = vmatpush3.bf16.msra.mxu0 %v14222_v26  ;;  %v12913_v16 = vpop.f32.mrf.mxu1  ;;  %v14229_v1 = vld [vmem:[%s18258_s1 + $0x688] sm:$0xff]   ;;  %v5640_v26 = vsel %vm3985_vm3, %v5636_v46, %v15905_v9  ;;  %v14232_v12 = vld [vmem:[%s18258_s1 + $0x6c0] sm:$0xff]   ;;  %v14235_v50 = vld [vmem:[%s18258_s1 + $0x778] sm:$0xff]  }
 0x1ba   : > { %13289 = vmatpush3.bf16.msra.mxu1 %v14223_v14  ;;  %v16416_v30 = vpop.f32.mrf.mxu0  ;;  %13262 = vmatprep.subr.bf16.mxu0 %v14224_v31  ;;  %v14230_v9 = vld [vmem:[%s18258_s1 + $0x6c8] sm:$0xff]   ;;  %v16458_v46 = vld [vmem:[%s14577_s10 + $0x94] sm:$0xf] }
 0x1bb   : > { %18374 = vst [vmem:[#allocation39_spill] sm:$0xff] %v16416_v30  ;;  %v16418_v13 = vadd.f32 %v12913_v16, %v2892_v57  ;;  %v16420_v32 = vpop.f32.mrf.mxu1  ;;  %13290 = vmatprep.subr.bf16.mxu1 %v14225_v62  ;;  %18376 = vst [vmem:[#allocation41_spill] sm:$0xff] %v16458_v46  ;;  %v16461_v57 = vld [vmem:[%s14577_s10 + $0x98] sm:$0xf] }
 0x1bc   : > { %18375 = vst [vmem:[#allocation40_spill] sm:$0xff] %v16420_v32  ;;  %v12888_v45 = vpop.f32.mrf.mxu0  ;;  %13223 = vmatmul.mubr.bf16.gmra.mxu0 %v5262_v27  ;;  %18377 = vst [vmem:[#allocation42_spill] sm:$0xff] %v16461_v57  ;;  %v6210_v32 = vld [vmem:[%s14577_s10 + $0x74] sm:$0x7] }
 0x1bd   : > { %v2895_v14 = vadd.f32 %v12888_v45, %v16319_v24  ;;  %13263 = vmatpush3.bf16.msra.mxu0 %v14224_v31  ;;  %v12916_v20 = vpop.f32.mrf.mxu1  ;;  %13251 = vmatmul.mubr.bf16.gmra.mxu1 %v15879_v21  ;;  %v14231_v21 = vld [vmem:[%s18258_s1 + $0x680] sm:$0xff]   ;;  %v16580_v45 = vld [vmem:[%s14577_s10 + $0x5c] sm:$0xf] }
 0x1be   : > { %13291 = vmatpush3.bf16.msra.mxu1 %v14225_v62  ;;  %v2871_v41 = vpop.f32.mrf.mxu0  ;;  %13264 = vmatprep.subr.bf16.mxu0 %v14227_v23  ;;  %v5831_v62 = vrot.slane %v16204_v51, 3 }
 0x1bf   : > { %v2893_v35 = vadd.f32 %v2871_v41, %v16327_v49  ;;  %v16436_v27 = vadd.f32 %v12916_v20, %v2895_v14  ;;  %v3070_v38 = vpop.f32.mrf.mxu1  ;;  %13292 = vmatprep.subr.bf16.mxu1 %v14228_v3  ;;  %13270 = vmatprep.mubr.bf16.mxu0 %v5640_v26  ;;  %v14238_v41 = vld [vmem:[%s18258_s1 + $0x728] sm:$0xff]  }
 0x1c0   : > { %v12889_v24 = vpop.f32.mrf.mxu0  ;;  %13298 = vmatprep.mubr.bf16.mxu1 %v5830_v4  ;;  %v5832_v51 = vsel %vm4384_vm4, %v5829_v43, %v5831_v62 }
 0x1c1   : > { %v16444_v31 = vadd.f32 %v3070_v38, %v2893_v35  ;;  %13265 = vmatpush3.bf16.msra.mxu0 %v14227_v23  ;;  %v12917_v49 = vpop.f32.mrf.mxu1  ;;  %v5833_v23 = vrot.slane %v16222_v33, 3  ;;  %v14237_v33 = vld [vmem:[%s18258_s1 + $0x770] sm:$0xff]   ;;  %v5835_v35 = vrot.slane %v16245_v48, 3  ;;  %v14240_v48 = vld [vmem:[%s18258_s1 + $0x720] sm:$0xff]  }
 0x1c2   : > { %13293 = vmatpush3.bf16.msra.mxu1 %v14228_v3  ;;  %13266 = vmatprep.subr.bf16.mxu0 %v14229_v1  ;;  %v16463_v16 = vpop.f32.mrf.mxu0  ;;  %v14236_v3 = vld [vmem:[%s18258_s1 + $0x730] sm:$0xff]  }
 0x1c3   : > { %13294 = vmatprep.subr.bf16.mxu1 %v14230_v9  ;;  %18378 = vst [vmem:[#allocation43_spill] sm:$0xff] %v16463_v16  ;;  %v5834_v20 = vsel %vm4384_vm4, %v5831_v62, %v5833_v23  ;;  %v16499_v62 = vld [vmem:[%s14577_s10 + $0xc] sm:$0xf]  ;;  %v5995_v16 = vld [vmem:[%s14577_s10 + $0x34] sm:$0x7] }
 0x1c5   : > { %13267 = vmatpush3.bf16.msra.mxu0 %v14229_v1  ;;  %v16471_v1 = vpop.f32.mrf.mxu1 }
 0x1c6   : > { %13295 = vmatpush3.bf16.msra.mxu1 %v14230_v9  ;;  %13268 = vmatprep.subr.bf16.mxu0 %v14231_v21  ;;  %18379 = vst [vmem:[#allocation44_spill] sm:$0xff] %v16471_v1  ;;  %v14239_v9 = vld [vmem:[%s18258_s1 + $0x768] sm:$0xff]   ;;  %v16669_v1 = vld [vmem:[%s14577_s10 + $0xd8] sm:$0xf] }
 0x1c7   : > { %13296 = vmatprep.subr.bf16.mxu1 %v14232_v12  ;;  %18386 = vst [vmem:[#allocation50_spill] sm:$0xff] %v16669_v1 }
 0x1c9   : > { %13269 = vmatpush3.bf16.msra.mxu0 %v14231_v21  ;;  %v5837_v21 = vrot.slane %v15853_v39, 3 }
 0x1ca   : > { %13297 = vmatpush3.bf16.msra.mxu1 %v14232_v12  ;;  %13310 = vmatprep.subr.bf16.mxu0 %v14234_v61 }
 0x1cb   : > { %13338 = vmatprep.subr.bf16.mxu1 %v14235_v50 }
 0x1cc   : > { %v12936_v26 = vpop.f32.mrf.mxu0  ;;  %13271 = vmatmul.mubr.bf16.vlgmr.msra.gmra.mxu0 %v15923_v53 }
 0x1cd   : > { %v3343_v43 = vadd.f32 %v12936_v26, %v16370_v47  ;;  %v12964_v14 = vpop.f32.mrf.mxu1  ;;  %13299 = vmatmul.mubr.bf16.vlgmr.msra.gmra.mxu1 %v5832_v51  ;;  %13311 = vmatpush3.bf16.msra.mxu0 %v14234_v61  ;;  %v16502_v61 = vld [vmem:[%s14577_s10 + $0x10] sm:$0xf]  ;;  %v5836_v51 = vsel %vm4384_vm4, %v5833_v23, %v5835_v35  ;;  %v6199_v26 = vld [vmem:[%s14577_s10 + $0x48] sm:$0x8] }
 0x1ce   : > { %13339 = vmatpush3.bf16.msra.mxu1 %v14235_v50  ;;  %v3295_v4 = vpop.f32.mrf.mxu0  ;;  %13312 = vmatprep.subr.bf16.mxu0 %v14236_v3 }
 0x1cf   : > { %v16483_v38 = vadd.f32 %v12964_v14, %v3343_v43  ;;  %v3341_v53 = vadd.f32 %v3295_v4, %v16380_v18  ;;  %v3552_v47 = vpop.f32.mrf.mxu1  ;;  %13340 = vmatprep.subr.bf16.mxu1 %v14237_v33  ;;  %13274 = vmatprep.mubr.bf16.mxu0 %v15965_v25  ;;  %v5984_v25 = vld [vmem:[%s14577_s10 + $0x8] sm:$0x8] }
 0x1d0   : > { %v12937_v24 = vpop.f32.mrf.mxu0  ;;  %13302 = vmatprep.mubr.bf16.mxu1 %v5834_v20  ;;  %v16520_v23 = vcombine.low %v5984_v25, %v16499_v62  ;;  %v14494_v20 = vld [vmem:[%s14577_s10 + $0x14] sm:$0xf] }
 0x1d1   : > { %v16494_v49 = vadd.f32 %v3552_v47, %v3341_v53  ;;  %v3344_v18 = vadd.f32 %v12937_v24, %v16386_v36  ;;  %v12965_v12 = vpop.f32.mrf.mxu1  ;;  %13313 = vmatpush3.bf16.msra.mxu0 %v14236_v3  ;;  %v14241_v36 = vld [vmem:[%s18258_s1 + $0x760] sm:$0xff]   ;;  %v16524_v4 = vcombine.low %v16502_v61, %v14494_v20  ;;  %v16531_v24 = vcombine.low %v6199_v26, %v16341_v10 }
 0x1d2   : > { %13341 = vmatpush3.bf16.msra.mxu1 %v14237_v33  ;;  %v16504_v50 = vpop.f32.mrf.mxu0  ;;  %13314 = vmatprep.subr.bf16.mxu0 %v14238_v41  ;;  %v5838_v33 = vsel %vm4384_vm4, %v5835_v35, %v5837_v21  ;;  %v14495_v35 = vld [vmem:[%s14577_s10 + $0x54] sm:$0xf]  ;;  %v6440_v29 = vshll.u32 %v16520_v23, 16 }
 0x1d3   : > { %18380 = vst [vmem:[#allocation45_spill] sm:$0xff] %v16504_v50  ;;  %v16508_v43 = vadd.f32 %v12965_v12, %v3344_v18  ;;  %v16510_v14 = vpop.f32.mrf.mxu1  ;;  %13342 = vmatprep.subr.bf16.mxu1 %v14239_v9  ;;  %v16535_v18 = vcombine.low %v16344_v7, %v14495_v35  ;;  %v16598_v50 = vld [vmem:[%s14577_s10 + $0x64] sm:$0xf]  ;;  %v18384_v8 = vrot.slane %v16524_v4, 3  ;;  %v6445_v17 = vshrl.u32 %v16524_v4, 16 }
 0x1d4   : > { %18381 = vst [vmem:[#allocation46_spill] sm:$0xff] %v16510_v14  ;;  %v12940_v3 = vpop.f32.mrf.mxu0  ;;  %13275 = vmatmul.mubr.bf16.gmra.mxu0 %v15976_v56  ;;  %v14243_v56 = vld [vmem:[%s18258_s1 + $0x718] sm:$0xff]  }
 0x1d5   : > { %v3347_v53 = vadd.f32 %v12940_v3, %v16403_v28  ;;  %13315 = vmatpush3.bf16.msra.mxu0 %v14238_v41  ;;  %v12968_v47 = vpop.f32.mrf.mxu1  ;;  %13303 = vmatmul.mubr.bf16.gmra.mxu1 %v5836_v51  ;;  %v14244_v51 = vld [vmem:[%s18258_s1 + $0x758] sm:$0xff]   ;;  %v6043_v3 = vrot.slane %v16520_v23, 3  ;;  %v18388_v54 = vrot.slane %v16535_v18, 3 }
 0x1d6   : > { %13343 = vmatpush3.bf16.msra.mxu1 %v14239_v9  ;;  %v3311_v12 = vpop.f32.mrf.mxu0  ;;  %13316 = vmatprep.subr.bf16.mxu0 %v14240_v48  ;;  %v18282_v9 = vrot.slane %v16524_v4, 3 }
 0x1d7   : > { %v3345_v25 = vadd.f32 %v3311_v12, %v16414_v2  ;;  %v16538_v28 = vadd.f32 %v12968_v47, %v3347_v53  ;;  %v3568_v41 = vpop.f32.mrf.mxu1  ;;  %13344 = vmatprep.subr.bf16.mxu1 %v14241_v36  ;;  %13278 = vmatprep.mubr.bf16.mxu0 %v16017_v11  ;;  %v6258_v53 = vrot.slane %v16531_v24, 3  ;;  %v18283_v11 = vrot.slane %v16535_v18, 3 }
 0x1d8   : > { %v12941_v26 = vpop.f32.mrf.mxu0  ;;  %13306 = vmatprep.mubr.bf16.mxu1 %v5838_v33  ;;  %v14245_v33 = vld [vmem:[%s18258_s1 + $0x710] sm:$0xff]  }
 0x1d9   : > { %v3348_v20 = vadd.f32 %v12941_v26, %v16418_v13  ;;  %v16547_v35 = vadd.f32 %v3568_v41, %v3345_v25  ;;  %13317 = vmatpush3.bf16.msra.mxu0 %v14240_v48  ;;  %v12969_v2 = vpop.f32.mrf.mxu1  ;;  %v14246_v48 = vld [vmem:[%s18258_s1 + $0x750] sm:$0xff]   ;;  %v16568_v41 = vld [vmem:[%s14577_s10 + $0x1c] sm:$0xf]  ;;  %v6045_v26 = vsel %vm4384_vm4, %v6043_v3, %v18282_v9  ;;  %v6260_v14 = vsel %vm4384_vm4, %v6258_v53, %v18283_v11  ;;  %v16595_v9 = vld [vmem:[%s14577_s10 + $0x60] sm:$0xf] }
 0x1da   : > { %13345 = vmatpush3.bf16.msra.mxu1 %v14241_v36  ;;  %v16551_v47 = vpop.f32.mrf.mxu0  ;;  %13318 = vmatprep.subr.bf16.mxu0 %v14243_v56  ;;  %v14247_v36 = vld [vmem:[%s18258_s1 + $0x708] sm:$0xff]   ;;  %v14249_v53 = vld [vmem:[%s18258_s1 + $0x700] sm:$0xff]  }
 0x1db   : > { %18382 = vst [vmem:[#allocation47_spill] sm:$0xff] %v16551_v47  ;;  %v16556_v12 = vadd.f32 %v12969_v2, %v3348_v20  ;;  %v16558_v13 = vpop.f32.mrf.mxu1  ;;  %13346 = vmatprep.subr.bf16.mxu1 %v14244_v51  ;;  %v16651_v47 = vld [vmem:[%s14577_s10 + $0x30] sm:$0xf] }
 0x1dc   : > { %18383 = vst [vmem:[#allocation48_spill] sm:$0xff] %v16558_v13  ;;  %v12944_v25 = vpop.f32.mrf.mxu0  ;;  %13279 = vmatmul.mubr.bf16.gmra.mxu0 %v15999_v58  ;;  %v14248_v58 = vld [vmem:[%s18258_s1 + $0x748] sm:$0xff]  }
 0x1dd   : > { %v3351_v20 = vadd.f32 %v12944_v25, %v16436_v27  ;;  %13319 = vmatpush3.bf16.msra.mxu0 %v14243_v56  ;;  %v12972_v2 = vpop.f32.mrf.mxu1  ;;  %13307 = vmatmul.mubr.bf16.gmra.mxu1 %v5837_v21  ;;  %v16586_v27 = vld [vmem:[%s14577_s10 + $0x20] sm:$0xf]  ;;  %v16589_v56 = vld [vmem:[%s14577_s10 + $0x24] sm:$0xf]  ;;  %v16640_v13 = vld [vmem:[%s14577_s10 + $0x68] sm:$0xf] }
 0x1de   : > { %13347 = vmatpush3.bf16.msra.mxu1 %v14244_v51  ;;  %v3327_v3 = vpop.f32.mrf.mxu0  ;;  %13320 = vmatprep.subr.bf16.mxu0 %v14245_v33 }
 0x1df   : > { %v3349_v39 = vadd.f32 %v3327_v3, %v16444_v31  ;;  %v16592_v21 = vadd.f32 %v12972_v2, %v3351_v20  ;;  %v3584_v25 = vpop.f32.mrf.mxu1  ;;  %13348 = vmatprep.subr.bf16.mxu1 %v14246_v48  ;;  %13326 = vmatprep.mubr.bf16.mxu0 %v6045_v26  ;;  %v14250_v26 = vld [vmem:[%s18258_s1 + $0x740] sm:$0xff]   ;;  %v14496_v20 = vld [vmem:[%s14577_s10 + $0x18] sm:$0xf] }
 0x1e0   : > { %v12945_v51 = vpop.f32.mrf.mxu0  ;;  %13354 = vmatprep.mubr.bf16.mxu1 %v6260_v14  ;;  %v16610_v2 = vcombine.low %v14496_v20, %v16568_v41  ;;  %v14497_v3 = vld [vmem:[%s14577_s10 + $0x58] sm:$0xf]  ;;  %v16618_v14 = vcombine.low %v16586_v27, %v16589_v56 }
 0x1e1   : > { %v16603_v11 = vadd.f32 %v3584_v25, %v3349_v39  ;;  %13321 = vmatpush3.bf16.msra.mxu0 %v14245_v33  ;;  %v12973_v31 = vpop.f32.mrf.mxu1  ;;  %v16614_v51 = vcombine.low %v14497_v3, %v16580_v45  ;;  %v16621_v33 = vld [vmem:[%s14577_s10 + $0x28] sm:$0xf]  ;;  %v16624_v39 = vld [vmem:[%s14577_s10 + $0x2c] sm:$0xf]  ;;  %v14259_v20 = vld [vmem:[%s18258_s1 + $0x7b8] sm:$0xff]  }
 0x1e2   : > { %13349 = vmatpush3.bf16.msra.mxu1 %v14246_v48  ;;  %13322 = vmatprep.subr.bf16.mxu0 %v14247_v36  ;;  %v16628_v48 = vcombine.low %v16595_v9, %v16598_v50  ;;  %v6046_v25 = vrot.slane %v16610_v2, 3  ;;  %v16637_v3 = vcombine.low %v16621_v33, %v16624_v39  ;;  %v16671_v37 = vpop.f32.mrf.mxu0 }
 0x1e3   : > { %13350 = vmatprep.subr.bf16.mxu1 %v14248_v58  ;;  %v6261_v31 = vrot.slane %v16614_v51, 3  ;;  %18387 = vst [vmem:[#allocation51_spill] sm:$0xff] %v16671_v37  ;;  %v16682_v0 = vpop.f32.mrf.mxu1  ;;  %v11222_v37 = vcombine.low %v16651_v47, %v5995_v16  ;;  %v14265_v16 = vld [vmem:[%s18258_s1 + $0x7a8] sm:$0xff]  }
 0x1e4   : > { %v6047_v5 = vsel %vm4384_vm4, %v18384_v8, %v6046_v25  ;;  %v14261_v8 = vld [vmem:[%s18258_s1 + $0x7b0] sm:$0xff]   ;;  %18389 = vst [vmem:[#allocation52_spill] sm:$0xff] %v16682_v0  ;;  %v11252_v0 = vcombine.low %v16655_v44, %v6210_v32  ;;  %v6448_v32 = vshll.u32 %v16524_v4, 16  ;;  %v6667_v4 = vshll.u32 %v16535_v18, 16 }
 0x1e5   : > { %13323 = vmatpush3.bf16.msra.mxu0 %v14247_v36  ;;  %v16643_v36 = vld [vmem:[%s14577_s10 + $0x6c] sm:$0xf]  ;;  %v6262_v15 = vsel %vm4384_vm4, %v18388_v54, %v6261_v31  ;;  %v6437_v54 = vshrl.u32 %v16520_v23, 16  ;;  %v18391_v23 = vrot.slane %v16628_v48, 3  ;;  %v6472_v46 = vshrl.u32 %v16637_v3, 16 }
 0x1e6   : > { %13351 = vmatpush3.bf16.msra.mxu1 %v14248_v58  ;;  %13324 = vmatprep.subr.bf16.mxu0 %v14249_v53  ;;  %v14260_v58 = vld [vmem:[%s18258_s1 + $0x7f8] sm:$0xff]   ;;  %v16663_v30 = vcombine.low %v16640_v13, %v16643_v36 }
 0x1e7   : > { %13352 = vmatprep.subr.bf16.mxu1 %v14250_v26  ;;  %v6264_v60 = vsel %vm4384_vm4, %v6261_v31, %v18391_v23  ;;  %v14266_v31 = vld [vmem:[%s18258_s1 + $0x7e8] sm:$0xff]  }
 0x1e9   : > { %13325 = vmatpush3.bf16.msra.mxu0 %v14249_v53  ;;  %v18390_v53 = vrot.slane %v16618_v14, 3 }
 0x1ea   : > { %13353 = vmatpush3.bf16.msra.mxu1 %v14250_v26  ;;  %13366 = vmatprep.subr.bf16.mxu0 %v14259_v20  ;;  %v14262_v26 = vld [vmem:[%s18258_s1 + $0x7f0] sm:$0xff]  }
 0x1eb   : > { %13394 = vmatprep.subr.bf16.mxu1 %v14260_v58  ;;  %v6049_v52 = vsel %vm4384_vm4, %v6046_v25, %v18390_v53 }
 0x1ec   : > { %v12992_v19 = vpop.f32.mrf.mxu0  ;;  %13327 = vmatmul.mubr.bf16.vlgmr.msra.gmra.mxu0 %v6047_v5  ;;  %v6265_v5 = vrot.slane %v16663_v30, 3 }
 0x1ed   : > { %v3778_v1 = vadd.f32 %v12992_v19, %v16483_v38  ;;  %v13020_v22 = vpop.f32.mrf.mxu1  ;;  %13355 = vmatmul.mubr.bf16.vlgmr.msra.gmra.mxu1 %v6262_v15  ;;  %13367 = vmatpush3.bf16.msra.mxu0 %v14259_v20  ;;  %v6656_v19 = vshrl.u32 %v16531_v24, 16  ;;  %v6659_v15 = vshll.u32 %v16531_v24, 16  ;;  %v6664_v38 = vshrl.u32 %v16535_v18, 16 }
 0x1ee   : > { %13395 = vmatpush3.bf16.msra.mxu1 %v14260_v58  ;;  %v3730_v63 = vpop.f32.mrf.mxu0  ;;  %13368 = vmatprep.subr.bf16.mxu0 %v14261_v8  ;;  %v16713_v58 = vrot.slane %v11222_v37, 3  ;;  %v18392_v18 = vrot.slane %v16637_v3, 3 }
 0x1ef   : > { %v16707_v25 = vadd.f32 %v13020_v22, %v3778_v1  ;;  %v3776_v20 = vadd.f32 %v3730_v63, %v16494_v49  ;;  %v3907_v53 = vpop.f32.mrf.mxu1  ;;  %13396 = vmatprep.subr.bf16.mxu1 %v14262_v26  ;;  %13330 = vmatprep.mubr.bf16.mxu0 %v6049_v52  ;;  %v14269_v22 = vld [vmem:[%s18258_s1 + $0x7a0] sm:$0xff]   ;;  %v16719_v1 = vrot.slane %v11252_v0, 3  ;;  %v16721_v63 = vrot.slane %v6437_v54, 3 }
 0x1f0   : > { %v12993_v23 = vpop.f32.mrf.mxu0  ;;  %13358 = vmatprep.mubr.bf16.mxu1 %v6264_v60  ;;  %v16723_v49 = vrot.slane %v6440_v29, 4  ;;  %v6447_v52 = vrot.slane %v6445_v17, 3  ;;  %v18393_v60 = vrot.slane %v16618_v14, 3  ;;  %v18394_v0 = vrot.slane %v16628_v48, 3 }
 0x1f1   : > { %v16725_v24 = vadd.f32 %v3907_v53, %v3776_v20  ;;  %v3779_v37 = vadd.f32 %v12993_v23, %v16508_v43  ;;  %v13021_v6 = vpop.f32.mrf.mxu1  ;;  %13369 = vmatpush3.bf16.msra.mxu0 %v14261_v8  ;;  %v6450_v17 = vrot.slane %v6448_v32, 4  ;;  %v16738_v20 = vrot.slane %v6656_v19, 3 }
 0x1f2   : > { %v6051_v57 = vsel %vm4384_vm4, %v18393_v60, %v18392_v18  ;;  %v6266_v54 = vsel %vm4384_vm4, %v18394_v0, %v6265_v5  ;;  %13397 = vmatpush3.bf16.msra.mxu1 %v14262_v26  ;;  %v16736_v29 = vpop.f32.mrf.mxu0  ;;  %13370 = vmatprep.subr.bf16.mxu0 %v14265_v16  ;;  %v16740_v43 = vrot.slane %v6659_v15, 4  ;;  %v6666_v8 = vrot.slane %v6664_v38, 3  ;;  %v14270_v18 = vld [vmem:[%s18258_s1 + $0x7e0] sm:$0xff]  }
 0x1f3   : > { %18395 = vst [vmem:[#allocation53_spill] sm:$0xff] %v16736_v29  ;;  %v16742_v53 = vadd.f32 %v13021_v6, %v3779_v37  ;;  %v16744_v23 = vpop.f32.mrf.mxu1  ;;  %13398 = vmatprep.subr.bf16.mxu1 %v14266_v31  ;;  %v6669_v60 = vrot.slane %v6667_v4, 4  ;;  %v6454_v26 = vshrl.u32 %v16610_v2, 16  ;;  %v6457_v0 = vshll.u32 %v16610_v2, 16 }
 0x1f4   : > { %18396 = vst [vmem:[#allocation54_spill] sm:$0xff] %v16744_v23  ;;  %v12996_v32 = vpop.f32.mrf.mxu0  ;;  %13331 = vmatmul.mubr.bf16.gmra.mxu0 %v6051_v57  ;;  %v18397_v19 = vrot.slane %v16637_v3, 3  ;;  %v6673_v15 = vshrl.u32 %v16614_v51, 16  ;;  %v6676_v38 = vshll.u32 %v16614_v51, 16  ;;  %v6268_v4 = vsel %vm4384_vm4, %v6265_v5, %v16719_v1  ;;  %v14272_v57 = vld [vmem:[%s18258_s1 + $0x798] sm:$0xff]  }
 0x1f5   : > { %v3782_v37 = vadd.f32 %v12996_v32, %v16538_v28  ;;  %13371 = vmatpush3.bf16.msra.mxu0 %v14265_v16  ;;  %v13024_v23 = vpop.f32.mrf.mxu1  ;;  %13359 = vmatmul.mubr.bf16.gmra.mxu1 %v6266_v54  ;;  %v16765_v51 = vor.u32 %v6450_v17, %v6447_v52  ;;  %v14273_v5 = vld [vmem:[%s18258_s1 + $0x7d8] sm:$0xff]   ;;  %v6463_v32 = vshrl.u32 %v16618_v14, 16  ;;  %v6459_v52 = vrot.slane %v6457_v0, 4 }
 0x1f6   : > { %v6053_v6 = vsel %vm4384_vm4, %v18397_v19, %v16713_v58  ;;  %13399 = vmatpush3.bf16.msra.mxu1 %v14266_v31  ;;  %v3746_v2 = vpop.f32.mrf.mxu0  ;;  %13372 = vmatprep.subr.bf16.mxu0 %v14269_v22  ;;  %v6443_v19 = vor.u32 %v16723_v49, %v16721_v63  ;;  %v16773_v31 = vrot.slane %v6454_v26, 3  ;;  %v14275_v63 = vld [vmem:[%s18258_s1 + $0x790] sm:$0xff]   ;;  %v16781_v49 = vor.u32 %v6669_v60, %v6666_v8 }
 0x1f7   : > { %v3780_v28 = vadd.f32 %v3746_v2, %v16547_v35  ;;  %v16768_v16 = vadd.f32 %v13024_v23, %v3782_v37  ;;  %v3923_v54 = vpop.f32.mrf.mxu1  ;;  %13400 = vmatprep.subr.bf16.mxu1 %v14270_v18  ;;  %13334 = vmatprep.mubr.bf16.mxu0 %v6053_v6  ;;  %v6662_v35 = vor.u32 %v16740_v43, %v16738_v20  ;;  %v6675_v17 = vrot.slane %v6673_v15, 3 }
 0x1f8   : > { %v12997_v29 = vpop.f32.mrf.mxu0  ;;  %13362 = vmatprep.mubr.bf16.mxu1 %v6268_v4  ;;  %v6678_v37 = vrot.slane %v6676_v38, 4  ;;  %v6466_v4 = vshll.u32 %v16618_v14, 16  ;;  %v6475_v20 = vshll.u32 %v16637_v3, 16  ;;  %v6682_v14 = vshrl.u32 %v16628_v48, 16  ;;  %v14277_v3 = vld [vmem:[%s18258_s1 + $0x788] sm:$0xff]  }
 0x1f9   : > { %v3783_v23 = vadd.f32 %v12997_v29, %v16556_v12  ;;  %v16784_v6 = vadd.f32 %v3923_v54, %v3780_v28  ;;  %13373 = vmatpush3.bf16.msra.mxu0 %v14269_v22  ;;  %v13025_v26 = vpop.f32.mrf.mxu1  ;;  %v14276_v12 = vld [vmem:[%s18258_s1 + $0x7d0] sm:$0xff]   ;;  %v6465_v22 = vrot.slane %v6463_v32, 3  ;;  %v6685_v29 = vshll.u32 %v16628_v48, 16  ;;  %v14278_v48 = vld [vmem:[%s18258_s1 + $0x7c8] sm:$0xff]   ;;  %v14279_v32 = vld [vmem:[%s18258_s1 + $0x780] sm:$0xff]  }
 0x1fa   : > { %13401 = vmatpush3.bf16.msra.mxu1 %v14270_v18  ;;  %v16787_v2 = vpop.f32.mrf.mxu0  ;;  %13374 = vmatprep.subr.bf16.mxu0 %v14272_v57  ;;  %v6452_v60 = vsel %vm6435_vm6, %v6443_v19, %v16765_v51 }
 0x1fb   : > { %v16791_v43 = vadd.f32 %v13025_v26, %v3783_v23  ;;  %v16793_v8 = vpop.f32.mrf.mxu1  ;;  %13402 = vmatprep.subr.bf16.mxu1 %v14273_v5  ;;  %v6468_v23 = vrot.slane %v6466_v4, 4  ;;  %v6691_v26 = vshrl.u32 %v16663_v30, 16  ;;  %v14281_v4 = vld [vmem:[%s18258_s1 + $0x838] sm:$0xff]  }
 0x1fc   : > { %v13000_v18 = vpop.f32.mrf.mxu0  ;;  %13335 = vmatmul.mubr.bf16.gmra.mxu0 %v16713_v58  ;;  %v6671_v58 = vsel %vm6435_vm6, %v6662_v35, %v16781_v49 }
 0x1fd   : > { %v3786_v0 = vadd.f32 %v13000_v18, %v16592_v21  ;;  %13375 = vmatpush3.bf16.msra.mxu0 %v14272_v57  ;;  %v13028_v15 = vpop.f32.mrf.mxu1  ;;  %13363 = vmatmul.mubr.bf16.gmra.mxu1 %v16719_v1  ;;  %v16817_v21 = vld [vmem:[%s14577_s10 + $0x34] sm:$0xf]  ;;  %v6694_v18 = vshll.u32 %v16663_v30, 16  ;;  %v14282_v30 = vld [vmem:[%s18258_s1 + $0x878] sm:$0xff]  }
 0x1fe   : > { %13403 = vmatpush3.bf16.msra.mxu1 %v14273_v5  ;;  %v3762_v38 = vpop.f32.mrf.mxu0  ;;  %13376 = vmatprep.subr.bf16.mxu0 %v14275_v63  ;;  %v16820_v1 = vld [vmem:[%s14577_s10 + $0x74] sm:$0xf] }
 0x1ff   : > { %v3784_v28 = vadd.f32 %v3762_v38, %v16603_v11  ;;  %v16814_v19 = vadd.f32 %v13028_v15, %v3786_v0  ;;  %v3939_v54 = vpop.f32.mrf.mxu1  ;;  %13404 = vmatprep.subr.bf16.mxu1 %v14276_v12  ;;  %13382 = vmatprep.mubr.bf16.mxu0 %v6452_v60  ;;  %v14280_v11 = vld [vmem:[%s18258_s1 + $0x7c0] sm:$0xff]   ;;  %v11277_v60 = vcombine.low %v16651_v47, %v16817_v21  ;;  %v6687_v15 = vrot.slane %v6685_v29, 4 }
 0x200   : > { %v13001_v57 = vpop.f32.mrf.mxu0  ;;  %13410 = vmatprep.mubr.bf16.mxu1 %v6671_v58  ;;  %v11302_v0 = vcombine.low %v16655_v44, %v16820_v1  ;;  %v6679_v58 = vor.u32 %v6678_v37, %v6675_v17  ;;  %v6474_v38 = vrot.slane %v6472_v46, 3  ;;  %v6696_v17 = vrot.slane %v6694_v18, 4 }
 0x201   : > { %v16825_v5 = vadd.f32 %v3939_v54, %v3784_v28  ;;  %13377 = vmatpush3.bf16.msra.mxu0 %v14275_v63  ;;  %v13029_v35 = vpop.f32.mrf.mxu1  ;;  %v6460_v63 = vor.u32 %v6459_v52, %v16773_v31  ;;  %v6469_v28 = vor.u32 %v6468_v23, %v6465_v22  ;;  %v6477_v54 = vrot.slane %v6475_v20, 4  ;;  %v14283_v31 = vld [vmem:[%s18258_s1 + $0x830] sm:$0xff]  }
 0x202   : > { %13405 = vmatpush3.bf16.msra.mxu1 %v14276_v12  ;;  %13378 = vmatprep.subr.bf16.mxu0 %v14277_v3  ;;  %v6684_v12 = vrot.slane %v6682_v14, 3  ;;  %v6484_v57 = vshll.u32 %v11277_v60, 16  ;;  %v6693_v52 = vrot.slane %v6691_v26, 3  ;;  %v6700_v37 = vshrl.u32 %v11302_v0, 16  ;;  %v14284_v35 = vld [vmem:[%s18258_s1 + $0x870] sm:$0xff]  }
 0x203   : > { %13406 = vmatprep.subr.bf16.mxu1 %v14278_v48  ;;  %v6703_v14 = vshll.u32 %v11302_v0, 16  ;;  %v6461_v46 = vsel %vm6435_vm6, %v16765_v51, %v6460_v63  ;;  %v6680_v20 = vsel %vm6435_vm6, %v16781_v49, %v6679_v58  ;;  %v16852_v22 = vpop.f32.mrf.mxu1  ;;  %v6470_v51 = vsel %vm6435_vm6, %v6460_v63, %v6469_v28 }
 0x204   : > { %v6688_v29 = vor.u32 %v6687_v15, %v6684_v12  ;;  %v6478_v18 = vor.u32 %v6477_v54, %v6474_v38  ;;  %v6702_v0 = vrot.slane %v6700_v37, 3 }
 0x205   : > { %13379 = vmatpush3.bf16.msra.mxu0 %v14277_v3  ;;  %v6481_v3 = vshrl.u32 %v11277_v60, 16  ;;  %v6705_v12 = vrot.slane %v6703_v14, 4 }
 0x206   : > { %13407 = vmatpush3.bf16.msra.mxu1 %v14278_v48  ;;  %13380 = vmatprep.subr.bf16.mxu0 %v14279_v32  ;;  %v16848_v48 = vpop.f32.mrf.mxu0  ;;  %v6689_v49 = vsel %vm6435_vm6, %v6679_v58, %v6688_v29  ;;  %v14286_v58 = vld [vmem:[%s18258_s1 + $0x868] sm:$0xff]  }
 0x207   : > { %13408 = vmatprep.subr.bf16.mxu1 %v14280_v11  ;;  %v6483_v23 = vrot.slane %v6481_v3, 3  ;;  %v14285_v3 = vld [vmem:[%s18258_s1 + $0x828] sm:$0xff]  }
 0x209   : > { %13381 = vmatpush3.bf16.msra.mxu0 %v14279_v32  ;;  %v6486_v32 = vrot.slane %v6484_v57, 4  ;;  %v6697_v57 = vor.u32 %v6696_v17, %v6693_v52  ;;  %v6479_v52 = vsel %vm6435_vm6, %v6469_v28, %v6478_v18  ;;  %v6706_v17 = vor.u32 %v6705_v12, %v6702_v0 }
 0x20a   : > { %13409 = vmatpush3.bf16.msra.mxu1 %v14280_v11  ;;  %13422 = vmatprep.subr.bf16.mxu0 %v14281_v4 }
 0x20b   : > { %13450 = vmatprep.subr.bf16.mxu1 %v14282_v30  ;;  %v6487_v38 = vor.u32 %v6486_v32, %v6483_v23  ;;  %v6698_v14 = vsel %vm6435_vm6, %v6688_v29, %v6697_v57 }
 0x20c   : > { %v13048_v26 = vpop.f32.mrf.mxu0  ;;  %13383 = vmatmul.mubr.bf16.vlgmr.msra.gmra.mxu0 %v6461_v46 }
 0x20d   : > { %v4155_v11 = vadd.f32 %v13048_v26, %v16707_v25  ;;  %v13076_v60 = vpop.f32.mrf.mxu1  ;;  %13411 = vmatmul.mubr.bf16.vlgmr.msra.gmra.mxu1 %v6680_v20  ;;  %13423 = vmatpush3.bf16.msra.mxu0 %v14281_v4  ;;  %v14287_v20 = vld [vmem:[%s18258_s1 + $0x820] sm:$0xff]   ;;  %v6707_v26 = vsel %vm6435_vm6, %v6697_v57, %v6706_v17 }
 0x20e   : > { %13451 = vmatpush3.bf16.msra.mxu1 %v14282_v30  ;;  %v4107_v15 = vpop.f32.mrf.mxu0  ;;  %13424 = vmatprep.subr.bf16.mxu0 %v14283_v31 }
 0x20f   : > { %v16863_v46 = vadd.f32 %v13076_v60, %v4155_v11  ;;  %v4153_v63 = vadd.f32 %v4107_v15, %v16725_v24  ;;  %v4306_v25 = vpop.f32.mrf.mxu1  ;;  %13452 = vmatprep.subr.bf16.mxu1 %v14284_v35  ;;  %13386 = vmatprep.mubr.bf16.mxu0 %v6470_v51  ;;  %v14290_v11 = vld [vmem:[%s18258_s1 + $0x818] sm:$0xff]  }
 0x210   : > { %v13049_v4 = vpop.f32.mrf.mxu0  ;;  %13414 = vmatprep.mubr.bf16.mxu1 %v6689_v49 }
 0x211   : > { %v16869_v30 = vadd.f32 %v4306_v25, %v4153_v63  ;;  %v4156_v54 = vadd.f32 %v13049_v4, %v16742_v53  ;;  %v13077_v37 = vpop.f32.mrf.mxu1  ;;  %13425 = vmatpush3.bf16.msra.mxu0 %v14283_v31  ;;  %v14288_v53 = vld [vmem:[%s18258_s1 + $0x860] sm:$0xff]   ;;  %v6488_v31 = vsel %vm6435_vm6, %v6478_v18, %v6487_v38 }
 0x212   : > { %13453 = vmatpush3.bf16.msra.mxu1 %v14284_v35  ;;  %v16873_v24 = vpop.f32.mrf.mxu0  ;;  %13426 = vmatprep.subr.bf16.mxu0 %v14285_v3 }
 0x213   : > { %18398 = vst [vmem:[#allocation55_spill] sm:$0xff] %v16873_v24  ;;  %v16879_v23 = vadd.f32 %v13077_v37, %v4156_v54  ;;  %v16881_v32 = vpop.f32.mrf.mxu1  ;;  %13454 = vmatprep.subr.bf16.mxu1 %v14286_v58 }
 0x214   : > { %18399 = vst [vmem:[#allocation56_spill] sm:$0xff] %v16881_v32  ;;  %v13052_v28 = vpop.f32.mrf.mxu0  ;;  %13387 = vmatmul.mubr.bf16.gmra.mxu0 %v6479_v52  ;;  %v14360_v32 = vld [vmem:[%s18258_s1 + $0x9b0] sm:$0xff]  }
 0x215   : > { %v4159_v35 = vadd.f32 %v13052_v28, %v16768_v16  ;;  %13427 = vmatpush3.bf16.msra.mxu0 %v14285_v3  ;;  %v13080_v29 = vpop.f32.mrf.mxu1  ;;  %13415 = vmatmul.mubr.bf16.gmra.mxu1 %v6698_v14  ;;  %v14291_v16 = vld [vmem:[%s18258_s1 + $0x858] sm:$0xff]   ;;  %v14295_v14 = vld [vmem:[%s18258_s1 + $0x808] sm:$0xff]  }
 0x216   : > { %13455 = vmatpush3.bf16.msra.mxu1 %v14286_v58  ;;  %v4123_v51 = vpop.f32.mrf.mxu0  ;;  %13428 = vmatprep.subr.bf16.mxu0 %v14287_v20  ;;  %v11327_v58 = vcombine.low %v16499_v62, %v16502_v61  ;;  %v14296_v62 = vld [vmem:[%s18258_s1 + $0x848] sm:$0xff]  }
 0x217   : > { %v4157_v60 = vadd.f32 %v4123_v51, %v16784_v6  ;;  %v16893_v49 = vadd.f32 %v13080_v29, %v4159_v35  ;;  %v4322_v0 = vpop.f32.mrf.mxu1  ;;  %13456 = vmatprep.subr.bf16.mxu1 %v14288_v53  ;;  %13390 = vmatprep.mubr.bf16.mxu0 %v6488_v31  ;;  %v14293_v6 = vld [vmem:[%s18258_s1 + $0x810] sm:$0xff]   ;;  %v14298_v31 = vld [vmem:[%s18258_s1 + $0x840] sm:$0xff]  }
 0x218   : > { %v13053_v18 = vpop.f32.mrf.mxu0  ;;  %13418 = vmatprep.mubr.bf16.mxu1 %v6707_v26  ;;  %v14303_v29 = vld [vmem:[%s18258_s1 + $0x8b0] sm:$0xff]  }
 0x219   : > { %v4160_v12 = vadd.f32 %v13053_v18, %v16791_v43  ;;  %v16899_v15 = vadd.f32 %v4322_v0, %v4157_v60  ;;  %13429 = vmatpush3.bf16.msra.mxu0 %v14287_v20  ;;  %v13081_v3 = vpop.f32.mrf.mxu1  ;;  %v14294_v43 = vld [vmem:[%s18258_s1 + $0x850] sm:$0xff]   ;;  %v18402_v0 = vcombine.low %v16065_v34, %v16068_v40  ;;  %v14307_v34 = vld [vmem:[%s18258_s1 + $0x8a8] sm:$0xff]  }
 0x21a   : > { %13457 = vmatpush3.bf16.msra.mxu1 %v14288_v53  ;;  %v16901_v57 = vpop.f32.mrf.mxu0  ;;  %13430 = vmatprep.subr.bf16.mxu0 %v14290_v11  ;;  %v14304_v51 = vld [vmem:[%s18258_s1 + $0x8f0] sm:$0xff]  }
 0x21b   : > { %v16906_v63 = vadd.f32 %v13081_v3, %v4160_v12  ;;  %v16908_v25 = vpop.f32.mrf.mxu1  ;;  %13458 = vmatprep.subr.bf16.mxu1 %v14291_v16  ;;  %v16960_v18 = vld [vmem:[%s14577_s10 + $0xc] sm:$0xff]  }
 0x21c   : > { %v13056_v4 = vpop.f32.mrf.mxu0  ;;  %13391 = vmatmul.mubr.bf16.gmra.mxu0 %v6487_v38 }
 0x21d   : > { %v4163_v54 = vadd.f32 %v13056_v4, %v16814_v19  ;;  %13431 = vmatpush3.bf16.msra.mxu0 %v14290_v11  ;;  %v13084_v37 = vpop.f32.mrf.mxu1  ;;  %13419 = vmatmul.mubr.bf16.gmra.mxu1 %v6706_v17  ;;  %v18400_v19 = vcombine.low %v16341_v10, %v16344_v7  ;;  %v14301_v10 = vld [vmem:[%s18258_s1 + $0x8b8] sm:$0xff]   ;;  %v11329_v11 = vcombine.low %v16568_v41, %v16586_v27 }
 0x21e   : > { %13459 = vmatpush3.bf16.msra.mxu1 %v14291_v16  ;;  %v4139_v52 = vpop.f32.mrf.mxu0  ;;  %13432 = vmatprep.subr.bf16.mxu0 %v14293_v6  ;;  %v14302_v7 = vld [vmem:[%s18258_s1 + $0x8f8] sm:$0xff]   ;;  %v11359_v16 = vcombine.low %v16580_v45, %v16595_v9  ;;  %v11330_v27 = vcombine.low %v16589_v56, %v16621_v33  ;;  %v7440_v33 = vld [vmem:[%s14577_s10 + $0x88] sm:$0x8] }
 0x21f   : > { %v4161_v20 = vadd.f32 %v4139_v52, %v16825_v5  ;;  %v16920_v53 = vadd.f32 %v13084_v37, %v4163_v54  ;;  %v4338_v28 = vpop.f32.mrf.mxu1  ;;  %13460 = vmatprep.subr.bf16.mxu1 %v14294_v43  ;;  %13438 = vmatprep.mubr.bf16.mxu0 %v11327_v58  ;;  %v14297_v5 = vld [vmem:[%s18258_s1 + $0x800] sm:$0xff]   ;;  %v11360_v54 = vcombine.low %v16598_v50, %v16640_v13  ;;  %v16993_v52 = vld [vmem:[%s14577_s10 + $0x8c] sm:$0xf] }
 0x220   : > { %v13057_v61 = vpop.f32.mrf.mxu0  ;;  %13466 = vmatprep.mubr.bf16.mxu1 %v18400_v19  ;;  %v14311_v37 = vld [vmem:[%s18258_s1 + $0x8a0] sm:$0xff]   ;;  %v11331_v13 = vcombine.low %v16624_v39, %v16651_v47 }
 0x221   : > { %v16928_v38 = vadd.f32 %v4338_v28, %v4161_v20  ;;  %13433 = vmatpush3.bf16.msra.mxu0 %v14293_v6  ;;  %v13085_v17 = vpop.f32.mrf.mxu1  ;;  %v18403_v6 = vcombine.low %v16081_v55, %v16084_v42  ;;  %v14308_v55 = vld [vmem:[%s18258_s1 + $0x8e8] sm:$0xff]   ;;  %v14312_v50 = vld [vmem:[%s18258_s1 + $0x8e0] sm:$0xff]   ;;  %v7249_v61 = vshrl.u32 %v16960_v18, 16 }
 0x222   : > { %13461 = vmatpush3.bf16.msra.mxu1 %v14294_v43  ;;  %13434 = vmatprep.subr.bf16.mxu0 %v14295_v14  ;;  %v16942_v35 = vpop.f32.mrf.mxu0  ;;  %v7251_v43 = vshll.u32 %v16960_v18, 16 }
 0x223   : > { %13462 = vmatprep.subr.bf16.mxu1 %v14296_v62  ;;  %v16947_v26 = vpop.f32.mrf.mxu1 }
 0x224   : > { %18401 = vst [vmem:[#allocation57_spill] sm:$0xff] %v16947_v26  ;;  %v7253_v19 = vrot.slane %v7251_v43, 1 }
 0x225   : > { %13435 = vmatpush3.bf16.msra.mxu0 %v14295_v14  ;;  %v16996_v14 = vld [vmem:[%s14577_s10 + $0x90] sm:$0xf] }
 0x226   : > { %13463 = vmatpush3.bf16.msra.mxu1 %v14296_v62  ;;  %13436 = vmatprep.subr.bf16.mxu0 %v14297_v5  ;;  %v11361_v62 = vcombine.low %v16643_v36, %v16655_v44  ;;  %v14315_v44 = vld [vmem:[%s18258_s1 + $0x898] sm:$0xff]  }
 0x227   : > { %13464 = vmatprep.subr.bf16.mxu1 %v14298_v31 }
 0x229   : > { %13437 = vmatpush3.bf16.msra.mxu0 %v14297_v5 }
 0x22a   : > { %13465 = vmatpush3.bf16.msra.mxu1 %v14298_v31  ;;  %13478 = vmatprep.subr.bf16.mxu0 %v14301_v10 }
 0x22b   : > { %13506 = vmatprep.subr.bf16.mxu1 %v14302_v7 }
 0x22c   : > { %v13104_v60 = vpop.f32.mrf.mxu0  ;;  %13439 = vmatmul.mubr.bf16.vlgmr.msra.gmra.mxu0 %v18402_v0  ;;  %v11362_v0 = vcombine.low %v16820_v1, %v16820_v1 }
 0x22d   : > { %v4532_v12 = vadd.f32 %v13104_v60, %v16863_v46  ;;  %v13132_v3 = vpop.f32.mrf.mxu1  ;;  %13467 = vmatmul.mubr.bf16.vlgmr.msra.gmra.mxu1 %v18403_v6  ;;  %13479 = vmatpush3.bf16.msra.mxu0 %v14301_v10  ;;  %v16978_v46 = vld [vmem:[%s14577_s10 + $0x14] sm:$0xff]   ;;  %v17013_v10 = vcombine.low %v7440_v33, %v16993_v52  ;;  %v11332_v60 = vcombine.low %v16817_v21, %v16817_v21 }
 0x22e   : > { %13507 = vmatpush3.bf16.msra.mxu1 %v14302_v7  ;;  %v4484_v41 = vpop.f32.mrf.mxu0  ;;  %13480 = vmatprep.subr.bf16.mxu0 %v14303_v29  ;;  %v7256_v17 = vshll.u32 %v16978_v46, 16  ;;  %v14498_v7 = vld [vmem:[%s14577_s10 + $0x94] sm:$0xf] }
 0x22f   : > { %v16969_v40 = vadd.f32 %v13132_v3, %v4532_v12  ;;  %v4530_v45 = vadd.f32 %v4484_v41, %v16869_v30  ;;  %v4741_v9 = vpop.f32.mrf.mxu1  ;;  %13508 = vmatprep.subr.bf16.mxu1 %v14304_v51  ;;  %13442 = vmatprep.mubr.bf16.mxu0 %v11329_v11  ;;  %v17017_v47 = vcombine.low %v16996_v14, %v14498_v7  ;;  %v7499_v6 = vrot.slane %v17013_v10, 3  ;;  %v14319_v21 = vld [vmem:[%s18258_s1 + $0x890] sm:$0xff]  }
 0x230   : > { %v13105_v42 = vpop.f32.mrf.mxu0  ;;  %13470 = vmatprep.mubr.bf16.mxu1 %v11359_v16  ;;  %v7254_v16 = vor.u32 %v7253_v19, %v7249_v61  ;;  %v7258_v18 = vrot.slane %v7256_v17, 1  ;;  %v7260_v19 = vshrl.u32 %v16978_v46, 16  ;;  %v14324_v46 = vld [vmem:[%s18258_s1 + $0x8c0] sm:$0xff]  }
 0x231   : > { %v16981_v30 = vadd.f32 %v4741_v9, %v4530_v45  ;;  %v4533_v58 = vadd.f32 %v13105_v42, %v16879_v23  ;;  %v13133_v4 = vpop.f32.mrf.mxu1  ;;  %13481 = vmatpush3.bf16.msra.mxu0 %v14303_v29  ;;  %v7500_v41 = vrot.slane %v17017_v47, 3  ;;  %v14320_v45 = vld [vmem:[%s18258_s1 + $0x8d0] sm:$0xff]  }
 0x232   : > { %13509 = vmatpush3.bf16.msra.mxu1 %v14304_v51  ;;  %v16989_v56 = vpop.f32.mrf.mxu0  ;;  %13482 = vmatprep.subr.bf16.mxu0 %v14307_v34  ;;  %v14316_v51 = vld [vmem:[%s18258_s1 + $0x8d8] sm:$0xff]  }
 0x233   : > { %18404 = vst [vmem:[#allocation58_spill] sm:$0xff] %v16989_v56  ;;  %v16998_v20 = vadd.f32 %v13133_v4, %v4533_v58  ;;  %v17000_v23 = vpop.f32.mrf.mxu1  ;;  %13510 = vmatprep.subr.bf16.mxu1 %v14308_v55  ;;  %v7501_v43 = vsel %vm4384_vm4, %v7499_v6, %v7500_v41  ;;  %v14331_v58 = vld [vmem:[%s14577_s10 + $0x1c] sm:$0xff]   ;;  %v17103_v6 = vld [vmem:[%s14577_s10 + $0xac] sm:$0xf] }
 0x234   : > { %18405 = vst [vmem:[#allocation59_spill] sm:$0xff] %v17000_v23  ;;  %v13108_v28 = vpop.f32.mrf.mxu0  ;;  %13443 = vmatmul.mubr.bf16.gmra.mxu0 %v11330_v27  ;;  %v7264_v17 = vshll.u32 %v14331_v58, 16 }
 0x235   : > { %v4536_v5 = vadd.f32 %v13108_v28, %v16893_v49  ;;  %13483 = vmatpush3.bf16.msra.mxu0 %v14307_v34  ;;  %v13136_v31 = vpop.f32.mrf.mxu1  ;;  %13471 = vmatmul.mubr.bf16.gmra.mxu1 %v11360_v54  ;;  %v14321_v54 = vld [vmem:[%s18258_s1 + $0x888] sm:$0xff]  }
 0x236   : > { %13511 = vmatpush3.bf16.msra.mxu1 %v14308_v55  ;;  %v4500_v39 = vpop.f32.mrf.mxu0  ;;  %13484 = vmatprep.subr.bf16.mxu0 %v14311_v37  ;;  %v7259_v55 = vsel %vm639_vm0, %v7254_v16, %v7258_v18 }
 0x237   : > { %v4534_v36 = vadd.f32 %v4500_v39, %v16899_v15  ;;  %v17023_v49 = vadd.f32 %v13136_v31, %v4536_v5  ;;  %v4757_v29 = vpop.f32.mrf.mxu1  ;;  %13512 = vmatprep.subr.bf16.mxu1 %v14312_v50  ;;  %13446 = vmatprep.mubr.bf16.mxu0 %v11331_v13  ;;  %v17065_v13 = vld [vmem:[%s14577_s10 + $0x9c] sm:$0xf]  ;;  %v14323_v5 = vld [vmem:[%s18258_s1 + $0x880] sm:$0xff]   ;;  %v14499_v31 = vld [vmem:[%s14577_s10 + $0x98] sm:$0xf] }
 0x238   : > { %v13109_v11 = vpop.f32.mrf.mxu0  ;;  %13474 = vmatprep.mubr.bf16.mxu1 %v11361_v62  ;;  %v14336_v62 = vld [vmem:[%s14577_s10 + $0x24] sm:$0xff]   ;;  %v17076_v7 = vcombine.low %v14499_v31, %v17065_v13  ;;  %v17079_v39 = vld [vmem:[%s14577_s10 + $0xa0] sm:$0xf] }
 0x239   : > { %v4537_v15 = vadd.f32 %v13109_v11, %v16906_v63  ;;  %v17033_v12 = vadd.f32 %v4757_v29, %v4534_v36  ;;  %13485 = vmatpush3.bf16.msra.mxu0 %v14311_v37  ;;  %v13137_v3 = vpop.f32.mrf.mxu1  ;;  %v7268_v36 = vshrl.u32 %v14331_v58, 16  ;;  %v7272_v29 = vshll.u32 %v14336_v62, 16  ;;  %v17111_v58 = vld [vmem:[%s14577_s10 + $0xb0] sm:$0xf] }
 0x23a   : > { %13513 = vmatpush3.bf16.msra.mxu1 %v14312_v50  ;;  %v17037_v34 = vpop.f32.mrf.mxu0  ;;  %13486 = vmatprep.subr.bf16.mxu0 %v14315_v44  ;;  %v14322_v50 = vld [vmem:[%s18258_s1 + $0x8c8] sm:$0xff]   ;;  %v7262_v11 = vor.u32 %v7260_v19, %v7258_v18  ;;  %v7502_v16 = vrot.slane %v17076_v7, 3 }
 0x23b   : > { %18406 = vst [vmem:[#allocation60_spill] sm:$0xff] %v17037_v34  ;;  %v17042_v1 = vadd.f32 %v13137_v3, %v4537_v15  ;;  %v17044_v63 = vpop.f32.mrf.mxu1  ;;  %13514 = vmatprep.subr.bf16.mxu1 %v14316_v51  ;;  %v14332_v15 = vld [vmem:[%s18258_s1 + $0x938] sm:$0xff]   ;;  %v17100_v18 = vld [vmem:[%s14577_s10 + $0xa8] sm:$0xf] }
 0x23c   : > { %18407 = vst [vmem:[#allocation61_spill] sm:$0xff] %v17044_v63  ;;  %v13112_v9 = vpop.f32.mrf.mxu0  ;;  %13447 = vmatmul.mubr.bf16.gmra.mxu0 %v11332_v60  ;;  %v7266_v60 = vrot.slane %v7264_v17, 1  ;;  %v14333_v3 = vld [vmem:[%s18258_s1 + $0x978] sm:$0xff]  }
 0x23d   : > { %v4540_v42 = vadd.f32 %v13112_v9, %v16920_v53  ;;  %13487 = vmatpush3.bf16.msra.mxu0 %v14315_v44  ;;  %v13140_v27 = vpop.f32.mrf.mxu1  ;;  %13475 = vmatmul.mubr.bf16.gmra.mxu1 %v11362_v0  ;;  %v17082_v44 = vld [vmem:[%s14577_s10 + $0xa4] sm:$0xf]  ;;  %v7274_v9 = vrot.slane %v7272_v29, 1 }
 0x23e   : > { %13515 = vmatpush3.bf16.msra.mxu1 %v14316_v51  ;;  %v4516_v4 = vpop.f32.mrf.mxu0  ;;  %13488 = vmatprep.subr.bf16.mxu0 %v14319_v21  ;;  %v14337_v51 = vld [vmem:[%s14577_s10 + $0x2c] sm:$0xff]   ;;  %v17090_v0 = vcombine.low %v17079_v39, %v17082_v44 }
 0x23f   : > { %v4538_v37 = vadd.f32 %v4516_v4, %v16928_v38  ;;  %v17059_v53 = vadd.f32 %v13140_v27, %v4540_v42  ;;  %v4773_v33 = vpop.f32.mrf.mxu1  ;;  %13516 = vmatprep.subr.bf16.mxu1 %v14320_v45  ;;  %13494 = vmatprep.mubr.bf16.mxu0 %v7259_v55  ;;  %v7276_v55 = vshrl.u32 %v14336_v62, 16  ;;  %v7280_v42 = vshll.u32 %v14337_v51, 16  ;;  %v7451_v4 = vld [vmem:[%s14577_s10 + $0xb4] sm:$0x7] }
 0x240   : > { %v13113_v28 = vpop.f32.mrf.mxu0  ;;  %13522 = vmatprep.mubr.bf16.mxu1 %v7501_v43  ;;  %v7267_v27 = vsel %vm639_vm0, %v7262_v11, %v7266_v60  ;;  %v7504_v43 = vrot.slane %v17090_v0, 3  ;;  %v14335_v62 = vld [vmem:[%s18258_s1 + $0x970] sm:$0xff]  }
 0x241   : > { %v17068_v61 = vadd.f32 %v4773_v33, %v4538_v37  ;;  %13489 = vmatpush3.bf16.msra.mxu0 %v14319_v21  ;;  %v13141_v38 = vpop.f32.mrf.mxu1  ;;  %v17106_v21 = vld [vmem:[%s14577_s10 + $0x34] sm:$0x1f]   ;;  %v7503_v37 = vsel %vm4384_vm4, %v7500_v41, %v7502_v16  ;;  %v7282_v31 = vrot.slane %v7280_v42, 1 }
 0x242   : > { %13517 = vmatpush3.bf16.msra.mxu1 %v14320_v45  ;;  %13490 = vmatprep.subr.bf16.mxu0 %v14321_v54  ;;  %v7270_v45 = vor.u32 %v7268_v36, %v7266_v60  ;;  %v14334_v33 = vld [vmem:[%s18258_s1 + $0x930] sm:$0xff]   ;;  %v7284_v38 = vshrl.u32 %v14337_v51, 16  ;;  %v7288_v19 = vshll.u32 %v17106_v21, 16  ;;  %v7505_v11 = vsel %vm4384_vm4, %v7502_v16, %v7504_v43  ;;  %v14338_v51 = vld [vmem:[%s18258_s1 + $0x928] sm:$0xff]  }
 0x243   : > { %13518 = vmatprep.subr.bf16.mxu1 %v14322_v50  ;;  %v17126_v28 = vpop.f32.mrf.mxu1  ;;  %v14339_v16 = vld [vmem:[%s18258_s1 + $0x968] sm:$0xff]  }
 0x244   : > { %18409 = vst [vmem:[#allocation63_spill] sm:$0xff] %v17126_v28  ;;  %v7275_v17 = vsel %vm639_vm0, %v7270_v45, %v7274_v9 }
 0x245   : > { %13491 = vmatpush3.bf16.msra.mxu0 %v14321_v54  ;;  %v17114_v54 = vpop.f32.mrf.mxu0 }
 0x246   : > { %13519 = vmatpush3.bf16.msra.mxu1 %v14322_v50  ;;  %13492 = vmatprep.subr.bf16.mxu0 %v14323_v5  ;;  %18408 = vst [vmem:[#allocation62_spill] sm:$0xff] %v17114_v54  ;;  %v17124_v50 = vcombine.low %v17100_v18, %v17103_v6 }
 0x247   : > { %13520 = vmatprep.subr.bf16.mxu1 %v14324_v46 }
 0x248   : > { %v7506_v45 = vrot.slane %v17124_v50, 3 }
 0x249   : > { %13493 = vmatpush3.bf16.msra.mxu0 %v14323_v5  ;;  %v7278_v5 = vor.u32 %v7276_v55, %v7274_v9 }
 0x24a   : > { %13521 = vmatpush3.bf16.msra.mxu1 %v14324_v46  ;;  %13534 = vmatprep.subr.bf16.mxu0 %v14332_v15  ;;  %v11422_v46 = vcombine.low %v17111_v58, %v7451_v4 }
 0x24b   : > { %13562 = vmatprep.subr.bf16.mxu1 %v14333_v3 }
 0x24c   : > { %v13160_v41 = vpop.f32.mrf.mxu0  ;;  %13495 = vmatmul.mubr.bf16.vlgmr.msra.gmra.mxu0 %v7267_v27  ;;  %v7283_v27 = vsel %vm639_vm0, %v7278_v5, %v7282_v31  ;;  %v17147_v4 = vrot.slane %v11422_v46, 3  ;;  %v7903_v5 = vshll.u32 %v17017_v47, 16 }
 0x24d   : > { %v5046_v36 = vadd.f32 %v13160_v41, %v16969_v40  ;;  %v13188_v29 = vpop.f32.mrf.mxu1  ;;  %13523 = vmatmul.mubr.bf16.vlgmr.msra.gmra.mxu1 %v7503_v37  ;;  %13535 = vmatpush3.bf16.msra.mxu0 %v14332_v15  ;;  %v7286_v15 = vor.u32 %v7284_v38, %v7282_v31  ;;  %v7655_v37 = vld [vmem:[%s14577_s10 + $0xc8] sm:$0x8]  ;;  %v7895_v41 = vshll.u32 %v17013_v10, 16  ;;  %v17159_v38 = vld [vmem:[%s14577_s10 + $0xd0] sm:$0xf] }
 0x24e   : > { %13563 = vmatpush3.bf16.msra.mxu1 %v14333_v3  ;;  %v4998_v60 = vpop.f32.mrf.mxu0  ;;  %13536 = vmatprep.subr.bf16.mxu0 %v14334_v33  ;;  %v7290_v3 = vrot.slane %v7288_v19, 1  ;;  %v7900_v19 = vshrl.u32 %v17017_v47, 16  ;;  %v14343_v47 = vld [vmem:[%s18258_s1 + $0x960] sm:$0xff]   ;;  %v7905_v23 = vrot.slane %v7903_v5, 4 }
 0x24f   : > { %v17140_v9 = vadd.f32 %v13188_v29, %v5046_v36  ;;  %v5044_v55 = vadd.f32 %v4998_v60, %v16981_v30  ;;  %v5175_v40 = vpop.f32.mrf.mxu1  ;;  %13564 = vmatprep.subr.bf16.mxu1 %v14335_v62  ;;  %13498 = vmatprep.mubr.bf16.mxu0 %v7275_v17  ;;  %v7892_v30 = vshrl.u32 %v17013_v10, 16  ;;  %v17156_v60 = vld [vmem:[%s14577_s10 + $0xcc] sm:$0xf]  ;;  %v7507_v10 = vsel %vm4384_vm4, %v7504_v43, %v7506_v45 }
 0x250   : > { %v13161_v42 = vpop.f32.mrf.mxu0  ;;  %13526 = vmatprep.mubr.bf16.mxu1 %v7505_v11  ;;  %v7292_v11 = vshrl.u32 %v17106_v21, 16  ;;  %v7509_v43 = vsel %vm4384_vm4, %v7506_v45, %v17147_v4  ;;  %v7902_v21 = vrot.slane %v7900_v19, 3  ;;  %v14345_v45 = vld [vmem:[%s18258_s1 + $0x918] sm:$0xff]  }
 0x251   : > { %v17152_v36 = vadd.f32 %v5175_v40, %v5044_v55  ;;  %v5047_v17 = vadd.f32 %v13161_v42, %v16998_v20  ;;  %v13189_v29 = vpop.f32.mrf.mxu1  ;;  %13537 = vmatpush3.bf16.msra.mxu0 %v14334_v33  ;;  %v14342_v20 = vld [vmem:[%s18258_s1 + $0x920] sm:$0xff]   ;;  %v17181_v40 = vcombine.low %v7655_v37, %v17156_v60  ;;  %v14500_v42 = vld [vmem:[%s14577_s10 + $0xd4] sm:$0xf] }
 0x252   : > { %13565 = vmatpush3.bf16.msra.mxu1 %v14335_v62  ;;  %v17163_v31 = vpop.f32.mrf.mxu0  ;;  %13538 = vmatprep.subr.bf16.mxu0 %v14338_v51  ;;  %v7291_v62 = vsel %vm639_vm0, %v7286_v15, %v7290_v3  ;;  %v7897_v15 = vrot.slane %v7895_v41, 4  ;;  %v7294_v41 = vor.u32 %v7292_v11, %v7290_v3  ;;  %v14348_v3 = vld [vmem:[%s18258_s1 + $0x910] sm:$0xff]  }
 0x253   : > { %18410 = vst [vmem:[#allocation64_spill] sm:$0xff] %v17163_v31  ;;  %v17169_v33 = vadd.f32 %v13189_v29, %v5047_v17  ;;  %v17171_v46 = vpop.f32.mrf.mxu1  ;;  %13566 = vmatprep.subr.bf16.mxu1 %v14339_v16  ;;  %v17185_v17 = vcombine.low %v17159_v38, %v14500_v42  ;;  %v7894_v29 = vrot.slane %v7892_v30, 3 }
 0x254   : > { %18411 = vst [vmem:[#allocation65_spill] sm:$0xff] %v17171_v46  ;;  %v13164_v55 = vpop.f32.mrf.mxu0  ;;  %13499 = vmatmul.mubr.bf16.gmra.mxu0 %v7283_v27 }
 0x255   : > { %v5050_v46 = vadd.f32 %v13164_v55, %v17023_v49  ;;  %13539 = vmatpush3.bf16.msra.mxu0 %v14338_v51  ;;  %v13192_v31 = vpop.f32.mrf.mxu1  ;;  %13527 = vmatmul.mubr.bf16.gmra.mxu1 %v7507_v10  ;;  %v14346_v49 = vld [vmem:[%s18258_s1 + $0x958] sm:$0xff]   ;;  %v7715_v19 = vrot.slane %v17185_v17, 3 }
 0x256   : > { %13567 = vmatpush3.bf16.msra.mxu1 %v14339_v16  ;;  %v5014_v27 = vpop.f32.mrf.mxu0  ;;  %13540 = vmatprep.subr.bf16.mxu0 %v14342_v20  ;;  %v7714_v16 = vrot.slane %v17181_v40, 3 }
 0x257   : > { %v5048_v37 = vadd.f32 %v5014_v27, %v17033_v12  ;;  %v17192_v42 = vadd.f32 %v13192_v31, %v5050_v46  ;;  %v5191_v30 = vpop.f32.mrf.mxu1  ;;  %13568 = vmatprep.subr.bf16.mxu1 %v14343_v47  ;;  %13502 = vmatprep.mubr.bf16.mxu0 %v7291_v62  ;;  %v7898_v31 = vor.u32 %v7897_v15, %v7894_v29  ;;  %v17222_v29 = vld [vmem:[%s14577_s10 + $0xdc] sm:$0xf]  ;;  %v14350_v27 = vld [vmem:[%s18258_s1 + $0x908] sm:$0xff]  }
 0x258   : > { %v13165_v51 = vpop.f32.mrf.mxu0  ;;  %13530 = vmatprep.mubr.bf16.mxu1 %v7509_v43  ;;  %v17202_v46 = vor.u32 %v7905_v23, %v7902_v21 }
 0x259   : > { %v5051_v5 = vadd.f32 %v13165_v51, %v17042_v1  ;;  %v17200_v10 = vadd.f32 %v5191_v30, %v5048_v37  ;;  %13541 = vmatpush3.bf16.msra.mxu0 %v14342_v20  ;;  %v13193_v12 = vpop.f32.mrf.mxu1  ;;  %v14349_v1 = vld [vmem:[%s18258_s1 + $0x950] sm:$0xff]   ;;  %v7716_v20 = vsel %vm4384_vm4, %v7714_v16, %v7715_v19 }
 0x25a   : > { %13569 = vmatpush3.bf16.msra.mxu1 %v14343_v47  ;;  %v17204_v62 = vpop.f32.mrf.mxu0  ;;  %13542 = vmatprep.subr.bf16.mxu0 %v14345_v45  ;;  %v7907_v15 = vsel %vm6435_vm6, %v7898_v31, %v17202_v46  ;;  %v7918_v31 = vshrl.u32 %v17090_v0, 16 }
 0x25b   : > { %18412 = vst [vmem:[#allocation66_spill] sm:$0xff] %v17204_v62  ;;  %v17209_v11 = vadd.f32 %v13193_v12, %v5051_v5  ;;  %v17211_v55 = vpop.f32.mrf.mxu1  ;;  %13570 = vmatprep.subr.bf16.mxu1 %v14346_v49  ;;  %v17247_v12 = vld [vmem:[%s14577_s10 + $0xe4] sm:$0xf] }
 0x25c   : > { %18413 = vst [vmem:[#allocation67_spill] sm:$0xff] %v17211_v55  ;;  %v13168_v23 = vpop.f32.mrf.mxu0  ;;  %13503 = vmatmul.mubr.bf16.gmra.mxu0 %v7294_v41  ;;  %v14501_v41 = vld [vmem:[%s14577_s10 + $0xd8] sm:$0xf] }
 0x25d   : > { %v5054_v47 = vadd.f32 %v13168_v23, %v17059_v53  ;;  %13543 = vmatpush3.bf16.msra.mxu0 %v14345_v45  ;;  %v13196_v43 = vpop.f32.mrf.mxu1  ;;  %13531 = vmatmul.mubr.bf16.gmra.mxu1 %v17147_v4  ;;  %v7909_v53 = vshrl.u32 %v17076_v7, 16  ;;  %v7912_v45 = vshll.u32 %v17076_v7, 16  ;;  %v17239_v16 = vcombine.low %v14501_v41, %v17222_v29  ;;  %v17244_v7 = vld [vmem:[%s14577_s10 + $0xe0] sm:$0xf]  ;;  %v14358_v41 = vld [vmem:[%s18258_s1 + $0x9b8] sm:$0xff]  }
 0x25e   : > { %13571 = vmatpush3.bf16.msra.mxu1 %v14346_v49  ;;  %v5030_v21 = vpop.f32.mrf.mxu0  ;;  %13544 = vmatprep.subr.bf16.mxu0 %v14348_v3  ;;  %v14351_v49 = vld [vmem:[%s18258_s1 + $0x948] sm:$0xff]   ;;  %v7921_v23 = vshll.u32 %v17090_v0, 16  ;;  %v17263_v0 = vcombine.low %v17244_v7, %v17247_v12 }
 0x25f   : > { %v5052_v4 = vadd.f32 %v5030_v21, %v17068_v61  ;;  %v17232_v37 = vadd.f32 %v13196_v43, %v5054_v47  ;;  %v5207_v30 = vpop.f32.mrf.mxu1  ;;  %13572 = vmatprep.subr.bf16.mxu1 %v14349_v1  ;;  %13550 = vmatprep.mubr.bf16.mxu0 %v7716_v20  ;;  %v14352_v20 = vld [vmem:[%s18258_s1 + $0x900] sm:$0xff]   ;;  %v7911_v47 = vrot.slane %v7909_v53, 3  ;;  %v7914_v43 = vrot.slane %v7912_v45, 4  ;;  %v17269_v53 = vld [vmem:[%s14577_s10 + $0xec] sm:$0xf] }
 0x260   : > { %v13169_v51 = vpop.f32.mrf.mxu0  ;;  %13578 = vmatprep.mubr.bf16.mxu1 %v7907_v15  ;;  %v14353_v15 = vld [vmem:[%s18258_s1 + $0x940] sm:$0xff]   ;;  %v7717_v21 = vrot.slane %v17239_v16, 3  ;;  %v7920_v45 = vrot.slane %v7918_v31, 3  ;;  %v14359_v31 = vld [vmem:[%s18258_s1 + $0x9f8] sm:$0xff]  }
 0x261   : > { %v17241_v5 = vadd.f32 %v5207_v30, %v5052_v4  ;;  %13545 = vmatpush3.bf16.msra.mxu0 %v14348_v3  ;;  %v13197_v61 = vpop.f32.mrf.mxu1  ;;  %v17255_v3 = vld [vmem:[%s14577_s10 + $0xb4] sm:$0xf]  ;;  %v7923_v4 = vrot.slane %v7921_v23, 4  ;;  %v7915_v51 = vor.u32 %v7914_v43, %v7911_v47  ;;  %v7719_v23 = vrot.slane %v17263_v0, 3  ;;  %v17287_v47 = vld [vmem:[%s14577_s10 + $0xf0] sm:$0xf] }
 0x262   : > { %13573 = vmatpush3.bf16.msra.mxu1 %v14349_v1  ;;  %13546 = vmatprep.subr.bf16.mxu0 %v14350_v27  ;;  %v17266_v1 = vld [vmem:[%s14577_s10 + $0xe8] sm:$0xf]  ;;  %v11477_v30 = vcombine.low %v17111_v58, %v17255_v3  ;;  %v7930_v61 = vshll.u32 %v17124_v50, 16  ;;  %v7666_v43 = vld [vmem:[%s14577_s10 + $0xf4] sm:$0x7]  ;;  %v7718_v28 = vsel %vm4384_vm4, %v7715_v19, %v7717_v21  ;;  %v17293_v62 = vpop.f32.mrf.mxu0 }
 0x263   : > { %13574 = vmatprep.subr.bf16.mxu1 %v14351_v49  ;;  %18414 = vst [vmem:[#allocation68_spill] sm:$0xff] %v17293_v62  ;;  %v7916_v54 = vsel %vm6435_vm6, %v17202_v46, %v7915_v51  ;;  %v17300_v26 = vpop.f32.mrf.mxu1  ;;  %v14361_v19 = vld [vmem:[%s18258_s1 + $0x9f0] sm:$0xff]   ;;  %v7720_v46 = vsel %vm4384_vm4, %v7717_v21, %v7719_v23 }
 0x264   : > { %v7936_v55 = vshrl.u32 %v11477_v30, 16  ;;  %v7939_v56 = vshll.u32 %v11477_v30, 16  ;;  %18415 = vst [vmem:[#allocation69_spill] sm:$0xff] %v17300_v26 }
 0x265   : > { %13547 = vmatpush3.bf16.msra.mxu0 %v14350_v27  ;;  %v7927_v27 = vshrl.u32 %v17124_v50, 16  ;;  %v7924_v50 = vor.u32 %v7923_v4, %v7920_v45  ;;  %v11452_v45 = vcombine.low %v17287_v47, %v7666_v43 }
 0x266   : > { %13575 = vmatpush3.bf16.msra.mxu1 %v14351_v49  ;;  %13548 = vmatprep.subr.bf16.mxu0 %v14352_v20  ;;  %v17284_v49 = vcombine.low %v17266_v1, %v17269_v53  ;;  %v7941_v26 = vrot.slane %v7939_v56, 4 }
 0x267   : > { %13576 = vmatprep.subr.bf16.mxu1 %v14353_v15  ;;  %v7929_v63 = vrot.slane %v7927_v27, 3  ;;  %v7925_v27 = vsel %vm6435_vm6, %v7915_v51, %v7924_v50  ;;  %v7723_v56 = vrot.slane %v11452_v45, 3  ;;  %v8111_v51 = vshrl.u32 %v17181_v40, 16 }
 0x268   : > { %v7721_v4 = vrot.slane %v17284_v49, 3 }
 0x269   : > { %13549 = vmatpush3.bf16.msra.mxu0 %v14352_v20  ;;  %v7932_v20 = vrot.slane %v7930_v61, 4  ;;  %v7938_v61 = vrot.slane %v7936_v55, 3 }
 0x26a   : > { %13577 = vmatpush3.bf16.msra.mxu1 %v14353_v15  ;;  %13590 = vmatprep.subr.bf16.mxu0 %v14358_v41 }
 0x26b   : > { %13618 = vmatprep.subr.bf16.mxu1 %v14359_v31  ;;  %v7933_v43 = vor.u32 %v7932_v20, %v7929_v63  ;;  %v8119_v63 = vshrl.u32 %v17185_v17, 16  ;;  %v7722_v20 = vsel %vm4384_vm4, %v7719_v23, %v7721_v4  ;;  %v8113_v23 = vrot.slane %v8111_v51, 3 }
 0x26c   : > { %v13216_v15 = vpop.f32.mrf.mxu0  ;;  %13551 = vmatmul.mubr.bf16.vlgmr.msra.gmra.mxu0 %v7718_v28  ;;  %v14364_v28 = vld [vmem:[%s18258_s1 + $0x9a8] sm:$0xff]  }
 0x26d   : > { %v5400_v30 = vadd.f32 %v13216_v15, %v17140_v9  ;;  %v13244_v62 = vpop.f32.mrf.mxu1  ;;  %13579 = vmatmul.mubr.bf16.vlgmr.msra.gmra.mxu1 %v7916_v54  ;;  %13591 = vmatpush3.bf16.msra.mxu0 %v14358_v41  ;;  %v14365_v54 = vld [vmem:[%s18258_s1 + $0x9e8] sm:$0xff]   ;;  %v8114_v41 = vshll.u32 %v17181_v40, 16  ;;  %v7942_v15 = vor.u32 %v7941_v26, %v7938_v61  ;;  %v14366_v40 = vld [vmem:[%s18258_s1 + $0x9a0] sm:$0xff]   ;;  %v7724_v26 = vsel %vm4384_vm4, %v7721_v4, %v7723_v56  ;;  %v14369_v4 = vld [vmem:[%s18258_s1 + $0x998] sm:$0xff]  }
 0x26e   : > { %13619 = vmatpush3.bf16.msra.mxu1 %v14359_v31  ;;  %v5352_v24 = vpop.f32.mrf.mxu0  ;;  %13592 = vmatprep.subr.bf16.mxu0 %v14360_v32 }
 0x26f   : > { %v17313_v21 = vadd.f32 %v13244_v62, %v5400_v30  ;;  %v5398_v34 = vadd.f32 %v5352_v24, %v17152_v36  ;;  %v5551_v9 = vpop.f32.mrf.mxu1  ;;  %13620 = vmatprep.subr.bf16.mxu1 %v14361_v19  ;;  %13554 = vmatprep.mubr.bf16.mxu0 %v7720_v46  ;;  %v8122_v62 = vshll.u32 %v17185_v17, 16  ;;  %v7934_v46 = vsel %vm6435_vm6, %v7924_v50, %v7933_v43 }
 0x270   : > { %v13217_v55 = vpop.f32.mrf.mxu0  ;;  %13582 = vmatprep.mubr.bf16.mxu1 %v7925_v27  ;;  %v8121_v50 = vrot.slane %v8119_v63, 3 }
 0x271   : > { %v17323_v31 = vadd.f32 %v5551_v9, %v5398_v34  ;;  %v5401_v24 = vadd.f32 %v13217_v55, %v17169_v33  ;;  %v13245_v36 = vpop.f32.mrf.mxu1  ;;  %13593 = vmatpush3.bf16.msra.mxu0 %v14360_v32  ;;  %v14367_v32 = vld [vmem:[%s18258_s1 + $0x9e0] sm:$0xff]   ;;  %v8124_v30 = vrot.slane %v8122_v62, 4  ;;  %v7943_v9 = vsel %vm6435_vm6, %v7933_v43, %v7942_v15 }
 0x272   : > { %13621 = vmatpush3.bf16.msra.mxu1 %v14361_v19  ;;  %v17327_v45 = vpop.f32.mrf.mxu0  ;;  %13594 = vmatprep.subr.bf16.mxu0 %v14364_v28  ;;  %v8116_v19 = vrot.slane %v8114_v41, 4 }
 0x273   : > { %v17333_v17 = vadd.f32 %v13245_v36, %v5401_v24  ;;  %v17335_v34 = vpop.f32.mrf.mxu1  ;;  %13622 = vmatprep.subr.bf16.mxu1 %v14365_v54 }
 0x274   : > { %v13220_v33 = vpop.f32.mrf.mxu0  ;;  %13555 = vmatmul.mubr.bf16.gmra.mxu0 %v7722_v20  ;;  %v8117_v43 = vor.u32 %v8116_v19, %v8113_v23  ;;  %v14372_v20 = vld [vmem:[%s18258_s1 + $0x990] sm:$0xff]  }
 0x275   : > { %v5404_v27 = vadd.f32 %v13220_v33, %v17192_v42  ;;  %13595 = vmatpush3.bf16.msra.mxu0 %v14364_v28  ;;  %v13248_v61 = vpop.f32.mrf.mxu1  ;;  %13583 = vmatmul.mubr.bf16.gmra.mxu1 %v7934_v46  ;;  %v14370_v42 = vld [vmem:[%s18258_s1 + $0x9d8] sm:$0xff]  }
 0x276   : > { %13623 = vmatpush3.bf16.msra.mxu1 %v14365_v54  ;;  %v5368_v55 = vpop.f32.mrf.mxu0  ;;  %13596 = vmatprep.subr.bf16.mxu0 %v14366_v40  ;;  %v17352_v54 = vor.u32 %v8124_v30, %v8121_v50  ;;  %v8128_v50 = vshrl.u32 %v17239_v16, 16  ;;  %v8131_v30 = vshll.u32 %v17239_v16, 16 }
 0x277   : > { %v5402_v24 = vadd.f32 %v5368_v55, %v17200_v10  ;;  %v17347_v51 = vadd.f32 %v13248_v61, %v5404_v27  ;;  %v5567_v41 = vpop.f32.mrf.mxu1  ;;  %13624 = vmatprep.subr.bf16.mxu1 %v14367_v32  ;;  %13558 = vmatprep.mubr.bf16.mxu0 %v7724_v26  ;;  %v14502_v27 = vld [vmem:[%s18259_s2] ss:$0 sm:$0xff] }
 0x278   : > { %v13221_v28 = vpop.f32.mrf.mxu0  ;;  %13586 = vmatprep.mubr.bf16.mxu1 %v7943_v9 }
 0x279   : > { %v5405_v63 = vadd.f32 %v13221_v28, %v17209_v11  ;;  %v17355_v62 = vadd.f32 %v5567_v41, %v5402_v24  ;;  %13597 = vmatpush3.bf16.msra.mxu0 %v14366_v40  ;;  %v13249_v10 = vpop.f32.mrf.mxu1  ;;  %v14373_v11 = vld [vmem:[%s18258_s1 + $0x9d0] sm:$0xff]   ;;  %v8126_v40 = vsel %vm6435_vm6, %v8117_v43, %v17352_v54  ;;  %v8137_v41 = vshrl.u32 %v17263_v0, 16 }
 0x27a   : > { %13625 = vmatpush3.bf16.msra.mxu1 %v14367_v32  ;;  %v17357_v36 = vpop.f32.mrf.mxu0  ;;  %13598 = vmatprep.subr.bf16.mxu0 %v14369_v4  ;;  %v11527_v32 = vcombine.low %v16993_v52, %v16996_v14  ;;  %v14374_v52 = vld [vmem:[%s18258_s1 + $0x988] sm:$0xff]   ;;  %v18417_v14 = vld [vmem:[#allocation2_spill] sm:$0xff]  ;;  %v18418_v28 = vld [vmem:[#allocation8_spill] sm:$0xff] }
 0x27b   : > { %v17362_v46 = vadd.f32 %v13249_v10, %v5405_v63  ;;  %v17364_v26 = vpop.f32.mrf.mxu1  ;;  %13626 = vmatprep.subr.bf16.mxu1 %v14370_v42  ;;  %v377_v43 = vadd.f32 %v14502_v27, %v18418_v28  ;;  %v8130_v10 = vrot.slane %v8128_v50, 3  ;;  %v8146_v50 = vshrl.u32 %v17284_v49, 16  ;;  %v14379_v28 = vld [vmem:[%s18258_s1 + $0xa38] sm:$0xff]  }
 0x27c   : > { %v13224_v33 = vpop.f32.mrf.mxu0  ;;  %13559 = vmatmul.mubr.bf16.gmra.mxu0 %v7723_v56  ;;  %v18416_v56 = vld [vmem:[#allocation4_spill] sm:$0xff] }
 0x27d   : > { %v5408_v23 = vadd.f32 %v13224_v33, %v17232_v37  ;;  %13599 = vmatpush3.bf16.msra.mxu0 %v14369_v4  ;;  %v13252_v19 = vpop.f32.mrf.mxu1  ;;  %13587 = vmatmul.mubr.bf16.gmra.mxu1 %v7942_v15  ;;  %v373_v61 = vadd.f32 %v14502_v27, %v18416_v56  ;;  %v369_v37 = vadd.f32 %v14502_v27, %v18417_v14  ;;  %v14375_v4 = vld [vmem:[%s18258_s1 + $0x9c8] sm:$0xff]   ;;  %v8133_v33 = vrot.slane %v8131_v30, 4  ;;  %v18421_v14 = vld [vmem:[#allocation9_spill] sm:$0xff] }
 0x27e   : > { %13627 = vmatpush3.bf16.msra.mxu1 %v14370_v42  ;;  %v5384_v9 = vpop.f32.mrf.mxu0  ;;  %13600 = vmatprep.subr.bf16.mxu0 %v14372_v20  ;;  %v8140_v42 = vshll.u32 %v17263_v0, 16  ;;  %v8149_v30 = vshll.u32 %v17284_v49, 16  ;;  %v18423_v49 = vld [vmem:[#allocation13_spill] sm:$0xff] }
 0x27f   : > { %v5406_v15 = vadd.f32 %v5384_v9, %v17241_v5  ;;  %v17385_v55 = vadd.f32 %v13252_v19, %v5408_v23  ;;  %v5583_v16 = vpop.f32.mrf.mxu1  ;;  %13628 = vmatprep.subr.bf16.mxu1 %v14373_v11  ;;  %13606 = vmatprep.mubr.bf16.mxu0 %v8126_v40  ;;  %v17396_v23 = vld [vmem:[%s14577_s10 + $0xf4] sm:$0xf]  ;;  %v18419_v19 = vld [vmem:[#allocation5_spill] sm:$0xff]  ;;  %v14376_v40 = vld [vmem:[%s18258_s1 + $0x980] sm:$0xff]  }
 0x280   : > { %v13225_v24 = vpop.f32.mrf.mxu0  ;;  %13634 = vmatprep.mubr.bf16.mxu1 %v11527_v32  ;;  %v574_v56 = vadd.f32 %v18419_v19, %v373_v61  ;;  %v18420_v32 = vld [vmem:[#allocation3_spill] sm:$0xff]  ;;  %v8139_v61 = vrot.slane %v8137_v41, 3  ;;  %v11502_v9 = vcombine.low %v17287_v47, %v17396_v23  ;;  %v8148_v41 = vrot.slane %v8146_v50, 3  ;;  %v14381_v50 = vld [vmem:[%s18258_s1 + $0xa30] sm:$0xff]  }
 0x281   : > { %v17393_v63 = vadd.f32 %v5583_v16, %v5406_v15  ;;  %13601 = vmatpush3.bf16.msra.mxu0 %v14372_v20  ;;  %v13253_v5 = vpop.f32.mrf.mxu1  ;;  %v570_v0 = vadd.f32 %v18420_v32, %v369_v37  ;;  %v14377_v20 = vld [vmem:[%s18258_s1 + $0x9c0] sm:$0xff]   ;;  %v578_v15 = vadd.f32 %v18421_v14, %v377_v43  ;;  %v8134_v24 = vor.u32 %v8133_v33, %v8130_v10  ;;  %v18424_v43 = vld [vmem:[#allocation12_spill] sm:$0xff] }
 0x282   : > { %13629 = vmatpush3.bf16.msra.mxu1 %v14373_v11  ;;  %13602 = vmatprep.subr.bf16.mxu0 %v14374_v52  ;;  %v826_v27 = vadd.f32 %v15638_v59, %v574_v56  ;;  %v8142_v11 = vrot.slane %v8140_v42, 4  ;;  %v18422_v16 = vld [vmem:[#allocation10_spill] sm:$0xff]  ;;  %v14380_v59 = vld [vmem:[%s18258_s1 + $0xa78] sm:$0xff]   ;;  %v8151_v42 = vrot.slane %v8149_v30, 4  ;;  %v8158_v10 = vshll.u32 %v11502_v9, 16 }
 0x283   : > { %13630 = vmatprep.subr.bf16.mxu1 %v14375_v4  ;;  %v822_v37 = vadd.f32 %v18422_v16, %v570_v0  ;;  %v830_v5 = vadd.f32 %v18423_v49, %v578_v15  ;;  %v8135_v32 = vsel %vm6435_vm6, %v17352_v54, %v8134_v24  ;;  %v18426_v0 = vld [vmem:[#allocation17_spill] sm:$0xff]  ;;  %v17425_v15 = vpop.f32.mrf.mxu0  ;;  %v18427_v30 = vld [vmem:[#allocation14_spill] sm:$0xff]  ;;  %v14382_v54 = vld [vmem:[%s18258_s1 + $0xa70] sm:$0xff]  }
 0x284   : > { %v1077_v19 = vadd.f32 %v18424_v43, %v826_v27  ;;  %v8143_v56 = vor.u32 %v8142_v11, %v8139_v61  ;;  %v18428_v61 = vld [vmem:[#allocation15_spill] sm:$0xff] }
 0x285   : > { %13603 = vmatpush3.bf16.msra.mxu0 %v14374_v52  ;;  %v8155_v52 = vshrl.u32 %v11502_v9, 16  ;;  %v1081_v27 = vadd.f32 %v18427_v30, %v830_v5  ;;  %v17432_v9 = vpop.f32.mrf.mxu1  ;;  %v8160_v5 = vrot.slane %v8158_v10, 4  ;;  %v17445_v30 = vld [vmem:[%s14577_s10 + $0x8c] sm:$0xff]  }
 0x286   : > { %13631 = vmatpush3.bf16.msra.mxu1 %v14375_v4  ;;  %13604 = vmatprep.subr.bf16.mxu0 %v14376_v40  ;;  %v18425_v4 = vld [vmem:[#allocation11_spill] sm:$0xff]  ;;  %v1255_v14 = vadd.f32 %v18426_v0, %v1077_v19  ;;  %v18434_v10 = vld [vmem:[#allocation16_spill] sm:$0xff] }
 0x287   : > { %13632 = vmatprep.subr.bf16.mxu1 %v14377_v20  ;;  %v1073_v33 = vadd.f32 %v18425_v4, %v822_v37  ;;  %v11529_v37 = vcombine.low %v17065_v13, %v17079_v39  ;;  %v8157_v49 = vrot.slane %v8155_v52, 3  ;;  %v18429_v4 = vld [vmem:[#allocation41_spill] sm:$0xff]  ;;  %v14383_v13 = vld [vmem:[%s18258_s1 + $0xa28] sm:$0xff]  }
 0x289   : > { %13605 = vmatpush3.bf16.msra.mxu0 %v14376_v40  ;;  %v1251_v11 = vadd.f32 %v18428_v61, %v1073_v33  ;;  %v8152_v40 = vor.u32 %v8151_v42, %v8148_v41  ;;  %v18430_v33 = vld [vmem:[#allocation42_spill] sm:$0xff] }
 0x28a   : > { %13633 = vmatpush3.bf16.msra.mxu1 %v14377_v20  ;;  %13646 = vmatprep.subr.bf16.mxu0 %v14379_v28  ;;  %v8144_v20 = vsel %vm6435_vm6, %v8134_v24, %v8143_v56  ;;  %v18431_v0 = vcombine.low %v18429_v4, %v18430_v33  ;;  %v18432_v41 = vld [vmem:[#allocation18_spill] sm:$0xff] }
 0x28b   : > { %13674 = vmatprep.subr.bf16.mxu1 %v14380_v59  ;;  %v1432_v42 = vadd.f32 %v18432_v41, %v1255_v14  ;;  %v18435_v14 = vld [vmem:[#allocation23_spill] sm:$0xff]  ;;  %v8153_v4 = vsel %vm6435_vm6, %v8143_v56, %v8152_v40  ;;  %v18436_v41 = vld [vmem:[#allocation20_spill] sm:$0xff] }
 0x28c   : > { %v13272_v16 = vpop.f32.mrf.mxu0  ;;  %13607 = vmatmul.mubr.bf16.vlgmr.msra.gmra.mxu0 %v8135_v32  ;;  %v18433_v32 = vld [vmem:[#allocation19_spill] sm:$0xff] }
 0x28d   : > { %v5798_v43 = vadd.f32 %v13272_v16, %v17313_v21  ;;  %v13300_v19 = vpop.f32.mrf.mxu1  ;;  %13635 = vmatmul.mubr.bf16.vlgmr.msra.gmra.mxu1 %v18431_v0  ;;  %13647 = vmatpush3.bf16.msra.mxu0 %v14379_v28  ;;  %v1259_v61 = vadd.f32 %v18433_v32, %v1081_v27  ;;  %v14384_v28 = vld [vmem:[%s18258_s1 + $0xa68] sm:$0xff]   ;;  %v1632_v27 = vadd.f32 %v18435_v14, %v1432_v42  ;;  %v17469_v0 = vld [vmem:[%s14577_s10 + $0x94] sm:$0xff]   ;;  %v8704_v14 = vshrl.u32 %v17445_v30, 16 }
 0x28e   : > { %13675 = vmatpush3.bf16.msra.mxu1 %v14380_v59  ;;  %v5750_v24 = vpop.f32.mrf.mxu0  ;;  %13648 = vmatprep.subr.bf16.mxu0 %v14381_v50  ;;  %v1428_v59 = vadd.f32 %v18434_v10, %v1251_v11  ;;  %v8706_v11 = vshll.u32 %v17445_v30, 16  ;;  %v18439_v32 = vld [vmem:[#allocation25_spill] sm:$0xff] }
 0x28f   : > { %v17452_v39 = vadd.f32 %v13300_v19, %v5798_v43  ;;  %v5796_v21 = vadd.f32 %v5750_v24, %v17323_v31  ;;  %v5927_v52 = vpop.f32.mrf.mxu1  ;;  %13676 = vmatprep.subr.bf16.mxu1 %v14382_v54  ;;  %13610 = vmatprep.mubr.bf16.mxu0 %v8144_v20  ;;  %v17461_v43 = vor.u32 %v8160_v5, %v8157_v49  ;;  %v14391_v30 = vld [vmem:[%s18258_s1 + $0xa58] sm:$0xff]  }
 0x290   : > { %v13273_v16 = vpop.f32.mrf.mxu0  ;;  %13638 = vmatprep.mubr.bf16.mxu1 %v11529_v37  ;;  %v11530_v20 = vcombine.low %v17082_v44, %v17100_v18  ;;  %v1436_v42 = vadd.f32 %v18436_v41, %v1259_v61  ;;  %v14387_v37 = vld [vmem:[%s18258_s1 + $0xa20] sm:$0xff]   ;;  %v18438_v18 = vld [vmem:[#allocation24_spill] sm:$0xff] }
 0x291   : > { %v17463_v19 = vadd.f32 %v5927_v52, %v5796_v21  ;;  %v5799_v31 = vadd.f32 %v13273_v16, %v17333_v17  ;;  %v13301_v33 = vpop.f32.mrf.mxu1  ;;  %13649 = vmatpush3.bf16.msra.mxu0 %v14381_v50  ;;  %v18437_v17 = vld [vmem:[#allocation21_spill] sm:$0xff]  ;;  %v14388_v44 = vld [vmem:[%s18258_s1 + $0xa60] sm:$0xff]   ;;  %v8162_v21 = vsel %vm6435_vm6, %v8152_v40, %v17461_v43  ;;  %v11531_v52 = vcombine.low %v17103_v6, %v17111_v58 }
 0x292   : > { %13677 = vmatpush3.bf16.msra.mxu1 %v14382_v54  ;;  %v17473_v56 = vpop.f32.mrf.mxu0  ;;  %13650 = vmatprep.subr.bf16.mxu0 %v14383_v13  ;;  %v1628_v49 = vadd.f32 %v18437_v17, %v1428_v59  ;;  %v1833_v54 = vadd.f32 %v18438_v18, %v1632_v27  ;;  %v1636_v61 = vadd.f32 %v18439_v32, %v1436_v42  ;;  %v8708_v16 = vrot.slane %v8706_v11, 1  ;;  %v14390_v40 = vld [vmem:[%s18258_s1 + $0xa18] sm:$0xff]  }
 0x293   : > { %v17479_v50 = vadd.f32 %v13301_v33, %v5799_v31  ;;  %v17481_v5 = vpop.f32.mrf.mxu1  ;;  %13678 = vmatprep.subr.bf16.mxu1 %v14384_v28  ;;  %v8711_v27 = vshll.u32 %v17469_v0, 16  ;;  %v18440_v31 = vld [vmem:[#allocation7_spill] sm:$0xff]  ;;  %v11532_v42 = vcombine.low %v17255_v3, %v17255_v3  ;;  %v14394_v3 = vld [vmem:[%s18258_s1 + $0xa10] sm:$0xff]  }
 0x294   : > { %v13276_v24 = vpop.f32.mrf.mxu0  ;;  %13611 = vmatmul.mubr.bf16.gmra.mxu0 %v8153_v4  ;;  %v2034_v33 = vadd.f32 %v18440_v31, %v1833_v54  ;;  %v8709_v54 = vor.u32 %v8708_v16, %v8704_v14  ;;  %v14395_v14 = vld [vmem:[%s18258_s1 + $0xa50] sm:$0xff]   ;;  %v18446_v16 = vld [vmem:[#allocation33_spill] sm:$0xff] }
 0x295   : > { %v5802_v10 = vadd.f32 %v13276_v24, %v17347_v51  ;;  %13651 = vmatpush3.bf16.msra.mxu0 %v14383_v13  ;;  %v13304_v59 = vpop.f32.mrf.mxu1  ;;  %13639 = vmatmul.mubr.bf16.gmra.mxu1 %v11530_v20  ;;  %v18441_v13 = vld [vmem:[#allocation22_spill] sm:$0xff]  ;;  %v8713_v32 = vrot.slane %v8711_v27, 1 }
 0x296   : > { %13679 = vmatpush3.bf16.msra.mxu1 %v14384_v28  ;;  %v5766_v4 = vpop.f32.mrf.mxu0  ;;  %13652 = vmatprep.subr.bf16.mxu0 %v14387_v37  ;;  %v1829_v20 = vadd.f32 %v18441_v13, %v1628_v49  ;;  %v18442_v28 = vld [vmem:[#allocation26_spill] sm:$0xff] }
 0x297   : > { %v5800_v6 = vadd.f32 %v5766_v4, %v17355_v62  ;;  %v17500_v58 = vadd.f32 %v13304_v59, %v5802_v10  ;;  %v5943_v51 = vpop.f32.mrf.mxu1  ;;  %13680 = vmatprep.subr.bf16.mxu1 %v14388_v44  ;;  %13614 = vmatprep.mubr.bf16.mxu0 %v8162_v21  ;;  %v1837_v11 = vadd.f32 %v18442_v28, %v1636_v61  ;;  %v18443_v24 = vld [vmem:[#allocation6_spill] sm:$0xff]  ;;  %v18444_v10 = vld [vmem:[#allocation28_spill] sm:$0xff]  ;;  %v18445_v61 = vld [vmem:[#allocation29_spill] sm:$0xff] }
 0x298   : > { %v13277_v41 = vpop.f32.mrf.mxu0  ;;  %13642 = vmatprep.mubr.bf16.mxu1 %v11531_v52  ;;  %v2030_v21 = vadd.f32 %v18443_v24, %v1829_v20  ;;  %v2285_v59 = vadd.f32 %v18444_v10, %v2034_v33  ;;  %v18448_v28 = vld [vmem:[#allocation30_spill] sm:$0xff]  ;;  %v18451_v24 = vld [vmem:[#allocation35_spill] sm:$0xff] }
 0x299   : > { %v5803_v62 = vadd.f32 %v13277_v41, %v17362_v46  ;;  %v17510_v17 = vadd.f32 %v5943_v51, %v5800_v6  ;;  %13653 = vmatpush3.bf16.msra.mxu0 %v14387_v37  ;;  %v13305_v18 = vpop.f32.mrf.mxu1  ;;  %v2038_v46 = vadd.f32 %v18445_v61, %v1837_v11  ;;  %v8714_v6 = vsel %vm639_vm0, %v8709_v54, %v8713_v32  ;;  %v18447_v51 = vld [vmem:[#allocation27_spill] sm:$0xff]  ;;  %v18449_v41 = vld [vmem:[#allocation34_spill] sm:$0xff] }
 0x29a   : > { %13681 = vmatpush3.bf16.msra.mxu1 %v14388_v44  ;;  %v17514_v49 = vpop.f32.mrf.mxu0  ;;  %13654 = vmatprep.subr.bf16.mxu0 %v14390_v40  ;;  %v11557_v44 = vcombine.low %v17156_v60, %v17159_v38  ;;  %v2536_v27 = vadd.f32 %v18446_v16, %v2285_v59  ;;  %v2281_v13 = vadd.f32 %v18447_v51, %v2030_v21  ;;  %v14396_v60 = vld [vmem:[%s18258_s1 + $0xa08] sm:$0xff]   ;;  %v14403_v38 = vld [vmem:[%s14577_s10 + $0x9c] sm:$0xff]   ;;  %v8715_v16 = vshrl.u32 %v17469_v0, 16 }
 0x29b   : > { %v17520_v52 = vadd.f32 %v13305_v18, %v5803_v62  ;;  %v17522_v37 = vpop.f32.mrf.mxu1  ;;  %13682 = vmatprep.subr.bf16.mxu1 %v14391_v30  ;;  %v18450_v18 = vld [vmem:[#allocation31_spill] sm:$0xff] }
 0x29c   : > { %v13280_v31 = vpop.f32.mrf.mxu0  ;;  %13615 = vmatmul.mubr.bf16.gmra.mxu0 %v17461_v43  ;;  %v2289_v43 = vadd.f32 %v18448_v28, %v2038_v46  ;;  %v2532_v54 = vadd.f32 %v18450_v18, %v2281_v13  ;;  %v17551_v59 = vld [vmem:[%s14577_s10 + $0xa4] sm:$0xff]   ;;  %v18455_v13 = vld [vmem:[#allocation40_spill] sm:$0xff]  ;;  %v8717_v0 = vor.u32 %v8715_v16, %v8713_v32 }
 0x29d   : > { %v5806_v33 = vadd.f32 %v13280_v31, %v17385_v55  ;;  %13655 = vmatpush3.bf16.msra.mxu0 %v14390_v40  ;;  %v13308_v4 = vpop.f32.mrf.mxu1  ;;  %13643 = vmatmul.mubr.bf16.gmra.mxu1 %v11532_v42  ;;  %v2713_v42 = vadd.f32 %v18449_v41, %v2536_v27  ;;  %v18452_v61 = vld [vmem:[#allocation39_spill] sm:$0xff]  ;;  %v8719_v27 = vshll.u32 %v14403_v38, 16  ;;  %v18453_v31 = vld [vmem:[#allocation32_spill] sm:$0xff]  ;;  %v8727_v51 = vshll.u32 %v17551_v59, 16 }
 0x29e   : > { %13683 = vmatpush3.bf16.msra.mxu1 %v14391_v30  ;;  %v5782_v20 = vpop.f32.mrf.mxu0  ;;  %13656 = vmatprep.subr.bf16.mxu0 %v14394_v3  ;;  %v14397_v30 = vld [vmem:[%s18258_s1 + $0xa48] sm:$0xff]   ;;  %v2540_v21 = vadd.f32 %v18451_v24, %v2289_v43  ;;  %v14404_v43 = vld [vmem:[%s18258_s1 + $0xab8] sm:$0xff]   ;;  %v14406_v18 = vld [vmem:[%s18258_s1 + $0xab0] sm:$0xff]   ;;  %v8731_v16 = vshrl.u32 %v17551_v59, 16 }
 0x29f   : > { %v5804_v55 = vadd.f32 %v5782_v20, %v17393_v63  ;;  %v17540_v40 = vadd.f32 %v13308_v4, %v5806_v33  ;;  %v5959_v11 = vpop.f32.mrf.mxu1  ;;  %13684 = vmatprep.subr.bf16.mxu1 %v14395_v14  ;;  %13662 = vmatprep.mubr.bf16.mxu0 %v11557_v44  ;;  %v2890_v46 = vadd.f32 %v18452_v61, %v2713_v42  ;;  %v14398_v44 = vld [vmem:[%s18258_s1 + $0xa00] sm:$0xff]   ;;  %v18454_v4 = vld [vmem:[#allocation36_spill] sm:$0xff]  ;;  %v8721_v28 = vrot.slane %v8719_v27, 1  ;;  %v18457_v42 = vld [vmem:[#allocation43_spill] sm:$0xff] }
 0x2a0   : > { %v13281_v62 = vpop.f32.mrf.mxu0  ;;  %13690 = vmatprep.mubr.bf16.mxu1 %v8714_v6  ;;  %v2709_v33 = vadd.f32 %v18453_v31, %v2532_v54  ;;  %v2717_v6 = vadd.f32 %v18454_v4, %v2540_v21  ;;  %v17576_v32 = vld [vmem:[%s14577_s10 + $0xb4] sm:$0x1f]   ;;  %v8729_v24 = vrot.slane %v8727_v51, 1  ;;  %v8895_v21 = vld [vmem:[%s14577_s10 + $0x10] sm:$0xf] }
 0x2a1   : > { %v17548_v10 = vadd.f32 %v5959_v11, %v5804_v55  ;;  %13657 = vmatpush3.bf16.msra.mxu0 %v14394_v3  ;;  %v13309_v63 = vpop.f32.mrf.mxu1  ;;  %v14399_v3 = vld [vmem:[%s18258_s1 + $0xa40] sm:$0xff]   ;;  %v3089_v20 = vadd.f32 %v18455_v13, %v2890_v46  ;;  %v14413_v55 = vld [vmem:[%s14577_s10 + $0xac] sm:$0xff]   ;;  %v18456_v11 = vld [vmem:[#allocation37_spill] sm:$0xff]  ;;  %v8722_v46 = vsel %vm639_vm0, %v8717_v0, %v8721_v28  ;;  %v11559_v13 = vcombine.low %v17222_v29, %v17244_v7 }
 0x2a2   : > { %13685 = vmatpush3.bf16.msra.mxu1 %v14395_v14  ;;  %13658 = vmatprep.subr.bf16.mxu0 %v14396_v60  ;;  %v8723_v14 = vshrl.u32 %v14403_v38, 16  ;;  %v2886_v41 = vadd.f32 %v18456_v11, %v2709_v33  ;;  %v14405_v38 = vld [vmem:[%s18258_s1 + $0xaf8] sm:$0xff]   ;;  %v17583_v63 = vld [vmem:[%s14577_s10 + $0x14] sm:$0xf]  ;;  %v17585_v61 = vpop.f32.mrf.mxu0  ;;  %v8735_v27 = vshll.u32 %v14413_v55, 16  ;;  %v18459_v33 = vld [vmem:[#allocation38_spill] sm:$0xff] }
 0x2a3   : > { %13686 = vmatprep.subr.bf16.mxu1 %v14397_v30  ;;  %v9146_v31 = vld [vmem:[%s14577_s10 + $0x50] sm:$0xf]  ;;  %v17595_v51 = vpop.f32.mrf.mxu1  ;;  %v18463_v11 = vld [vmem:[#allocation50_spill] sm:$0xff] }
 0x2a4   : > { %v8725_v54 = vor.u32 %v8723_v14, %v8721_v28  ;;  %v3085_v4 = vadd.f32 %v18459_v33, %v2886_v41  ;;  %v18462_v28 = vld [vmem:[#allocation49_spill] sm:$0xff]  ;;  %v8739_v41 = vshrl.u32 %v14413_v55, 16 }
 0x2a5   : > { %13659 = vmatpush3.bf16.msra.mxu0 %v14396_v60  ;;  %v2894_v60 = vadd.f32 %v18457_v42, %v2717_v6  ;;  %v18460_v6 = vld [vmem:[#allocation44_spill] sm:$0xff]  ;;  %v18464_v42 = vcombine.low %v18462_v28, %v18463_v11  ;;  %v18466_v28 = vld [vmem:[#allocation51_spill] sm:$0xff] }
 0x2a6   : > { %13687 = vmatpush3.bf16.msra.mxu1 %v14397_v30  ;;  %13660 = vmatprep.subr.bf16.mxu0 %v14398_v44  ;;  %v18458_v30 = vld [vmem:[#allocation47_spill] sm:$0xff]  ;;  %v8730_v29 = vsel %vm639_vm0, %v8725_v54, %v8729_v24 }
 0x2a7   : > { %13688 = vmatprep.subr.bf16.mxu1 %v14399_v3  ;;  %v3346_v62 = vadd.f32 %v18458_v30, %v3089_v20  ;;  %v3093_v14 = vadd.f32 %v18460_v6, %v2894_v60  ;;  %v18461_v20 = vld [vmem:[#allocation48_spill] sm:$0xff]  ;;  %v8743_v60 = vshll.u32 %v17576_v32, 16  ;;  %v17608_v30 = vcombine.low %v8895_v21, %v17583_v63 }
 0x2a8   : > { %v8733_v21 = vor.u32 %v8731_v16, %v8729_v24 }
 0x2a9   : > { %13661 = vmatpush3.bf16.msra.mxu0 %v14398_v44  ;;  %v17591_v44 = vld [vmem:[%s14577_s10 + $0x54] sm:$0xf]  ;;  %v3603_v59 = vadd.f32 %v18461_v20, %v3346_v62  ;;  %v18465_v62 = vld [vmem:[#allocation45_spill] sm:$0xff]  ;;  %v3350_v11 = vadd.f32 %v18466_v28, %v3093_v14  ;;  %v8745_v16 = vrot.slane %v8743_v60, 1 }
 0x2aa   : > { %13689 = vmatpush3.bf16.msra.mxu1 %v14399_v3  ;;  %13702 = vmatprep.subr.bf16.mxu0 %v14404_v43  ;;  %v14407_v3 = vld [vmem:[%s18258_s1 + $0xaf0] sm:$0xff]   ;;  %v17613_v7 = vcombine.low %v9146_v31, %v17591_v44  ;;  %v3342_v20 = vadd.f32 %v18465_v62, %v3085_v4 }
 0x2ab   : > { %13730 = vmatprep.subr.bf16.mxu1 %v14405_v38 }
 0x2ac   : > { %v13328_v0 = vpop.f32.mrf.mxu0  ;;  %13663 = vmatmul.mubr.bf16.vlgmr.msra.gmra.mxu0 %v18464_v42  ;;  %v17637_v42 = vld [vmem:[%s14577_s10 + $0x58] sm:$0xff]  }
 0x2ad   : > { %v6190_v33 = vadd.f32 %v13328_v0, %v17452_v39  ;;  %v13356_v6 = vpop.f32.mrf.mxu1  ;;  %13691 = vmatmul.mubr.bf16.vlgmr.msra.gmra.mxu1 %v8722_v46  ;;  %13703 = vmatpush3.bf16.msra.mxu0 %v14404_v43  ;;  %v14410_v39 = vld [vmem:[%s18258_s1 + $0xaa8] sm:$0xff]   ;;  %v8737_v46 = vrot.slane %v8735_v27, 1  ;;  %v3781_v43 = vadd.f32 %v16787_v2, %v3603_v59  ;;  %v11560_v0 = vcombine.low %v17247_v12, %v17266_v1  ;;  %v17630_v2 = vld [vmem:[%s14577_s10 + $0x18] sm:$0xff]   ;;  %v18468_v12 = vld [vmem:[#allocation52_spill] sm:$0xff] }
 0x2ae   : > { %13731 = vmatpush3.bf16.msra.mxu1 %v14405_v38  ;;  %v6142_v55 = vpop.f32.mrf.mxu0  ;;  %13704 = vmatprep.subr.bf16.mxu0 %v14406_v18  ;;  %v14411_v38 = vld [vmem:[%s18258_s1 + $0xae8] sm:$0xff]   ;;  %v8957_v27 = vshll.u32 %v17608_v30, 16  ;;  %v3607_v1 = vadd.f32 %v18468_v12, %v3350_v11  ;;  %v8747_v11 = vshrl.u32 %v17576_v32, 16 }
 0x2af   : > { %v17621_v54 = vadd.f32 %v13356_v6, %v6190_v33  ;;  %v6188_v31 = vadd.f32 %v6142_v55, %v17463_v19  ;;  %v6357_v4 = vpop.f32.mrf.mxu1  ;;  %13732 = vmatprep.subr.bf16.mxu1 %v14407_v3  ;;  %13666 = vmatprep.mubr.bf16.mxu0 %v11559_v13  ;;  %v8741_v24 = vor.u32 %v8739_v41, %v8737_v46  ;;  %v9208_v33 = vshll.u32 %v17613_v7, 16  ;;  %v18467_v6 = vld [vmem:[#allocation46_spill] sm:$0xff] }
 0x2b0   : > { %v13329_v14 = vpop.f32.mrf.mxu0  ;;  %13694 = vmatprep.mubr.bf16.mxu1 %v8730_v29  ;;  %v3599_v62 = vadd.f32 %v18467_v6, %v3342_v20  ;;  %v8738_v60 = vsel %vm639_vm0, %v8733_v21, %v8737_v46  ;;  %v11561_v20 = vcombine.low %v17269_v53, %v17287_v47  ;;  %v8959_v46 = vrot.slane %v8957_v27, 1  ;;  %v18469_v47 = vld [vmem:[#allocation53_spill] sm:$0xff] }
 0x2b1   : > { %v17633_v19 = vadd.f32 %v6357_v4, %v6188_v31  ;;  %v6191_v59 = vadd.f32 %v13329_v14, %v17479_v50  ;;  %v13357_v13 = vpop.f32.mrf.mxu1  ;;  %13705 = vmatpush3.bf16.msra.mxu0 %v14406_v18  ;;  %v14414_v50 = vld [vmem:[%s18258_s1 + $0xaa0] sm:$0xff]   ;;  %v3958_v18 = vadd.f32 %v16793_v8, %v3781_v43  ;;  %v8746_v21 = vsel %vm639_vm0, %v8741_v24, %v8745_v16 }
 0x2b2   : > { %13733 = vmatpush3.bf16.msra.mxu1 %v14407_v3  ;;  %v17642_v41 = vpop.f32.mrf.mxu0  ;;  %13706 = vmatprep.subr.bf16.mxu0 %v14410_v39  ;;  %v14415_v3 = vld [vmem:[%s18258_s1 + $0xae0] sm:$0xff]   ;;  %v8955_v8 = vshrl.u32 %v17608_v30, 16  ;;  %v18294_v43 = vshll.u32 %v17630_v2, 16  ;;  %v9206_v14 = vshrl.u32 %v17613_v7, 16  ;;  %v18290_v53 = vshll.u32 %v17637_v42, 16  ;;  %v14418_v30 = vld [vmem:[%s18258_s1 + $0xa98] sm:$0xff]  }
 0x2b3   : > { %v17649_v29 = vadd.f32 %v13357_v13, %v6191_v59  ;;  %v17651_v28 = vpop.f32.mrf.mxu1  ;;  %13734 = vmatprep.subr.bf16.mxu1 %v14411_v38  ;;  %v9210_v59 = vrot.slane %v9208_v33, 1  ;;  %v3777_v32 = vadd.f32 %v18469_v47, %v3599_v62  ;;  %v11562_v13 = vcombine.low %v17396_v23, %v17396_v23 }
 0x2b4   : > { %v13332_v55 = vpop.f32.mrf.mxu0  ;;  %13667 = vmatmul.mubr.bf16.gmra.mxu0 %v11560_v0  ;;  %v3785_v0 = vadd.f32 %v16848_v48, %v3607_v1  ;;  %v14419_v48 = vld [vmem:[%s18258_s1 + $0xad8] sm:$0xff]   ;;  %v8749_v33 = vor.u32 %v8747_v11, %v8745_v16  ;;  %v8960_v6 = vor.u32 %v8959_v46, %v8955_v8  ;;  %v14422_v11 = vld [vmem:[%s18258_s1 + $0xad0] sm:$0xff]  }
 0x2b5   : > { %v6194_v31 = vadd.f32 %v13332_v55, %v17500_v58  ;;  %13707 = vmatpush3.bf16.msra.mxu0 %v14410_v39  ;;  %v13360_v4 = vpop.f32.mrf.mxu1  ;;  %13695 = vmatmul.mubr.bf16.gmra.mxu1 %v8738_v60  ;;  %v4158_v58 = vadd.f32 %v16901_v57, %v3958_v18  ;;  %v17681_v57 = vrot.slane %v18294_v43, 1  ;;  %v9211_v1 = vor.u32 %v9210_v59, %v9206_v14  ;;  %v18471_v46 = vld [vmem:[#allocation60_spill] sm:$0xff] }
 0x2b6   : > { %13735 = vmatpush3.bf16.msra.mxu1 %v14411_v38  ;;  %v6158_v24 = vpop.f32.mrf.mxu0  ;;  %13708 = vmatprep.subr.bf16.mxu0 %v14414_v50  ;;  %v17688_v60 = vrot.slane %v18290_v53, 1  ;;  %v3962_v23 = vadd.f32 %v16852_v22, %v3785_v0  ;;  %v18470_v22 = vld [vmem:[#allocation54_spill] sm:$0xff]  ;;  %v14423_v0 = vld [vmem:[%s18258_s1 + $0xa88] sm:$0xff]  }
 0x2b7   : > { %v6192_v39 = vadd.f32 %v6158_v24, %v17510_v17  ;;  %v17672_v27 = vadd.f32 %v13360_v4, %v6194_v31  ;;  %v6373_v7 = vpop.f32.mrf.mxu1  ;;  %13736 = vmatprep.subr.bf16.mxu1 %v14415_v3  ;;  %13670 = vmatprep.mubr.bf16.mxu0 %v11561_v20  ;;  %v4357_v18 = vadd.f32 %v16908_v25, %v4158_v58  ;;  %v17709_v25 = vld [vmem:[%s14577_s10 + $0x20] sm:$0xff]  }
 0x2b8   : > { %v13333_v38 = vpop.f32.mrf.mxu0  ;;  %13698 = vmatprep.mubr.bf16.mxu1 %v8746_v21  ;;  %v4162_v55 = vadd.f32 %v16942_v35, %v3962_v23  ;;  %v8965_v8 = vsel %vm639_vm0, %v8960_v6, %v17681_v57  ;;  %v9216_v59 = vsel %vm639_vm0, %v9211_v1, %v17688_v60  ;;  %v18472_v35 = vld [vmem:[#allocation55_spill] sm:$0xff]  ;;  %v17720_v24 = vld [vmem:[%s14577_s10 + $0x60] sm:$0xff]  }
 0x2b9   : > { %v6195_v17 = vadd.f32 %v13333_v38, %v17520_v52  ;;  %v17684_v62 = vadd.f32 %v6373_v7, %v6192_v39  ;;  %13709 = vmatpush3.bf16.msra.mxu0 %v14414_v50  ;;  %v13361_v12 = vpop.f32.mrf.mxu1  ;;  %v14421_v52 = vld [vmem:[%s18258_s1 + $0xa90] sm:$0xff]   ;;  %v4535_v31 = vadd.f32 %v18471_v46, %v4357_v18  ;;  %v14424_v39 = vld [vmem:[%s18258_s1 + $0xac8] sm:$0xff]   ;;  %v18297_v38 = vshrl.u32 %v17630_v2, 16  ;;  %v18477_v46 = vld [vmem:[#allocation66_spill] sm:$0xff] }
 0x2ba   : > { %13737 = vmatpush3.bf16.msra.mxu1 %v14415_v3  ;;  %v17691_v16 = vpop.f32.mrf.mxu0  ;;  %13710 = vmatprep.subr.bf16.mxu0 %v14418_v30  ;;  %v3954_v3 = vadd.f32 %v18470_v22, %v3777_v32  ;;  %v17729_v7 = vld [vmem:[%s14577_s10 + $0x28] sm:$0xff]   ;;  %v18475_v18 = vld [vmem:[#allocation56_spill] sm:$0xff] }
 0x2bb   : > { %v17697_v50 = vadd.f32 %v13361_v12, %v6195_v17  ;;  %v17699_v20 = vpop.f32.mrf.mxu1  ;;  %13738 = vmatprep.subr.bf16.mxu1 %v14419_v48  ;;  %v18474_v17 = vld [vmem:[#allocation61_spill] sm:$0xff] }
 0x2bc   : > { %v13336_v21 = vpop.f32.mrf.mxu0  ;;  %13671 = vmatmul.mubr.bf16.gmra.mxu0 %v11562_v13  ;;  %v4154_v47 = vadd.f32 %v18472_v35, %v3954_v3  ;;  %v18289_v13 = vshll.u32 %v17709_v25, 16  ;;  %v4792_v12 = vadd.f32 %v18474_v17, %v4535_v31  ;;  %v14425_v3 = vld [vmem:[%s18258_s1 + $0xa80] sm:$0xff]  }
 0x2bd   : > { %v6198_v4 = vadd.f32 %v13336_v21, %v17540_v40  ;;  %13711 = vmatpush3.bf16.msra.mxu0 %v14418_v30  ;;  %v13364_v14 = vpop.f32.mrf.mxu1  ;;  %13699 = vmatmul.mubr.bf16.gmra.mxu1 %v8749_v33  ;;  %v17734_v33 = vld [vmem:[%s14577_s10 + $0x68] sm:$0xff]   ;;  %v18291_v21 = vshrl.u32 %v17637_v42, 16  ;;  %v18481_v17 = vld [vmem:[#allocation58_spill] sm:$0xff] }
 0x2be   : > { %13739 = vmatpush3.bf16.msra.mxu1 %v14419_v48  ;;  %v6174_v32 = vpop.f32.mrf.mxu0  ;;  %13712 = vmatprep.subr.bf16.mxu0 %v14421_v52  ;;  %v4353_v22 = vadd.f32 %v18475_v18, %v4154_v47  ;;  %v5049_v31 = vadd.f32 %v18477_v46, %v4792_v12  ;;  %v8972_v35 = vrot.slane %v18289_v13, 1  ;;  %v17759_v47 = vld [vmem:[%s14577_s10 + $0x30] sm:$0xff]   ;;  %v14433_v18 = vld [vmem:[%s18258_s1 + $0xb38] sm:$0xff]  }
 0x2bf   : > { %v6196_v40 = vadd.f32 %v6174_v32, %v17548_v10  ;;  %v17723_v30 = vadd.f32 %v13364_v14, %v6198_v4  ;;  %v6389_v58 = vpop.f32.mrf.mxu1  ;;  %13740 = vmatprep.subr.bf16.mxu1 %v14422_v11  ;;  %13718 = vmatprep.mubr.bf16.mxu0 %v8965_v8  ;;  %v18473_v10 = vld [vmem:[#allocation57_spill] sm:$0xff]  ;;  %v18476_v8 = vld [vmem:[#allocation62_spill] sm:$0xff]  ;;  %v18292_v4 = vshrl.u32 %v17709_v25, 16  ;;  %v18293_v14 = vshll.u32 %v17729_v7, 16  ;;  %18478 = vst [vmem:[#allocation4_spill] sm:$0xff] %v17759_v47 }
 0x2c0   : > { %v13337_v48 = vpop.f32.mrf.mxu0  ;;  %13746 = vmatprep.mubr.bf16.mxu1 %v9216_v59  ;;  %v4361_v6 = vadd.f32 %v18473_v10, %v4162_v55  ;;  %v18288_v55 = vshll.u32 %v17720_v24, 16  ;;  %v8968_v59 = vor.u32 %v18297_v38, %v17681_v57  ;;  %v18296_v32 = vshrl.u32 %v17720_v24, 16  ;;  %v17768_v10 = vld [vmem:[%s14577_s10 + $0x78] sm:$0xf] }
 0x2c1   : > { %v17738_v1 = vadd.f32 %v6389_v58, %v6196_v40  ;;  %13713 = vmatpush3.bf16.msra.mxu0 %v14421_v52  ;;  %v13365_v23 = vpop.f32.mrf.mxu1  ;;  %v18295_v40 = vshll.u32 %v17734_v33, 16  ;;  %v17764_v58 = vld [vmem:[%s14577_s10 + $0x38] sm:$0xf]  ;;  %v8906_v48 = vld [vmem:[%s14577_s10 + $0x3c] sm:$0x1]  ;;  %18480 = vst [vmem:[#allocation8_spill] sm:$0xff] %v17768_v10  ;;  %v4531_v12 = vadd.f32 %v18481_v17, %v4353_v22  ;;  %v9219_v57 = vor.u32 %v18291_v21, %v17688_v60 }
 0x2c2   : > { %13741 = vmatpush3.bf16.msra.mxu1 %v14422_v11  ;;  %13714 = vmatprep.subr.bf16.mxu0 %v14423_v0  ;;  %v4539_v52 = vadd.f32 %v18476_v8, %v4361_v6  ;;  %v14426_v11 = vld [vmem:[%s18258_s1 + $0xac0] sm:$0xff]   ;;  %18479 = vst [vmem:[#allocation2_spill] sm:$0xff] %v17764_v58  ;;  %v9157_v6 = vld [vmem:[%s14577_s10 + $0x7c] sm:$0x1]  ;;  %v9223_v23 = vrot.slane %v18288_v55, 1  ;;  %v18482_v8 = vld [vmem:[#allocation67_spill] sm:$0xff]  ;;  %v8976_v22 = vor.u32 %v18292_v4, %v8972_v35 }
 0x2c3   : > { %13742 = vmatprep.subr.bf16.mxu1 %v14424_v39  ;;  %v5226_v46 = vadd.f32 %v18482_v8, %v5049_v31  ;;  %v8980_v60 = vrot.slane %v18293_v14, 1  ;;  %v18298_v17 = vshrl.u32 %v17729_v7, 16  ;;  %v18483_v55 = vld [vmem:[#allocation63_spill] sm:$0xff]  ;;  %v8973_v53 = vsel %vm639_vm0, %v8968_v59, %v8972_v35  ;;  %v17807_v59 = vpop.f32.mrf.mxu0 }
 0x2c4   : > { %v4796_v13 = vadd.f32 %v18483_v55, %v4539_v52  ;;  %v17795_v21 = vcombine.low %v17764_v58, %v8906_v48  ;;  %v17798_v31 = vcombine.low %v17768_v10, %v9157_v6  ;;  %v18300_v4 = vshll.u32 %v17759_v47, 16  ;;  %v18484_v55 = vld [vmem:[#allocation68_spill] sm:$0xff]  ;;  %v17815_v6 = vpop.f32.mrf.mxu1 }
 0x2c5   : > { %13715 = vmatpush3.bf16.msra.mxu0 %v14423_v0  ;;  %v17781_v0 = vld [vmem:[%s14577_s10 + $0x70] sm:$0xff]   ;;  %v5403_v8 = vadd.f32 %v17357_v36, %v5226_v46  ;;  %v9227_v14 = vor.u32 %v18296_v32, %v9223_v23  ;;  %v9231_v43 = vrot.slane %v18295_v40, 1  ;;  %v9224_v35 = vsel %vm639_vm0, %v9219_v57, %v9223_v23  ;;  %v18486_v46 = vld [vmem:[#allocation69_spill] sm:$0xff] }
 0x2c6   : > { %13743 = vmatpush3.bf16.msra.mxu1 %v14424_v39  ;;  %13716 = vmatprep.subr.bf16.mxu0 %v14425_v3  ;;  %v14434_v39 = vld [vmem:[%s18258_s1 + $0xb78] sm:$0xff]   ;;  %v5053_v52 = vadd.f32 %v18484_v55, %v4796_v13  ;;  %v14435_v36 = vld [vmem:[%s18258_s1 + $0xb30] sm:$0xff]   ;;  %v8984_v57 = vor.u32 %v18298_v17, %v8980_v60  ;;  %v8994_v55 = vshll.u32 %v17795_v21, 16  ;;  %v9245_v32 = vshll.u32 %v17798_v31, 16 }
 0x2c7   : > { %13744 = vmatprep.subr.bf16.mxu1 %v14426_v11  ;;  %v14436_v13 = vld [vmem:[%s18258_s1 + $0xb70] sm:$0xff]   ;;  %v5602_v38 = vadd.f32 %v17364_v26, %v5403_v8  ;;  %v14439_v26 = vld [vmem:[%s18258_s1 + $0xb28] sm:$0xff]  }
 0x2c8   : > { %v5230_v10 = vadd.f32 %v18486_v46, %v5053_v52  ;;  %v18491_v58 = vld [vmem:[#allocation64_spill] sm:$0xff] }
 0x2c9   : > { %13717 = vmatpush3.bf16.msra.mxu0 %v14425_v3 }
 0x2ca   : > { %13745 = vmatpush3.bf16.msra.mxu1 %v14426_v11  ;;  %13758 = vmatprep.subr.bf16.mxu0 %v14433_v18  ;;  %v8981_v11 = vsel %vm639_vm0, %v8976_v22, %v8980_v60  ;;  %v8988_v22 = vrot.slane %v18300_v4, 1  ;;  %v18485_v60 = vld [vmem:[#allocation59_spill] sm:$0xff]  ;;  %v9397_v4 = vld [vmem:[%s14577_s10 + $0x10] sm:$0xe] }
 0x2cb   : > { %13786 = vmatprep.subr.bf16.mxu1 %v14434_v39  ;;  %v4788_v17 = vadd.f32 %v18485_v60, %v4531_v12 }
 0x2cc   : > { %v13384_v23 = vpop.f32.mrf.mxu0  ;;  %13719 = vmatmul.mubr.bf16.vlgmr.msra.gmra.mxu0 %v8973_v53  ;;  %v9232_v53 = vsel %vm639_vm0, %v9227_v14, %v9231_v43 }
 0x2cd   : > { %v6625_v48 = vadd.f32 %v13384_v23, %v17621_v54  ;;  %v13412_v3 = vpop.f32.mrf.mxu1  ;;  %13747 = vmatmul.mubr.bf16.vlgmr.msra.gmra.mxu1 %v9224_v35  ;;  %13759 = vmatpush3.bf16.msra.mxu0 %v14433_v18  ;;  %v18487_v54 = vshrl.u32 %v17734_v33, 16  ;;  %v18488_v18 = vshll.u32 %v17781_v0, 16  ;;  %v5801_v23 = vadd.f32 %v17514_v49, %v5602_v38 }
 0x2ce   : > { %13787 = vmatpush3.bf16.msra.mxu1 %v14434_v39  ;;  %v6577_v40 = vpop.f32.mrf.mxu0  ;;  %13760 = vmatprep.subr.bf16.mxu0 %v14435_v36  ;;  %v14440_v39 = vld [vmem:[%s18258_s1 + $0xb68] sm:$0xff]   ;;  %v18490_v49 = vshrl.u32 %v17781_v0, 16 }
 0x2cf   : > { %v9235_v8 = vor.u32 %v18487_v54, %v9231_v43  ;;  %v9239_v35 = vrot.slane %v18488_v18, 1  ;;  %v17842_v14 = vadd.f32 %v13412_v3, %v6625_v48  ;;  %v6623_v12 = vadd.f32 %v6577_v40, %v17633_v19  ;;  %v6796_v52 = vpop.f32.mrf.mxu1  ;;  %13788 = vmatprep.subr.bf16.mxu1 %v14436_v13  ;;  %13722 = vmatprep.mubr.bf16.mxu0 %v8981_v11 }
 0x2d0   : > { %v13385_v46 = vpop.f32.mrf.mxu0  ;;  %13750 = vmatprep.mubr.bf16.mxu1 %v9232_v53  ;;  %v18489_v43 = vshrl.u32 %v17759_v47, 16  ;;  %v8996_v54 = vrot.slane %v8994_v55, 1  ;;  %v9247_v3 = vrot.slane %v9245_v32, 1  ;;  %v5407_v19 = vadd.f32 %v17425_v15, %v5230_v10  ;;  %v9574_v53 = vld [vmem:[%s14577_s10 + $0x50] sm:$0xe]  ;;  %v14443_v15 = vld [vmem:[%s18258_s1 + $0xb20] sm:$0xff]  }
 0x2d1   : > { %v9243_v38 = vor.u32 %v18490_v49, %v9239_v35  ;;  %v17853_v40 = vadd.f32 %v6796_v52, %v6623_v12  ;;  %v6626_v48 = vadd.f32 %v13385_v46, %v17649_v29  ;;  %v13413_v11 = vpop.f32.mrf.mxu1  ;;  %13761 = vmatpush3.bf16.msra.mxu0 %v14435_v36  ;;  %v8989_v18 = vsel %vm639_vm0, %v8984_v57, %v8988_v22 }
 0x2d2   : > { %v8992_v60 = vor.u32 %v18489_v43, %v8988_v22  ;;  %v5045_v47 = vadd.f32 %v18491_v58, %v4788_v17  ;;  %13789 = vmatpush3.bf16.msra.mxu1 %v14436_v13  ;;  %v17860_v55 = vpop.f32.mrf.mxu0  ;;  %13762 = vmatprep.subr.bf16.mxu0 %v14439_v26  ;;  %v9240_v32 = vsel %vm639_vm0, %v9235_v8, %v9239_v35  ;;  %v8998_v29 = vshrl.u32 %v17795_v21, 16  ;;  %v14444_v58 = vld [vmem:[%s18258_s1 + $0xb60] sm:$0xff]   ;;  %v18492_v43 = vld [vmem:[#allocation65_spill] sm:$0xff] }
 0x2d3   : > { %v5978_v10 = vadd.f32 %v17522_v37, %v5801_v23  ;;  %v17868_v36 = vadd.f32 %v13413_v11, %v6626_v48  ;;  %v17870_v57 = vpop.f32.mrf.mxu1  ;;  %13790 = vmatprep.subr.bf16.mxu1 %v14440_v39  ;;  %v9248_v22 = vsel %vm639_vm0, %v9243_v38, %v9247_v3  ;;  %v17878_v8 = vcombine.low %v9397_v4, %v17583_v63 }
 0x2d4   : > { %v13388_v17 = vpop.f32.mrf.mxu0  ;;  %13723 = vmatmul.mubr.bf16.gmra.mxu0 %v8989_v18  ;;  %v8997_v13 = vsel %vm639_vm0, %v8992_v60, %v8996_v54  ;;  %v17881_v37 = vcombine.low %v9574_v53, %v17591_v44  ;;  %v5606_v35 = vadd.f32 %v17432_v9, %v5407_v19  ;;  %v9249_v46 = vshrl.u32 %v17798_v31, 16  ;;  %v14446_v44 = vld [vmem:[%s18258_s1 + $0xb18] sm:$0xff]  }
 0x2d5   : > { %v6193_v23 = vadd.f32 %v17691_v16, %v5978_v10  ;;  %v6629_v12 = vadd.f32 %v13388_v17, %v17672_v27  ;;  %13763 = vmatpush3.bf16.msra.mxu0 %v14439_v26  ;;  %v13416_v52 = vpop.f32.mrf.mxu1  ;;  %13751 = vmatmul.mubr.bf16.gmra.mxu1 %v9240_v32  ;;  %v5222_v60 = vadd.f32 %v18492_v43, %v5045_v47  ;;  %v14447_v47 = vld [vmem:[%s18258_s1 + $0xb58] sm:$0xff]   ;;  %v14449_v32 = vld [vmem:[%s18258_s1 + $0xb10] sm:$0xff]  }
 0x2d6   : > { %13791 = vmatpush3.bf16.msra.mxu1 %v14440_v39  ;;  %v6593_v49 = vpop.f32.mrf.mxu0  ;;  %13764 = vmatprep.subr.bf16.mxu0 %v14443_v15  ;;  %v9000_v63 = vor.u32 %v8998_v29, %v8996_v54  ;;  %v5805_v9 = vadd.f32 %v17585_v61, %v5606_v35  ;;  %v9418_v39 = vrot.slane %v17878_v8, 1  ;;  %v9419_v54 = vrot.slane %v17630_v2, 1 }
 0x2d7   : > { %v6627_v16 = vadd.f32 %v6593_v49, %v17684_v62  ;;  %v17893_v27 = vadd.f32 %v13416_v52, %v6629_v12  ;;  %v6812_v4 = vpop.f32.mrf.mxu1  ;;  %13792 = vmatprep.subr.bf16.mxu1 %v14444_v58  ;;  %13726 = vmatprep.mubr.bf16.mxu0 %v8997_v13  ;;  %v9595_v38 = vrot.slane %v17881_v37, 1  ;;  %v9596_v61 = vrot.slane %v17637_v42, 1  ;;  %v14451_v12 = vld [vmem:[%s18258_s1 + $0xb08] sm:$0xff]  }
 0x2d8   : > { %v13389_v26 = vpop.f32.mrf.mxu0  ;;  %13754 = vmatprep.mubr.bf16.mxu1 %v9248_v22  ;;  %v6408_v62 = vadd.f32 %v17699_v20, %v6193_v23  ;;  %v9251_v18 = vor.u32 %v9249_v46, %v9247_v3  ;;  %v5399_v29 = vadd.f32 %v17327_v45, %v5222_v60  ;;  %v5982_v10 = vadd.f32 %v17595_v51, %v5805_v9  ;;  %v14450_v3 = vld [vmem:[%s18258_s1 + $0xb50] sm:$0xff]   ;;  %v14453_v9 = vld [vmem:[%s18258_s1 + $0xb00] sm:$0xff]  }
 0x2d9   : > { %v6630_v19 = vadd.f32 %v13389_v26, %v17697_v50  ;;  %v17904_v48 = vadd.f32 %v6812_v4, %v6627_v16  ;;  %13765 = vmatpush3.bf16.msra.mxu0 %v14443_v15  ;;  %v13417_v11 = vpop.f32.mrf.mxu1  ;;  %v9597_v45 = vsel %vm1104_vm1, %v9595_v38, %v9596_v61  ;;  %v9421_v26 = vrot.slane %v17709_v25, 1  ;;  %v14457_v38 = vld [vmem:[%s18258_s1 + $0xbb8] sm:$0xff]  }
 0x2da   : > { %13793 = vmatpush3.bf16.msra.mxu1 %v14444_v58  ;;  %v6596_v53 = vpop.f32.mrf.mxu0  ;;  %13766 = vmatprep.subr.bf16.mxu0 %v14446_v44  ;;  %v9420_v58 = vsel %vm1104_vm1, %v9418_v39, %v9419_v54  ;;  %v6197_v51 = vadd.f32 %v17807_v59, %v5982_v10  ;;  %v5598_v52 = vadd.f32 %v17335_v34, %v5399_v29  ;;  %v9598_v39 = vrot.slane %v17720_v24, 1  ;;  %v14460_v29 = vld [vmem:[%s18258_s1 + $0xbf0] sm:$0xff]  }
 0x2db   : > { %v6628_v17 = vadd.f32 %v6596_v53, %v6408_v62  ;;  %v17911_v20 = vadd.f32 %v13417_v11, %v6630_v19  ;;  %v6815_v50 = vpop.f32.mrf.mxu1  ;;  %13794 = vmatprep.subr.bf16.mxu1 %v14447_v47  ;;  %v9423_v19 = vrot.slane %v17729_v7, 1  ;;  %v9422_v11 = vsel %vm1104_vm1, %v9419_v54, %v9421_v26 }
 0x2dc   : > { %v13392_v15 = vpop.f32.mrf.mxu0  ;;  %13727 = vmatmul.mubr.bf16.gmra.mxu0 %v9000_v63  ;;  %v5797_v49 = vadd.f32 %v17473_v56, %v5598_v52  ;;  %v6412_v63 = vadd.f32 %v17815_v6, %v6197_v51  ;;  %v14454_v56 = vld [vmem:[%s18258_s1 + $0xb40] sm:$0xff]   ;;  %v9599_v53 = vsel %vm1104_vm1, %v9596_v61, %v9598_v39  ;;  %v9602_v51 = vrot.slane %v17781_v0, 1 }
 0x2dd   : > { %v6633_v13 = vadd.f32 %v13392_v15, %v17723_v30  ;;  %v17924_v22 = vadd.f32 %v6815_v50, %v6628_v17  ;;  %13767 = vmatpush3.bf16.msra.mxu0 %v14446_v44  ;;  %v13420_v35 = vpop.f32.mrf.mxu1  ;;  %13755 = vmatmul.mubr.bf16.gmra.mxu1 %v9251_v18  ;;  %v14452_v30 = vld [vmem:[%s18258_s1 + $0xb48] sm:$0xff]   ;;  %v9600_v18 = vrot.slane %v17734_v33, 1  ;;  %v9424_v10 = vsel %vm1104_vm1, %v9421_v26, %v9423_v19 }
 0x2de   : > { %13795 = vmatpush3.bf16.msra.mxu1 %v14447_v47  ;;  %v6609_v23 = vpop.f32.mrf.mxu0  ;;  %13768 = vmatprep.subr.bf16.mxu0 %v14449_v32  ;;  %v5974_v6 = vadd.f32 %v17481_v5, %v5797_v49  ;;  %v14458_v5 = vld [vmem:[%s18258_s1 + $0xbf8] sm:$0xff]   ;;  %v9773_v52 = vshrl.u32 %v17878_v8, 16 }
 0x2df   : > { %v6631_v46 = vadd.f32 %v6609_v23, %v17738_v1  ;;  %v17931_v43 = vadd.f32 %v13420_v35, %v6633_v13  ;;  %v6828_v59 = vpop.f32.mrf.mxu1  ;;  %13796 = vmatprep.subr.bf16.mxu1 %v14450_v3  ;;  %13774 = vmatprep.mubr.bf16.mxu0 %v9420_v58 }
 0x2e0   : > { %v13393_v60 = vpop.f32.mrf.mxu0  ;;  %13802 = vmatprep.mubr.bf16.mxu1 %v9597_v45  ;;  %v6189_v62 = vadd.f32 %v17642_v41, %v5974_v6  ;;  %v14459_v41 = vld [vmem:[%s18258_s1 + $0xbb0] sm:$0xff]   ;;  %v14461_v45 = vld [vmem:[%s18258_s1 + $0xba8] sm:$0xff]   ;;  %v14464_v6 = vld [vmem:[%s18258_s1 + $0xbe0] sm:$0xff]   ;;  %v9775_v26 = vrot.slane %v9773_v52, 1 }
 0x2e1   : > { %v17938_v44 = vadd.f32 %v6828_v59, %v6631_v46  ;;  %13769 = vmatpush3.bf16.msra.mxu0 %v14449_v32  ;;  %v13421_v34 = vpop.f32.mrf.mxu1  ;;  %v9776_v46 = vshll.u32 %v17878_v8, 16  ;;  %v9975_v60 = vshll.u32 %v17881_v37, 16  ;;  %v9603_v8 = vsel %vm1104_vm1, %v9600_v18, %v9602_v51 }
 0x2e2   : > { %13797 = vmatpush3.bf16.msra.mxu1 %v14450_v3  ;;  %v6612_v1 = vpop.f32.mrf.mxu0  ;;  %13770 = vmatprep.subr.bf16.mxu0 %v14451_v12  ;;  %v6404_v32 = vadd.f32 %v17651_v28, %v6189_v62  ;;  %v18493_v3 = vld [vmem:[#allocation4_spill] sm:$0xff]  ;;  %v9601_v28 = vsel %vm1104_vm1, %v9598_v39, %v9600_v18  ;;  %v18494_v62 = vshrl.u32 %v17630_v2, 16 }
 0x2e3   : > { %v6632_v16 = vadd.f32 %v6612_v1, %v6412_v63  ;;  %v6831_v4 = vpop.f32.mrf.mxu1  ;;  %13798 = vmatprep.subr.bf16.mxu1 %v14452_v30  ;;  %v9425_v15 = vrot.slane %v18493_v3, 1  ;;  %v9778_v39 = vrot.slane %v9776_v46, 2 }
 0x2e4   : > { %v6624_v17 = vadd.f32 %v17860_v55, %v6404_v32  ;;  %v9427_v55 = vrot.slane %v17795_v21, 1  ;;  %v14469_v21 = vld [vmem:[%s18258_s1 + $0xb88] sm:$0xff]  }
 0x2e5   : > { %v17947_v47 = vadd.f32 %v6831_v4, %v6632_v16  ;;  %13771 = vmatpush3.bf16.msra.mxu0 %v14451_v12  ;;  %v14462_v12 = vld [vmem:[%s18258_s1 + $0xbe8] sm:$0xff]   ;;  %v9426_v1 = vsel %vm1104_vm1, %v9423_v19, %v9425_v15  ;;  %v14463_v16 = vld [vmem:[%s18258_s1 + $0xba0] sm:$0xff]   ;;  %v18495_v19 = vshll.u32 %v17630_v2, 16  ;;  %v14465_v2 = vld [vmem:[%s18258_s1 + $0xb98] sm:$0xff]  }
 0x2e6   : > { %13799 = vmatpush3.bf16.msra.mxu1 %v14452_v30  ;;  %13772 = vmatprep.subr.bf16.mxu0 %v14453_v9  ;;  %v9972_v30 = vshrl.u32 %v17881_v37, 16  ;;  %v6843_v49 = vadd.f32 %v17870_v57, %v6624_v17  ;;  %v9428_v57 = vsel %vm1104_vm1, %v9425_v15, %v9427_v55  ;;  %v18497_v17 = vshll.u32 %v17637_v42, 16 }
 0x2e7   : > { %13800 = vmatprep.subr.bf16.mxu1 %v14454_v56 }
 0x2e8   : > { %v9974_v18 = vrot.slane %v9972_v30, 1 }
 0x2e9   : > { %13773 = vmatpush3.bf16.msra.mxu0 %v14453_v9 }
 0x2ea   : > { %13801 = vmatpush3.bf16.msra.mxu1 %v14454_v56  ;;  %13814 = vmatprep.subr.bf16.mxu0 %v14457_v38 }
 0x2eb   : > { %13842 = vmatprep.subr.bf16.mxu1 %v14458_v5 }
 0x2ec   : > { %v13440_v54 = vpop.f32.mrf.mxu0  ;;  %13775 = vmatmul.mubr.bf16.vlgmr.msra.gmra.mxu0 %v9422_v11  ;;  %v9781_v11 = vrot.slane %v18495_v19, 2 }
 0x2ed   : > { %v7012_v61 = vadd.f32 %v13440_v54, %v17842_v14  ;;  %v13468_v50 = vpop.f32.mrf.mxu1  ;;  %13803 = vmatmul.mubr.bf16.vlgmr.msra.gmra.mxu1 %v9599_v53  ;;  %13815 = vmatpush3.bf16.msra.mxu0 %v14457_v38  ;;  %v9604_v14 = vrot.slane %v17798_v31, 1  ;;  %v9977_v53 = vrot.slane %v9975_v60, 2  ;;  %v18496_v54 = vshrl.u32 %v17637_v42, 16  ;;  %v14470_v31 = vld [vmem:[%s18258_s1 + $0xbc8] sm:$0xff]  }
 0x2ee   : > { %13843 = vmatpush3.bf16.msra.mxu1 %v14458_v5  ;;  %v6964_v58 = vpop.f32.mrf.mxu0  ;;  %13816 = vmatprep.subr.bf16.mxu0 %v14459_v41  ;;  %v9780_v5 = vrot.slane %v18494_v62, 1 }
 0x2ef   : > { %v17984_v13 = vadd.f32 %v13468_v50, %v7012_v61  ;;  %v7010_v35 = vadd.f32 %v6964_v58, %v17853_v40  ;;  %v7132_v23 = vpop.f32.mrf.mxu1  ;;  %13844 = vmatprep.subr.bf16.mxu1 %v14460_v29  ;;  %13778 = vmatprep.mubr.bf16.mxu0 %v9424_v10  ;;  %v9979_v10 = vrot.slane %v18496_v54, 1  ;;  %v9980_v61 = vrot.slane %v18497_v17, 2  ;;  %v14466_v58 = vld [vmem:[%s18258_s1 + $0xbd8] sm:$0xff]   ;;  %v14472_v54 = vld [vmem:[%s18258_s1 + $0xbc0] sm:$0xff]  }
 0x2f0   : > { %v13441_v59 = vpop.f32.mrf.mxu0  ;;  %13806 = vmatprep.mubr.bf16.mxu1 %v9601_v28 }
 0x2f1   : > { %v17995_v40 = vadd.f32 %v7132_v23, %v7010_v35  ;;  %v7013_v63 = vadd.f32 %v13441_v59, %v17868_v36  ;;  %v13469_v34 = vpop.f32.mrf.mxu1  ;;  %13817 = vmatpush3.bf16.msra.mxu0 %v14459_v41  ;;  %v9605_v36 = vsel %vm1104_vm1, %v9602_v51, %v9604_v14  ;;  %v18034_v51 = vor.u32 %v9781_v11, %v9780_v5  ;;  %v14467_v59 = vld [vmem:[%s18258_s1 + $0xb90] sm:$0xff]  }
 0x2f2   : > { %13845 = vmatpush3.bf16.msra.mxu1 %v14460_v29  ;;  %v6967_v9 = vpop.f32.mrf.mxu0  ;;  %13818 = vmatprep.subr.bf16.mxu0 %v14461_v45  ;;  %v18039_v52 = vor.u32 %v9980_v61, %v9979_v10  ;;  %v18501_v5 = vshll.u32 %v17720_v24, 16  ;;  %v18503_v61 = vshll.u32 %v17729_v7, 16 }
 0x2f3   : > { %v18009_v37 = vadd.f32 %v13469_v34, %v7013_v63  ;;  %v7011_v4 = vadd.f32 %v6967_v9, %v6843_v49  ;;  %v7135_v56 = vpop.f32.mrf.mxu1  ;;  %13846 = vmatprep.subr.bf16.mxu1 %v14462_v12 }
 0x2f4   : > { %v13444_v38 = vpop.f32.mrf.mxu0  ;;  %13779 = vmatmul.mubr.bf16.gmra.mxu0 %v9426_v1  ;;  %v9984_v19 = vrot.slane %v18501_v5, 2 }
 0x2f5   : > { %v18018_v41 = vadd.f32 %v7135_v56, %v7011_v4  ;;  %v7016_v32 = vadd.f32 %v13444_v38, %v17893_v27  ;;  %13819 = vmatpush3.bf16.msra.mxu0 %v14461_v45  ;;  %v13472_v29 = vpop.f32.mrf.mxu1  ;;  %13807 = vmatmul.mubr.bf16.gmra.mxu1 %v9603_v8  ;;  %v9779_v45 = vor.u32 %v9778_v39, %v9775_v26  ;;  %v18499_v4 = vshll.u32 %v17709_v25, 16  ;;  %v9751_v39 = vld [vmem:[%s14577_s10 + $0x3c] sm:$0x3] }
 0x2f6   : > { %13847 = vmatpush3.bf16.msra.mxu1 %v14462_v12  ;;  %v6980_v50 = vpop.f32.mrf.mxu0  ;;  %13820 = vmatprep.subr.bf16.mxu0 %v14463_v16  ;;  %v9978_v12 = vor.u32 %v9977_v53, %v9974_v18  ;;  %v18500_v38 = vshrl.u32 %v17720_v24, 16  ;;  %v14471_v18 = vld [vmem:[%s18258_s1 + $0xb80] sm:$0xff]   ;;  %v9950_v53 = vld [vmem:[%s14577_s10 + $0x7c] sm:$0x3]  ;;  %v18502_v24 = vshrl.u32 %v17729_v7, 16 }
 0x2f7   : > { %v7014_v15 = vadd.f32 %v6980_v50, %v17904_v48  ;;  %v18029_v28 = vadd.f32 %v13472_v29, %v7016_v32  ;;  %v7148_v27 = vpop.f32.mrf.mxu1  ;;  %13848 = vmatprep.subr.bf16.mxu1 %v14464_v6  ;;  %13782 = vmatprep.mubr.bf16.mxu0 %v9428_v57  ;;  %v9783_v34 = vsel %vm1459_vm2, %v9779_v45, %v18034_v51  ;;  %v9785_v56 = vrot.slane %v18499_v4, 2 }
 0x2f8   : > { %v13445_v42 = vpop.f32.mrf.mxu0  ;;  %13810 = vmatprep.mubr.bf16.mxu1 %v9605_v36  ;;  %v9982_v8 = vsel %vm1459_vm2, %v9978_v12, %v18039_v52  ;;  %v9983_v62 = vrot.slane %v18500_v38, 1  ;;  %v9788_v17 = vrot.slane %v18502_v24, 1  ;;  %v9789_v50 = vrot.slane %v18503_v61, 2 }
 0x2f9   : > { %v7017_v35 = vadd.f32 %v13445_v42, %v17911_v20  ;;  %v18037_v23 = vadd.f32 %v7148_v27, %v7014_v15  ;;  %13821 = vmatpush3.bf16.msra.mxu0 %v14463_v16  ;;  %v13473_v48 = vpop.f32.mrf.mxu1  ;;  %v14468_v20 = vld [vmem:[%s18258_s1 + $0xbd0] sm:$0xff]   ;;  %v18506_v42 = vshll.u32 %v17734_v33, 16 }
 0x2fa   : > { %13849 = vmatpush3.bf16.msra.mxu1 %v14464_v6  ;;  %v6983_v46 = vpop.f32.mrf.mxu0  ;;  %13822 = vmatprep.subr.bf16.mxu0 %v14465_v2  ;;  %v9985_v12 = vor.u32 %v9984_v19, %v9983_v62  ;;  %v14475_v19 = vld [vmem:[%s18258_s1 + $0xc28] sm:$0xff]  }
 0x2fb   : > { %v7015_v30 = vadd.f32 %v6983_v46, %v17924_v22  ;;  %v18045_v60 = vadd.f32 %v13473_v48, %v7017_v35  ;;  %v7151_v49 = vpop.f32.mrf.mxu1  ;;  %13850 = vmatprep.subr.bf16.mxu1 %v14466_v58  ;;  %v9988_v45 = vrot.slane %v18506_v42, 2  ;;  %v18507_v35 = vld [vmem:[#allocation8_spill] sm:$0xff]  ;;  %v14473_v46 = vld [vmem:[%s18258_s1 + $0xc38] sm:$0xff]  }
 0x2fc   : > { %v13448_v63 = vpop.f32.mrf.mxu0  ;;  %13783 = vmatmul.mubr.bf16.gmra.mxu0 %v9427_v55  ;;  %v11752_v48 = vcombine.low %v18507_v35, %v9950_v53 }
 0x2fd   : > { %v7020_v1 = vadd.f32 %v13448_v63, %v17931_v43  ;;  %v18055_v9 = vadd.f32 %v7151_v49, %v7015_v30  ;;  %13823 = vmatpush3.bf16.msra.mxu0 %v14465_v2  ;;  %v13476_v22 = vpop.f32.mrf.mxu1  ;;  %13811 = vmatmul.mubr.bf16.gmra.mxu1 %v9604_v14  ;;  %v18498_v14 = vshrl.u32 %v17709_v25, 16  ;;  %v18504_v2 = vld [vmem:[#allocation2_spill] sm:$0xff]  ;;  %v9790_v49 = vor.u32 %v9789_v50, %v9788_v17  ;;  %v10149_v50 = vld [vmem:[%s14577_s10 + $0x10] sm:$0xc] }
 0x2fe   : > { %13851 = vmatpush3.bf16.msra.mxu1 %v14466_v58  ;;  %v6996_v16 = vpop.f32.mrf.mxu0  ;;  %13824 = vmatprep.subr.bf16.mxu0 %v14467_v59  ;;  %v18094_v15 = vcombine.low %v18504_v2, %v9751_v39 }
 0x2ff   : > { %v7018_v43 = vadd.f32 %v6996_v16, %v17938_v44  ;;  %v18065_v55 = vadd.f32 %v13476_v22, %v7020_v1  ;;  %v7164_v57 = vpop.f32.mrf.mxu1  ;;  %13852 = vmatprep.subr.bf16.mxu1 %v14468_v20  ;;  %13830 = vmatprep.mubr.bf16.mxu0 %v9783_v34  ;;  %v9784_v36 = vrot.slane %v18498_v14, 1  ;;  %v9999_v16 = vshll.u32 %v11752_v48, 16 }
 0x300   : > { %v13449_v6 = vpop.f32.mrf.mxu0  ;;  %13858 = vmatprep.mubr.bf16.mxu1 %v9982_v8  ;;  %v9800_v34 = vshll.u32 %v18094_v15, 16  ;;  %v9996_v8 = vshrl.u32 %v11752_v48, 16  ;;  %v18511_v14 = vshll.u32 %v17781_v0, 16  ;;  %v14503_v48 = vld [vmem:[%s14577_s10 + $0x14] sm:$0xf] }
 0x301   : > { %v18074_v26 = vadd.f32 %v7164_v57, %v7018_v43  ;;  %13825 = vmatpush3.bf16.msra.mxu0 %v14467_v59  ;;  %v13477_v44 = vpop.f32.mrf.mxu1  ;;  %v9786_v10 = vor.u32 %v9785_v56, %v9784_v36  ;;  %v18508_v59 = vshrl.u32 %v18493_v3, 16  ;;  %v14474_v43 = vld [vmem:[%s18258_s1 + $0xc30] sm:$0xff]   ;;  %v18510_v57 = vshrl.u32 %v17781_v0, 16 }
 0x302   : > { %13853 = vmatpush3.bf16.msra.mxu1 %v14468_v20  ;;  %v6999_v11 = vpop.f32.mrf.mxu0  ;;  %13826 = vmatprep.subr.bf16.mxu0 %v14469_v21  ;;  %v18509_v20 = vshll.u32 %v18493_v3, 16  ;;  %v9992_v36 = vrot.slane %v18511_v14, 2  ;;  %v9802_v44 = vrot.slane %v9800_v34, 2  ;;  %v9998_v62 = vrot.slane %v9996_v8, 1  ;;  %v14480_v14 = vld [vmem:[%s18258_s1 + $0xc10] sm:$0xff]  }
 0x303   : > { %v7019_v32 = vadd.f32 %v6999_v11, %v17947_v47  ;;  %v7167_v29 = vpop.f32.mrf.mxu1  ;;  %13854 = vmatprep.subr.bf16.mxu1 %v14470_v31  ;;  %v18505_v47 = vshrl.u32 %v17734_v33, 16  ;;  %v9792_v30 = vrot.slane %v18508_v59, 1  ;;  %v9797_v33 = vshrl.u32 %v18094_v15, 16 }
 0x304   : > { %v9793_v63 = vrot.slane %v18509_v20, 2  ;;  %v9787_v1 = vsel %vm1459_vm2, %v18034_v51, %v9786_v10  ;;  %v9791_v4 = vsel %vm1459_vm2, %v9786_v10, %v9790_v49  ;;  %v10001_v5 = vrot.slane %v9999_v16, 2  ;;  %v14478_v20 = vld [vmem:[%s18258_s1 + $0xc18] sm:$0xff]  }
 0x305   : > { %v18096_v27 = vadd.f32 %v7167_v29, %v7019_v32  ;;  %13827 = vmatpush3.bf16.msra.mxu0 %v14469_v21  ;;  %v9987_v58 = vrot.slane %v18505_v47, 1  ;;  %v9986_v21 = vsel %vm1459_vm2, %v18039_v52, %v9985_v12  ;;  %v9799_v6 = vrot.slane %v9797_v33, 1  ;;  %v14476_v47 = vld [vmem:[%s18258_s1 + $0xc20] sm:$0xff]  }
 0x306   : > { %13855 = vmatpush3.bf16.msra.mxu1 %v14470_v31  ;;  %13828 = vmatprep.subr.bf16.mxu0 %v14471_v18  ;;  %v9991_v31 = vrot.slane %v18510_v57, 1  ;;  %v9794_v56 = vor.u32 %v9793_v63, %v9792_v30  ;;  %v10002_v61 = vor.u32 %v10001_v5, %v9998_v62  ;;  %v10173_v57 = vrot.slane %v17709_v25, 2 }
 0x307   : > { %13856 = vmatprep.subr.bf16.mxu1 %v14472_v54  ;;  %v9989_v22 = vor.u32 %v9988_v45, %v9987_v58  ;;  %v9803_v29 = vor.u32 %v9802_v44, %v9799_v6 }
 0x308   : > { %v9993_v11 = vor.u32 %v9992_v36, %v9991_v31  ;;  %v9795_v17 = vsel %vm1459_vm2, %v9790_v49, %v9794_v56 }
 0x309   : > { %13829 = vmatpush3.bf16.msra.mxu0 %v14471_v18  ;;  %v9990_v38 = vsel %vm1459_vm2, %v9985_v12, %v9989_v22  ;;  %v9804_v35 = vsel %vm1459_vm2, %v9794_v56, %v9803_v29  ;;  %v11777_v12 = vcombine.low %v10149_v50, %v14503_v48 }
 0x30a   : > { %13857 = vmatpush3.bf16.msra.mxu1 %v14472_v54  ;;  %13870 = vmatprep.subr.bf16.mxu0 %v14473_v46  ;;  %v10003_v49 = vsel %vm1459_vm2, %v9993_v11, %v10002_v61 }
 0x30b   : > { %13898 = vmatprep.subr.bf16.mxu1 %v14473_v46 }
 0x30c   : > { %v13496_v51 = vpop.f32.mrf.mxu0  ;;  %13831 = vmatmul.mubr.bf16.vlgmr.msra.gmra.mxu0 %v9787_v1  ;;  %v10170_v1 = vrot.slane %v11777_v12, 2 }
 0x30d   : > { %v7431_v52 = vadd.f32 %v13496_v51, %v17984_v13  ;;  %v13524_v39 = vpop.f32.mrf.mxu1  ;;  %13859 = vmatmul.mubr.bf16.vlgmr.msra.gmra.mxu1 %v9986_v21  ;;  %13871 = vmatpush3.bf16.msra.mxu0 %v14473_v46 }
 0x30e   : > { %13906 = vmatpush3.bf16.msra.mxu1 %v14473_v46  ;;  %v7383_v0 = vpop.f32.mrf.mxu0  ;;  %13872 = vmatprep.subr.bf16.mxu0 %v14474_v43 }
 0x30f   : > { %v18129_v18 = vadd.f32 %v13524_v39, %v7431_v52  ;;  %v7429_v13 = vadd.f32 %v7383_v0, %v17995_v40  ;;  %v7598_v53 = vpop.f32.mrf.mxu1  ;;  %13899 = vmatprep.subr.bf16.mxu1 %v14474_v43  ;;  %13834 = vmatprep.mubr.bf16.mxu0 %v9791_v4  ;;  %v9994_v40 = vsel %vm1459_vm2, %v9989_v22, %v9993_v11  ;;  %v14504_v22 = vld [vmem:[%s14577_s10 + $0x18] sm:$0xff]   ;;  %v14482_v11 = vld [vmem:[%s18258_s1 + $0xc00] sm:$0xff]  }
 0x310   : > { %v13497_v32 = vpop.f32.mrf.mxu0  ;;  %13862 = vmatprep.mubr.bf16.mxu1 %v9990_v38  ;;  %v10171_v8 = vrot.slane %v14504_v22, 2 }
 0x311   : > { %v18132_v54 = vadd.f32 %v7598_v53, %v7429_v13  ;;  %v7432_v10 = vadd.f32 %v13497_v32, %v18009_v37  ;;  %v13525_v24 = vpop.f32.mrf.mxu1  ;;  %13873 = vmatpush3.bf16.msra.mxu0 %v14474_v43  ;;  %v10177_v32 = vrot.slane %v18493_v3, 2 }
 0x312   : > { %13907 = vmatpush3.bf16.msra.mxu1 %v14474_v43  ;;  %v7386_v2 = vpop.f32.mrf.mxu0  ;;  %13874 = vmatprep.subr.bf16.mxu0 %v14475_v19  ;;  %v10172_v56 = vsel %vm3630_vm5, %v10170_v1, %v10171_v8 }
 0x313   : > { %v18141_v58 = vadd.f32 %v13525_v24, %v7432_v10  ;;  %v7430_v37 = vadd.f32 %v7386_v2, %v18018_v41  ;;  %v7601_v42 = vpop.f32.mrf.mxu1  ;;  %13900 = vmatprep.subr.bf16.mxu1 %v14475_v19  ;;  %v10174_v10 = vsel %vm3630_vm5, %v10171_v8, %v10173_v57 }
 0x314   : > { %v13500_v45 = vpop.f32.mrf.mxu0  ;;  %13835 = vmatmul.mubr.bf16.gmra.mxu0 %v9795_v17 }
 0x315   : > { %v18146_v46 = vadd.f32 %v7601_v42, %v7430_v37  ;;  %v7435_v59 = vadd.f32 %v13500_v45, %v18029_v28  ;;  %13875 = vmatpush3.bf16.msra.mxu0 %v14475_v19  ;;  %v13528_v30 = vpop.f32.mrf.mxu1  ;;  %13863 = vmatmul.mubr.bf16.gmra.mxu1 %v9994_v40 }
 0x316   : > { %13908 = vmatpush3.bf16.msra.mxu1 %v14475_v19  ;;  %v7399_v41 = vpop.f32.mrf.mxu0  ;;  %13876 = vmatprep.subr.bf16.mxu0 %v14476_v47 }
 0x317   : > { %v7433_v63 = vadd.f32 %v7399_v41, %v18037_v23  ;;  %v18154_v33 = vadd.f32 %v13528_v30, %v7435_v59  ;;  %v7614_v34 = vpop.f32.mrf.mxu1  ;;  %13901 = vmatprep.subr.bf16.mxu1 %v14476_v47  ;;  %13838 = vmatprep.mubr.bf16.mxu0 %v9804_v35  ;;  %v10175_v23 = vrot.slane %v17729_v7, 2 }
 0x318   : > { %v13501_v28 = vpop.f32.mrf.mxu0  ;;  %13866 = vmatprep.mubr.bf16.mxu1 %v10003_v49 }
 0x319   : > { %v7436_v16 = vadd.f32 %v13501_v28, %v18045_v60  ;;  %v18158_v21 = vadd.f32 %v7614_v34, %v7433_v63  ;;  %13877 = vmatpush3.bf16.msra.mxu0 %v14476_v47  ;;  %v13529_v43 = vpop.f32.mrf.mxu1  ;;  %v10176_v44 = vsel %vm3630_vm5, %v10173_v57, %v10175_v23  ;;  %v10178_v24 = vsel %vm3630_vm5, %v10175_v23, %v10177_v32 }
 0x31a   : > { %13909 = vmatpush3.bf16.msra.mxu1 %v14476_v47  ;;  %v7402_v31 = vpop.f32.mrf.mxu0  ;;  %13878 = vmatprep.subr.bf16.mxu0 %v14478_v20 }
 0x31b   : > { %v7434_v36 = vadd.f32 %v7402_v31, %v18055_v9  ;;  %v18166_v51 = vadd.f32 %v13529_v43, %v7436_v16  ;;  %v7617_v60 = vpop.f32.mrf.mxu1  ;;  %13902 = vmatprep.subr.bf16.mxu1 %v14478_v20  ;;  %v14481_v9 = vld [vmem:[%s18258_s1 + $0xc08] sm:$0xff]  }
 0x31c   : > { %v13504_v4 = vpop.f32.mrf.mxu0  ;;  %13839 = vmatmul.mubr.bf16.gmra.mxu0 %v9803_v29  ;;  %v10179_v29 = vrot.slane %v18094_v15, 2 }
 0x31d   : > { %v7439_v25 = vadd.f32 %v13504_v4, %v18065_v55  ;;  %v18170_v7 = vadd.f32 %v7617_v60, %v7434_v36  ;;  %13879 = vmatpush3.bf16.msra.mxu0 %v14478_v20  ;;  %v13532_v6 = vpop.f32.mrf.mxu1  ;;  %13867 = vmatmul.mubr.bf16.gmra.mxu1 %v10002_v61 }
 0x31e   : > { %13910 = vmatpush3.bf16.msra.mxu1 %v14478_v20  ;;  %v7415_v52 = vpop.f32.mrf.mxu0  ;;  %13880 = vmatprep.subr.bf16.mxu0 %v14480_v14  ;;  %v10180_v17 = vsel %vm3630_vm5, %v10177_v32, %v10179_v29 }
 0x31f   : > { %v7437_v39 = vadd.f32 %v7415_v52, %v18074_v26  ;;  %v18177_v38 = vadd.f32 %v13532_v6, %v7439_v25  ;;  %v7630_v62 = vpop.f32.mrf.mxu1  ;;  %13903 = vmatprep.subr.bf16.mxu1 %v14480_v14  ;;  %13886 = vmatprep.mubr.bf16.mxu0 %v10172_v56 }
 0x320   : > { %v13505_v55 = vpop.f32.mrf.mxu0  ;;  %13890 = vmatprep.mubr.bf16.mxu1 %v10176_v44 }
 0x321   : > { %v7652_v5 = vadd.f32 %v7630_v62, %v7437_v39  ;;  %13881 = vmatpush3.bf16.msra.mxu0 %v14480_v14  ;;  %v13533_v0 = vpop.f32.mrf.mxu1 }
 0x322   : > { %13911 = vmatpush3.bf16.msra.mxu1 %v14480_v14  ;;  %v7418_v19 = vpop.f32.mrf.mxu0  ;;  %13882 = vmatprep.subr.bf16.mxu0 %v14481_v9 }
 0x323   : > { %v7438_v13 = vadd.f32 %v7418_v19, %v18096_v27  ;;  %v7633_v26 = vpop.f32.mrf.mxu1  ;;  %13904 = vmatprep.subr.bf16.mxu1 %v14481_v9 }
 0x325   : > { %v7653_v53 = vadd.f32 %v7633_v26, %v7438_v13  ;;  %13883 = vmatpush3.bf16.msra.mxu0 %v14481_v9 }
 0x326   : > { %13912 = vmatpush3.bf16.msra.mxu1 %v14481_v9  ;;  %13884 = vmatprep.subr.bf16.mxu0 %v14482_v11 }
 0x327   : > { %13905 = vmatprep.subr.bf16.mxu1 %v14482_v11 }
 0x329   : > { %13885 = vmatpush3.bf16.msra.mxu0 %v14482_v11 }
 0x32a   : > { %13913 = vmatpush3.bf16.msra.mxu1 %v14482_v11 }
 0x32c   : > { %v13552_v27 = vpop.f32.mrf.mxu0  ;;  %13887 = vmatmul.mubr.bf16.vlgmr.msra.gmra.mxu0 %v10174_v10 }
 0x32d   : > { %v7861_v61 = vadd.f32 %v13552_v27, %v18129_v18  ;;  %v13580_v50 = vpop.f32.mrf.mxu1  ;;  %13891 = vmatmul.mubr.bf16.vlgmr.msra.gmra.mxu1 %v10178_v24 }
 0x32e   : > { %v7813_v2 = vpop.f32.mrf.mxu0  ;;  %13894 = vmatprep.mubr.bf16.mxu1 %v10180_v17 }
 0x32f   : > { %v8080_v3 = vadd.f32 %v13580_v50, %v7861_v61  ;;  %v7859_v40 = vadd.f32 %v7813_v2, %v18132_v54  ;;  %v8032_v15 = vpop.f32.mrf.mxu1 }
 0x330   : > { %v13553_v47 = vpop.f32.mrf.mxu0 }
 0x331   : > { %v8078_v37 = vadd.f32 %v8032_v15, %v7859_v40  ;;  %v7862_v42 = vadd.f32 %v13553_v47, %v18141_v58  ;;  %v13581_v45 = vpop.f32.mrf.mxu1 }
 0x332   : > { %v7816_v35 = vpop.f32.mrf.mxu0 }
 0x333   : > { %v8081_v48 = vadd.f32 %v13581_v45, %v7862_v42  ;;  %v7860_v12 = vadd.f32 %v7816_v35, %v18146_v46  ;;  %v8035_v59 = vpop.f32.mrf.mxu1 }
 0x334   : > { %v13556_v30 = vpop.f32.mrf.mxu0 }
 0x335   : > { %v8079_v18 = vadd.f32 %v8035_v59, %v7860_v12  ;;  %v7865_v49 = vadd.f32 %v13556_v30, %v18154_v33  ;;  %13895 = vmatmul.mubr.bf16.gmra.mxu1 %v10179_v29  ;;  %v13584_v41 = vpop.f32.mrf.mxu1 }
 0x336   : > { %v7829_v20 = vpop.f32.mrf.mxu0 }
 0x337   : > { %v7863_v54 = vadd.f32 %v7829_v20, %v18158_v21  ;;  %v8084_v63 = vadd.f32 %v13584_v41, %v7865_v49  ;;  %v8048_v34 = vpop.f32.mrf.mxu1 }
 0x338   : > { %v13557_v28 = vpop.f32.mrf.mxu0 }
 0x339   : > { %v7866_v58 = vadd.f32 %v13557_v28, %v18166_v51  ;;  %v8082_v1 = vadd.f32 %v8048_v34, %v7863_v54  ;;  %v13585_v22 = vpop.f32.mrf.mxu1 }
 0x33a   : > { %v7832_v8 = vpop.f32.mrf.mxu0 }
 0x33b   : > { %v7864_v46 = vadd.f32 %v7832_v8, %v18170_v7  ;;  %v8085_v16 = vadd.f32 %v13585_v22, %v7866_v58  ;;  %v8051_v43 = vpop.f32.mrf.mxu1 }
 0x33c   : > { %v13560_v57 = vpop.f32.mrf.mxu0 }
 0x33d   : > { %v7869_v33 = vadd.f32 %v13560_v57, %v18177_v38  ;;  %v8083_v23 = vadd.f32 %v8051_v43, %v7864_v46  ;;  %v13588_v31 = vpop.f32.mrf.mxu1 }
 0x33e   : > { %v7845_v14 = vpop.f32.mrf.mxu0 }
 0x33f   : > { %v7867_v36 = vadd.f32 %v7845_v14, %v7652_v5  ;;  %v8088_v21 = vadd.f32 %v13588_v31, %v7869_v33  ;;  %v8064_v60 = vpop.f32.mrf.mxu1 }
 0x340   : > { %v13561_v4 = vpop.f32.mrf.mxu0 }
 0x341   : > { %v8086_v56 = vadd.f32 %v8064_v60, %v7867_v36  ;;  %v13589_v25 = vpop.f32.mrf.mxu1 }
 0x342   : > { %v7848_v51 = vpop.f32.mrf.mxu0 }
 0x343   : > { %v7868_v6 = vadd.f32 %v7848_v51, %v7653_v53  ;;  %v8067_v44 = vpop.f32.mrf.mxu1 }
 0x345   : > { %v8087_v52 = vadd.f32 %v8067_v44, %v7868_v6 }
 0x34c   : > { %v13608_v9 = vpop.f32.mrf.mxu0 }
 0x34d   : > { %v8299_v7 = vadd.f32 %v13608_v9, %v8080_v3  ;;  %v13636_v39 = vpop.f32.mrf.mxu1 }
 0x34e   : > { %v8251_v62 = vpop.f32.mrf.mxu0 }
 0x34f   : > { %v8467_v55 = vadd.f32 %v13636_v39, %v8299_v7  ;;  %v8297_v0 = vadd.f32 %v8251_v62, %v8078_v37  ;;  %v8419_v38 = vpop.f32.mrf.mxu1 }
 0x350   : > { %v13609_v19 = vpop.f32.mrf.mxu0 }
 0x351   : > { %v8465_v11 = vadd.f32 %v8419_v38, %v8297_v0  ;;  %v8300_v13 = vadd.f32 %v13609_v19, %v8081_v48  ;;  %v13637_v5 = vpop.f32.mrf.mxu1 }
 0x352   : > { %v8254_v26 = vpop.f32.mrf.mxu0 }
 0x353   : > { %v8468_v32 = vadd.f32 %v13637_v5, %v8300_v13  ;;  %v8298_v29 = vadd.f32 %v8254_v26, %v8079_v18  ;;  %v8422_v10 = vpop.f32.mrf.mxu1 }
 0x354   : > { %v13612_v24 = vpop.f32.mrf.mxu0 }
 0x355   : > { %v8466_v17 = vadd.f32 %v8422_v10, %v8298_v29  ;;  %v8303_v53 = vadd.f32 %v13612_v24, %v8084_v63  ;;  %v13640_v27 = vpop.f32.mrf.mxu1 }
 0x356   : > { %v8267_v61 = vpop.f32.mrf.mxu0 }
 0x357   : > { %v8301_v50 = vadd.f32 %v8267_v61, %v8082_v1  ;;  %v8471_v2 = vadd.f32 %v13640_v27, %v8303_v53  ;;  %v8435_v3 = vpop.f32.mrf.mxu1 }
 0x358   : > { %v13613_v40 = vpop.f32.mrf.mxu0 }
 0x359   : > { %v8304_v15 = vadd.f32 %v13613_v40, %v8085_v16  ;;  %v8469_v47 = vadd.f32 %v8435_v3, %v8301_v50  ;;  %v13641_v37 = vpop.f32.mrf.mxu1 }
 0x35a   : > { %v8270_v42 = vpop.f32.mrf.mxu0 }
 0x35b   : > { %v8302_v45 = vadd.f32 %v8270_v42, %v8083_v23  ;;  %v8472_v35 = vadd.f32 %v13641_v37, %v8304_v15  ;;  %v8438_v48 = vpop.f32.mrf.mxu1 }
 0x35c   : > { %v13616_v12 = vpop.f32.mrf.mxu0 }
 0x35d   : > { %v8307_v59 = vadd.f32 %v13616_v12, %v8088_v21  ;;  %v8470_v30 = vadd.f32 %v8438_v48, %v8302_v45  ;;  %v13644_v18 = vpop.f32.mrf.mxu1 }
 0x35e   : > { %v8283_v49 = vpop.f32.mrf.mxu0 }
 0x35f   : > { %v8305_v41 = vadd.f32 %v8283_v49, %v8086_v56  ;;  %v8475_v20 = vadd.f32 %v13644_v18, %v8307_v59  ;;  %v8451_v54 = vpop.f32.mrf.mxu1 }
 0x360   : > { %v13617_v63 = vpop.f32.mrf.mxu0 }
 0x361   : > { %v8473_v34 = vadd.f32 %v8451_v54, %v8305_v41  ;;  %v13645_v28 = vpop.f32.mrf.mxu1 }
 0x362   : > { %v8286_v58 = vpop.f32.mrf.mxu0 }
 0x363   : > { %v8306_v1 = vadd.f32 %v8286_v58, %v8087_v52  ;;  %v8454_v22 = vpop.f32.mrf.mxu1 }
 0x365   : > { %v8474_v8 = vadd.f32 %v8454_v22, %v8306_v1 }
 0x36c   : > { %v13664_v46 = vpop.f32.mrf.mxu0 }
 0x36d   : > { %v8635_v16 = vadd.f32 %v13664_v46, %v8467_v55  ;;  %v13692_v43 = vpop.f32.mrf.mxu1 }
 0x36e   : > { %v8587_v57 = vpop.f32.mrf.mxu0 }
 0x36f   : > { %v8886_v33 = vadd.f32 %v13692_v43, %v8635_v16  ;;  %v8633_v23 = vadd.f32 %v8587_v57, %v8465_v11  ;;  %v8838_v31 = vpop.f32.mrf.mxu1 }
 0x370   : > { %v13665_v14 = vpop.f32.mrf.mxu0 }
 0x371   : > { %v8884_v36 = vadd.f32 %v8838_v31, %v8633_v23  ;;  %v8636_v21 = vadd.f32 %v13665_v14, %v8468_v32  ;;  %v13693_v60 = vpop.f32.mrf.mxu1 }
 0x372   : > { %v8590_v4 = vpop.f32.mrf.mxu0 }
 0x373   : > { %v8887_v56 = vadd.f32 %v13693_v60, %v8636_v21  ;;  %v8634_v25 = vadd.f32 %v8590_v4, %v8466_v17  ;;  %v8841_v51 = vpop.f32.mrf.mxu1 }
 0x374   : > { %v13668_v6 = vpop.f32.mrf.mxu0 }
 0x375   : > { %v8885_v44 = vadd.f32 %v8841_v51, %v8634_v25  ;;  %v8639_v52 = vadd.f32 %v13668_v6, %v8471_v2  ;;  %v13696_v9 = vpop.f32.mrf.mxu1 }
 0x376   : > { %v8603_v7 = vpop.f32.mrf.mxu0 }
 0x377   : > { %v8637_v39 = vadd.f32 %v8603_v7, %v8469_v47  ;;  %v8890_v62 = vadd.f32 %v13696_v9, %v8639_v52  ;;  %v8854_v55 = vpop.f32.mrf.mxu1 }
 0x378   : > { %v13669_v0 = vpop.f32.mrf.mxu0 }
 0x379   : > { %v8640_v38 = vadd.f32 %v13669_v0, %v8472_v35  ;;  %v8888_v19 = vadd.f32 %v8854_v55, %v8637_v39  ;;  %v13697_v11 = vpop.f32.mrf.mxu1 }
 0x37a   : > { %v8606_v13 = vpop.f32.mrf.mxu0 }
 0x37b   : > { %v8638_v5 = vadd.f32 %v8606_v13, %v8470_v30  ;;  %v8891_v26 = vadd.f32 %v13697_v11, %v8640_v38  ;;  %v8857_v32 = vpop.f32.mrf.mxu1 }
 0x37c   : > { %v13672_v29 = vpop.f32.mrf.mxu0 }
 0x37d   : > { %v8643_v10 = vadd.f32 %v13672_v29, %v8475_v20  ;;  %v8889_v24 = vadd.f32 %v8857_v32, %v8638_v5  ;;  %v13700_v17 = vpop.f32.mrf.mxu1 }
 0x37e   : > { %v8619_v53 = vpop.f32.mrf.mxu0 }
 0x37f   : > { %v8641_v27 = vadd.f32 %v8619_v53, %v8473_v34  ;;  %v8894_v61 = vadd.f32 %v13700_v17, %v8643_v10  ;;  %v8870_v50 = vpop.f32.mrf.mxu1 }
 0x380   : > { %v13673_v2 = vpop.f32.mrf.mxu0 }
 0x381   : > { %v8892_v3 = vadd.f32 %v8870_v50, %v8641_v27  ;;  %v13701_v40 = vpop.f32.mrf.mxu1 }
 0x382   : > { %v8622_v15 = vpop.f32.mrf.mxu0 }
 0x383   : > { %v8642_v47 = vadd.f32 %v8622_v15, %v8474_v8  ;;  %v8873_v37 = vpop.f32.mrf.mxu1 }
 0x385   : > { %v8893_v42 = vadd.f32 %v8873_v37, %v8642_v47 }
 0x38c   : > { %v13720_v45 = vpop.f32.mrf.mxu0 }
 0x38d   : > { %v9137_v35 = vadd.f32 %v13720_v45, %v8886_v33  ;;  %v13748_v48 = vpop.f32.mrf.mxu1 }
 0x38e   : > { %v9089_v12 = vpop.f32.mrf.mxu0 }
 0x38f   : > { %v18197_v59 = vadd.f32 %v13748_v48, %v9137_v35  ;;  %v9135_v30 = vadd.f32 %v9089_v12, %v8884_v36  ;;  %v9340_v18 = vpop.f32.mrf.mxu1 }
 0x390   : > { %v13721_v49 = vpop.f32.mrf.mxu0 }
 0x391   : > { %v18199_v41 = vadd.f32 %v9340_v18, %v9135_v30  ;;  %v9138_v20 = vadd.f32 %v13721_v49, %v8887_v56  ;;  %v13749_v54 = vpop.f32.mrf.mxu1 }
 0x392   : > { %v9092_v63 = vpop.f32.mrf.mxu0 }
 0x393   : > { %v18201_v34 = vadd.f32 %v13749_v54, %v9138_v20  ;;  %v9136_v28 = vadd.f32 %v9092_v63, %v8885_v44  ;;  %v9343_v58 = vpop.f32.mrf.mxu1 }
 0x394   : > { %v13724_v1 = vpop.f32.mrf.mxu0 }
 0x395   : > { %v18203_v22 = vadd.f32 %v9343_v58, %v9136_v28  ;;  %v9141_v8 = vadd.f32 %v13724_v1, %v8890_v62  ;;  %v13752_v46 = vpop.f32.mrf.mxu1 }
 0x396   : > { %v9105_v16 = vpop.f32.mrf.mxu0 }
 0x397   : > { %v9139_v43 = vadd.f32 %v9105_v16, %v8888_v19  ;;  %v18205_v57 = vadd.f32 %v13752_v46, %v9141_v8  ;;  %v9356_v33 = vpop.f32.mrf.mxu1 }
 0x398   : > { %v13725_v23 = vpop.f32.mrf.mxu0 }
 0x399   : > { %v9142_v31 = vadd.f32 %v13725_v23, %v8891_v26  ;;  %v18207_v14 = vadd.f32 %v9356_v33, %v9139_v43  ;;  %v13753_v36 = vpop.f32.mrf.mxu1 }
 0x39a   : > { %v9108_v21 = vpop.f32.mrf.mxu0 }
 0x39b   : > { %v9140_v60 = vadd.f32 %v9108_v21, %v8889_v24  ;;  %v18209_v4 = vadd.f32 %v13753_v36, %v9142_v31  ;;  %v9359_v56 = vpop.f32.mrf.mxu1 }
 0x39c   : > { %v13728_v25 = vpop.f32.mrf.mxu0 }
 0x39d   : > { %v9145_v51 = vadd.f32 %v13728_v25, %v8894_v61  ;;  %v18211_v6 = vadd.f32 %v9359_v56, %v9140_v60  ;;  %v13756_v44 = vpop.f32.mrf.mxu1 }
 0x39e   : > { %v9121_v52 = vpop.f32.mrf.mxu0 }
 0x39f   : > { %v9143_v9 = vadd.f32 %v9121_v52, %v8892_v3  ;;  %v18213_v7 = vadd.f32 %v13756_v44, %v9145_v51  ;;  %v9372_v39 = vpop.f32.mrf.mxu1 }
 0x3a0   : > { %v13729_v62 = vpop.f32.mrf.mxu0 }
 0x3a1   : > { %v18215_v55 = vadd.f32 %v9372_v39, %v9143_v9  ;;  %v13757_v0 = vpop.f32.mrf.mxu1 }
 0x3a2   : > { %v9124_v38 = vpop.f32.mrf.mxu0 }
 0x3a3   : > { %v9144_v19 = vadd.f32 %v9124_v38, %v8893_v42  ;;  %v9375_v11 = vpop.f32.mrf.mxu1 }
 0x3a5   : > { %v18217_v13 = vadd.f32 %v9375_v11, %v9144_v19 }
 0x3ac   : > { %v13776_v5 = vpop.f32.mrf.mxu0 }
 0x3ad   : > { %v13804_v26 = vpop.f32.mrf.mxu1  ;;  %v9565_v9 = vadd.f32 %v13776_v5, %v18197_v59 }
 0x3ae   : > { %v9517_v32 = vpop.f32.mrf.mxu0 }
 0x3af   : > { %v9694_v29 = vpop.f32.mrf.mxu1  ;;  %v9563_v62 = vadd.f32 %v9517_v32, %v18199_v41  ;;  %v9742_v11 = vadd.f32 %v13804_v26, %v9565_v9 }
 0x3b0   : > { %v13777_v10 = vpop.f32.mrf.mxu0 }
 0x3b1   : > { %v13805_v24 = vpop.f32.mrf.mxu1  ;;  %v9566_v0 = vadd.f32 %v13777_v10, %v18201_v34 }
 0x3b2   : > { %v9520_v17 = vpop.f32.mrf.mxu0 }
 0x3b3   : > { %v9697_v53 = vpop.f32.mrf.mxu1 }
 0x3b4   : > { %v13780_v27 = vpop.f32.mrf.mxu0 }
 0x3b5   : > { %v13808_v61 = vpop.f32.mrf.mxu1  ;;  %v9569_v39 = vadd.f32 %v13780_v27, %v18205_v57 }
 0x3b6   : > { %v9533_v50 = vpop.f32.mrf.mxu0 }
 0x3b7   : > { %v9710_v2 = vpop.f32.mrf.mxu1  ;;  %v9567_v38 = vadd.f32 %v9533_v50, %v18207_v14 }
 0x3b8   : > { %v13781_v3 = vpop.f32.mrf.mxu0 }
 0x3b9   : > { %v13809_v40 = vpop.f32.mrf.mxu1  ;;  %v9570_v19 = vadd.f32 %v13781_v3, %v18209_v4  ;;  %v9744_v59 = vadd.f32 %v9710_v2, %v9567_v38 }
 0x3ba   : > { %v9536_v15 = vpop.f32.mrf.mxu0 }
 0x3bb   : > { %v9713_v47 = vpop.f32.mrf.mxu1  ;;  %v9747_v5 = vadd.f32 %v13809_v40, %v9570_v19 }
 0x3bc   : > { %v13784_v37 = vpop.f32.mrf.mxu0 }
 0x3bd   : > { %v13812_v42 = vpop.f32.mrf.mxu1  ;;  %v9573_v57 = vadd.f32 %v13784_v37, %v18213_v7 }
 0x3be   : > { %v9549_v45 = vpop.f32.mrf.mxu0 }
 0x3bf   : > { %v18219_v35 = vpop.f32.mrf.mxu1 }
 0x3c0   : > { %v13785_v48 = vpop.f32.mrf.mxu0 }
 0x3c1   : > { %v13813_v12 = vpop.f32.mrf.mxu1  ;;  %v9564_v48 = vadd.f32 %v9520_v17, %v18203_v22  ;;  %v9571_v17 = vadd.f32 %v9549_v45, %v18215_v55 }
 0x3c2   : > { %v9552_v30 = vpop.f32.mrf.mxu0  ;;  %v9746_v12 = vadd.f32 %v13808_v61, %v9569_v39  ;;  %v9750_v61 = vadd.f32 %v13812_v42, %v9573_v57 }
 0x3c3   : > { %v18221_v18 = vpop.f32.mrf.mxu1  ;;  %v9741_v34 = vadd.f32 %v9697_v53, %v9564_v48  ;;  %v9572_v2 = vadd.f32 %v9552_v30, %v18217_v13  ;;  %v9748_v45 = vadd.f32 %v18219_v35, %v9571_v17 }
 0x3c5   : > { %v9749_v13 = vadd.f32 %v18221_v18, %v9572_v2 }
 0x3cc   : > { %v13832_v49 = vpop.f32.mrf.mxu0 }
 0x3cd   : > { %v13860_v20 = vpop.f32.mrf.mxu1 }
 0x3ce   : > { %v9893_v54 = vpop.f32.mrf.mxu0 }
 0x3cf   : > { %v10092_v63 = vpop.f32.mrf.mxu1 }
 0x3d0   : > { %v13833_v28 = vpop.f32.mrf.mxu0 }
 0x3d1   : > { %v13861_v58 = vpop.f32.mrf.mxu1 }
 0x3d2   : > { %v9896_v1 = vpop.f32.mrf.mxu0 }
 0x3d3   : > { %v10095_v8 = vpop.f32.mrf.mxu1 }
 0x3d4   : > { %v13836_v46 = vpop.f32.mrf.mxu0 }
 0x3d5   : > { %v13864_v16 = vpop.f32.mrf.mxu1  ;;  %v9945_v41 = vadd.f32 %v13836_v46, %v9746_v12 }
 0x3d6   : > { %v9909_v43 = vpop.f32.mrf.mxu0 }
 0x3d7   : > { %v10108_v33 = vpop.f32.mrf.mxu1  ;;  %v9943_v26 = vadd.f32 %v9909_v43, %v9744_v59  ;;  %v10144_v7 = vadd.f32 %v13864_v16, %v9945_v41 }
 0x3d8   : > { %v13837_v23 = vpop.f32.mrf.mxu0 }
 0x3d9   : > { %v13865_v31 = vpop.f32.mrf.mxu1  ;;  %v9946_v50 = vadd.f32 %v13837_v23, %v9747_v5 }
 0x3da   : > { %v9912_v36 = vpop.f32.mrf.mxu0 }
 0x3db   : > { %v10111_v21 = vpop.f32.mrf.mxu1 }
 0x3dc   : > { %v13840_v60 = vpop.f32.mrf.mxu0 }
 0x3dd   : > { %v18223_v56 = vpop.f32.mrf.mxu1 }
 0x3de   : > { %18512 = vst [vmem:[#allocation5_spill] sm:$0xff] %v18223_v56  ;;  %v9925_v25 = vpop.f32.mrf.mxu0  ;;  %v9941_v56 = vadd.f32 %v13832_v49, %v9742_v11 }
 0x3df   : > { %v18225_v51 = vpop.f32.mrf.mxu1  ;;  %v9947_v23 = vadd.f32 %v9925_v25, %v9748_v45 }
 0x3e0   : > { %18513 = vst [vmem:[#allocation3_spill] sm:$0xff] %v18225_v51  ;;  %v13841_v44 = vpop.f32.mrf.mxu0  ;;  %v9568_v51 = vadd.f32 %v9536_v15, %v18211_v6  ;;  %v10140_v6 = vadd.f32 %v13860_v20, %v9941_v56 }
 0x3e1   : > { %v13869_v52 = vpop.f32.mrf.mxu1  ;;  %v9740_v44 = vadd.f32 %v9694_v29, %v9563_v62  ;;  %v9940_v29 = vadd.f32 %v9896_v1, %v9741_v34 }
 0x3e2   : > { %v9743_v52 = vadd.f32 %v13805_v24, %v9566_v0  ;;  %v9928_v32 = vpop.f32.mrf.mxu0  ;;  %v9745_v4 = vadd.f32 %v9713_v47, %v9568_v51  ;;  %v10142_v47 = vadd.f32 %v10108_v33, %v9943_v26 }
 0x3e3   : > { %v9939_v10 = vadd.f32 %v9893_v54, %v9740_v44  ;;  %v10127_v27 = vpop.f32.mrf.mxu1  ;;  %v10145_v54 = vadd.f32 %v13865_v31, %v9946_v50  ;;  %v10139_v20 = vadd.f32 %v10095_v8, %v9940_v29  ;;  %v9948_v8 = vadd.f32 %v9928_v32, %v9749_v13 }
 0x3e4   : > { %v9942_v14 = vadd.f32 %v13833_v28, %v9743_v52  ;;  %v9944_v3 = vadd.f32 %v9912_v36, %v9745_v4  ;;  %v9949_v28 = vadd.f32 %v13840_v60, %v9750_v61 }
 0x3e5   : > { %v10138_v53 = vadd.f32 %v10092_v63, %v9939_v10  ;;  %v18514_v56 = vld [vmem:[#allocation5_spill] sm:$0xff]  ;;  %v10147_v41 = vadd.f32 %v10127_v27, %v9948_v8 }
 0x3e6   : > { %v10141_v15 = vadd.f32 %v13861_v58, %v9942_v14  ;;  %v10143_v30 = vadd.f32 %v10111_v21, %v9944_v3  ;;  %v10148_v51 = vadd.f32 %v18514_v56, %v9949_v28 }
 0x3e7   : > { %v18515_v44 = vld [vmem:[#allocation3_spill] sm:$0xff] }
 0x3e8   : > { %v10146_v52 = vadd.f32 %v18515_v44, %v9947_v23 }
 0x3ec   : > { %v13888_v22 = vpop.f32.mrf.mxu0 }
 0x3ed   : > { %v13892_v24 = vpop.f32.mrf.mxu1  ;;  %v10317_v37 = vadd.f32 %v13888_v22, %v10140_v6 }
 0x3ee   : > { %v10269_v40 = vpop.f32.mrf.mxu0  ;;  %v10321_v46 = vadd.f32 %v13892_v24, %v10144_v7 }
 0x3ef   : > { %v10285_v49 = vpop.f32.mrf.mxu1  ;;  %v10315_v1 = vadd.f32 %v10269_v40, %v10138_v53  ;;  %v10328_v36 = vmax.f32 %v10317_v37, 0.0 }
 0x3f0   : > { %v13889_v55 = vpop.f32.mrf.mxu0  ;;  %v10319_v16 = vadd.f32 %v10285_v49, %v10142_v47  ;;  %v10332_v9 = vmax.f32 %v10321_v46, 0.0 }
 0x3f1   : > { %v10318_v42 = vadd.f32 %v13889_v55, %v10141_v15  ;;  %v13893_v43 = vpop.f32.mrf.mxu1  ;;  %v10326_v21 = vmax.f32 %v10315_v1, 0.0 }
 0x3f2   : > { %v10322_v63 = vadd.f32 %v13893_v43, %v10145_v54  ;;  %v10272_v58 = vpop.f32.mrf.mxu0  ;;  %v10330_v0 = vmax.f32 %v10319_v16, 0.0 }
 0x3f3   : > { %v10329_v33 = vmax.f32 %v10318_v42, 0.0  ;;  %v10316_v31 = vadd.f32 %v10272_v58, %v10139_v20  ;;  %v10288_v60 = vpop.f32.mrf.mxu1 }
 0x3f4   : > { %v10333_v35 = vmax.f32 %v10322_v63, 0.0  ;;  %v10320_v18 = vadd.f32 %v10288_v60, %v10143_v30 }
 0x3f5   : > { %v11819_v25 = vpack.c.bf16 %v10329_v33, %v10328_v36  ;;  %v10327_v39 = vmax.f32 %v10316_v31, 0.0  ;;  %v13896_v62 = vpop.f32.mrf.mxu1 }
 0x3f6   : > { %v11829_v38 = vpack.c.bf16 %v10333_v35, %v10332_v9  ;;  %v10331_v19 = vmax.f32 %v10320_v18, 0.0  ;;  %v10325_v11 = vadd.f32 %v13896_v62, %v10148_v51 }
 0x3f7   : > { %11836 = vst [vmem:[%s18245_s14 + $0x8] sm:$0xff] %v11819_v25   ;;  %v11814_v48 = vpack.c.bf16 %v10327_v39, %v10326_v21  ;;  %v10301_v12 = vpop.f32.mrf.mxu1 }
 0x3f8   : > { %11838 = vst [vmem:[%s18245_s14 + $0x18] sm:$0xff] %v11829_v38   ;;  %v11824_v59 = vpack.c.bf16 %v10331_v19, %v10330_v0  ;;  %v10336_v5 = vmax.f32 %v10325_v11, 0.0  ;;  %v10323_v34 = vadd.f32 %v10301_v12, %v10146_v52 }
 0x3f9   : > { %11815 = vst [vmem:[%s18245_s14] sm:$0xff] %v11814_v48   ;;  %v13897_v57 = vpop.f32.mrf.mxu1 }
 0x3fa   : > { %11837 = vst [vmem:[%s18245_s14 + $0x10] sm:$0xff] %v11824_v59   ;;  %v11810_v32 = vpack.c.bf16 %v10336_v5, %v10336_v5  ;;  %v10334_v4 = vmax.f32 %v10323_v34, 0.0 }
 0x3fb   : > { %v10304_v10 = vpop.f32.mrf.mxu1 }
 0x3fc   : > { %10392 = vst [vmem:[%s18245_s14 + $0x28] sm:$0xf] %v11810_v32  ;;  %v10324_v14 = vadd.f32 %v10304_v10, %v10147_v41 }
 0x3fe   : > { %v10335_v26 = vmax.f32 %v10324_v14, 0.0 }
 0x400   : > { %v11834_v50 = vpack.c.bf16 %v10335_v26, %v10334_v4 }
 0x402   : > { %11839 = vst [vmem:[%s18245_s14 + $0x20] sm:$0xff] %v11834_v50  }
 0x403 PF: > { %s13_s12 = sadd.s32 1, %s14511_s12  }
 0x404   : > { %p10_p4 = scmp.ge.s32.totalorder %s13_s12, 4  }
 0x406   :  { %12 = sbr.rel (!%p10_p4) target bundleno = 1 (0x1), region = 110 }

</bundles_post_ra>
